<compile_context>
chip_gen: v7x
topology: tpu7x:2x2x1
jax: 0.10.0
libtpu: 0.0.40
codegen_flags: <defaults>
</compile_context>

<pallas_src>
import numpy as np
import jax
import jax.numpy as jnp
from jax.experimental import pallas as pl
from jax.experimental.pallas import tpu as pltpu


# ----------------------------------------------------------------------------
# Static model geometry
# ----------------------------------------------------------------------------
CP = 128                    # all channel dims padded to one 128-lane vreg
IN_CH, HIDDEN, ZCH, EMB_DIM, N_EMBED = 3, 32, 16, 16, 64
IN_CH_PAD = 8               # wrapper pads 3 -> 8 channels (cheap, K=8 matmul)
H0 = W0 = 16                # input spatial size
ROWS = H0 * W0
MAX_B_TILE = 8              # images per grid step (VMEM-safe on v7x 64 MiB)

# offsets into the packed per-tap weight stack (python constants)
OFF_E1 = 0                  # enc1: conv 4x4 s2 p1   16x16 -> 8x8
OFF_E2 = 16                 # enc2: conv 4x4 s2 p1    8x8  -> 4x4
OFF_E3 = 32                 # enc3: conv 3x3 s1 p1    4x4  -> 4x4
OFF_Q = 41                  # quant_conv 1x1
OFF_P = 42                  # post_quant_conv 1x1
OFF_D1 = 43                 # dec1: conv 3x3 s1 p1    4x4  -> 4x4
OFF_D2 = 52                 # dec2: convT 4x4 s2 p1   4x4  -> 8x8   (4 phases x 4 taps)
OFF_D3 = 68                 # dec3: convT 4x4 s2 p1   8x8  -> 16x16
N_TAPS = 84


# ----------------------------------------------------------------------------
# Fused Pallas kernel: whole VQVAE forward for B_TILE images per grid step
# ----------------------------------------------------------------------------
def _vqgan_fused_kernel(x_ref, emb_ref, wt_ref, b_ref,
                        ge1_ref, ge2_ref, ge3_ref, gd1_ref, gd2_ref, gd3_ref,
                        pd3_ref, et_ref, esq_ref, ecb_ref, o_ref):
    f32, bf16 = jnp.float32, jnp.bfloat16
    B = x_ref.shape[0] // ROWS            # images in this grid step (static)

    def gather_all(x_b3, g_ref):
        """Apply the host-precomputed stacked 0/1 gather (T*ro, ri) to every
        image: (B, ri, CP) -> (B, T*ro, CP).  One batched bf16 MXU matmul."""
        tro, ri = g_ref.shape
        g = jnp.broadcast_to(g_ref[...], (B, tro, ri))
        out = jnp.einsum('bor,bri->boi', g, x_b3,
                         preferred_element_type=f32)
        return out.astype(bf16)

    def conv(x_rows, g_ref, woff, ntaps, ro, bias, relu):
        """KxK conv (stride folded into the gather).  x_rows: (B*ri, CP)."""
        ri = x_rows.shape[0] // B
        xb = x_rows.astype(bf16).reshape(B, ri, CP)
        gat = gather_all(xb, g_ref)                      # (B, ntaps*ro, CP)
        acc = None
        for t in range(ntaps):
            gt = gat[:, t * ro:(t + 1) * ro, :].reshape(B * ro, CP)
            d = jnp.dot(gt, wt_ref[woff + t], preferred_element_type=f32)
            acc = d if acc is None else acc + d
        y = acc + bias
        return jnp.maximum(y, 0.0) if relu else y

    def conv1x1(x_rows, woff, bias):
        return jnp.dot(x_rows.astype(bf16), wt_ref[woff],
                       preferred_element_type=f32) + bias

    def conv_transpose(x_rows, g_ref, woff, ri, bias, relu):
        """ConvTranspose2d k4 s2 p1 via subpixel phases.  Returns the
        PHASE-STACKED output (B*4*ri, CP): rows ordered [phase 2r+t, grid row].
        The row permutation back to raster order is applied later (either folded
        into the next layer's gather or via the final interleave matmul)."""
        xb = x_rows.astype(bf16).reshape(B, ri, CP)
        gat = gather_all(xb, g_ref)                      # (B, 9*ri, CP)
        phases = []
        for r in range(2):
            for t in range(2):
                pacc = None
                for a in range(2):
                    for b2 in range(2):
                        si = (r + a) * 3 + (t + b2)      # shift (r+a-1, t+b2-1)
                        gt = gat[:, si * ri:(si + 1) * ri, :].reshape(B * ri, CP)
                        wi = woff + ((r * 2 + t) * 2 + a) * 2 + b2
                        d = jnp.dot(gt, wt_ref[wi], preferred_element_type=f32)
                        pacc = d if pacc is None else pacc + d
                ph = pacc + bias
                if relu:
                    ph = jnp.maximum(ph, 0.0)
                phases.append(ph.reshape(B, ri, CP))
        return jnp.concatenate(phases, axis=1).reshape(B * 4 * ri, CP)

    def vector_quantize(z_rows):
        """Nearest-codebook lookup (forward value of straight-through VQ)."""
        m = z_rows.shape[0]
        # distance proxy: -2 z.e + |e|^2  (|z|^2 constant per row); padded
        # codebook entries carry |e|^2 = 1e30 so they never win the argmin.
        dist = -2.0 * jnp.dot(z_rows.astype(bf16), et_ref[...],
                              preferred_element_type=f32) + esq_ref[...]
        min_d = jnp.min(dist, axis=1, keepdims=True)
        kio = jax.lax.broadcasted_iota(jnp.int32, (m, CP), 1)
        cand = jnp.where(dist <= min_d, kio, CP)         # torch.argmin tie-break
        idx = jnp.min(cand, axis=1, keepdims=True)
        onehot = (kio == idx).astype(f32)
        return jnp.dot(onehot, ecb_ref[...], preferred_element_type=f32)

    # ---- lane-pad input 8 -> 128 (tiny matmul, keeps HBM input un-padded) ----
    x8 = x_ref[...]                                               # (B*256, 8)
    xp = jnp.dot(x8.astype(bf16), emb_ref[...],
                 preferred_element_type=f32)                      # (B*256, 128)

    # ---- encoder ----
    h = conv(xp, ge1_ref, OFF_E1, 16, 64, b_ref[0], True)         # (B*64, 128)
    h = conv(h, ge2_ref, OFF_E2, 16, 16, b_ref[1], True)          # (B*16, 128)
    z = conv(h, ge3_ref, OFF_E3, 9, 16, b_ref[2], False)          # (B*16, 128)

    # ---- quant conv -> vector quantize -> post quant conv (VMEM resident) ----
    z = conv1x1(z, OFF_Q, b_ref[3])
    zq = vector_quantize(z)
    zq = conv1x1(zq, OFF_P, b_ref[4])

    # ---- decoder ----
    d = conv(zq, gd1_ref, OFF_D1, 9, 16, b_ref[5], True)          # (B*16, 128)
    d = conv_transpose(d, gd2_ref, OFF_D2, 16, b_ref[6], True)    # (B*64, 128) phase-stacked
    d = conv_transpose(d, gd3_ref, OFF_D3, 64, b_ref[7], False)   # (B*256,128) phase-stacked

    # final phase-interleave back to raster row order (exact 0/1 permutation)
    st = d.astype(bf16).reshape(B, 4 * 64, CP)
    pm = jnp.broadcast_to(pd3_ref[...], (B, ROWS, 4 * 64))
    y = jnp.einsum('bor,bri->boi', pm, st, preferred_element_type=f32)

    o_ref[...] = y.reshape(B * ROWS, CP).astype(o_ref.dtype)


# ----------------------------------------------------------------------------
# pallas_call wrapper
# ----------------------------------------------------------------------------
_CONST_NAMES = ["embed", "taps", "bias", "g_e1", "g_e2", "g_e3",
                "g_d1", "g_d2", "g_d3", "p_d3",
                "codebook_t", "codebook_sq", "codebook"]


def _const_spec(shape):
    nd = len(shape)
    return pl.BlockSpec(shape, lambda n, _nd=nd: (0,) * _nd)


def _make_vqgan_call(n_pad, b_tile, packed):
    in_specs = [pl.BlockSpec((b_tile * ROWS, IN_CH_PAD), lambda n: (n, 0))]
    in_specs += [_const_spec(tuple(packed[k].shape)) for k in _CONST_NAMES]
    return pl.pallas_call(
        _vqgan_fused_kernel,
        out_shape=jax.ShapeDtypeStruct((n_pad * ROWS, CP), jnp.float32),
        grid=(n_pad // b_tile,),
        in_specs=in_specs,
        out_specs=pl.BlockSpec((b_tile * ROWS, CP), lambda n: (n, 0)),
        compiler_params=pltpu.CompilerParams(
            dimension_semantics=("parallel",),        # batch tiles across TCs
            vmem_limit_bytes=48 * 1024 * 1024,
        ),
    )


def _pick_b_tile(n):
    if n <= 1:
        return 1
    return max(1, min(MAX_B_TILE, n // 2))            # keep grid >= 2 (v7x megacore)


@jax.jit
def vqgan_forward(packed, x_nchw):
    n = x_nchw.shape[0]
    b_tile = _pick_b_tile(n)
    n_pad = ((n + b_tile - 1) // b_tile) * b_tile

    x = jnp.transpose(x_nchw, (0, 2, 3, 1))                        # NHWC
    x = jnp.pad(x, ((0, 0), (0, 0), (0, 0), (0, IN_CH_PAD - IN_CH)))
    if n_pad != n:
        x = jnp.concatenate(
            [x, jnp.zeros((n_pad - n, H0, W0, IN_CH_PAD), x.dtype)], axis=0)
    x = x.reshape(n_pad * ROWS, IN_CH_PAD).astype(jnp.float32)

    out = _make_vqgan_call(n_pad, b_tile, packed)(
        x, *[packed[k] for k in _CONST_NAMES])

    x_hat = out.reshape(n_pad, H0, W0, CP)[:n, :, :, :IN_CH]
    return jnp.transpose(x_hat, (0, 3, 1, 2))                      # NHWC -> NCHW


# ----------------------------------------------------------------------------
# Host-side constant construction (done ONCE, outside jit)
# ----------------------------------------------------------------------------
def _gather_stack(h_in, w_in, stride, shifts):
    """Stacked 0/1 gather: row (t*ro + ho*Wout+wo) picks input row
    (stride*ho+dh, stride*wo+dw) for shift t=(dh,dw); zero when out of range."""
    h_out, w_out = h_in // stride, w_in // stride
    ri, ro = h_in * w_in, h_out * w_out
    g = np.zeros((len(shifts) * ro, ri), np.float32)
    for t, (dh, dw) in enumerate(shifts):
        for ho in range(h_out):
            for wo in range(w_out):
                ih, iw = stride * ho + dh, stride * wo + dw
                if 0 <= ih < h_in and 0 <= iw < w_in:
                    g[t * ro + ho * w_out + wo, ih * w_in + iw] = 1.0
    return g


def _phase_interleave(h_in, w_in):
    """(2H*2W, 4*H*W) permutation: column (2r+t)*H*W + hb*W+wb -> output row
    (2hb+r, 2wb+t).  Maps phase-stacked convT output to raster order."""
    ho, wo = 2 * h_in, 2 * w_in
    p = np.zeros((ho * wo, 4 * h_in * w_in), np.float32)
    for oh in range(ho):
        for ow in range(wo):
            r, t = oh & 1, ow & 1
            hb, wb = oh >> 1, ow >> 1
            p[oh * wo + ow, (2 * r + t) * h_in * w_in + hb * w_in + wb] = 1.0
    return p


def init_params(key):
    ks = jax.random.split(key, 9)

    def nrm(k, shape, scale=0.02):
        return scale * jax.random.normal(k, shape, jnp.float32)

    p = {}
    p["enc1_w"] = nrm(ks[0], (HIDDEN, IN_CH, 4, 4));  p["enc1_b"] = jnp.zeros((HIDDEN,), jnp.float32)
    p["enc2_w"] = nrm(ks[1], (HIDDEN, HIDDEN, 4, 4)); p["enc2_b"] = jnp.zeros((HIDDEN,), jnp.float32)
    p["enc3_w"] = nrm(ks[2], (ZCH, HIDDEN, 3, 3));    p["enc3_b"] = jnp.zeros((ZCH,), jnp.float32)
    p["quant_w"] = nrm(ks[3], (EMB_DIM, ZCH, 1, 1));  p["quant_b"] = jnp.zeros((EMB_DIM,), jnp.float32)
    p["codebook"] = nrm(ks[4], (N_EMBED, EMB_DIM), scale=1.0)
    p["post_w"] = nrm(ks[5], (ZCH, EMB_DIM, 1, 1));   p["post_b"] = jnp.zeros((ZCH,), jnp.float32)
    p["dec1_w"] = nrm(ks[6], (HIDDEN, ZCH, 3, 3));    p["dec1_b"] = jnp.zeros((HIDDEN,), jnp.float32)
    # ConvTranspose2d weight layout: (Cin, Cout, kh, kw)
    p["dec2_w"] = nrm(ks[7], (HIDDEN, HIDDEN, 4, 4)); p["dec2_b"] = jnp.zeros((HIDDEN,), jnp.float32)
    p["dec3_w"] = nrm(ks[8], (HIDDEN, IN_CH, 4, 4));  p["dec3_b"] = jnp.zeros((IN_CH,), jnp.float32)
    return p


def pack_params(raw):
    """One-time repack: lane-padded per-tap weights, stacked gathers,
    interleave permutations, codebook tables.  All matmul operands bf16."""
    taps = np.zeros((N_TAPS, CP, CP), np.float32)
    bias = np.zeros((8, 1, CP), np.float32)

    def put_conv(off, w_oihw):                      # Conv2d: (Cout, Cin, kh, kw)
        w = np.asarray(w_oihw)
        cout, cin, kh, kw = w.shape
        t = 0
        for i in range(kh):
            for j in range(kw):
                taps[off + t, :cin, :cout] = w[:, :, i, j].T
                t += 1

    def put_convt(off, w_iohw):                     # ConvTranspose2d: (Cin, Cout, kh, kw)
        w = np.asarray(w_iohw)
        cin, cout = w.shape[0], w.shape[1]
        for r in range(2):
            for t in range(2):
                for a in range(2):
                    for b in range(2):
                        idx = off + ((r * 2 + t) * 2 + a) * 2 + b
                        taps[idx, :cin, :cout] = w[:, :, 3 - 2 * a - r, 3 - 2 * b - t]

    def put_bias(li, b):
        b = np.asarray(b)
        bias[li, 0, :b.shape[0]] = b

    put_conv(OFF_E1, raw["enc1_w"]);  put_bias(0, raw["enc1_b"])
    put_conv(OFF_E2, raw["enc2_w"]);  put_bias(1, raw["enc2_b"])
    put_conv(OFF_E3, raw["enc3_w"]);  put_bias(2, raw["enc3_b"])
    put_conv(OFF_Q, raw["quant_w"]);  put_bias(3, raw["quant_b"])
    put_conv(OFF_P, raw["post_w"]);   put_bias(4, raw["post_b"])
    put_conv(OFF_D1, raw["dec1_w"]);  put_bias(5, raw["dec1_b"])
    put_convt(OFF_D2, raw["dec2_w"]); put_bias(6, raw["dec2_b"])
    put_convt(OFF_D3, raw["dec3_w"]); put_bias(7, raw["dec3_b"])

    # ---- precomputed 0/1 gather / interleave matrices (review item #1) ----
    k4 = [(i - 1, j - 1) for i in range(4) for j in range(4)]
    k3 = [(i - 1, j - 1) for i in range(3) for j in range(3)]
    ct = [(dh, dw) for dh in (-1, 0, 1) for dw in (-1, 0, 1)]

    g_e1 = _gather_stack(16, 16, 2, k4)             # (1024, 256)
    g_e2 = _gather_stack(8, 8, 2, k4)               # (256, 64)
    g_e3 = _gather_stack(4, 4, 1, k3)               # (144, 16)
    g_d1 = _gather_stack(4, 4, 1, k3)               # (144, 16)
    g_d2 = _gather_stack(4, 4, 1, ct)               # (144, 16)
    p_d2 = _phase_interleave(4, 4)                  # (64, 64) permutation
    # fold dec2's phase->raster permutation into dec3's gather (host matmul)
    g_d3 = _gather_stack(8, 8, 1, ct) @ p_d2        # (576, 64)
    p_d3 = _phase_interleave(8, 8)                  # (256, 256)

    emb = np.zeros((IN_CH_PAD, CP), np.float32)
    for c in range(IN_CH):
        emb[c, c] = 1.0

    cb = np.asarray(raw["codebook"])                # (64, 16)
    ecb = np.zeros((CP, CP), np.float32)
    ecb[:N_EMBED, :EMB_DIM] = cb
    esq = np.full((1, CP), 1e30, np.float32)        # pad entries never win argmin
    esq[0, :N_EMBED] = np.sum(cb * cb, axis=1)

    bf = lambda a: jnp.asarray(a, jnp.bfloat16)
    return {
        "embed": bf(emb),
        "taps": bf(taps),
        "bias": jnp.asarray(bias, jnp.float32),
        "g_e1": bf(g_e1), "g_e2": bf(g_e2), "g_e3": bf(g_e3),
        "g_d1": bf(g_d1), "g_d2": bf(g_d2), "g_d3": bf(g_d3),
        "p_d3": bf(p_d3),
        "codebook": jnp.asarray(ecb, jnp.float32),      # f32 lookup
        "codebook_t": bf(ecb.T),                        # bf16 distance matmul
        "codebook_sq": jnp.asarray(esq, jnp.float32),
    }


if __name__ == "__main__":
    key = jax.random.PRNGKey(0)
    pkey, xkey = jax.random.split(key)
    raw = init_params(pkey)
    packed = pack_params(raw)                        # one-time repack outside jit

    x = jax.random.normal(xkey, (2, IN_CH, H0, W0), jnp.float32)   # NCHW

    x_hat = vqgan_forward(packed, x)
    jax.block_until_ready(x_hat)

    assert x_hat.shape == (2, IN_CH, H0, W0), x_hat.shape
    assert x_hat.dtype == jnp.float32
    assert bool(jnp.all(jnp.isfinite(x_hat)))
    print("KERNEL_OK")
</pallas_src>

<mosaic_0001>
module attributes {stable_mosaic.version = 11 : i64} {
  func.func @_vqgan_fused_kernel(%arg0: i32, %arg1: memref<256x8xf32, #tpu.memory_space<vmem>>, %arg2: memref<8x128xbf16, #tpu.memory_space<vmem>>, %arg3: memref<84x128x128xbf16, #tpu.memory_space<vmem>>, %arg4: memref<8x1x128xf32, #tpu.memory_space<vmem>>, %arg5: memref<1024x256xbf16, #tpu.memory_space<vmem>>, %arg6: memref<256x64xbf16, #tpu.memory_space<vmem>>, %arg7: memref<144x16xbf16, #tpu.memory_space<vmem>>, %arg8: memref<144x16xbf16, #tpu.memory_space<vmem>>, %arg9: memref<144x16xbf16, #tpu.memory_space<vmem>>, %arg10: memref<576x64xbf16, #tpu.memory_space<vmem>>, %arg11: memref<256x256xbf16, #tpu.memory_space<vmem>>, %arg12: memref<128x128xbf16, #tpu.memory_space<vmem>>, %arg13: memref<1x128xf32, #tpu.memory_space<vmem>>, %arg14: memref<128x128xf32, #tpu.memory_space<vmem>>, %arg15: memref<256x128xf32, #tpu.memory_space<vmem>>) attributes {dimension_semantics = [#tpu.dimension_semantics<parallel>], iteration_bounds = array<i64: 2>, scalar_prefetch = 0 : i64, scratch_operands = 0 : i64, tpu.core_type = #tpu.core_type<tc>, window_params = [{transform_indices = @transform_0, window_bounds = array<i64: 256, 8>}, {pipeline_mode = #tpu.pipeline_mode<synchronous>, transform_indices = @transform_1, window_bounds = array<i64: 8, 128>}, {pipeline_mode = #tpu.pipeline_mode<synchronous>, transform_indices = @transform_2, window_bounds = array<i64: 84, 128, 128>}, {pipeline_mode = #tpu.pipeline_mode<synchronous>, transform_indices = @transform_3, window_bounds = array<i64: 8, 1, 128>}, {pipeline_mode = #tpu.pipeline_mode<synchronous>, transform_indices = @transform_4, window_bounds = array<i64: 1024, 256>}, {pipeline_mode = #tpu.pipeline_mode<synchronous>, transform_indices = @transform_5, window_bounds = array<i64: 256, 64>}, {pipeline_mode = #tpu.pipeline_mode<synchronous>, transform_indices = @transform_6, window_bounds = array<i64: 144, 16>}, {pipeline_mode = #tpu.pipeline_mode<synchronous>, transform_indices = @transform_7, window_bounds = array<i64: 144, 16>}, {pipeline_mode = #tpu.pipeline_mode<synchronous>, transform_indices = @transform_8, window_bounds = array<i64: 144, 16>}, {pipeline_mode = #tpu.pipeline_mode<synchronous>, transform_indices = @transform_9, window_bounds = array<i64: 576, 64>}, {pipeline_mode = #tpu.pipeline_mode<synchronous>, transform_indices = @transform_10, window_bounds = array<i64: 256, 256>}, {pipeline_mode = #tpu.pipeline_mode<synchronous>, transform_indices = @transform_11, window_bounds = array<i64: 128, 128>}, {pipeline_mode = #tpu.pipeline_mode<synchronous>, transform_indices = @transform_12, window_bounds = array<i64: 1, 128>}, {pipeline_mode = #tpu.pipeline_mode<synchronous>, transform_indices = @transform_13, window_bounds = array<i64: 128, 128>}, {transform_indices = @transform_14, window_bounds = array<i64: 256, 128>}]} {
    %c0 = arith.constant 0 : index
    %c0_0 = arith.constant 0 : index
    %0 = vector.load %arg1[%c0, %c0_0] : memref<256x8xf32, #tpu.memory_space<vmem>>, vector<256x8xf32>
    %1 = arith.truncf %0 : vector<256x8xf32> to vector<256x8xbf16>
    %c0_1 = arith.constant 0 : index
    %c0_2 = arith.constant 0 : index
    %2 = vector.load %arg2[%c0_1, %c0_2] : memref<8x128xbf16, #tpu.memory_space<vmem>>, vector<8x128xbf16>
    %cst = arith.constant dense<0.000000e+00> : vector<256x128xf32>
    %3 = tpu.matmul %1, %2, %cst {dimension_numbers = #tpu.dot_dimension_numbers<[1], [0], [0], [1], [0, 0, 1, 1], [], []>} : vector<256x8xbf16>, vector<8x128xbf16>, vector<256x128xf32> -> vector<256x128xf32>
    %c0_3 = arith.constant 0 : index
    %c0_4 = arith.constant 0 : index
    %c0_5 = arith.constant 0 : index
    %4 = vector.load %arg4[%c0_3, %c0_4, %c0_5] : memref<8x1x128xf32, #tpu.memory_space<vmem>>, vector<1x1x128xf32>
    %5 = vector.shape_cast %4 : vector<1x1x128xf32> to vector<1x128xf32>
    %6 = arith.truncf %3 : vector<256x128xf32> to vector<256x128xbf16>
    %7 = vector.shape_cast %6 : vector<256x128xbf16> to vector<1x256x128xbf16>
    %c0_6 = arith.constant 0 : index
    %c0_7 = arith.constant 0 : index
    %8 = vector.load %arg5[%c0_6, %c0_7] : memref<1024x256xbf16, #tpu.memory_space<vmem>>, vector<1024x256xbf16>
    %9 = vector.shape_cast %8 : vector<1024x256xbf16> to vector<1x1024x256xbf16>
    "tpu.trace_start"() <{level = 10 : i32, message = "bor,bri->boi"}> : () -> ()
    %cst_8 = arith.constant dense<0.000000e+00> : vector<1x1024x128xf32>
    %10 = tpu.matmul %9, %7, %cst_8 {dimension_numbers = #tpu.dot_dimension_numbers<[2], [1], [1], [2], [0, 0, 0, 1, 1, 2], [0], [0]>} : vector<1x1024x256xbf16>, vector<1x256x128xbf16>, vector<1x1024x128xf32> -> vector<1x1024x128xf32>
    "tpu.trace_stop"() : () -> ()
    %11 = arith.truncf %10 : vector<1x1024x128xf32> to vector<1x1024x128xbf16>
    %12 = vector.extract_strided_slice %11 {offsets = [0, 0, 0], sizes = [1, 64, 128], strides = [1, 1, 1]} : vector<1x1024x128xbf16> to vector<1x64x128xbf16>
    %13 = vector.shape_cast %12 : vector<1x64x128xbf16> to vector<64x128xbf16>
    %c0_9 = arith.constant 0 : index
    %c0_10 = arith.constant 0 : index
    %c0_11 = arith.constant 0 : index
    %14 = vector.load %arg3[%c0_9, %c0_10, %c0_11] : memref<84x128x128xbf16, #tpu.memory_space<vmem>>, vector<1x128x128xbf16>
    %15 = vector.shape_cast %14 : vector<1x128x128xbf16> to vector<128x128xbf16>
    %cst_12 = arith.constant dense<0.000000e+00> : vector<64x128xf32>
    %16 = tpu.matmul %13, %15, %cst_12 {dimension_numbers = #tpu.dot_dimension_numbers<[1], [0], [0], [1], [0, 0, 1, 1], [], []>} : vector<64x128xbf16>, vector<128x128xbf16>, vector<64x128xf32> -> vector<64x128xf32>
    %17 = vector.extract_strided_slice %11 {offsets = [0, 64, 0], sizes = [1, 64, 128], strides = [1, 1, 1]} : vector<1x1024x128xbf16> to vector<1x64x128xbf16>
    %18 = vector.shape_cast %17 : vector<1x64x128xbf16> to vector<64x128xbf16>
    %c1 = arith.constant 1 : index
    %c0_13 = arith.constant 0 : index
    %c0_14 = arith.constant 0 : index
    %19 = vector.load %arg3[%c1, %c0_13, %c0_14] : memref<84x128x128xbf16, #tpu.memory_space<vmem>>, vector<1x128x128xbf16>
    %20 = vector.shape_cast %19 : vector<1x128x128xbf16> to vector<128x128xbf16>
    %cst_15 = arith.constant dense<0.000000e+00> : vector<64x128xf32>
    %21 = tpu.matmul %18, %20, %cst_15 {dimension_numbers = #tpu.dot_dimension_numbers<[1], [0], [0], [1], [0, 0, 1, 1], [], []>} : vector<64x128xbf16>, vector<128x128xbf16>, vector<64x128xf32> -> vector<64x128xf32>
    %22 = arith.addf %16, %21 : vector<64x128xf32>
    %23 = vector.extract_strided_slice %11 {offsets = [0, 128, 0], sizes = [1, 64, 128], strides = [1, 1, 1]} : vector<1x1024x128xbf16> to vector<1x64x128xbf16>
    %24 = vector.shape_cast %23 : vector<1x64x128xbf16> to vector<64x128xbf16>
    %c2 = arith.constant 2 : index
    %c0_16 = arith.constant 0 : index
    %c0_17 = arith.constant 0 : index
    %25 = vector.load %arg3[%c2, %c0_16, %c0_17] : memref<84x128x128xbf16, #tpu.memory_space<vmem>>, vector<1x128x128xbf16>
    %26 = vector.shape_cast %25 : vector<1x128x128xbf16> to vector<128x128xbf16>
    %cst_18 = arith.constant dense<0.000000e+00> : vector<64x128xf32>
    %27 = tpu.matmul %24, %26, %cst_18 {dimension_numbers = #tpu.dot_dimension_numbers<[1], [0], [0], [1], [0, 0, 1, 1], [], []>} : vector<64x128xbf16>, vector<128x128xbf16>, vector<64x128xf32> -> vector<64x128xf32>
    %28 = arith.addf %22, %27 : vector<64x128xf32>
    %29 = vector.extract_strided_slice %11 {offsets = [0, 192, 0], sizes = [1, 64, 128], strides = [1, 1, 1]} : vector<1x1024x128xbf16> to vector<1x64x128xbf16>
    %30 = vector.shape_cast %29 : vector<1x64x128xbf16> to vector<64x128xbf16>
    %c3 = arith.constant 3 : index
    %c0_19 = arith.constant 0 : index
    %c0_20 = arith.constant 0 : index
    %31 = vector.load %arg3[%c3, %c0_19, %c0_20] : memref<84x128x128xbf16, #tpu.memory_space<vmem>>, vector<1x128x128xbf16>
    %32 = vector.shape_cast %31 : vector<1x128x128xbf16> to vector<128x128xbf16>
    %cst_21 = arith.constant dense<0.000000e+00> : vector<64x128xf32>
    %33 = tpu.matmul %30, %32, %cst_21 {dimension_numbers = #tpu.dot_dimension_numbers<[1], [0], [0], [1], [0, 0, 1, 1], [], []>} : vector<64x128xbf16>, vector<128x128xbf16>, vector<64x128xf32> -> vector<64x128xf32>
    %34 = arith.addf %28, %33 : vector<64x128xf32>
    %35 = vector.extract_strided_slice %11 {offsets = [0, 256, 0], sizes = [1, 64, 128], strides = [1, 1, 1]} : vector<1x1024x128xbf16> to vector<1x64x128xbf16>
    %36 = vector.shape_cast %35 : vector<1x64x128xbf16> to vector<64x128xbf16>
    %c4 = arith.constant 4 : index
    %c0_22 = arith.constant 0 : index
    %c0_23 = arith.constant 0 : index
    %37 = vector.load %arg3[%c4, %c0_22, %c0_23] : memref<84x128x128xbf16, #tpu.memory_space<vmem>>, vector<1x128x128xbf16>
    %38 = vector.shape_cast %37 : vector<1x128x128xbf16> to vector<128x128xbf16>
    %cst_24 = arith.constant dense<0.000000e+00> : vector<64x128xf32>
    %39 = tpu.matmul %36, %38, %cst_24 {dimension_numbers = #tpu.dot_dimension_numbers<[1], [0], [0], [1], [0, 0, 1, 1], [], []>} : vector<64x128xbf16>, vector<128x128xbf16>, vector<64x128xf32> -> vector<64x128xf32>
    %40 = arith.addf %34, %39 : vector<64x128xf32>
    %41 = vector.extract_strided_slice %11 {offsets = [0, 320, 0], sizes = [1, 64, 128], strides = [1, 1, 1]} : vector<1x1024x128xbf16> to vector<1x64x128xbf16>
    %42 = vector.shape_cast %41 : vector<1x64x128xbf16> to vector<64x128xbf16>
    %c5 = arith.constant 5 : index
    %c0_25 = arith.constant 0 : index
    %c0_26 = arith.constant 0 : index
    %43 = vector.load %arg3[%c5, %c0_25, %c0_26] : memref<84x128x128xbf16, #tpu.memory_space<vmem>>, vector<1x128x128xbf16>
    %44 = vector.shape_cast %43 : vector<1x128x128xbf16> to vector<128x128xbf16>
    %cst_27 = arith.constant dense<0.000000e+00> : vector<64x128xf32>
    %45 = tpu.matmul %42, %44, %cst_27 {dimension_numbers = #tpu.dot_dimension_numbers<[1], [0], [0], [1], [0, 0, 1, 1], [], []>} : vector<64x128xbf16>, vector<128x128xbf16>, vector<64x128xf32> -> vector<64x128xf32>
    %46 = arith.addf %40, %45 : vector<64x128xf32>
    %47 = vector.extract_strided_slice %11 {offsets = [0, 384, 0], sizes = [1, 64, 128], strides = [1, 1, 1]} : vector<1x1024x128xbf16> to vector<1x64x128xbf16>
    %48 = vector.shape_cast %47 : vector<1x64x128xbf16> to vector<64x128xbf16>
    %c6 = arith.constant 6 : index
    %c0_28 = arith.constant 0 : index
    %c0_29 = arith.constant 0 : index
    %49 = vector.load %arg3[%c6, %c0_28, %c0_29] : memref<84x128x128xbf16, #tpu.memory_space<vmem>>, vector<1x128x128xbf16>
    %50 = vector.shape_cast %49 : vector<1x128x128xbf16> to vector<128x128xbf16>
    %cst_30 = arith.constant dense<0.000000e+00> : vector<64x128xf32>
    %51 = tpu.matmul %48, %50, %cst_30 {dimension_numbers = #tpu.dot_dimension_numbers<[1], [0], [0], [1], [0, 0, 1, 1], [], []>} : vector<64x128xbf16>, vector<128x128xbf16>, vector<64x128xf32> -> vector<64x128xf32>
    %52 = arith.addf %46, %51 : vector<64x128xf32>
    %53 = vector.extract_strided_slice %11 {offsets = [0, 448, 0], sizes = [1, 64, 128], strides = [1, 1, 1]} : vector<1x1024x128xbf16> to vector<1x64x128xbf16>
    %54 = vector.shape_cast %53 : vector<1x64x128xbf16> to vector<64x128xbf16>
    %c7 = arith.constant 7 : index
    %c0_31 = arith.constant 0 : index
    %c0_32 = arith.constant 0 : index
    %55 = vector.load %arg3[%c7, %c0_31, %c0_32] : memref<84x128x128xbf16, #tpu.memory_space<vmem>>, vector<1x128x128xbf16>
    %56 = vector.shape_cast %55 : vector<1x128x128xbf16> to vector<128x128xbf16>
    %cst_33 = arith.constant dense<0.000000e+00> : vector<64x128xf32>
    %57 = tpu.matmul %54, %56, %cst_33 {dimension_numbers = #tpu.dot_dimension_numbers<[1], [0], [0], [1], [0, 0, 1, 1], [], []>} : vector<64x128xbf16>, vector<128x128xbf16>, vector<64x128xf32> -> vector<64x128xf32>
    %58 = arith.addf %52, %57 : vector<64x128xf32>
    %59 = vector.extract_strided_slice %11 {offsets = [0, 512, 0], sizes = [1, 64, 128], strides = [1, 1, 1]} : vector<1x1024x128xbf16> to vector<1x64x128xbf16>
    %60 = vector.shape_cast %59 : vector<1x64x128xbf16> to vector<64x128xbf16>
    %c8 = arith.constant 8 : index
    %c0_34 = arith.constant 0 : index
    %c0_35 = arith.constant 0 : index
    %61 = vector.load %arg3[%c8, %c0_34, %c0_35] : memref<84x128x128xbf16, #tpu.memory_space<vmem>>, vector<1x128x128xbf16>
    %62 = vector.shape_cast %61 : vector<1x128x128xbf16> to vector<128x128xbf16>
    %cst_36 = arith.constant dense<0.000000e+00> : vector<64x128xf32>
    %63 = tpu.matmul %60, %62, %cst_36 {dimension_numbers = #tpu.dot_dimension_numbers<[1], [0], [0], [1], [0, 0, 1, 1], [], []>} : vector<64x128xbf16>, vector<128x128xbf16>, vector<64x128xf32> -> vector<64x128xf32>
    %64 = arith.addf %58, %63 : vector<64x128xf32>
    %65 = vector.extract_strided_slice %11 {offsets = [0, 576, 0], sizes = [1, 64, 128], strides = [1, 1, 1]} : vector<1x1024x128xbf16> to vector<1x64x128xbf16>
    %66 = vector.shape_cast %65 : vector<1x64x128xbf16> to vector<64x128xbf16>
    %c9 = arith.constant 9 : index
    %c0_37 = arith.constant 0 : index
    %c0_38 = arith.constant 0 : index
    %67 = vector.load %arg3[%c9, %c0_37, %c0_38] : memref<84x128x128xbf16, #tpu.memory_space<vmem>>, vector<1x128x128xbf16>
    %68 = vector.shape_cast %67 : vector<1x128x128xbf16> to vector<128x128xbf16>
    %cst_39 = arith.constant dense<0.000000e+00> : vector<64x128xf32>
    %69 = tpu.matmul %66, %68, %cst_39 {dimension_numbers = #tpu.dot_dimension_numbers<[1], [0], [0], [1], [0, 0, 1, 1], [], []>} : vector<64x128xbf16>, vector<128x128xbf16>, vector<64x128xf32> -> vector<64x128xf32>
    %70 = arith.addf %64, %69 : vector<64x128xf32>
    %71 = vector.extract_strided_slice %11 {offsets = [0, 640, 0], sizes = [1, 64, 128], strides = [1, 1, 1]} : vector<1x1024x128xbf16> to vector<1x64x128xbf16>
    %72 = vector.shape_cast %71 : vector<1x64x128xbf16> to vector<64x128xbf16>
    %c10 = arith.constant 10 : index
    %c0_40 = arith.constant 0 : index
    %c0_41 = arith.constant 0 : index
    %73 = vector.load %arg3[%c10, %c0_40, %c0_41] : memref<84x128x128xbf16, #tpu.memory_space<vmem>>, vector<1x128x128xbf16>
    %74 = vector.shape_cast %73 : vector<1x128x128xbf16> to vector<128x128xbf16>
    %cst_42 = arith.constant dense<0.000000e+00> : vector<64x128xf32>
    %75 = tpu.matmul %72, %74, %cst_42 {dimension_numbers = #tpu.dot_dimension_numbers<[1], [0], [0], [1], [0, 0, 1, 1], [], []>} : vector<64x128xbf16>, vector<128x128xbf16>, vector<64x128xf32> -> vector<64x128xf32>
    %76 = arith.addf %70, %75 : vector<64x128xf32>
    %77 = vector.extract_strided_slice %11 {offsets = [0, 704, 0], sizes = [1, 64, 128], strides = [1, 1, 1]} : vector<1x1024x128xbf16> to vector<1x64x128xbf16>
    %78 = vector.shape_cast %77 : vector<1x64x128xbf16> to vector<64x128xbf16>
    %c11 = arith.constant 11 : index
    %c0_43 = arith.constant 0 : index
    %c0_44 = arith.constant 0 : index
    %79 = vector.load %arg3[%c11, %c0_43, %c0_44] : memref<84x128x128xbf16, #tpu.memory_space<vmem>>, vector<1x128x128xbf16>
    %80 = vector.shape_cast %79 : vector<1x128x128xbf16> to vector<128x128xbf16>
    %cst_45 = arith.constant dense<0.000000e+00> : vector<64x128xf32>
    %81 = tpu.matmul %78, %80, %cst_45 {dimension_numbers = #tpu.dot_dimension_numbers<[1], [0], [0], [1], [0, 0, 1, 1], [], []>} : vector<64x128xbf16>, vector<128x128xbf16>, vector<64x128xf32> -> vector<64x128xf32>
    %82 = arith.addf %76, %81 : vector<64x128xf32>
    %83 = vector.extract_strided_slice %11 {offsets = [0, 768, 0], sizes = [1, 64, 128], strides = [1, 1, 1]} : vector<1x1024x128xbf16> to vector<1x64x128xbf16>
    %84 = vector.shape_cast %83 : vector<1x64x128xbf16> to vector<64x128xbf16>
    %c12 = arith.constant 12 : index
    %c0_46 = arith.constant 0 : index
    %c0_47 = arith.constant 0 : index
    %85 = vector.load %arg3[%c12, %c0_46, %c0_47] : memref<84x128x128xbf16, #tpu.memory_space<vmem>>, vector<1x128x128xbf16>
    %86 = vector.shape_cast %85 : vector<1x128x128xbf16> to vector<128x128xbf16>
    %cst_48 = arith.constant dense<0.000000e+00> : vector<64x128xf32>
    %87 = tpu.matmul %84, %86, %cst_48 {dimension_numbers = #tpu.dot_dimension_numbers<[1], [0], [0], [1], [0, 0, 1, 1], [], []>} : vector<64x128xbf16>, vector<128x128xbf16>, vector<64x128xf32> -> vector<64x128xf32>
    %88 = arith.addf %82, %87 : vector<64x128xf32>
    %89 = vector.extract_strided_slice %11 {offsets = [0, 832, 0], sizes = [1, 64, 128], strides = [1, 1, 1]} : vector<1x1024x128xbf16> to vector<1x64x128xbf16>
    %90 = vector.shape_cast %89 : vector<1x64x128xbf16> to vector<64x128xbf16>
    %c13 = arith.constant 13 : index
    %c0_49 = arith.constant 0 : index
    %c0_50 = arith.constant 0 : index
    %91 = vector.load %arg3[%c13, %c0_49, %c0_50] : memref<84x128x128xbf16, #tpu.memory_space<vmem>>, vector<1x128x128xbf16>
    %92 = vector.shape_cast %91 : vector<1x128x128xbf16> to vector<128x128xbf16>
    %cst_51 = arith.constant dense<0.000000e+00> : vector<64x128xf32>
    %93 = tpu.matmul %90, %92, %cst_51 {dimension_numbers = #tpu.dot_dimension_numbers<[1], [0], [0], [1], [0, 0, 1, 1], [], []>} : vector<64x128xbf16>, vector<128x128xbf16>, vector<64x128xf32> -> vector<64x128xf32>
    %94 = arith.addf %88, %93 : vector<64x128xf32>
    %95 = vector.extract_strided_slice %11 {offsets = [0, 896, 0], sizes = [1, 64, 128], strides = [1, 1, 1]} : vector<1x1024x128xbf16> to vector<1x64x128xbf16>
    %96 = vector.shape_cast %95 : vector<1x64x128xbf16> to vector<64x128xbf16>
    %c14 = arith.constant 14 : index
    %c0_52 = arith.constant 0 : index
    %c0_53 = arith.constant 0 : index
    %97 = vector.load %arg3[%c14, %c0_52, %c0_53] : memref<84x128x128xbf16, #tpu.memory_space<vmem>>, vector<1x128x128xbf16>
    %98 = vector.shape_cast %97 : vector<1x128x128xbf16> to vector<128x128xbf16>
    %cst_54 = arith.constant dense<0.000000e+00> : vector<64x128xf32>
    %99 = tpu.matmul %96, %98, %cst_54 {dimension_numbers = #tpu.dot_dimension_numbers<[1], [0], [0], [1], [0, 0, 1, 1], [], []>} : vector<64x128xbf16>, vector<128x128xbf16>, vector<64x128xf32> -> vector<64x128xf32>
    %100 = arith.addf %94, %99 : vector<64x128xf32>
    %101 = vector.extract_strided_slice %11 {offsets = [0, 960, 0], sizes = [1, 64, 128], strides = [1, 1, 1]} : vector<1x1024x128xbf16> to vector<1x64x128xbf16>
    %102 = vector.shape_cast %101 : vector<1x64x128xbf16> to vector<64x128xbf16>
    %c15 = arith.constant 15 : index
    %c0_55 = arith.constant 0 : index
    %c0_56 = arith.constant 0 : index
    %103 = vector.load %arg3[%c15, %c0_55, %c0_56] : memref<84x128x128xbf16, #tpu.memory_space<vmem>>, vector<1x128x128xbf16>
    %104 = vector.shape_cast %103 : vector<1x128x128xbf16> to vector<128x128xbf16>
    %cst_57 = arith.constant dense<0.000000e+00> : vector<64x128xf32>
    %105 = tpu.matmul %102, %104, %cst_57 {dimension_numbers = #tpu.dot_dimension_numbers<[1], [0], [0], [1], [0, 0, 1, 1], [], []>} : vector<64x128xbf16>, vector<128x128xbf16>, vector<64x128xf32> -> vector<64x128xf32>
    %106 = arith.addf %100, %105 : vector<64x128xf32>
    %107 = vector.broadcast %5 : vector<1x128xf32> to vector<64x128xf32>
    %108 = arith.addf %106, %107 : vector<64x128xf32>
    %cst_58 = arith.constant 0.000000e+00 : f32
    %109 = vector.broadcast %cst_58 : f32 to vector<64x128xf32>
    %110 = arith.maximumf %108, %109 : vector<64x128xf32>
    %c1_59 = arith.constant 1 : index
    %c0_60 = arith.constant 0 : index
    %c0_61 = arith.constant 0 : index
    %111 = vector.load %arg4[%c1_59, %c0_60, %c0_61] : memref<8x1x128xf32, #tpu.memory_space<vmem>>, vector<1x1x128xf32>
    %112 = vector.shape_cast %111 : vector<1x1x128xf32> to vector<1x128xf32>
    %113 = arith.truncf %110 : vector<64x128xf32> to vector<64x128xbf16>
    %114 = vector.shape_cast %113 : vector<64x128xbf16> to vector<1x64x128xbf16>
    %c0_62 = arith.constant 0 : index
    %c0_63 = arith.constant 0 : index
    %115 = vector.load %arg6[%c0_62, %c0_63] : memref<256x64xbf16, #tpu.memory_space<vmem>>, vector<256x64xbf16>
    %116 = vector.shape_cast %115 : vector<256x64xbf16> to vector<1x256x64xbf16>
    "tpu.trace_start"() <{level = 10 : i32, message = "bor,bri->boi"}> : () -> ()
    %cst_64 = arith.constant dense<0.000000e+00> : vector<1x256x128xf32>
    %117 = tpu.matmul %116, %114, %cst_64 {dimension_numbers = #tpu.dot_dimension_numbers<[2], [1], [1], [2], [0, 0, 0, 1, 1, 2], [0], [0]>} : vector<1x256x64xbf16>, vector<1x64x128xbf16>, vector<1x256x128xf32> -> vector<1x256x128xf32>
    "tpu.trace_stop"() : () -> ()
    %118 = arith.truncf %117 : vector<1x256x128xf32> to vector<1x256x128xbf16>
    %119 = vector.extract_strided_slice %118 {offsets = [0, 0, 0], sizes = [1, 16, 128], strides = [1, 1, 1]} : vector<1x256x128xbf16> to vector<1x16x128xbf16>
    %120 = vector.shape_cast %119 : vector<1x16x128xbf16> to vector<16x128xbf16>
    %c16 = arith.constant 16 : index
    %c0_65 = arith.constant 0 : index
    %c0_66 = arith.constant 0 : index
    %121 = vector.load %arg3[%c16, %c0_65, %c0_66] : memref<84x128x128xbf16, #tpu.memory_space<vmem>>, vector<1x128x128xbf16>
    %122 = vector.shape_cast %121 : vector<1x128x128xbf16> to vector<128x128xbf16>
    %cst_67 = arith.constant dense<0.000000e+00> : vector<16x128xf32>
    %123 = tpu.matmul %120, %122, %cst_67 {dimension_numbers = #tpu.dot_dimension_numbers<[1], [0], [0], [1], [0, 0, 1, 1], [], []>} : vector<16x128xbf16>, vector<128x128xbf16>, vector<16x128xf32> -> vector<16x128xf32>
    %124 = vector.extract_strided_slice %118 {offsets = [0, 16, 0], sizes = [1, 16, 128], strides = [1, 1, 1]} : vector<1x256x128xbf16> to vector<1x16x128xbf16>
    %125 = vector.shape_cast %124 : vector<1x16x128xbf16> to vector<16x128xbf16>
    %c17 = arith.constant 17 : index
    %c0_68 = arith.constant 0 : index
    %c0_69 = arith.constant 0 : index
    %126 = vector.load %arg3[%c17, %c0_68, %c0_69] : memref<84x128x128xbf16, #tpu.memory_space<vmem>>, vector<1x128x128xbf16>
    %127 = vector.shape_cast %126 : vector<1x128x128xbf16> to vector<128x128xbf16>
    %cst_70 = arith.constant dense<0.000000e+00> : vector<16x128xf32>
    %128 = tpu.matmul %125, %127, %cst_70 {dimension_numbers = #tpu.dot_dimension_numbers<[1], [0], [0], [1], [0, 0, 1, 1], [], []>} : vector<16x128xbf16>, vector<128x128xbf16>, vector<16x128xf32> -> vector<16x128xf32>
    %129 = arith.addf %123, %128 : vector<16x128xf32>
    %130 = vector.extract_strided_slice %118 {offsets = [0, 32, 0], sizes = [1, 16, 128], strides = [1, 1, 1]} : vector<1x256x128xbf16> to vector<1x16x128xbf16>
    %131 = vector.shape_cast %130 : vector<1x16x128xbf16> to vector<16x128xbf16>
    %c18 = arith.constant 18 : index
    %c0_71 = arith.constant 0 : index
    %c0_72 = arith.constant 0 : index
    %132 = vector.load %arg3[%c18, %c0_71, %c0_72] : memref<84x128x128xbf16, #tpu.memory_space<vmem>>, vector<1x128x128xbf16>
    %133 = vector.shape_cast %132 : vector<1x128x128xbf16> to vector<128x128xbf16>
    %cst_73 = arith.constant dense<0.000000e+00> : vector<16x128xf32>
    %134 = tpu.matmul %131, %133, %cst_73 {dimension_numbers = #tpu.dot_dimension_numbers<[1], [0], [0], [1], [0, 0, 1, 1], [], []>} : vector<16x128xbf16>, vector<128x128xbf16>, vector<16x128xf32> -> vector<16x128xf32>
    %135 = arith.addf %129, %134 : vector<16x128xf32>
    %136 = vector.extract_strided_slice %118 {offsets = [0, 48, 0], sizes = [1, 16, 128], strides = [1, 1, 1]} : vector<1x256x128xbf16> to vector<1x16x128xbf16>
    %137 = vector.shape_cast %136 : vector<1x16x128xbf16> to vector<16x128xbf16>
    %c19 = arith.constant 19 : index
    %c0_74 = arith.constant 0 : index
    %c0_75 = arith.constant 0 : index
    %138 = vector.load %arg3[%c19, %c0_74, %c0_75] : memref<84x128x128xbf16, #tpu.memory_space<vmem>>, vector<1x128x128xbf16>
    %139 = vector.shape_cast %138 : vector<1x128x128xbf16> to vector<128x128xbf16>
    %cst_76 = arith.constant dense<0.000000e+00> : vector<16x128xf32>
    %140 = tpu.matmul %137, %139, %cst_76 {dimension_numbers = #tpu.dot_dimension_numbers<[1], [0], [0], [1], [0, 0, 1, 1], [], []>} : vector<16x128xbf16>, vector<128x128xbf16>, vector<16x128xf32> -> vector<16x128xf32>
    %141 = arith.addf %135, %140 : vector<16x128xf32>
    %142 = vector.extract_strided_slice %118 {offsets = [0, 64, 0], sizes = [1, 16, 128], strides = [1, 1, 1]} : vector<1x256x128xbf16> to vector<1x16x128xbf16>
    %143 = vector.shape_cast %142 : vector<1x16x128xbf16> to vector<16x128xbf16>
    %c20 = arith.constant 20 : index
    %c0_77 = arith.constant 0 : index
    %c0_78 = arith.constant 0 : index
    %144 = vector.load %arg3[%c20, %c0_77, %c0_78] : memref<84x128x128xbf16, #tpu.memory_space<vmem>>, vector<1x128x128xbf16>
    %145 = vector.shape_cast %144 : vector<1x128x128xbf16> to vector<128x128xbf16>
    %cst_79 = arith.constant dense<0.000000e+00> : vector<16x128xf32>
    %146 = tpu.matmul %143, %145, %cst_79 {dimension_numbers = #tpu.dot_dimension_numbers<[1], [0], [0], [1], [0, 0, 1, 1], [], []>} : vector<16x128xbf16>, vector<128x128xbf16>, vector<16x128xf32> -> vector<16x128xf32>
    %147 = arith.addf %141, %146 : vector<16x128xf32>
    %148 = vector.extract_strided_slice %118 {offsets = [0, 80, 0], sizes = [1, 16, 128], strides = [1, 1, 1]} : vector<1x256x128xbf16> to vector<1x16x128xbf16>
    %149 = vector.shape_cast %148 : vector<1x16x128xbf16> to vector<16x128xbf16>
    %c21 = arith.constant 21 : index
    %c0_80 = arith.constant 0 : index
    %c0_81 = arith.constant 0 : index
    %150 = vector.load %arg3[%c21, %c0_80, %c0_81] : memref<84x128x128xbf16, #tpu.memory_space<vmem>>, vector<1x128x128xbf16>
    %151 = vector.shape_cast %150 : vector<1x128x128xbf16> to vector<128x128xbf16>
    %cst_82 = arith.constant dense<0.000000e+00> : vector<16x128xf32>
    %152 = tpu.matmul %149, %151, %cst_82 {dimension_numbers = #tpu.dot_dimension_numbers<[1], [0], [0], [1], [0, 0, 1, 1], [], []>} : vector<16x128xbf16>, vector<128x128xbf16>, vector<16x128xf32> -> vector<16x128xf32>
    %153 = arith.addf %147, %152 : vector<16x128xf32>
    %154 = vector.extract_strided_slice %118 {offsets = [0, 96, 0], sizes = [1, 16, 128], strides = [1, 1, 1]} : vector<1x256x128xbf16> to vector<1x16x128xbf16>
    %155 = vector.shape_cast %154 : vector<1x16x128xbf16> to vector<16x128xbf16>
    %c22 = arith.constant 22 : index
    %c0_83 = arith.constant 0 : index
    %c0_84 = arith.constant 0 : index
    %156 = vector.load %arg3[%c22, %c0_83, %c0_84] : memref<84x128x128xbf16, #tpu.memory_space<vmem>>, vector<1x128x128xbf16>
    %157 = vector.shape_cast %156 : vector<1x128x128xbf16> to vector<128x128xbf16>
    %cst_85 = arith.constant dense<0.000000e+00> : vector<16x128xf32>
    %158 = tpu.matmul %155, %157, %cst_85 {dimension_numbers = #tpu.dot_dimension_numbers<[1], [0], [0], [1], [0, 0, 1, 1], [], []>} : vector<16x128xbf16>, vector<128x128xbf16>, vector<16x128xf32> -> vector<16x128xf32>
    %159 = arith.addf %153, %158 : vector<16x128xf32>
    %160 = vector.extract_strided_slice %118 {offsets = [0, 112, 0], sizes = [1, 16, 128], strides = [1, 1, 1]} : vector<1x256x128xbf16> to vector<1x16x128xbf16>
    %161 = vector.shape_cast %160 : vector<1x16x128xbf16> to vector<16x128xbf16>
    %c23 = arith.constant 23 : index
    %c0_86 = arith.constant 0 : index
    %c0_87 = arith.constant 0 : index
    %162 = vector.load %arg3[%c23, %c0_86, %c0_87] : memref<84x128x128xbf16, #tpu.memory_space<vmem>>, vector<1x128x128xbf16>
    %163 = vector.shape_cast %162 : vector<1x128x128xbf16> to vector<128x128xbf16>
    %cst_88 = arith.constant dense<0.000000e+00> : vector<16x128xf32>
    %164 = tpu.matmul %161, %163, %cst_88 {dimension_numbers = #tpu.dot_dimension_numbers<[1], [0], [0], [1], [0, 0, 1, 1], [], []>} : vector<16x128xbf16>, vector<128x128xbf16>, vector<16x128xf32> -> vector<16x128xf32>
    %165 = arith.addf %159, %164 : vector<16x128xf32>
    %166 = vector.extract_strided_slice %118 {offsets = [0, 128, 0], sizes = [1, 16, 128], strides = [1, 1, 1]} : vector<1x256x128xbf16> to vector<1x16x128xbf16>
    %167 = vector.shape_cast %166 : vector<1x16x128xbf16> to vector<16x128xbf16>
    %c24 = arith.constant 24 : index
    %c0_89 = arith.constant 0 : index
    %c0_90 = arith.constant 0 : index
    %168 = vector.load %arg3[%c24, %c0_89, %c0_90] : memref<84x128x128xbf16, #tpu.memory_space<vmem>>, vector<1x128x128xbf16>
    %169 = vector.shape_cast %168 : vector<1x128x128xbf16> to vector<128x128xbf16>
    %cst_91 = arith.constant dense<0.000000e+00> : vector<16x128xf32>
    %170 = tpu.matmul %167, %169, %cst_91 {dimension_numbers = #tpu.dot_dimension_numbers<[1], [0], [0], [1], [0, 0, 1, 1], [], []>} : vector<16x128xbf16>, vector<128x128xbf16>, vector<16x128xf32> -> vector<16x128xf32>
    %171 = arith.addf %165, %170 : vector<16x128xf32>
    %172 = vector.extract_strided_slice %118 {offsets = [0, 144, 0], sizes = [1, 16, 128], strides = [1, 1, 1]} : vector<1x256x128xbf16> to vector<1x16x128xbf16>
    %173 = vector.shape_cast %172 : vector<1x16x128xbf16> to vector<16x128xbf16>
    %c25 = arith.constant 25 : index
    %c0_92 = arith.constant 0 : index
    %c0_93 = arith.constant 0 : index
    %174 = vector.load %arg3[%c25, %c0_92, %c0_93] : memref<84x128x128xbf16, #tpu.memory_space<vmem>>, vector<1x128x128xbf16>
    %175 = vector.shape_cast %174 : vector<1x128x128xbf16> to vector<128x128xbf16>
    %cst_94 = arith.constant dense<0.000000e+00> : vector<16x128xf32>
    %176 = tpu.matmul %173, %175, %cst_94 {dimension_numbers = #tpu.dot_dimension_numbers<[1], [0], [0], [1], [0, 0, 1, 1], [], []>} : vector<16x128xbf16>, vector<128x128xbf16>, vector<16x128xf32> -> vector<16x128xf32>
    %177 = arith.addf %171, %176 : vector<16x128xf32>
    %178 = vector.extract_strided_slice %118 {offsets = [0, 160, 0], sizes = [1, 16, 128], strides = [1, 1, 1]} : vector<1x256x128xbf16> to vector<1x16x128xbf16>
    %179 = vector.shape_cast %178 : vector<1x16x128xbf16> to vector<16x128xbf16>
    %c26 = arith.constant 26 : index
    %c0_95 = arith.constant 0 : index
    %c0_96 = arith.constant 0 : index
    %180 = vector.load %arg3[%c26, %c0_95, %c0_96] : memref<84x128x128xbf16, #tpu.memory_space<vmem>>, vector<1x128x128xbf16>
    %181 = vector.shape_cast %180 : vector<1x128x128xbf16> to vector<128x128xbf16>
    %cst_97 = arith.constant dense<0.000000e+00> : vector<16x128xf32>
    %182 = tpu.matmul %179, %181, %cst_97 {dimension_numbers = #tpu.dot_dimension_numbers<[1], [0], [0], [1], [0, 0, 1, 1], [], []>} : vector<16x128xbf16>, vector<128x128xbf16>, vector<16x128xf32> -> vector<16x128xf32>
    %183 = arith.addf %177, %182 : vector<16x128xf32>
    %184 = vector.extract_strided_slice %118 {offsets = [0, 176, 0], sizes = [1, 16, 128], strides = [1, 1, 1]} : vector<1x256x128xbf16> to vector<1x16x128xbf16>
    %185 = vector.shape_cast %184 : vector<1x16x128xbf16> to vector<16x128xbf16>
    %c27 = arith.constant 27 : index
    %c0_98 = arith.constant 0 : index
    %c0_99 = arith.constant 0 : index
    %186 = vector.load %arg3[%c27, %c0_98, %c0_99] : memref<84x128x128xbf16, #tpu.memory_space<vmem>>, vector<1x128x128xbf16>
    %187 = vector.shape_cast %186 : vector<1x128x128xbf16> to vector<128x128xbf16>
    %cst_100 = arith.constant dense<0.000000e+00> : vector<16x128xf32>
    %188 = tpu.matmul %185, %187, %cst_100 {dimension_numbers = #tpu.dot_dimension_numbers<[1], [0], [0], [1], [0, 0, 1, 1], [], []>} : vector<16x128xbf16>, vector<128x128xbf16>, vector<16x128xf32> -> vector<16x128xf32>
    %189 = arith.addf %183, %188 : vector<16x128xf32>
    %190 = vector.extract_strided_slice %118 {offsets = [0, 192, 0], sizes = [1, 16, 128], strides = [1, 1, 1]} : vector<1x256x128xbf16> to vector<1x16x128xbf16>
    %191 = vector.shape_cast %190 : vector<1x16x128xbf16> to vector<16x128xbf16>
    %c28 = arith.constant 28 : index
    %c0_101 = arith.constant 0 : index
    %c0_102 = arith.constant 0 : index
    %192 = vector.load %arg3[%c28, %c0_101, %c0_102] : memref<84x128x128xbf16, #tpu.memory_space<vmem>>, vector<1x128x128xbf16>
    %193 = vector.shape_cast %192 : vector<1x128x128xbf16> to vector<128x128xbf16>
    %cst_103 = arith.constant dense<0.000000e+00> : vector<16x128xf32>
    %194 = tpu.matmul %191, %193, %cst_103 {dimension_numbers = #tpu.dot_dimension_numbers<[1], [0], [0], [1], [0, 0, 1, 1], [], []>} : vector<16x128xbf16>, vector<128x128xbf16>, vector<16x128xf32> -> vector<16x128xf32>
    %195 = arith.addf %189, %194 : vector<16x128xf32>
    %196 = vector.extract_strided_slice %118 {offsets = [0, 208, 0], sizes = [1, 16, 128], strides = [1, 1, 1]} : vector<1x256x128xbf16> to vector<1x16x128xbf16>
    %197 = vector.shape_cast %196 : vector<1x16x128xbf16> to vector<16x128xbf16>
    %c29 = arith.constant 29 : index
    %c0_104 = arith.constant 0 : index
    %c0_105 = arith.constant 0 : index
    %198 = vector.load %arg3[%c29, %c0_104, %c0_105] : memref<84x128x128xbf16, #tpu.memory_space<vmem>>, vector<1x128x128xbf16>
    %199 = vector.shape_cast %198 : vector<1x128x128xbf16> to vector<128x128xbf16>
    %cst_106 = arith.constant dense<0.000000e+00> : vector<16x128xf32>
    %200 = tpu.matmul %197, %199, %cst_106 {dimension_numbers = #tpu.dot_dimension_numbers<[1], [0], [0], [1], [0, 0, 1, 1], [], []>} : vector<16x128xbf16>, vector<128x128xbf16>, vector<16x128xf32> -> vector<16x128xf32>
    %201 = arith.addf %195, %200 : vector<16x128xf32>
    %202 = vector.extract_strided_slice %118 {offsets = [0, 224, 0], sizes = [1, 16, 128], strides = [1, 1, 1]} : vector<1x256x128xbf16> to vector<1x16x128xbf16>
    %203 = vector.shape_cast %202 : vector<1x16x128xbf16> to vector<16x128xbf16>
    %c30 = arith.constant 30 : index
    %c0_107 = arith.constant 0 : index
    %c0_108 = arith.constant 0 : index
    %204 = vector.load %arg3[%c30, %c0_107, %c0_108] : memref<84x128x128xbf16, #tpu.memory_space<vmem>>, vector<1x128x128xbf16>
    %205 = vector.shape_cast %204 : vector<1x128x128xbf16> to vector<128x128xbf16>
    %cst_109 = arith.constant dense<0.000000e+00> : vector<16x128xf32>
    %206 = tpu.matmul %203, %205, %cst_109 {dimension_numbers = #tpu.dot_dimension_numbers<[1], [0], [0], [1], [0, 0, 1, 1], [], []>} : vector<16x128xbf16>, vector<128x128xbf16>, vector<16x128xf32> -> vector<16x128xf32>
    %207 = arith.addf %201, %206 : vector<16x128xf32>
    %208 = vector.extract_strided_slice %118 {offsets = [0, 240, 0], sizes = [1, 16, 128], strides = [1, 1, 1]} : vector<1x256x128xbf16> to vector<1x16x128xbf16>
    %209 = vector.shape_cast %208 : vector<1x16x128xbf16> to vector<16x128xbf16>
    %c31 = arith.constant 31 : index
    %c0_110 = arith.constant 0 : index
    %c0_111 = arith.constant 0 : index
    %210 = vector.load %arg3[%c31, %c0_110, %c0_111] : memref<84x128x128xbf16, #tpu.memory_space<vmem>>, vector<1x128x128xbf16>
    %211 = vector.shape_cast %210 : vector<1x128x128xbf16> to vector<128x128xbf16>
    %cst_112 = arith.constant dense<0.000000e+00> : vector<16x128xf32>
    %212 = tpu.matmul %209, %211, %cst_112 {dimension_numbers = #tpu.dot_dimension_numbers<[1], [0], [0], [1], [0, 0, 1, 1], [], []>} : vector<16x128xbf16>, vector<128x128xbf16>, vector<16x128xf32> -> vector<16x128xf32>
    %213 = arith.addf %207, %212 : vector<16x128xf32>
    %214 = vector.broadcast %112 : vector<1x128xf32> to vector<16x128xf32>
    %215 = arith.addf %213, %214 : vector<16x128xf32>
    %cst_113 = arith.constant 0.000000e+00 : f32
    %216 = vector.broadcast %cst_113 : f32 to vector<16x128xf32>
    %217 = arith.maximumf %215, %216 : vector<16x128xf32>
    %c2_114 = arith.constant 2 : index
    %c0_115 = arith.constant 0 : index
    %c0_116 = arith.constant 0 : index
    %218 = vector.load %arg4[%c2_114, %c0_115, %c0_116] : memref<8x1x128xf32, #tpu.memory_space<vmem>>, vector<1x1x128xf32>
    %219 = vector.shape_cast %218 : vector<1x1x128xf32> to vector<1x128xf32>
    %220 = arith.truncf %217 : vector<16x128xf32> to vector<16x128xbf16>
    %221 = vector.shape_cast %220 : vector<16x128xbf16> to vector<1x16x128xbf16>
    %c0_117 = arith.constant 0 : index
    %c0_118 = arith.constant 0 : index
    %222 = vector.load %arg7[%c0_117, %c0_118] : memref<144x16xbf16, #tpu.memory_space<vmem>>, vector<144x16xbf16>
    %223 = vector.shape_cast %222 : vector<144x16xbf16> to vector<1x144x16xbf16>
    "tpu.trace_start"() <{level = 10 : i32, message = "bor,bri->boi"}> : () -> ()
    %cst_119 = arith.constant dense<0.000000e+00> : vector<1x144x128xf32>
    %224 = tpu.matmul %223, %221, %cst_119 {dimension_numbers = #tpu.dot_dimension_numbers<[2], [1], [1], [2], [0, 0, 0, 1, 1, 2], [0], [0]>} : vector<1x144x16xbf16>, vector<1x16x128xbf16>, vector<1x144x128xf32> -> vector<1x144x128xf32>
    "tpu.trace_stop"() : () -> ()
    %225 = arith.truncf %224 : vector<1x144x128xf32> to vector<1x144x128xbf16>
    %226 = vector.extract_strided_slice %225 {offsets = [0, 0, 0], sizes = [1, 16, 128], strides = [1, 1, 1]} : vector<1x144x128xbf16> to vector<1x16x128xbf16>
    %227 = vector.shape_cast %226 : vector<1x16x128xbf16> to vector<16x128xbf16>
    %c32 = arith.constant 32 : index
    %c0_120 = arith.constant 0 : index
    %c0_121 = arith.constant 0 : index
    %228 = vector.load %arg3[%c32, %c0_120, %c0_121] : memref<84x128x128xbf16, #tpu.memory_space<vmem>>, vector<1x128x128xbf16>
    %229 = vector.shape_cast %228 : vector<1x128x128xbf16> to vector<128x128xbf16>
    %cst_122 = arith.constant dense<0.000000e+00> : vector<16x128xf32>
    %230 = tpu.matmul %227, %229, %cst_122 {dimension_numbers = #tpu.dot_dimension_numbers<[1], [0], [0], [1], [0, 0, 1, 1], [], []>} : vector<16x128xbf16>, vector<128x128xbf16>, vector<16x128xf32> -> vector<16x128xf32>
    %231 = vector.extract_strided_slice %225 {offsets = [0, 16, 0], sizes = [1, 16, 128], strides = [1, 1, 1]} : vector<1x144x128xbf16> to vector<1x16x128xbf16>
    %232 = vector.shape_cast %231 : vector<1x16x128xbf16> to vector<16x128xbf16>
    %c33 = arith.constant 33 : index
    %c0_123 = arith.constant 0 : index
    %c0_124 = arith.constant 0 : index
    %233 = vector.load %arg3[%c33, %c0_123, %c0_124] : memref<84x128x128xbf16, #tpu.memory_space<vmem>>, vector<1x128x128xbf16>
    %234 = vector.shape_cast %233 : vector<1x128x128xbf16> to vector<128x128xbf16>
    %cst_125 = arith.constant dense<0.000000e+00> : vector<16x128xf32>
    %235 = tpu.matmul %232, %234, %cst_125 {dimension_numbers = #tpu.dot_dimension_numbers<[1], [0], [0], [1], [0, 0, 1, 1], [], []>} : vector<16x128xbf16>, vector<128x128xbf16>, vector<16x128xf32> -> vector<16x128xf32>
    %236 = arith.addf %230, %235 : vector<16x128xf32>
    %237 = vector.extract_strided_slice %225 {offsets = [0, 32, 0], sizes = [1, 16, 128], strides = [1, 1, 1]} : vector<1x144x128xbf16> to vector<1x16x128xbf16>
    %238 = vector.shape_cast %237 : vector<1x16x128xbf16> to vector<16x128xbf16>
    %c34 = arith.constant 34 : index
    %c0_126 = arith.constant 0 : index
    %c0_127 = arith.constant 0 : index
    %239 = vector.load %arg3[%c34, %c0_126, %c0_127] : memref<84x128x128xbf16, #tpu.memory_space<vmem>>, vector<1x128x128xbf16>
    %240 = vector.shape_cast %239 : vector<1x128x128xbf16> to vector<128x128xbf16>
    %cst_128 = arith.constant dense<0.000000e+00> : vector<16x128xf32>
    %241 = tpu.matmul %238, %240, %cst_128 {dimension_numbers = #tpu.dot_dimension_numbers<[1], [0], [0], [1], [0, 0, 1, 1], [], []>} : vector<16x128xbf16>, vector<128x128xbf16>, vector<16x128xf32> -> vector<16x128xf32>
    %242 = arith.addf %236, %241 : vector<16x128xf32>
    %243 = vector.extract_strided_slice %225 {offsets = [0, 48, 0], sizes = [1, 16, 128], strides = [1, 1, 1]} : vector<1x144x128xbf16> to vector<1x16x128xbf16>
    %244 = vector.shape_cast %243 : vector<1x16x128xbf16> to vector<16x128xbf16>
    %c35 = arith.constant 35 : index
    %c0_129 = arith.constant 0 : index
    %c0_130 = arith.constant 0 : index
    %245 = vector.load %arg3[%c35, %c0_129, %c0_130] : memref<84x128x128xbf16, #tpu.memory_space<vmem>>, vector<1x128x128xbf16>
    %246 = vector.shape_cast %245 : vector<1x128x128xbf16> to vector<128x128xbf16>
    %cst_131 = arith.constant dense<0.000000e+00> : vector<16x128xf32>
    %247 = tpu.matmul %244, %246, %cst_131 {dimension_numbers = #tpu.dot_dimension_numbers<[1], [0], [0], [1], [0, 0, 1, 1], [], []>} : vector<16x128xbf16>, vector<128x128xbf16>, vector<16x128xf32> -> vector<16x128xf32>
    %248 = arith.addf %242, %247 : vector<16x128xf32>
    %249 = vector.extract_strided_slice %225 {offsets = [0, 64, 0], sizes = [1, 16, 128], strides = [1, 1, 1]} : vector<1x144x128xbf16> to vector<1x16x128xbf16>
    %250 = vector.shape_cast %249 : vector<1x16x128xbf16> to vector<16x128xbf16>
    %c36 = arith.constant 36 : index
    %c0_132 = arith.constant 0 : index
    %c0_133 = arith.constant 0 : index
    %251 = vector.load %arg3[%c36, %c0_132, %c0_133] : memref<84x128x128xbf16, #tpu.memory_space<vmem>>, vector<1x128x128xbf16>
    %252 = vector.shape_cast %251 : vector<1x128x128xbf16> to vector<128x128xbf16>
    %cst_134 = arith.constant dense<0.000000e+00> : vector<16x128xf32>
    %253 = tpu.matmul %250, %252, %cst_134 {dimension_numbers = #tpu.dot_dimension_numbers<[1], [0], [0], [1], [0, 0, 1, 1], [], []>} : vector<16x128xbf16>, vector<128x128xbf16>, vector<16x128xf32> -> vector<16x128xf32>
    %254 = arith.addf %248, %253 : vector<16x128xf32>
    %255 = vector.extract_strided_slice %225 {offsets = [0, 80, 0], sizes = [1, 16, 128], strides = [1, 1, 1]} : vector<1x144x128xbf16> to vector<1x16x128xbf16>
    %256 = vector.shape_cast %255 : vector<1x16x128xbf16> to vector<16x128xbf16>
    %c37 = arith.constant 37 : index
    %c0_135 = arith.constant 0 : index
    %c0_136 = arith.constant 0 : index
    %257 = vector.load %arg3[%c37, %c0_135, %c0_136] : memref<84x128x128xbf16, #tpu.memory_space<vmem>>, vector<1x128x128xbf16>
    %258 = vector.shape_cast %257 : vector<1x128x128xbf16> to vector<128x128xbf16>
    %cst_137 = arith.constant dense<0.000000e+00> : vector<16x128xf32>
    %259 = tpu.matmul %256, %258, %cst_137 {dimension_numbers = #tpu.dot_dimension_numbers<[1], [0], [0], [1], [0, 0, 1, 1], [], []>} : vector<16x128xbf16>, vector<128x128xbf16>, vector<16x128xf32> -> vector<16x128xf32>
    %260 = arith.addf %254, %259 : vector<16x128xf32>
    %261 = vector.extract_strided_slice %225 {offsets = [0, 96, 0], sizes = [1, 16, 128], strides = [1, 1, 1]} : vector<1x144x128xbf16> to vector<1x16x128xbf16>
    %262 = vector.shape_cast %261 : vector<1x16x128xbf16> to vector<16x128xbf16>
    %c38 = arith.constant 38 : index
    %c0_138 = arith.constant 0 : index
    %c0_139 = arith.constant 0 : index
    %263 = vector.load %arg3[%c38, %c0_138, %c0_139] : memref<84x128x128xbf16, #tpu.memory_space<vmem>>, vector<1x128x128xbf16>
    %264 = vector.shape_cast %263 : vector<1x128x128xbf16> to vector<128x128xbf16>
    %cst_140 = arith.constant dense<0.000000e+00> : vector<16x128xf32>
    %265 = tpu.matmul %262, %264, %cst_140 {dimension_numbers = #tpu.dot_dimension_numbers<[1], [0], [0], [1], [0, 0, 1, 1], [], []>} : vector<16x128xbf16>, vector<128x128xbf16>, vector<16x128xf32> -> vector<16x128xf32>
    %266 = arith.addf %260, %265 : vector<16x128xf32>
    %267 = vector.extract_strided_slice %225 {offsets = [0, 112, 0], sizes = [1, 16, 128], strides = [1, 1, 1]} : vector<1x144x128xbf16> to vector<1x16x128xbf16>
    %268 = vector.shape_cast %267 : vector<1x16x128xbf16> to vector<16x128xbf16>
    %c39 = arith.constant 39 : index
    %c0_141 = arith.constant 0 : index
    %c0_142 = arith.constant 0 : index
    %269 = vector.load %arg3[%c39, %c0_141, %c0_142] : memref<84x128x128xbf16, #tpu.memory_space<vmem>>, vector<1x128x128xbf16>
    %270 = vector.shape_cast %269 : vector<1x128x128xbf16> to vector<128x128xbf16>
    %cst_143 = arith.constant dense<0.000000e+00> : vector<16x128xf32>
    %271 = tpu.matmul %268, %270, %cst_143 {dimension_numbers = #tpu.dot_dimension_numbers<[1], [0], [0], [1], [0, 0, 1, 1], [], []>} : vector<16x128xbf16>, vector<128x128xbf16>, vector<16x128xf32> -> vector<16x128xf32>
    %272 = arith.addf %266, %271 : vector<16x128xf32>
    %273 = vector.extract_strided_slice %225 {offsets = [0, 128, 0], sizes = [1, 16, 128], strides = [1, 1, 1]} : vector<1x144x128xbf16> to vector<1x16x128xbf16>
    %274 = vector.shape_cast %273 : vector<1x16x128xbf16> to vector<16x128xbf16>
    %c40 = arith.constant 40 : index
    %c0_144 = arith.constant 0 : index
    %c0_145 = arith.constant 0 : index
    %275 = vector.load %arg3[%c40, %c0_144, %c0_145] : memref<84x128x128xbf16, #tpu.memory_space<vmem>>, vector<1x128x128xbf16>
    %276 = vector.shape_cast %275 : vector<1x128x128xbf16> to vector<128x128xbf16>
    %cst_146 = arith.constant dense<0.000000e+00> : vector<16x128xf32>
    %277 = tpu.matmul %274, %276, %cst_146 {dimension_numbers = #tpu.dot_dimension_numbers<[1], [0], [0], [1], [0, 0, 1, 1], [], []>} : vector<16x128xbf16>, vector<128x128xbf16>, vector<16x128xf32> -> vector<16x128xf32>
    %278 = arith.addf %272, %277 : vector<16x128xf32>
    %279 = vector.broadcast %219 : vector<1x128xf32> to vector<16x128xf32>
    %280 = arith.addf %278, %279 : vector<16x128xf32>
    %c3_147 = arith.constant 3 : index
    %c0_148 = arith.constant 0 : index
    %c0_149 = arith.constant 0 : index
    %281 = vector.load %arg4[%c3_147, %c0_148, %c0_149] : memref<8x1x128xf32, #tpu.memory_space<vmem>>, vector<1x1x128xf32>
    %282 = vector.shape_cast %281 : vector<1x1x128xf32> to vector<1x128xf32>
    %283 = arith.truncf %280 : vector<16x128xf32> to vector<16x128xbf16>
    %c41 = arith.constant 41 : index
    %c0_150 = arith.constant 0 : index
    %c0_151 = arith.constant 0 : index
    %284 = vector.load %arg3[%c41, %c0_150, %c0_151] : memref<84x128x128xbf16, #tpu.memory_space<vmem>>, vector<1x128x128xbf16>
    %285 = vector.shape_cast %284 : vector<1x128x128xbf16> to vector<128x128xbf16>
    %cst_152 = arith.constant dense<0.000000e+00> : vector<16x128xf32>
    %286 = tpu.matmul %283, %285, %cst_152 {dimension_numbers = #tpu.dot_dimension_numbers<[1], [0], [0], [1], [0, 0, 1, 1], [], []>} : vector<16x128xbf16>, vector<128x128xbf16>, vector<16x128xf32> -> vector<16x128xf32>
    %287 = vector.broadcast %282 : vector<1x128xf32> to vector<16x128xf32>
    %288 = arith.addf %286, %287 : vector<16x128xf32>
    %289 = arith.truncf %288 : vector<16x128xf32> to vector<16x128xbf16>
    %c0_153 = arith.constant 0 : index
    %c0_154 = arith.constant 0 : index
    %290 = vector.load %arg12[%c0_153, %c0_154] : memref<128x128xbf16, #tpu.memory_space<vmem>>, vector<128x128xbf16>
    %cst_155 = arith.constant dense<0.000000e+00> : vector<16x128xf32>
    %291 = tpu.matmul %289, %290, %cst_155 {dimension_numbers = #tpu.dot_dimension_numbers<[1], [0], [0], [1], [0, 0, 1, 1], [], []>} : vector<16x128xbf16>, vector<128x128xbf16>, vector<16x128xf32> -> vector<16x128xf32>
    %cst_156 = arith.constant -2.000000e+00 : f32
    %292 = vector.broadcast %cst_156 : f32 to vector<16x128xf32>
    %293 = arith.mulf %292, %291 : vector<16x128xf32>
    %c0_157 = arith.constant 0 : index
    %c0_158 = arith.constant 0 : index
    %294 = vector.load %arg13[%c0_157, %c0_158] : memref<1x128xf32, #tpu.memory_space<vmem>>, vector<1x128xf32>
    %295 = vector.broadcast %294 : vector<1x128xf32> to vector<16x128xf32>
    %296 = arith.addf %293, %295 : vector<16x128xf32>
    %cst_159 = arith.constant dense<0x7F800000> : vector<16xf32>
    %297 = vector.multi_reduction <minimumf>, %296, %cst_159 [1] : vector<16x128xf32> to vector<16xf32>
    %298 = vector.shape_cast %297 : vector<16xf32> to vector<16x1xf32>
    %299 = tpu.iota {dimensions = array<i32: 1>} : vector<16x128xi32>
    %300 = vector.broadcast %298 : vector<16x1xf32> to vector<16x128xf32>
    %301 = arith.cmpf ole, %296, %300 : vector<16x128xf32>
    %c128_i32 = arith.constant 128 : i32
    %302 = vector.broadcast %c128_i32 : i32 to vector<16x128xi32>
    %303 = arith.select %301, %299, %302 : vector<16x128xi1>, vector<16x128xi32>
    %cst_160 = arith.constant dense<2147483647> : vector<16xi32>
    %304 = vector.multi_reduction <minsi>, %303, %cst_160 [1] : vector<16x128xi32> to vector<16xi32>
    %305 = vector.shape_cast %304 : vector<16xi32> to vector<16x1xi32>
    %306 = vector.broadcast %305 : vector<16x1xi32> to vector<16x128xi32>
    %307 = arith.cmpi eq, %299, %306 : vector<16x128xi32>
    %308 = arith.extui %307 : vector<16x128xi1> to vector<16x128xi32>
    %309 = arith.sitofp %308 : vector<16x128xi32> to vector<16x128xf32>
    %c0_161 = arith.constant 0 : index
    %c0_162 = arith.constant 0 : index
    %310 = vector.load %arg14[%c0_161, %c0_162] : memref<128x128xf32, #tpu.memory_space<vmem>>, vector<128x128xf32>
    %cst_163 = arith.constant dense<0.000000e+00> : vector<16x128xf32>
    %311 = tpu.matmul %309, %310, %cst_163 {dimension_numbers = #tpu.dot_dimension_numbers<[1], [0], [0], [1], [0, 0, 1, 1], [], []>} : vector<16x128xf32>, vector<128x128xf32>, vector<16x128xf32> -> vector<16x128xf32>
    %c4_164 = arith.constant 4 : index
    %c0_165 = arith.constant 0 : index
    %c0_166 = arith.constant 0 : index
    %312 = vector.load %arg4[%c4_164, %c0_165, %c0_166] : memref<8x1x128xf32, #tpu.memory_space<vmem>>, vector<1x1x128xf32>
    %313 = vector.shape_cast %312 : vector<1x1x128xf32> to vector<1x128xf32>
    %314 = arith.truncf %311 : vector<16x128xf32> to vector<16x128xbf16>
    %c42 = arith.constant 42 : index
    %c0_167 = arith.constant 0 : index
    %c0_168 = arith.constant 0 : index
    %315 = vector.load %arg3[%c42, %c0_167, %c0_168] : memref<84x128x128xbf16, #tpu.memory_space<vmem>>, vector<1x128x128xbf16>
    %316 = vector.shape_cast %315 : vector<1x128x128xbf16> to vector<128x128xbf16>
    %cst_169 = arith.constant dense<0.000000e+00> : vector<16x128xf32>
    %317 = tpu.matmul %314, %316, %cst_169 {dimension_numbers = #tpu.dot_dimension_numbers<[1], [0], [0], [1], [0, 0, 1, 1], [], []>} : vector<16x128xbf16>, vector<128x128xbf16>, vector<16x128xf32> -> vector<16x128xf32>
    %318 = vector.broadcast %313 : vector<1x128xf32> to vector<16x128xf32>
    %319 = arith.addf %317, %318 : vector<16x128xf32>
    %c5_170 = arith.constant 5 : index
    %c0_171 = arith.constant 0 : index
    %c0_172 = arith.constant 0 : index
    %320 = vector.load %arg4[%c5_170, %c0_171, %c0_172] : memref<8x1x128xf32, #tpu.memory_space<vmem>>, vector<1x1x128xf32>
    %321 = vector.shape_cast %320 : vector<1x1x128xf32> to vector<1x128xf32>
    %322 = arith.truncf %319 : vector<16x128xf32> to vector<16x128xbf16>
    %323 = vector.shape_cast %322 : vector<16x128xbf16> to vector<1x16x128xbf16>
    %c0_173 = arith.constant 0 : index
    %c0_174 = arith.constant 0 : index
    %324 = vector.load %arg8[%c0_173, %c0_174] : memref<144x16xbf16, #tpu.memory_space<vmem>>, vector<144x16xbf16>
    %325 = vector.shape_cast %324 : vector<144x16xbf16> to vector<1x144x16xbf16>
    "tpu.trace_start"() <{level = 10 : i32, message = "bor,bri->boi"}> : () -> ()
    %cst_175 = arith.constant dense<0.000000e+00> : vector<1x144x128xf32>
    %326 = tpu.matmul %325, %323, %cst_175 {dimension_numbers = #tpu.dot_dimension_numbers<[2], [1], [1], [2], [0, 0, 0, 1, 1, 2], [0], [0]>} : vector<1x144x16xbf16>, vector<1x16x128xbf16>, vector<1x144x128xf32> -> vector<1x144x128xf32>
    "tpu.trace_stop"() : () -> ()
    %327 = arith.truncf %326 : vector<1x144x128xf32> to vector<1x144x128xbf16>
    %328 = vector.extract_strided_slice %327 {offsets = [0, 0, 0], sizes = [1, 16, 128], strides = [1, 1, 1]} : vector<1x144x128xbf16> to vector<1x16x128xbf16>
    %329 = vector.shape_cast %328 : vector<1x16x128xbf16> to vector<16x128xbf16>
    %c43 = arith.constant 43 : index
    %c0_176 = arith.constant 0 : index
    %c0_177 = arith.constant 0 : index
    %330 = vector.load %arg3[%c43, %c0_176, %c0_177] : memref<84x128x128xbf16, #tpu.memory_space<vmem>>, vector<1x128x128xbf16>
    %331 = vector.shape_cast %330 : vector<1x128x128xbf16> to vector<128x128xbf16>
    %cst_178 = arith.constant dense<0.000000e+00> : vector<16x128xf32>
    %332 = tpu.matmul %329, %331, %cst_178 {dimension_numbers = #tpu.dot_dimension_numbers<[1], [0], [0], [1], [0, 0, 1, 1], [], []>} : vector<16x128xbf16>, vector<128x128xbf16>, vector<16x128xf32> -> vector<16x128xf32>
    %333 = vector.extract_strided_slice %327 {offsets = [0, 16, 0], sizes = [1, 16, 128], strides = [1, 1, 1]} : vector<1x144x128xbf16> to vector<1x16x128xbf16>
    %334 = vector.shape_cast %333 : vector<1x16x128xbf16> to vector<16x128xbf16>
    %c44 = arith.constant 44 : index
    %c0_179 = arith.constant 0 : index
    %c0_180 = arith.constant 0 : index
    %335 = vector.load %arg3[%c44, %c0_179, %c0_180] : memref<84x128x128xbf16, #tpu.memory_space<vmem>>, vector<1x128x128xbf16>
    %336 = vector.shape_cast %335 : vector<1x128x128xbf16> to vector<128x128xbf16>
    %cst_181 = arith.constant dense<0.000000e+00> : vector<16x128xf32>
    %337 = tpu.matmul %334, %336, %cst_181 {dimension_numbers = #tpu.dot_dimension_numbers<[1], [0], [0], [1], [0, 0, 1, 1], [], []>} : vector<16x128xbf16>, vector<128x128xbf16>, vector<16x128xf32> -> vector<16x128xf32>
    %338 = arith.addf %332, %337 : vector<16x128xf32>
    %339 = vector.extract_strided_slice %327 {offsets = [0, 32, 0], sizes = [1, 16, 128], strides = [1, 1, 1]} : vector<1x144x128xbf16> to vector<1x16x128xbf16>
    %340 = vector.shape_cast %339 : vector<1x16x128xbf16> to vector<16x128xbf16>
    %c45 = arith.constant 45 : index
    %c0_182 = arith.constant 0 : index
    %c0_183 = arith.constant 0 : index
    %341 = vector.load %arg3[%c45, %c0_182, %c0_183] : memref<84x128x128xbf16, #tpu.memory_space<vmem>>, vector<1x128x128xbf16>
    %342 = vector.shape_cast %341 : vector<1x128x128xbf16> to vector<128x128xbf16>
    %cst_184 = arith.constant dense<0.000000e+00> : vector<16x128xf32>
    %343 = tpu.matmul %340, %342, %cst_184 {dimension_numbers = #tpu.dot_dimension_numbers<[1], [0], [0], [1], [0, 0, 1, 1], [], []>} : vector<16x128xbf16>, vector<128x128xbf16>, vector<16x128xf32> -> vector<16x128xf32>
    %344 = arith.addf %338, %343 : vector<16x128xf32>
    %345 = vector.extract_strided_slice %327 {offsets = [0, 48, 0], sizes = [1, 16, 128], strides = [1, 1, 1]} : vector<1x144x128xbf16> to vector<1x16x128xbf16>
    %346 = vector.shape_cast %345 : vector<1x16x128xbf16> to vector<16x128xbf16>
    %c46 = arith.constant 46 : index
    %c0_185 = arith.constant 0 : index
    %c0_186 = arith.constant 0 : index
    %347 = vector.load %arg3[%c46, %c0_185, %c0_186] : memref<84x128x128xbf16, #tpu.memory_space<vmem>>, vector<1x128x128xbf16>
    %348 = vector.shape_cast %347 : vector<1x128x128xbf16> to vector<128x128xbf16>
    %cst_187 = arith.constant dense<0.000000e+00> : vector<16x128xf32>
    %349 = tpu.matmul %346, %348, %cst_187 {dimension_numbers = #tpu.dot_dimension_numbers<[1], [0], [0], [1], [0, 0, 1, 1], [], []>} : vector<16x128xbf16>, vector<128x128xbf16>, vector<16x128xf32> -> vector<16x128xf32>
    %350 = arith.addf %344, %349 : vector<16x128xf32>
    %351 = vector.extract_strided_slice %327 {offsets = [0, 64, 0], sizes = [1, 16, 128], strides = [1, 1, 1]} : vector<1x144x128xbf16> to vector<1x16x128xbf16>
    %352 = vector.shape_cast %351 : vector<1x16x128xbf16> to vector<16x128xbf16>
    %c47 = arith.constant 47 : index
    %c0_188 = arith.constant 0 : index
    %c0_189 = arith.constant 0 : index
    %353 = vector.load %arg3[%c47, %c0_188, %c0_189] : memref<84x128x128xbf16, #tpu.memory_space<vmem>>, vector<1x128x128xbf16>
    %354 = vector.shape_cast %353 : vector<1x128x128xbf16> to vector<128x128xbf16>
    %cst_190 = arith.constant dense<0.000000e+00> : vector<16x128xf32>
    %355 = tpu.matmul %352, %354, %cst_190 {dimension_numbers = #tpu.dot_dimension_numbers<[1], [0], [0], [1], [0, 0, 1, 1], [], []>} : vector<16x128xbf16>, vector<128x128xbf16>, vector<16x128xf32> -> vector<16x128xf32>
    %356 = arith.addf %350, %355 : vector<16x128xf32>
    %357 = vector.extract_strided_slice %327 {offsets = [0, 80, 0], sizes = [1, 16, 128], strides = [1, 1, 1]} : vector<1x144x128xbf16> to vector<1x16x128xbf16>
    %358 = vector.shape_cast %357 : vector<1x16x128xbf16> to vector<16x128xbf16>
    %c48 = arith.constant 48 : index
    %c0_191 = arith.constant 0 : index
    %c0_192 = arith.constant 0 : index
    %359 = vector.load %arg3[%c48, %c0_191, %c0_192] : memref<84x128x128xbf16, #tpu.memory_space<vmem>>, vector<1x128x128xbf16>
    %360 = vector.shape_cast %359 : vector<1x128x128xbf16> to vector<128x128xbf16>
    %cst_193 = arith.constant dense<0.000000e+00> : vector<16x128xf32>
    %361 = tpu.matmul %358, %360, %cst_193 {dimension_numbers = #tpu.dot_dimension_numbers<[1], [0], [0], [1], [0, 0, 1, 1], [], []>} : vector<16x128xbf16>, vector<128x128xbf16>, vector<16x128xf32> -> vector<16x128xf32>
    %362 = arith.addf %356, %361 : vector<16x128xf32>
    %363 = vector.extract_strided_slice %327 {offsets = [0, 96, 0], sizes = [1, 16, 128], strides = [1, 1, 1]} : vector<1x144x128xbf16> to vector<1x16x128xbf16>
    %364 = vector.shape_cast %363 : vector<1x16x128xbf16> to vector<16x128xbf16>
    %c49 = arith.constant 49 : index
    %c0_194 = arith.constant 0 : index
    %c0_195 = arith.constant 0 : index
    %365 = vector.load %arg3[%c49, %c0_194, %c0_195] : memref<84x128x128xbf16, #tpu.memory_space<vmem>>, vector<1x128x128xbf16>
    %366 = vector.shape_cast %365 : vector<1x128x128xbf16> to vector<128x128xbf16>
    %cst_196 = arith.constant dense<0.000000e+00> : vector<16x128xf32>
    %367 = tpu.matmul %364, %366, %cst_196 {dimension_numbers = #tpu.dot_dimension_numbers<[1], [0], [0], [1], [0, 0, 1, 1], [], []>} : vector<16x128xbf16>, vector<128x128xbf16>, vector<16x128xf32> -> vector<16x128xf32>
    %368 = arith.addf %362, %367 : vector<16x128xf32>
    %369 = vector.extract_strided_slice %327 {offsets = [0, 112, 0], sizes = [1, 16, 128], strides = [1, 1, 1]} : vector<1x144x128xbf16> to vector<1x16x128xbf16>
    %370 = vector.shape_cast %369 : vector<1x16x128xbf16> to vector<16x128xbf16>
    %c50 = arith.constant 50 : index
    %c0_197 = arith.constant 0 : index
    %c0_198 = arith.constant 0 : index
    %371 = vector.load %arg3[%c50, %c0_197, %c0_198] : memref<84x128x128xbf16, #tpu.memory_space<vmem>>, vector<1x128x128xbf16>
    %372 = vector.shape_cast %371 : vector<1x128x128xbf16> to vector<128x128xbf16>
    %cst_199 = arith.constant dense<0.000000e+00> : vector<16x128xf32>
    %373 = tpu.matmul %370, %372, %cst_199 {dimension_numbers = #tpu.dot_dimension_numbers<[1], [0], [0], [1], [0, 0, 1, 1], [], []>} : vector<16x128xbf16>, vector<128x128xbf16>, vector<16x128xf32> -> vector<16x128xf32>
    %374 = arith.addf %368, %373 : vector<16x128xf32>
    %375 = vector.extract_strided_slice %327 {offsets = [0, 128, 0], sizes = [1, 16, 128], strides = [1, 1, 1]} : vector<1x144x128xbf16> to vector<1x16x128xbf16>
    %376 = vector.shape_cast %375 : vector<1x16x128xbf16> to vector<16x128xbf16>
    %c51 = arith.constant 51 : index
    %c0_200 = arith.constant 0 : index
    %c0_201 = arith.constant 0 : index
    %377 = vector.load %arg3[%c51, %c0_200, %c0_201] : memref<84x128x128xbf16, #tpu.memory_space<vmem>>, vector<1x128x128xbf16>
    %378 = vector.shape_cast %377 : vector<1x128x128xbf16> to vector<128x128xbf16>
    %cst_202 = arith.constant dense<0.000000e+00> : vector<16x128xf32>
    %379 = tpu.matmul %376, %378, %cst_202 {dimension_numbers = #tpu.dot_dimension_numbers<[1], [0], [0], [1], [0, 0, 1, 1], [], []>} : vector<16x128xbf16>, vector<128x128xbf16>, vector<16x128xf32> -> vector<16x128xf32>
    %380 = arith.addf %374, %379 : vector<16x128xf32>
    %381 = vector.broadcast %321 : vector<1x128xf32> to vector<16x128xf32>
    %382 = arith.addf %380, %381 : vector<16x128xf32>
    %cst_203 = arith.constant 0.000000e+00 : f32
    %383 = vector.broadcast %cst_203 : f32 to vector<16x128xf32>
    %384 = arith.maximumf %382, %383 : vector<16x128xf32>
    %c6_204 = arith.constant 6 : index
    %c0_205 = arith.constant 0 : index
    %c0_206 = arith.constant 0 : index
    %385 = vector.load %arg4[%c6_204, %c0_205, %c0_206] : memref<8x1x128xf32, #tpu.memory_space<vmem>>, vector<1x1x128xf32>
    %386 = vector.shape_cast %385 : vector<1x1x128xf32> to vector<1x128xf32>
    %387 = arith.truncf %384 : vector<16x128xf32> to vector<16x128xbf16>
    %388 = vector.shape_cast %387 : vector<16x128xbf16> to vector<1x16x128xbf16>
    %c0_207 = arith.constant 0 : index
    %c0_208 = arith.constant 0 : index
    %389 = vector.load %arg9[%c0_207, %c0_208] : memref<144x16xbf16, #tpu.memory_space<vmem>>, vector<144x16xbf16>
    %390 = vector.shape_cast %389 : vector<144x16xbf16> to vector<1x144x16xbf16>
    "tpu.trace_start"() <{level = 10 : i32, message = "bor,bri->boi"}> : () -> ()
    %cst_209 = arith.constant dense<0.000000e+00> : vector<1x144x128xf32>
    %391 = tpu.matmul %390, %388, %cst_209 {dimension_numbers = #tpu.dot_dimension_numbers<[2], [1], [1], [2], [0, 0, 0, 1, 1, 2], [0], [0]>} : vector<1x144x16xbf16>, vector<1x16x128xbf16>, vector<1x144x128xf32> -> vector<1x144x128xf32>
    "tpu.trace_stop"() : () -> ()
    %392 = arith.truncf %391 : vector<1x144x128xf32> to vector<1x144x128xbf16>
    %393 = vector.extract_strided_slice %392 {offsets = [0, 0, 0], sizes = [1, 16, 128], strides = [1, 1, 1]} : vector<1x144x128xbf16> to vector<1x16x128xbf16>
    %394 = vector.shape_cast %393 : vector<1x16x128xbf16> to vector<16x128xbf16>
    %c52 = arith.constant 52 : index
    %c0_210 = arith.constant 0 : index
    %c0_211 = arith.constant 0 : index
    %395 = vector.load %arg3[%c52, %c0_210, %c0_211] : memref<84x128x128xbf16, #tpu.memory_space<vmem>>, vector<1x128x128xbf16>
    %396 = vector.shape_cast %395 : vector<1x128x128xbf16> to vector<128x128xbf16>
    %cst_212 = arith.constant dense<0.000000e+00> : vector<16x128xf32>
    %397 = tpu.matmul %394, %396, %cst_212 {dimension_numbers = #tpu.dot_dimension_numbers<[1], [0], [0], [1], [0, 0, 1, 1], [], []>} : vector<16x128xbf16>, vector<128x128xbf16>, vector<16x128xf32> -> vector<16x128xf32>
    %398 = vector.extract_strided_slice %392 {offsets = [0, 16, 0], sizes = [1, 16, 128], strides = [1, 1, 1]} : vector<1x144x128xbf16> to vector<1x16x128xbf16>
    %399 = vector.shape_cast %398 : vector<1x16x128xbf16> to vector<16x128xbf16>
    %c53 = arith.constant 53 : index
    %c0_213 = arith.constant 0 : index
    %c0_214 = arith.constant 0 : index
    %400 = vector.load %arg3[%c53, %c0_213, %c0_214] : memref<84x128x128xbf16, #tpu.memory_space<vmem>>, vector<1x128x128xbf16>
    %401 = vector.shape_cast %400 : vector<1x128x128xbf16> to vector<128x128xbf16>
    %cst_215 = arith.constant dense<0.000000e+00> : vector<16x128xf32>
    %402 = tpu.matmul %399, %401, %cst_215 {dimension_numbers = #tpu.dot_dimension_numbers<[1], [0], [0], [1], [0, 0, 1, 1], [], []>} : vector<16x128xbf16>, vector<128x128xbf16>, vector<16x128xf32> -> vector<16x128xf32>
    %403 = arith.addf %397, %402 : vector<16x128xf32>
    %404 = vector.extract_strided_slice %392 {offsets = [0, 48, 0], sizes = [1, 16, 128], strides = [1, 1, 1]} : vector<1x144x128xbf16> to vector<1x16x128xbf16>
    %405 = vector.shape_cast %404 : vector<1x16x128xbf16> to vector<16x128xbf16>
    %c54 = arith.constant 54 : index
    %c0_216 = arith.constant 0 : index
    %c0_217 = arith.constant 0 : index
    %406 = vector.load %arg3[%c54, %c0_216, %c0_217] : memref<84x128x128xbf16, #tpu.memory_space<vmem>>, vector<1x128x128xbf16>
    %407 = vector.shape_cast %406 : vector<1x128x128xbf16> to vector<128x128xbf16>
    %cst_218 = arith.constant dense<0.000000e+00> : vector<16x128xf32>
    %408 = tpu.matmul %405, %407, %cst_218 {dimension_numbers = #tpu.dot_dimension_numbers<[1], [0], [0], [1], [0, 0, 1, 1], [], []>} : vector<16x128xbf16>, vector<128x128xbf16>, vector<16x128xf32> -> vector<16x128xf32>
    %409 = arith.addf %403, %408 : vector<16x128xf32>
    %410 = vector.extract_strided_slice %392 {offsets = [0, 64, 0], sizes = [1, 16, 128], strides = [1, 1, 1]} : vector<1x144x128xbf16> to vector<1x16x128xbf16>
    %411 = vector.shape_cast %410 : vector<1x16x128xbf16> to vector<16x128xbf16>
    %c55 = arith.constant 55 : index
    %c0_219 = arith.constant 0 : index
    %c0_220 = arith.constant 0 : index
    %412 = vector.load %arg3[%c55, %c0_219, %c0_220] : memref<84x128x128xbf16, #tpu.memory_space<vmem>>, vector<1x128x128xbf16>
    %413 = vector.shape_cast %412 : vector<1x128x128xbf16> to vector<128x128xbf16>
    %cst_221 = arith.constant dense<0.000000e+00> : vector<16x128xf32>
    %414 = tpu.matmul %411, %413, %cst_221 {dimension_numbers = #tpu.dot_dimension_numbers<[1], [0], [0], [1], [0, 0, 1, 1], [], []>} : vector<16x128xbf16>, vector<128x128xbf16>, vector<16x128xf32> -> vector<16x128xf32>
    %415 = arith.addf %409, %414 : vector<16x128xf32>
    %416 = vector.broadcast %386 : vector<1x128xf32> to vector<16x128xf32>
    %417 = arith.addf %415, %416 : vector<16x128xf32>
    %cst_222 = arith.constant 0.000000e+00 : f32
    %418 = vector.broadcast %cst_222 : f32 to vector<16x128xf32>
    %419 = arith.maximumf %417, %418 : vector<16x128xf32>
    %420 = vector.shape_cast %419 : vector<16x128xf32> to vector<1x16x128xf32>
    %421 = vector.extract_strided_slice %392 {offsets = [0, 16, 0], sizes = [1, 16, 128], strides = [1, 1, 1]} : vector<1x144x128xbf16> to vector<1x16x128xbf16>
    %422 = vector.shape_cast %421 : vector<1x16x128xbf16> to vector<16x128xbf16>
    %c56 = arith.constant 56 : index
    %c0_223 = arith.constant 0 : index
    %c0_224 = arith.constant 0 : index
    %423 = vector.load %arg3[%c56, %c0_223, %c0_224] : memref<84x128x128xbf16, #tpu.memory_space<vmem>>, vector<1x128x128xbf16>
    %424 = vector.shape_cast %423 : vector<1x128x128xbf16> to vector<128x128xbf16>
    %cst_225 = arith.constant dense<0.000000e+00> : vector<16x128xf32>
    %425 = tpu.matmul %422, %424, %cst_225 {dimension_numbers = #tpu.dot_dimension_numbers<[1], [0], [0], [1], [0, 0, 1, 1], [], []>} : vector<16x128xbf16>, vector<128x128xbf16>, vector<16x128xf32> -> vector<16x128xf32>
    %426 = vector.extract_strided_slice %392 {offsets = [0, 32, 0], sizes = [1, 16, 128], strides = [1, 1, 1]} : vector<1x144x128xbf16> to vector<1x16x128xbf16>
    %427 = vector.shape_cast %426 : vector<1x16x128xbf16> to vector<16x128xbf16>
    %c57 = arith.constant 57 : index
    %c0_226 = arith.constant 0 : index
    %c0_227 = arith.constant 0 : index
    %428 = vector.load %arg3[%c57, %c0_226, %c0_227] : memref<84x128x128xbf16, #tpu.memory_space<vmem>>, vector<1x128x128xbf16>
    %429 = vector.shape_cast %428 : vector<1x128x128xbf16> to vector<128x128xbf16>
    %cst_228 = arith.constant dense<0.000000e+00> : vector<16x128xf32>
    %430 = tpu.matmul %427, %429, %cst_228 {dimension_numbers = #tpu.dot_dimension_numbers<[1], [0], [0], [1], [0, 0, 1, 1], [], []>} : vector<16x128xbf16>, vector<128x128xbf16>, vector<16x128xf32> -> vector<16x128xf32>
    %431 = arith.addf %425, %430 : vector<16x128xf32>
    %432 = vector.extract_strided_slice %392 {offsets = [0, 64, 0], sizes = [1, 16, 128], strides = [1, 1, 1]} : vector<1x144x128xbf16> to vector<1x16x128xbf16>
    %433 = vector.shape_cast %432 : vector<1x16x128xbf16> to vector<16x128xbf16>
    %c58 = arith.constant 58 : index
    %c0_229 = arith.constant 0 : index
    %c0_230 = arith.constant 0 : index
    %434 = vector.load %arg3[%c58, %c0_229, %c0_230] : memref<84x128x128xbf16, #tpu.memory_space<vmem>>, vector<1x128x128xbf16>
    %435 = vector.shape_cast %434 : vector<1x128x128xbf16> to vector<128x128xbf16>
    %cst_231 = arith.constant dense<0.000000e+00> : vector<16x128xf32>
    %436 = tpu.matmul %433, %435, %cst_231 {dimension_numbers = #tpu.dot_dimension_numbers<[1], [0], [0], [1], [0, 0, 1, 1], [], []>} : vector<16x128xbf16>, vector<128x128xbf16>, vector<16x128xf32> -> vector<16x128xf32>
    %437 = arith.addf %431, %436 : vector<16x128xf32>
    %438 = vector.extract_strided_slice %392 {offsets = [0, 80, 0], sizes = [1, 16, 128], strides = [1, 1, 1]} : vector<1x144x128xbf16> to vector<1x16x128xbf16>
    %439 = vector.shape_cast %438 : vector<1x16x128xbf16> to vector<16x128xbf16>
    %c59 = arith.constant 59 : index
    %c0_232 = arith.constant 0 : index
    %c0_233 = arith.constant 0 : index
    %440 = vector.load %arg3[%c59, %c0_232, %c0_233] : memref<84x128x128xbf16, #tpu.memory_space<vmem>>, vector<1x128x128xbf16>
    %441 = vector.shape_cast %440 : vector<1x128x128xbf16> to vector<128x128xbf16>
    %cst_234 = arith.constant dense<0.000000e+00> : vector<16x128xf32>
    %442 = tpu.matmul %439, %441, %cst_234 {dimension_numbers = #tpu.dot_dimension_numbers<[1], [0], [0], [1], [0, 0, 1, 1], [], []>} : vector<16x128xbf16>, vector<128x128xbf16>, vector<16x128xf32> -> vector<16x128xf32>
    %443 = arith.addf %437, %442 : vector<16x128xf32>
    %444 = vector.broadcast %386 : vector<1x128xf32> to vector<16x128xf32>
    %445 = arith.addf %443, %444 : vector<16x128xf32>
    %cst_235 = arith.constant 0.000000e+00 : f32
    %446 = vector.broadcast %cst_235 : f32 to vector<16x128xf32>
    %447 = arith.maximumf %445, %446 : vector<16x128xf32>
    %448 = vector.shape_cast %447 : vector<16x128xf32> to vector<1x16x128xf32>
    %449 = vector.extract_strided_slice %392 {offsets = [0, 48, 0], sizes = [1, 16, 128], strides = [1, 1, 1]} : vector<1x144x128xbf16> to vector<1x16x128xbf16>
    %450 = vector.shape_cast %449 : vector<1x16x128xbf16> to vector<16x128xbf16>
    %c60 = arith.constant 60 : index
    %c0_236 = arith.constant 0 : index
    %c0_237 = arith.constant 0 : index
    %451 = vector.load %arg3[%c60, %c0_236, %c0_237] : memref<84x128x128xbf16, #tpu.memory_space<vmem>>, vector<1x128x128xbf16>
    %452 = vector.shape_cast %451 : vector<1x128x128xbf16> to vector<128x128xbf16>
    %cst_238 = arith.constant dense<0.000000e+00> : vector<16x128xf32>
    %453 = tpu.matmul %450, %452, %cst_238 {dimension_numbers = #tpu.dot_dimension_numbers<[1], [0], [0], [1], [0, 0, 1, 1], [], []>} : vector<16x128xbf16>, vector<128x128xbf16>, vector<16x128xf32> -> vector<16x128xf32>
    %454 = vector.extract_strided_slice %392 {offsets = [0, 64, 0], sizes = [1, 16, 128], strides = [1, 1, 1]} : vector<1x144x128xbf16> to vector<1x16x128xbf16>
    %455 = vector.shape_cast %454 : vector<1x16x128xbf16> to vector<16x128xbf16>
    %c61 = arith.constant 61 : index
    %c0_239 = arith.constant 0 : index
    %c0_240 = arith.constant 0 : index
    %456 = vector.load %arg3[%c61, %c0_239, %c0_240] : memref<84x128x128xbf16, #tpu.memory_space<vmem>>, vector<1x128x128xbf16>
    %457 = vector.shape_cast %456 : vector<1x128x128xbf16> to vector<128x128xbf16>
    %cst_241 = arith.constant dense<0.000000e+00> : vector<16x128xf32>
    %458 = tpu.matmul %455, %457, %cst_241 {dimension_numbers = #tpu.dot_dimension_numbers<[1], [0], [0], [1], [0, 0, 1, 1], [], []>} : vector<16x128xbf16>, vector<128x128xbf16>, vector<16x128xf32> -> vector<16x128xf32>
    %459 = arith.addf %453, %458 : vector<16x128xf32>
    %460 = vector.extract_strided_slice %392 {offsets = [0, 96, 0], sizes = [1, 16, 128], strides = [1, 1, 1]} : vector<1x144x128xbf16> to vector<1x16x128xbf16>
    %461 = vector.shape_cast %460 : vector<1x16x128xbf16> to vector<16x128xbf16>
    %c62 = arith.constant 62 : index
    %c0_242 = arith.constant 0 : index
    %c0_243 = arith.constant 0 : index
    %462 = vector.load %arg3[%c62, %c0_242, %c0_243] : memref<84x128x128xbf16, #tpu.memory_space<vmem>>, vector<1x128x128xbf16>
    %463 = vector.shape_cast %462 : vector<1x128x128xbf16> to vector<128x128xbf16>
    %cst_244 = arith.constant dense<0.000000e+00> : vector<16x128xf32>
    %464 = tpu.matmul %461, %463, %cst_244 {dimension_numbers = #tpu.dot_dimension_numbers<[1], [0], [0], [1], [0, 0, 1, 1], [], []>} : vector<16x128xbf16>, vector<128x128xbf16>, vector<16x128xf32> -> vector<16x128xf32>
    %465 = arith.addf %459, %464 : vector<16x128xf32>
    %466 = vector.extract_strided_slice %392 {offsets = [0, 112, 0], sizes = [1, 16, 128], strides = [1, 1, 1]} : vector<1x144x128xbf16> to vector<1x16x128xbf16>
    %467 = vector.shape_cast %466 : vector<1x16x128xbf16> to vector<16x128xbf16>
    %c63 = arith.constant 63 : index
    %c0_245 = arith.constant 0 : index
    %c0_246 = arith.constant 0 : index
    %468 = vector.load %arg3[%c63, %c0_245, %c0_246] : memref<84x128x128xbf16, #tpu.memory_space<vmem>>, vector<1x128x128xbf16>
    %469 = vector.shape_cast %468 : vector<1x128x128xbf16> to vector<128x128xbf16>
    %cst_247 = arith.constant dense<0.000000e+00> : vector<16x128xf32>
    %470 = tpu.matmul %467, %469, %cst_247 {dimension_numbers = #tpu.dot_dimension_numbers<[1], [0], [0], [1], [0, 0, 1, 1], [], []>} : vector<16x128xbf16>, vector<128x128xbf16>, vector<16x128xf32> -> vector<16x128xf32>
    %471 = arith.addf %465, %470 : vector<16x128xf32>
    %472 = vector.broadcast %386 : vector<1x128xf32> to vector<16x128xf32>
    %473 = arith.addf %471, %472 : vector<16x128xf32>
    %cst_248 = arith.constant 0.000000e+00 : f32
    %474 = vector.broadcast %cst_248 : f32 to vector<16x128xf32>
    %475 = arith.maximumf %473, %474 : vector<16x128xf32>
    %476 = vector.shape_cast %475 : vector<16x128xf32> to vector<1x16x128xf32>
    %477 = vector.extract_strided_slice %392 {offsets = [0, 64, 0], sizes = [1, 16, 128], strides = [1, 1, 1]} : vector<1x144x128xbf16> to vector<1x16x128xbf16>
    %478 = vector.shape_cast %477 : vector<1x16x128xbf16> to vector<16x128xbf16>
    %c64 = arith.constant 64 : index
    %c0_249 = arith.constant 0 : index
    %c0_250 = arith.constant 0 : index
    %479 = vector.load %arg3[%c64, %c0_249, %c0_250] : memref<84x128x128xbf16, #tpu.memory_space<vmem>>, vector<1x128x128xbf16>
    %480 = vector.shape_cast %479 : vector<1x128x128xbf16> to vector<128x128xbf16>
    %cst_251 = arith.constant dense<0.000000e+00> : vector<16x128xf32>
    %481 = tpu.matmul %478, %480, %cst_251 {dimension_numbers = #tpu.dot_dimension_numbers<[1], [0], [0], [1], [0, 0, 1, 1], [], []>} : vector<16x128xbf16>, vector<128x128xbf16>, vector<16x128xf32> -> vector<16x128xf32>
    %482 = vector.extract_strided_slice %392 {offsets = [0, 80, 0], sizes = [1, 16, 128], strides = [1, 1, 1]} : vector<1x144x128xbf16> to vector<1x16x128xbf16>
    %483 = vector.shape_cast %482 : vector<1x16x128xbf16> to vector<16x128xbf16>
    %c65 = arith.constant 65 : index
    %c0_252 = arith.constant 0 : index
    %c0_253 = arith.constant 0 : index
    %484 = vector.load %arg3[%c65, %c0_252, %c0_253] : memref<84x128x128xbf16, #tpu.memory_space<vmem>>, vector<1x128x128xbf16>
    %485 = vector.shape_cast %484 : vector<1x128x128xbf16> to vector<128x128xbf16>
    %cst_254 = arith.constant dense<0.000000e+00> : vector<16x128xf32>
    %486 = tpu.matmul %483, %485, %cst_254 {dimension_numbers = #tpu.dot_dimension_numbers<[1], [0], [0], [1], [0, 0, 1, 1], [], []>} : vector<16x128xbf16>, vector<128x128xbf16>, vector<16x128xf32> -> vector<16x128xf32>
    %487 = arith.addf %481, %486 : vector<16x128xf32>
    %488 = vector.extract_strided_slice %392 {offsets = [0, 112, 0], sizes = [1, 16, 128], strides = [1, 1, 1]} : vector<1x144x128xbf16> to vector<1x16x128xbf16>
    %489 = vector.shape_cast %488 : vector<1x16x128xbf16> to vector<16x128xbf16>
    %c66 = arith.constant 66 : index
    %c0_255 = arith.constant 0 : index
    %c0_256 = arith.constant 0 : index
    %490 = vector.load %arg3[%c66, %c0_255, %c0_256] : memref<84x128x128xbf16, #tpu.memory_space<vmem>>, vector<1x128x128xbf16>
    %491 = vector.shape_cast %490 : vector<1x128x128xbf16> to vector<128x128xbf16>
    %cst_257 = arith.constant dense<0.000000e+00> : vector<16x128xf32>
    %492 = tpu.matmul %489, %491, %cst_257 {dimension_numbers = #tpu.dot_dimension_numbers<[1], [0], [0], [1], [0, 0, 1, 1], [], []>} : vector<16x128xbf16>, vector<128x128xbf16>, vector<16x128xf32> -> vector<16x128xf32>
    %493 = arith.addf %487, %492 : vector<16x128xf32>
    %494 = vector.extract_strided_slice %392 {offsets = [0, 128, 0], sizes = [1, 16, 128], strides = [1, 1, 1]} : vector<1x144x128xbf16> to vector<1x16x128xbf16>
    %495 = vector.shape_cast %494 : vector<1x16x128xbf16> to vector<16x128xbf16>
    %c67 = arith.constant 67 : index
    %c0_258 = arith.constant 0 : index
    %c0_259 = arith.constant 0 : index
    %496 = vector.load %arg3[%c67, %c0_258, %c0_259] : memref<84x128x128xbf16, #tpu.memory_space<vmem>>, vector<1x128x128xbf16>
    %497 = vector.shape_cast %496 : vector<1x128x128xbf16> to vector<128x128xbf16>
    %cst_260 = arith.constant dense<0.000000e+00> : vector<16x128xf32>
    %498 = tpu.matmul %495, %497, %cst_260 {dimension_numbers = #tpu.dot_dimension_numbers<[1], [0], [0], [1], [0, 0, 1, 1], [], []>} : vector<16x128xbf16>, vector<128x128xbf16>, vector<16x128xf32> -> vector<16x128xf32>
    %499 = arith.addf %493, %498 : vector<16x128xf32>
    %500 = vector.broadcast %386 : vector<1x128xf32> to vector<16x128xf32>
    %501 = arith.addf %499, %500 : vector<16x128xf32>
    %cst_261 = arith.constant 0.000000e+00 : f32
    %502 = vector.broadcast %cst_261 : f32 to vector<16x128xf32>
    %503 = arith.maximumf %501, %502 : vector<16x128xf32>
    %504 = vector.shape_cast %503 : vector<16x128xf32> to vector<1x16x128xf32>
    %505 = tpu.concatenate %420, %448, %476, %504 in 1 : vector<1x16x128xf32>, vector<1x16x128xf32>, vector<1x16x128xf32>, vector<1x16x128xf32> -> vector<1x64x128xf32>
    %506 = vector.shape_cast %505 : vector<1x64x128xf32> to vector<64x128xf32>
    %c7_262 = arith.constant 7 : index
    %c0_263 = arith.constant 0 : index
    %c0_264 = arith.constant 0 : index
    %507 = vector.load %arg4[%c7_262, %c0_263, %c0_264] : memref<8x1x128xf32, #tpu.memory_space<vmem>>, vector<1x1x128xf32>
    %508 = vector.shape_cast %507 : vector<1x1x128xf32> to vector<1x128xf32>
    %509 = arith.truncf %506 : vector<64x128xf32> to vector<64x128xbf16>
    %510 = vector.shape_cast %509 : vector<64x128xbf16> to vector<1x64x128xbf16>
    %c0_265 = arith.constant 0 : index
    %c0_266 = arith.constant 0 : index
    %511 = vector.load %arg10[%c0_265, %c0_266] : memref<576x64xbf16, #tpu.memory_space<vmem>>, vector<576x64xbf16>
    %512 = vector.shape_cast %511 : vector<576x64xbf16> to vector<1x576x64xbf16>
    "tpu.trace_start"() <{level = 10 : i32, message = "bor,bri->boi"}> : () -> ()
    %cst_267 = arith.constant dense<0.000000e+00> : vector<1x576x128xf32>
    %513 = tpu.matmul %512, %510, %cst_267 {dimension_numbers = #tpu.dot_dimension_numbers<[2], [1], [1], [2], [0, 0, 0, 1, 1, 2], [0], [0]>} : vector<1x576x64xbf16>, vector<1x64x128xbf16>, vector<1x576x128xf32> -> vector<1x576x128xf32>
    "tpu.trace_stop"() : () -> ()
    %514 = arith.truncf %513 : vector<1x576x128xf32> to vector<1x576x128xbf16>
    %515 = vector.extract_strided_slice %514 {offsets = [0, 0, 0], sizes = [1, 64, 128], strides = [1, 1, 1]} : vector<1x576x128xbf16> to vector<1x64x128xbf16>
    %516 = vector.shape_cast %515 : vector<1x64x128xbf16> to vector<64x128xbf16>
    %c68 = arith.constant 68 : index
    %c0_268 = arith.constant 0 : index
    %c0_269 = arith.constant 0 : index
    %517 = vector.load %arg3[%c68, %c0_268, %c0_269] : memref<84x128x128xbf16, #tpu.memory_space<vmem>>, vector<1x128x128xbf16>
    %518 = vector.shape_cast %517 : vector<1x128x128xbf16> to vector<128x128xbf16>
    %cst_270 = arith.constant dense<0.000000e+00> : vector<64x128xf32>
    %519 = tpu.matmul %516, %518, %cst_270 {dimension_numbers = #tpu.dot_dimension_numbers<[1], [0], [0], [1], [0, 0, 1, 1], [], []>} : vector<64x128xbf16>, vector<128x128xbf16>, vector<64x128xf32> -> vector<64x128xf32>
    %520 = vector.extract_strided_slice %514 {offsets = [0, 64, 0], sizes = [1, 64, 128], strides = [1, 1, 1]} : vector<1x576x128xbf16> to vector<1x64x128xbf16>
    %521 = vector.shape_cast %520 : vector<1x64x128xbf16> to vector<64x128xbf16>
    %c69 = arith.constant 69 : index
    %c0_271 = arith.constant 0 : index
    %c0_272 = arith.constant 0 : index
    %522 = vector.load %arg3[%c69, %c0_271, %c0_272] : memref<84x128x128xbf16, #tpu.memory_space<vmem>>, vector<1x128x128xbf16>
    %523 = vector.shape_cast %522 : vector<1x128x128xbf16> to vector<128x128xbf16>
    %cst_273 = arith.constant dense<0.000000e+00> : vector<64x128xf32>
    %524 = tpu.matmul %521, %523, %cst_273 {dimension_numbers = #tpu.dot_dimension_numbers<[1], [0], [0], [1], [0, 0, 1, 1], [], []>} : vector<64x128xbf16>, vector<128x128xbf16>, vector<64x128xf32> -> vector<64x128xf32>
    %525 = arith.addf %519, %524 : vector<64x128xf32>
    %526 = vector.extract_strided_slice %514 {offsets = [0, 192, 0], sizes = [1, 64, 128], strides = [1, 1, 1]} : vector<1x576x128xbf16> to vector<1x64x128xbf16>
    %527 = vector.shape_cast %526 : vector<1x64x128xbf16> to vector<64x128xbf16>
    %c70 = arith.constant 70 : index
    %c0_274 = arith.constant 0 : index
    %c0_275 = arith.constant 0 : index
    %528 = vector.load %arg3[%c70, %c0_274, %c0_275] : memref<84x128x128xbf16, #tpu.memory_space<vmem>>, vector<1x128x128xbf16>
    %529 = vector.shape_cast %528 : vector<1x128x128xbf16> to vector<128x128xbf16>
    %cst_276 = arith.constant dense<0.000000e+00> : vector<64x128xf32>
    %530 = tpu.matmul %527, %529, %cst_276 {dimension_numbers = #tpu.dot_dimension_numbers<[1], [0], [0], [1], [0, 0, 1, 1], [], []>} : vector<64x128xbf16>, vector<128x128xbf16>, vector<64x128xf32> -> vector<64x128xf32>
    %531 = arith.addf %525, %530 : vector<64x128xf32>
    %532 = vector.extract_strided_slice %514 {offsets = [0, 256, 0], sizes = [1, 64, 128], strides = [1, 1, 1]} : vector<1x576x128xbf16> to vector<1x64x128xbf16>
    %533 = vector.shape_cast %532 : vector<1x64x128xbf16> to vector<64x128xbf16>
    %c71 = arith.constant 71 : index
    %c0_277 = arith.constant 0 : index
    %c0_278 = arith.constant 0 : index
    %534 = vector.load %arg3[%c71, %c0_277, %c0_278] : memref<84x128x128xbf16, #tpu.memory_space<vmem>>, vector<1x128x128xbf16>
    %535 = vector.shape_cast %534 : vector<1x128x128xbf16> to vector<128x128xbf16>
    %cst_279 = arith.constant dense<0.000000e+00> : vector<64x128xf32>
    %536 = tpu.matmul %533, %535, %cst_279 {dimension_numbers = #tpu.dot_dimension_numbers<[1], [0], [0], [1], [0, 0, 1, 1], [], []>} : vector<64x128xbf16>, vector<128x128xbf16>, vector<64x128xf32> -> vector<64x128xf32>
    %537 = arith.addf %531, %536 : vector<64x128xf32>
    %538 = vector.broadcast %508 : vector<1x128xf32> to vector<64x128xf32>
    %539 = arith.addf %537, %538 : vector<64x128xf32>
    %540 = vector.shape_cast %539 : vector<64x128xf32> to vector<1x64x128xf32>
    %541 = vector.extract_strided_slice %514 {offsets = [0, 64, 0], sizes = [1, 64, 128], strides = [1, 1, 1]} : vector<1x576x128xbf16> to vector<1x64x128xbf16>
    %542 = vector.shape_cast %541 : vector<1x64x128xbf16> to vector<64x128xbf16>
    %c72 = arith.constant 72 : index
    %c0_280 = arith.constant 0 : index
    %c0_281 = arith.constant 0 : index
    %543 = vector.load %arg3[%c72, %c0_280, %c0_281] : memref<84x128x128xbf16, #tpu.memory_space<vmem>>, vector<1x128x128xbf16>
    %544 = vector.shape_cast %543 : vector<1x128x128xbf16> to vector<128x128xbf16>
    %cst_282 = arith.constant dense<0.000000e+00> : vector<64x128xf32>
    %545 = tpu.matmul %542, %544, %cst_282 {dimension_numbers = #tpu.dot_dimension_numbers<[1], [0], [0], [1], [0, 0, 1, 1], [], []>} : vector<64x128xbf16>, vector<128x128xbf16>, vector<64x128xf32> -> vector<64x128xf32>
    %546 = vector.extract_strided_slice %514 {offsets = [0, 128, 0], sizes = [1, 64, 128], strides = [1, 1, 1]} : vector<1x576x128xbf16> to vector<1x64x128xbf16>
    %547 = vector.shape_cast %546 : vector<1x64x128xbf16> to vector<64x128xbf16>
    %c73 = arith.constant 73 : index
    %c0_283 = arith.constant 0 : index
    %c0_284 = arith.constant 0 : index
    %548 = vector.load %arg3[%c73, %c0_283, %c0_284] : memref<84x128x128xbf16, #tpu.memory_space<vmem>>, vector<1x128x128xbf16>
    %549 = vector.shape_cast %548 : vector<1x128x128xbf16> to vector<128x128xbf16>
    %cst_285 = arith.constant dense<0.000000e+00> : vector<64x128xf32>
    %550 = tpu.matmul %547, %549, %cst_285 {dimension_numbers = #tpu.dot_dimension_numbers<[1], [0], [0], [1], [0, 0, 1, 1], [], []>} : vector<64x128xbf16>, vector<128x128xbf16>, vector<64x128xf32> -> vector<64x128xf32>
    %551 = arith.addf %545, %550 : vector<64x128xf32>
    %552 = vector.extract_strided_slice %514 {offsets = [0, 256, 0], sizes = [1, 64, 128], strides = [1, 1, 1]} : vector<1x576x128xbf16> to vector<1x64x128xbf16>
    %553 = vector.shape_cast %552 : vector<1x64x128xbf16> to vector<64x128xbf16>
    %c74 = arith.constant 74 : index
    %c0_286 = arith.constant 0 : index
    %c0_287 = arith.constant 0 : index
    %554 = vector.load %arg3[%c74, %c0_286, %c0_287] : memref<84x128x128xbf16, #tpu.memory_space<vmem>>, vector<1x128x128xbf16>
    %555 = vector.shape_cast %554 : vector<1x128x128xbf16> to vector<128x128xbf16>
    %cst_288 = arith.constant dense<0.000000e+00> : vector<64x128xf32>
    %556 = tpu.matmul %553, %555, %cst_288 {dimension_numbers = #tpu.dot_dimension_numbers<[1], [0], [0], [1], [0, 0, 1, 1], [], []>} : vector<64x128xbf16>, vector<128x128xbf16>, vector<64x128xf32> -> vector<64x128xf32>
    %557 = arith.addf %551, %556 : vector<64x128xf32>
    %558 = vector.extract_strided_slice %514 {offsets = [0, 320, 0], sizes = [1, 64, 128], strides = [1, 1, 1]} : vector<1x576x128xbf16> to vector<1x64x128xbf16>
    %559 = vector.shape_cast %558 : vector<1x64x128xbf16> to vector<64x128xbf16>
    %c75 = arith.constant 75 : index
    %c0_289 = arith.constant 0 : index
    %c0_290 = arith.constant 0 : index
    %560 = vector.load %arg3[%c75, %c0_289, %c0_290] : memref<84x128x128xbf16, #tpu.memory_space<vmem>>, vector<1x128x128xbf16>
    %561 = vector.shape_cast %560 : vector<1x128x128xbf16> to vector<128x128xbf16>
    %cst_291 = arith.constant dense<0.000000e+00> : vector<64x128xf32>
    %562 = tpu.matmul %559, %561, %cst_291 {dimension_numbers = #tpu.dot_dimension_numbers<[1], [0], [0], [1], [0, 0, 1, 1], [], []>} : vector<64x128xbf16>, vector<128x128xbf16>, vector<64x128xf32> -> vector<64x128xf32>
    %563 = arith.addf %557, %562 : vector<64x128xf32>
    %564 = vector.broadcast %508 : vector<1x128xf32> to vector<64x128xf32>
    %565 = arith.addf %563, %564 : vector<64x128xf32>
    %566 = vector.shape_cast %565 : vector<64x128xf32> to vector<1x64x128xf32>
    %567 = vector.extract_strided_slice %514 {offsets = [0, 192, 0], sizes = [1, 64, 128], strides = [1, 1, 1]} : vector<1x576x128xbf16> to vector<1x64x128xbf16>
    %568 = vector.shape_cast %567 : vector<1x64x128xbf16> to vector<64x128xbf16>
    %c76 = arith.constant 76 : index
    %c0_292 = arith.constant 0 : index
    %c0_293 = arith.constant 0 : index
    %569 = vector.load %arg3[%c76, %c0_292, %c0_293] : memref<84x128x128xbf16, #tpu.memory_space<vmem>>, vector<1x128x128xbf16>
    %570 = vector.shape_cast %569 : vector<1x128x128xbf16> to vector<128x128xbf16>
    %cst_294 = arith.constant dense<0.000000e+00> : vector<64x128xf32>
    %571 = tpu.matmul %568, %570, %cst_294 {dimension_numbers = #tpu.dot_dimension_numbers<[1], [0], [0], [1], [0, 0, 1, 1], [], []>} : vector<64x128xbf16>, vector<128x128xbf16>, vector<64x128xf32> -> vector<64x128xf32>
    %572 = vector.extract_strided_slice %514 {offsets = [0, 256, 0], sizes = [1, 64, 128], strides = [1, 1, 1]} : vector<1x576x128xbf16> to vector<1x64x128xbf16>
    %573 = vector.shape_cast %572 : vector<1x64x128xbf16> to vector<64x128xbf16>
    %c77 = arith.constant 77 : index
    %c0_295 = arith.constant 0 : index
    %c0_296 = arith.constant 0 : index
    %574 = vector.load %arg3[%c77, %c0_295, %c0_296] : memref<84x128x128xbf16, #tpu.memory_space<vmem>>, vector<1x128x128xbf16>
    %575 = vector.shape_cast %574 : vector<1x128x128xbf16> to vector<128x128xbf16>
    %cst_297 = arith.constant dense<0.000000e+00> : vector<64x128xf32>
    %576 = tpu.matmul %573, %575, %cst_297 {dimension_numbers = #tpu.dot_dimension_numbers<[1], [0], [0], [1], [0, 0, 1, 1], [], []>} : vector<64x128xbf16>, vector<128x128xbf16>, vector<64x128xf32> -> vector<64x128xf32>
    %577 = arith.addf %571, %576 : vector<64x128xf32>
    %578 = vector.extract_strided_slice %514 {offsets = [0, 384, 0], sizes = [1, 64, 128], strides = [1, 1, 1]} : vector<1x576x128xbf16> to vector<1x64x128xbf16>
    %579 = vector.shape_cast %578 : vector<1x64x128xbf16> to vector<64x128xbf16>
    %c78 = arith.constant 78 : index
    %c0_298 = arith.constant 0 : index
    %c0_299 = arith.constant 0 : index
    %580 = vector.load %arg3[%c78, %c0_298, %c0_299] : memref<84x128x128xbf16, #tpu.memory_space<vmem>>, vector<1x128x128xbf16>
    %581 = vector.shape_cast %580 : vector<1x128x128xbf16> to vector<128x128xbf16>
    %cst_300 = arith.constant dense<0.000000e+00> : vector<64x128xf32>
    %582 = tpu.matmul %579, %581, %cst_300 {dimension_numbers = #tpu.dot_dimension_numbers<[1], [0], [0], [1], [0, 0, 1, 1], [], []>} : vector<64x128xbf16>, vector<128x128xbf16>, vector<64x128xf32> -> vector<64x128xf32>
    %583 = arith.addf %577, %582 : vector<64x128xf32>
    %584 = vector.extract_strided_slice %514 {offsets = [0, 448, 0], sizes = [1, 64, 128], strides = [1, 1, 1]} : vector<1x576x128xbf16> to vector<1x64x128xbf16>
    %585 = vector.shape_cast %584 : vector<1x64x128xbf16> to vector<64x128xbf16>
    %c79 = arith.constant 79 : index
    %c0_301 = arith.constant 0 : index
    %c0_302 = arith.constant 0 : index
    %586 = vector.load %arg3[%c79, %c0_301, %c0_302] : memref<84x128x128xbf16, #tpu.memory_space<vmem>>, vector<1x128x128xbf16>
    %587 = vector.shape_cast %586 : vector<1x128x128xbf16> to vector<128x128xbf16>
    %cst_303 = arith.constant dense<0.000000e+00> : vector<64x128xf32>
    %588 = tpu.matmul %585, %587, %cst_303 {dimension_numbers = #tpu.dot_dimension_numbers<[1], [0], [0], [1], [0, 0, 1, 1], [], []>} : vector<64x128xbf16>, vector<128x128xbf16>, vector<64x128xf32> -> vector<64x128xf32>
    %589 = arith.addf %583, %588 : vector<64x128xf32>
    %590 = vector.broadcast %508 : vector<1x128xf32> to vector<64x128xf32>
    %591 = arith.addf %589, %590 : vector<64x128xf32>
    %592 = vector.shape_cast %591 : vector<64x128xf32> to vector<1x64x128xf32>
    %593 = vector.extract_strided_slice %514 {offsets = [0, 256, 0], sizes = [1, 64, 128], strides = [1, 1, 1]} : vector<1x576x128xbf16> to vector<1x64x128xbf16>
    %594 = vector.shape_cast %593 : vector<1x64x128xbf16> to vector<64x128xbf16>
    %c80 = arith.constant 80 : index
    %c0_304 = arith.constant 0 : index
    %c0_305 = arith.constant 0 : index
    %595 = vector.load %arg3[%c80, %c0_304, %c0_305] : memref<84x128x128xbf16, #tpu.memory_space<vmem>>, vector<1x128x128xbf16>
    %596 = vector.shape_cast %595 : vector<1x128x128xbf16> to vector<128x128xbf16>
    %cst_306 = arith.constant dense<0.000000e+00> : vector<64x128xf32>
    %597 = tpu.matmul %594, %596, %cst_306 {dimension_numbers = #tpu.dot_dimension_numbers<[1], [0], [0], [1], [0, 0, 1, 1], [], []>} : vector<64x128xbf16>, vector<128x128xbf16>, vector<64x128xf32> -> vector<64x128xf32>
    %598 = vector.extract_strided_slice %514 {offsets = [0, 320, 0], sizes = [1, 64, 128], strides = [1, 1, 1]} : vector<1x576x128xbf16> to vector<1x64x128xbf16>
    %599 = vector.shape_cast %598 : vector<1x64x128xbf16> to vector<64x128xbf16>
    %c81 = arith.constant 81 : index
    %c0_307 = arith.constant 0 : index
    %c0_308 = arith.constant 0 : index
    %600 = vector.load %arg3[%c81, %c0_307, %c0_308] : memref<84x128x128xbf16, #tpu.memory_space<vmem>>, vector<1x128x128xbf16>
    %601 = vector.shape_cast %600 : vector<1x128x128xbf16> to vector<128x128xbf16>
    %cst_309 = arith.constant dense<0.000000e+00> : vector<64x128xf32>
    %602 = tpu.matmul %599, %601, %cst_309 {dimension_numbers = #tpu.dot_dimension_numbers<[1], [0], [0], [1], [0, 0, 1, 1], [], []>} : vector<64x128xbf16>, vector<128x128xbf16>, vector<64x128xf32> -> vector<64x128xf32>
    %603 = arith.addf %597, %602 : vector<64x128xf32>
    %604 = vector.extract_strided_slice %514 {offsets = [0, 448, 0], sizes = [1, 64, 128], strides = [1, 1, 1]} : vector<1x576x128xbf16> to vector<1x64x128xbf16>
    %605 = vector.shape_cast %604 : vector<1x64x128xbf16> to vector<64x128xbf16>
    %c82 = arith.constant 82 : index
    %c0_310 = arith.constant 0 : index
    %c0_311 = arith.constant 0 : index
    %606 = vector.load %arg3[%c82, %c0_310, %c0_311] : memref<84x128x128xbf16, #tpu.memory_space<vmem>>, vector<1x128x128xbf16>
    %607 = vector.shape_cast %606 : vector<1x128x128xbf16> to vector<128x128xbf16>
    %cst_312 = arith.constant dense<0.000000e+00> : vector<64x128xf32>
    %608 = tpu.matmul %605, %607, %cst_312 {dimension_numbers = #tpu.dot_dimension_numbers<[1], [0], [0], [1], [0, 0, 1, 1], [], []>} : vector<64x128xbf16>, vector<128x128xbf16>, vector<64x128xf32> -> vector<64x128xf32>
    %609 = arith.addf %603, %608 : vector<64x128xf32>
    %610 = vector.extract_strided_slice %514 {offsets = [0, 512, 0], sizes = [1, 64, 128], strides = [1, 1, 1]} : vector<1x576x128xbf16> to vector<1x64x128xbf16>
    %611 = vector.shape_cast %610 : vector<1x64x128xbf16> to vector<64x128xbf16>
    %c83 = arith.constant 83 : index
    %c0_313 = arith.constant 0 : index
    %c0_314 = arith.constant 0 : index
    %612 = vector.load %arg3[%c83, %c0_313, %c0_314] : memref<84x128x128xbf16, #tpu.memory_space<vmem>>, vector<1x128x128xbf16>
    %613 = vector.shape_cast %612 : vector<1x128x128xbf16> to vector<128x128xbf16>
    %cst_315 = arith.constant dense<0.000000e+00> : vector<64x128xf32>
    %614 = tpu.matmul %611, %613, %cst_315 {dimension_numbers = #tpu.dot_dimension_numbers<[1], [0], [0], [1], [0, 0, 1, 1], [], []>} : vector<64x128xbf16>, vector<128x128xbf16>, vector<64x128xf32> -> vector<64x128xf32>
    %615 = arith.addf %609, %614 : vector<64x128xf32>
    %616 = vector.broadcast %508 : vector<1x128xf32> to vector<64x128xf32>
    %617 = arith.addf %615, %616 : vector<64x128xf32>
    %618 = vector.shape_cast %617 : vector<64x128xf32> to vector<1x64x128xf32>
    %619 = tpu.concatenate %540, %566, %592, %618 in 1 : vector<1x64x128xf32>, vector<1x64x128xf32>, vector<1x64x128xf32>, vector<1x64x128xf32> -> vector<1x256x128xf32>
    %620 = vector.shape_cast %619 : vector<1x256x128xf32> to vector<256x128xf32>
    %621 = arith.truncf %620 : vector<256x128xf32> to vector<256x128xbf16>
    %622 = vector.shape_cast %621 : vector<256x128xbf16> to vector<1x256x128xbf16>
    %c0_316 = arith.constant 0 : index
    %c0_317 = arith.constant 0 : index
    %623 = vector.load %arg11[%c0_316, %c0_317] : memref<256x256xbf16, #tpu.memory_space<vmem>>, vector<256x256xbf16>
    %624 = vector.shape_cast %623 : vector<256x256xbf16> to vector<1x256x256xbf16>
    "tpu.trace_start"() <{level = 10 : i32, message = "bor,bri->boi"}> : () -> ()
    %cst_318 = arith.constant dense<0.000000e+00> : vector<1x256x128xf32>
    %625 = tpu.matmul %624, %622, %cst_318 {dimension_numbers = #tpu.dot_dimension_numbers<[2], [1], [1], [2], [0, 0, 0, 1, 1, 2], [0], [0]>} : vector<1x256x256xbf16>, vector<1x256x128xbf16>, vector<1x256x128xf32> -> vector<1x256x128xf32>
    "tpu.trace_stop"() : () -> ()
    %626 = vector.shape_cast %625 : vector<1x256x128xf32> to vector<256x128xf32>
    %c0_319 = arith.constant 0 : index
    %c0_320 = arith.constant 0 : index
    %627 = vector.load %arg15[%c0_319, %c0_320] : memref<256x128xf32, #tpu.memory_space<vmem>>, vector<256x128xf32>
    tpu.vector_store %arg15[%c0_319, %c0_320], %626 {strides = array<i32>} : memref<256x128xf32, #tpu.memory_space<vmem>>, vector<256x128xf32>,
    return
  }
  func.func @transform_0(%arg0: i32) -> (i32, i32) {
    %c0_i32 = arith.constant 0 : i32
    %c0_i32_0 = arith.constant 0 : i32
    return %arg0, %c0_i32 : i32, i32
  }
  func.func @transform_1(%arg0: i32) -> (i32, i32) {
    %c0_i32 = arith.constant 0 : i32
    %c0_i32_0 = arith.constant 0 : i32
    %c0_i32_1 = arith.constant 0 : i32
    return %c0_i32, %c0_i32_0 : i32, i32
  }
  func.func @transform_2(%arg0: i32) -> (i32, i32, i32) {
    %c0_i32 = arith.constant 0 : i32
    %c0_i32_0 = arith.constant 0 : i32
    %c0_i32_1 = arith.constant 0 : i32
    %c0_i32_2 = arith.constant 0 : i32
    return %c0_i32, %c0_i32_0, %c0_i32_1 : i32, i32, i32
  }
  func.func @transform_3(%arg0: i32) -> (i32, i32, i32) {
    %c0_i32 = arith.constant 0 : i32
    %c0_i32_0 = arith.constant 0 : i32
    %c0_i32_1 = arith.constant 0 : i32
    %c0_i32_2 = arith.constant 0 : i32
    return %c0_i32, %c0_i32_0, %c0_i32_1 : i32, i32, i32
  }
  func.func @transform_4(%arg0: i32) -> (i32, i32) {
    %c0_i32 = arith.constant 0 : i32
    %c0_i32_0 = arith.constant 0 : i32
    %c0_i32_1 = arith.constant 0 : i32
    return %c0_i32, %c0_i32_0 : i32, i32
  }
  func.func @transform_5(%arg0: i32) -> (i32, i32) {
    %c0_i32 = arith.constant 0 : i32
    %c0_i32_0 = arith.constant 0 : i32
    %c0_i32_1 = arith.constant 0 : i32
    return %c0_i32, %c0_i32_0 : i32, i32
  }
  func.func @transform_6(%arg0: i32) -> (i32, i32) {
    %c0_i32 = arith.constant 0 : i32
    %c0_i32_0 = arith.constant 0 : i32
    %c0_i32_1 = arith.constant 0 : i32
    return %c0_i32, %c0_i32_0 : i32, i32
  }
  func.func @transform_7(%arg0: i32) -> (i32, i32) {
    %c0_i32 = arith.constant 0 : i32
    %c0_i32_0 = arith.constant 0 : i32
    %c0_i32_1 = arith.constant 0 : i32
    return %c0_i32, %c0_i32_0 : i32, i32
  }
  func.func @transform_8(%arg0: i32) -> (i32, i32) {
    %c0_i32 = arith.constant 0 : i32
    %c0_i32_0 = arith.constant 0 : i32
    %c0_i32_1 = arith.constant 0 : i32
    return %c0_i32, %c0_i32_0 : i32, i32
  }
  func.func @transform_9(%arg0: i32) -> (i32, i32) {
    %c0_i32 = arith.constant 0 : i32
    %c0_i32_0 = arith.constant 0 : i32
    %c0_i32_1 = arith.constant 0 : i32
    return %c0_i32, %c0_i32_0 : i32, i32
  }
  func.func @transform_10(%arg0: i32) -> (i32, i32) {
    %c0_i32 = arith.constant 0 : i32
    %c0_i32_0 = arith.constant 0 : i32
    %c0_i32_1 = arith.constant 0 : i32
    return %c0_i32, %c0_i32_0 : i32, i32
  }
  func.func @transform_11(%arg0: i32) -> (i32, i32) {
    %c0_i32 = arith.constant 0 : i32
    %c0_i32_0 = arith.constant 0 : i32
    %c0_i32_1 = arith.constant 0 : i32
    return %c0_i32, %c0_i32_0 : i32, i32
  }
  func.func @transform_12(%arg0: i32) -> (i32, i32) {
    %c0_i32 = arith.constant 0 : i32
    %c0_i32_0 = arith.constant 0 : i32
    %c0_i32_1 = arith.constant 0 : i32
    return %c0_i32, %c0_i32_0 : i32, i32
  }
  func.func @transform_13(%arg0: i32) -> (i32, i32) {
    %c0_i32 = arith.constant 0 : i32
    %c0_i32_0 = arith.constant 0 : i32
    %c0_i32_1 = arith.constant 0 : i32
    return %c0_i32, %c0_i32_0 : i32, i32
  }
  func.func @transform_14(%arg0: i32) -> (i32, i32) {
    %c0_i32 = arith.constant 0 : i32
    %c0_i32_0 = arith.constant 0 : i32
    return %arg0, %c0_i32 : i32, i32
  }
}

</mosaic_0001>

<bundles_post_ra>
// kernel: vqgan_forward.1
= control target key start
LH: loop header
LB: loop body
LE: loop exit
PB: predicated region body
PF: predicated region fallthrough
CT: control target
= control target key end

     0   :  { %s22658_s0 = inlined_call_operand.vmem [shape: f32[512,8], index: 0, kind: input, shape index: {}]   ;;  %s22659_s1 = inlined_call_operand.hbm [shape: bf16[8,128], index: 1, kind: input, shape index: {}]   ;;  %s22660_s2 = inlined_call_operand.hbm [shape: bf16[84,128,128], index: 2, kind: input, shape index: {}]   ;;  %s22661_s3 = inlined_call_operand.hbm [shape: f32[8,1,128], index: 3, kind: input, shape index: {}]   ;;  %s22662_s4 = inlined_call_operand.hbm [shape: bf16[1024,256], index: 4, kind: input, shape index: {}]   ;;  %s22663_s5 = inlined_call_operand.vmem [shape: bf16[256,64], index: 5, kind: input, shape index: {}]   ;;  %s22664_s6 = inlined_call_operand.vmem [shape: bf16[144,16], index: 6, kind: input, shape index: {}]   ;;  %s22665_s7 = inlined_call_operand.vmem [shape: bf16[144,16], index: 7, kind: input, shape index: {}]   ;;  %s22666_s8 = inlined_call_operand.vmem [shape: bf16[144,16], index: 8, kind: input, shape index: {}]   ;;  %s22667_s9 = inlined_call_operand.vmem [shape: bf16[576,64], index: 9, kind: input, shape index: {}]   ;;  %s22668_s10 = inlined_call_operand.hbm [shape: bf16[256,256], index: 10, kind: input, shape index: {}]   ;;  %s22669_s11 = inlined_call_operand.hbm [shape: bf16[128,128], index: 11, kind: input, shape index: {}]   ;;  %s22670_s12 = inlined_call_operand.hbm [shape: f32[1,128], index: 12, kind: input, shape index: {}]   ;;  %s22671_s13 = inlined_call_operand.hbm [shape: f32[128,128], index: 13, kind: input, shape index: {}]   ;;  %s22672_s14 = inlined_call_operand.vmem [shape: f32[512,128], index: 14, kind: output, shape index: {}]  }
   0x1   :  { %22683 = sst [smem:[#allocation20_spill]] %s22660_s2 }
   0x2   :  { %22684 = sst [smem:[#allocation21_spill]] %s22666_s8 }
   0x3   :  { %22685 = sst [smem:[#allocation22_spill]] %s22667_s9 }
   0x4   :  { %22686 = sst [smem:[#allocation23_spill]] %s22672_s14 }
   0x5   :  { %19 = vsyncpa [#allocation3], 0 }
   0x6   :  { %20 = vsyncpa [#allocation5], 0 }
   0x7   :  { %21 = vsyncpa [#allocation8], 0 }
   0x8   :  { %22 = vsyncpa [#allocation11], 0 }
   0x9   :  { %23 = vsyncpa [#allocation14], 0  ;;  %s20743_s29 = smov 0  }
   0xa LB: > { %s20650_s30 = smov [#allocation4]   ;;  %s22673_s16 = sadd.s32 4294967295, %s20648_s29   ;;  %s20648_s29 = sphi %s20743_s29, %s29_s29  }
   0xb   : > { %s382_s15 = sshll.u32 %s20650_s30, 4  ;;  %p14768_p0 = scmp.ge.s32.totalorder %s20648_s29, 1  ;;  %s20757_s15 = int_to_ptr.vmem [resolvable:$true] %s382_s15 }
   0xc   : > { %p359_p1 = scmp.lt.s32.totalorder %s20648_s29, 3  ;;  %p20753_p2 = scmp.eq.s32.totalorder %s22673_s16, 0 }
   0xd   : > { %s20651_s19 = smov [#allocation7]   ;;  %s20652_s22 = smov [#allocation10]  }
   0xe   : > { %s22687_s17 = scalar_select %p20753_p2, 1, 0 }
   0xf   : > { %p20759_p3 = pnand %p14768_p0, %p359_p1  ;;  %s408_s20 = sshll.u32 %s20651_s19, 4  ;;  %s20765_s20 = int_to_ptr.vmem [resolvable:$true] %s408_s20 }
  0x10   : > { %s20773_s23 = sshll.u32 %s20652_s22, 4  ;;  %s22690_s2 = sld [smem:[#allocation20_spill]]  ;;  %s450_s23 = int_to_ptr.vmem [resolvable:$true] %s20773_s23 }
  0x11   : > { %s22688_s18 = scalar_select %p20759_p3, 1, 0 }
  0x12   : > { %p19332_p4 = pneg %p20759_p3 }
  0x14   : > { %p20769_p5 = pnand %p20753_p2, %p19332_p4 }
  0x16   : > { %s20398_s26 = scalar_lea.hbm %s22690_s2, 86016  ;;  %p20783_p7 = pneg %p20769_p5 }
  0x17   : > { %p20399_p6 = scmp.ne.s32.totalorder %s22690_s2, %s20398_s26  ;;  %p20405_p10 = scmp.lt.u32.totalorder %s20398_s26, %s22690_s2 }
  0x19   : > { %p20401_p8 = pnand %p20783_p7, %p20399_p6 }
  0x1b   : > { %p20402_p9 = pneg %p20401_p8 }
  0x1d   : > { %p20407_p11 = pnand %p20405_p10, %p20402_p9 }
  0x1f   : > { %20410 = shalt.err (!%p20407_p11)
}
  0x20   : > { %s20411_s24 = scalar_lea.vmem %s20757_s15, 86016  ;;  %p20419_p1 = scmp.lt.s32.totalorder %s20757_s15, %s20757_s15 }
  0x21   : > { %p20412_p12 = scmp.ne.s32.totalorder %s20757_s15, %s20411_s24  ;;  %p20420_p4 = scmp.lt.s32.totalorder %s20411_s24, %s20411_s24 }
  0x23   : > { %p20414_p13 = pnand %p20412_p12, %p20783_p7  ;;  %p20421_p6 = por %p20420_p4, %p20419_p1 }
  0x25   : > { %p20415_p0 = pneg %p20414_p13 }
  0x27   : > { %p20422_p8 = pnand %p20421_p6, %p20415_p0 }
  0x29   : > { %20425 = shalt.err (!%p20422_p8)
}
  0x2a   : > { %s22676_s25 = smov 64   ;;  %s22677_s26 = smov 4  }
  0x2b   : > { %19338 = dma.hbm_to_vmem [thread:$0]  (!%p20769_p5), %s22690_s2, 86016, %s20757_s15, [#allocation5], %s22676_s25, %s22676_s25, %s22677_s26  }
  0x2c   : > { %s20426_s24 = scalar_lea.hbm %s22662_s4, 16384 }
  0x2d   : > { %p20427_p9 = scmp.ne.s32.totalorder %s22662_s4, %s20426_s24  ;;  %p20433_p12 = scmp.lt.u32.totalorder %s20426_s24, %s22662_s4 }
  0x2f   : > { %p20429_p10 = pnand %p20427_p9, %p20783_p7 }
  0x31   : > { %p20430_p11 = pneg %p20429_p10 }
  0x33   : > { %p20435_p13 = pnand %p20433_p12, %p20430_p11 }
  0x35   : > { %20438 = shalt.err (!%p20435_p13)
}
  0x36   : > { %s20439_s15 = scalar_lea.vmem %s20765_s20, 16384  ;;  %p20447_p6 = scmp.lt.s32.totalorder %s20765_s20, %s20765_s20 }
  0x37   : > { %p20440_p0 = scmp.ne.s32.totalorder %s20765_s20, %s20439_s15  ;;  %p20448_p8 = scmp.lt.s32.totalorder %s20439_s15, %s20439_s15 }
  0x39   : > { %p20442_p1 = pnand %p20440_p0, %p20783_p7  ;;  %p20449_p9 = por %p20448_p8, %p20447_p6 }
  0x3b   : > { %p20443_p4 = pneg %p20442_p1 }
  0x3d   : > { %p20450_p10 = pnand %p20449_p9, %p20443_p4 }
  0x3f   : > { %20453 = shalt.err (!%p20450_p10)
}
  0x40   : > { %s22681_s14 = smov 128   ;;  %s20656_s8 = smov 8  }
  0x41   : > { %19344 = dma.hbm_to_vmem [thread:$0]  (!%p20769_p5), %s22662_s4, 16384, %s20765_s20, [#allocation8], %s22681_s14, %s22681_s14, %s20656_s8  }
  0x42   : > { %s20657_s27 = smov [#allocation2]   ;;  %s20454_s24 = scalar_lea.hbm %s22669_s11, 1024 }
  0x43   : > { %s372_s28 = sshll.u32 %s20657_s27, 4  ;;  %p20455_p11 = scmp.ne.s32.totalorder %s22669_s11, %s20454_s24  ;;  %s373_s28 = int_to_ptr.vmem [resolvable:$true] %s372_s28 }
  0x44   : > { %p20461_p0 = scmp.lt.u32.totalorder %s20454_s24, %s22669_s11 }
  0x45   : > { %p20457_p12 = pnand %p20455_p11, %p20783_p7 }
  0x47   : > { %p20458_p13 = pneg %p20457_p12 }
  0x49   : > { %p20463_p1 = pnand %p20461_p0, %p20458_p13 }
  0x4b   : > { %20466 = shalt.err (!%p20463_p1)
}
  0x4c   : > { %s20467_s20 = scalar_lea.vmem %s450_s23, 1024  ;;  %p20475_p9 = scmp.lt.s32.totalorder %s450_s23, %s450_s23 }
  0x4d   : > { %p20468_p4 = scmp.ne.s32.totalorder %s450_s23, %s20467_s20  ;;  %p20476_p10 = scmp.lt.s32.totalorder %s20467_s20, %s20467_s20 }
  0x4f   : > { %p20470_p6 = pnand %p20468_p4, %p20783_p7  ;;  %p20477_p2 = por %p20476_p10, %p20475_p9 }
  0x51   : > { %p20471_p8 = pneg %p20470_p6 }
  0x53   : > { %p20478_p3 = pnand %p20477_p2, %p20471_p8 }
  0x55   : > { %20481 = shalt.err (!%p20478_p3)
}
  0x56   : > { %s22692_s25 = smov 4   ;;  %s22693_s9 = smov 64  }
  0x57   : > { %19350 = dma.hbm_to_vmem [thread:$0]  (!%p20769_p5), %s22669_s11, 1024, %s450_s23, [#allocation11], %s22693_s9, %s22693_s9, %s22692_s25  }
  0x58   : > { %s20482_s19 = scalar_lea.hbm %s22659_s1, 64 }
  0x59   : > { %p20483_p2 = scmp.ne.s32.totalorder %s22659_s1, %s20482_s19  ;;  %p20489_p12 = scmp.lt.u32.totalorder %s20482_s19, %s22659_s1 }
  0x5b   : > { %p20485_p3 = pnand %p20483_p2, %p20783_p7 }
  0x5d   : > { %p20486_p11 = pneg %p20485_p3 }
  0x5f   : > { %p20491_p13 = pnand %p20489_p12, %p20486_p11 }
  0x61   : > { %20494 = shalt.err (!%p20491_p13)
}
  0x62   : > { %s20495_s2 = scalar_lea.vmem %s373_s28, 64  ;;  %p20503_p6 = scmp.lt.s32.totalorder %s373_s28, %s373_s28 }
  0x63   : > { %p20496_p0 = scmp.ne.s32.totalorder %s373_s28, %s20495_s2  ;;  %p20504_p8 = scmp.lt.s32.totalorder %s20495_s2, %s20495_s2 }
  0x65   : > { %p20498_p1 = pnand %p20496_p0, %p20783_p7  ;;  %p20505_p9 = por %p20504_p8, %p20503_p6 }
  0x67   : > { %p20499_p4 = pneg %p20498_p1 }
  0x69   : > { %p20506_p10 = pnand %p20505_p9, %p20499_p4 }
  0x6b   : > { %20509 = shalt.err (!%p20506_p10)
}
  0x6c   : > { %19335 = dma.hbm_to_vmem [thread:$0]  (!%p20769_p5), %s22659_s1, 64, %s373_s28, [#allocation3]  }
  0x6d   : > { %s20658_s9 = smov [#allocation6]   ;;  %s20510_s19 = scalar_lea.hbm %s22661_s3, 128 }
  0x6e   : > { %s395_s26 = sshll.u32 %s20658_s9, 4  ;;  %p20511_p2 = scmp.ne.s32.totalorder %s22661_s3, %s20510_s19  ;;  %s396_s26 = int_to_ptr.vmem [resolvable:$true] %s395_s26 }
  0x6f   : > { %p20517_p12 = scmp.lt.u32.totalorder %s20510_s19, %s22661_s3 }
  0x70   : > { %p20513_p3 = pnand %p20511_p2, %p20783_p7 }
  0x72   : > { %p20514_p11 = pneg %p20513_p3 }
  0x74   : > { %p20519_p13 = pnand %p20517_p12, %p20514_p11 }
  0x76   : > { %20522 = shalt.err (!%p20519_p13)
}
  0x77   : > { %s20523_s28 = scalar_lea.vmem %s396_s26, 128  ;;  %p20531_p6 = scmp.lt.s32.totalorder %s396_s26, %s396_s26 }
  0x78   : > { %p20524_p0 = scmp.ne.s32.totalorder %s396_s26, %s20523_s28  ;;  %p20532_p8 = scmp.lt.s32.totalorder %s20523_s28, %s20523_s28 }
  0x7a   : > { %p20526_p1 = pnand %p20524_p0, %p20783_p7  ;;  %p20533_p9 = por %p20532_p8, %p20531_p6 }
  0x7c   : > { %p20527_p4 = pneg %p20526_p1 }
  0x7e   : > { %p20534_p10 = pnand %p20533_p9, %p20527_p4 }
  0x80   : > { %20537 = shalt.err (!%p20534_p10)
}
  0x81   : > { %s20659_s2 = smov 16   ;;  %s20660_s23 = smov 1  }
  0x82   : > { %19341 = dma.hbm_to_vmem [thread:$0]  (!%p20769_p5), %s22661_s3, 128, %s396_s26, [#allocation5], %s20659_s2, %s20659_s2, %s20660_s23  }
  0x83   : > { %s20661_s16 = smov [#allocation9]   ;;  %s20662_s19 = smov [#allocation12]  }
  0x84   : > { %s436_s27 = sshll.u32 %s20661_s16, 4  ;;  %s463_s22 = sshll.u32 %s20662_s19, 4  ;;  %s437_s27 = int_to_ptr.vmem [resolvable:$true] %s436_s27  ;;  %s20891_s22 = int_to_ptr.vmem [resolvable:$true] %s463_s22 }
  0x85   : > { %s20538_s20 = scalar_lea.hbm %s22668_s10, 4096 }
  0x86   : > { %p20539_p2 = scmp.ne.s32.totalorder %s22668_s10, %s20538_s20  ;;  %p20545_p12 = scmp.lt.u32.totalorder %s20538_s20, %s22668_s10 }
  0x88   : > { %p20541_p3 = pnand %p20539_p2, %p20783_p7 }
  0x8a   : > { %p20542_p11 = pneg %p20541_p3 }
  0x8c   : > { %p20547_p13 = pnand %p20545_p12, %p20542_p11 }
  0x8e   : > { %20550 = shalt.err (!%p20547_p13)
}
  0x8f   : > { %s20551_s2 = scalar_lea.vmem %s437_s27, 4096  ;;  %p20559_p6 = scmp.lt.s32.totalorder %s437_s27, %s437_s27 }
  0x90   : > { %p20552_p0 = scmp.ne.s32.totalorder %s437_s27, %s20551_s2  ;;  %p20560_p8 = scmp.lt.s32.totalorder %s20551_s2, %s20551_s2 }
  0x92   : > { %p20554_p1 = pnand %p20552_p0, %p20783_p7  ;;  %p20561_p9 = por %p20560_p8, %p20559_p6 }
  0x94   : > { %p20555_p4 = pneg %p20554_p1 }
  0x96   : > { %p20562_p10 = pnand %p20561_p9, %p20555_p4 }
  0x98   : > { %20565 = shalt.err (!%p20562_p10)
}
  0x99   : > { %s22694_s14 = smov 128   ;;  %s20566_s24 = scalar_lea.hbm %s22670_s12, 16 }
  0x9a   : > { %19347 = dma.hbm_to_vmem [thread:$0]  (!%p20769_p5), %s22668_s10, 4096, %s437_s27, [#allocation8], %s22694_s14, %s22694_s14, %s20656_s8  }
  0x9b   : > { %p20567_p2 = scmp.ne.s32.totalorder %s22670_s12, %s20566_s24  ;;  %p20573_p12 = scmp.lt.u32.totalorder %s20566_s24, %s22670_s12 }
  0x9d   : > { %p20569_p3 = pnand %p20567_p2, %p20783_p7 }
  0x9f   : > { %p20570_p11 = pneg %p20569_p3 }
  0xa1   : > { %p20575_p13 = pnand %p20573_p12, %p20570_p11 }
  0xa3   : > { %20578 = shalt.err (!%p20575_p13)
}
  0xa4   : > { %s20579_s27 = scalar_lea.vmem %s20891_s22, 16  ;;  %s20586_s26 = scalar_lea.vmem %s20891_s22, 32 }
  0xa5   : > { %p20580_p0 = scmp.ne.s32.totalorder %s20891_s22, %s20579_s27  ;;  %p20587_p6 = scmp.lt.s32.totalorder %s20891_s22, %s20891_s22 }
  0xa6   : > { %p20588_p8 = scmp.lt.s32.totalorder %s20586_s26, %s20579_s27 }
  0xa7   : > { %p20582_p1 = pnand %p20580_p0, %p20783_p7 }
  0xa8   : > { %p20589_p9 = por %p20588_p8, %p20587_p6 }
  0xa9   : > { %p20583_p4 = pneg %p20582_p1 }
  0xab   : > { %p20590_p10 = pnand %p20589_p9, %p20583_p4 }
  0xad   : > { %20593 = shalt.err (!%p20590_p10)
}
  0xae   : > { %19353 = dma.hbm_to_vmem [thread:$0]  (!%p20769_p5), %s22670_s12, 16, %s20891_s22, [#allocation11]  }
  0xaf   : > { %s20663_s9 = smov [#allocation13]   ;;  %s20594_s15 = scalar_lea.hbm %s22671_s13, 2048 }
  0xb0   : > { %s473_s16 = sshll.u32 %s20663_s9, 4  ;;  %p20595_p2 = scmp.ne.s32.totalorder %s22671_s13, %s20594_s15  ;;  %s474_s16 = int_to_ptr.vmem [resolvable:$true] %s473_s16 }
  0xb1   : > { %p20601_p12 = scmp.lt.u32.totalorder %s20594_s15, %s22671_s13 }
  0xb2   : > { %p20597_p3 = pnand %p20595_p2, %p20783_p7 }
  0xb4   : > { %p20598_p11 = pneg %p20597_p3 }
  0xb6   : > { %p20603_p13 = pnand %p20601_p12, %p20598_p11 }
  0xb8   : > { %20606 = shalt.err (!%p20603_p13)
}
  0xb9   : > { %s20607_s22 = scalar_lea.vmem %s474_s16, 2048  ;;  %p20615_p6 = scmp.lt.s32.totalorder %s474_s16, %s474_s16 }
  0xba   : > { %p20608_p0 = scmp.ne.s32.totalorder %s474_s16, %s20607_s22  ;;  %p20616_p8 = scmp.lt.s32.totalorder %s20607_s22, %s20607_s22 }
  0xbc   : > { %p20610_p1 = pnand %p20608_p0, %p20783_p7  ;;  %p20617_p9 = por %p20616_p8, %p20615_p6 }
  0xbe   : > { %p20611_p4 = pneg %p20610_p1 }
  0xc0   : > { %p20618_p10 = pnand %p20617_p9, %p20611_p4 }
  0xc2   : > { %20621 = shalt.err (!%p20618_p10)
}
  0xc3   : > { %19356 = dma.hbm_to_vmem [thread:$0]  (!%p20769_p5), %s22671_s13, 2048, %s474_s16, [#allocation14], %s22694_s14, %s22694_s14, %s20656_s8  }
  0xc4   : > { %p22695_p2 = scmp.ne.s32.totalorder %s22688_s18, 0 }
  0xc5   : > { %p22696_p7 = scmp.ne.s32.totalorder (!%p22695_p2), %s22687_s17, 0 }
  0xc6   : > { %498 = sbr.rel (%p22695_p2) target bundleno = 6395 (0x18fb), region = 76 }
  0xcd   : > { %20627 = dma.done.wait (%p22696_p7), [#allocation3], 64  }
  0xce   : > { %20629 = vsyncadd (%p22696_p7), [#allocation3], 4294967232 }
  0xcf   : > { %20631 = dma.done.wait (%p22696_p7), [#allocation5], 86144  }
  0xd0   : > { %20633 = vsyncadd (%p22696_p7), [#allocation5], 4294881152 }
  0xd1   : > { %20635 = dma.done.wait (%p22696_p7), [#allocation8], 20480  }
  0xd2   : > { %20637 = vsyncadd (%p22696_p7), [#allocation8], 4294946816 }
  0xd3   : > { %20639 = dma.done.wait (%p22696_p7), [#allocation11], 1040  }
  0xd4   : > { %20641 = vsyncadd (%p22696_p7), [#allocation11], 4294966256 }
  0xd5   : > { %20643 = dma.done.wait (%p22696_p7), [#allocation14], 2048  }
  0xd6   : > { %20645 = vsyncadd (%p22696_p7), [#allocation14], 4294965248  ;;  %s22697_s18 = sadd.s32 4294967295, %s20648_s29   ;;  %vm683_vm0 = vcmask 1043456   ;;  %v633_v0 = vld [vmem:[#allocation2] sm:$0xf] }
  0xd7   : > { %s14787_s21 = sshll.u32 %s22697_s18, 5  ;;  %vm634_vm1 = vcmask 64512   ;;  %19299 = vmatprep.subr.msk.bf16.mxu0 %vm683_vm0, %v633_v0  ;;  %v685_v3 = vsel %vm683_vm0, %v633_v0, 0  ;;  %v20664_v50 = vmov 0   ;;  %v19401_v51 = vld [vmem:[#allocation7 + $0x4] ss:$8 sps:$4 sm:$0xff]  }
  0xd8   : > { %p573_p5 = scmp.lt.s32.totalorder %s14787_s21, 63  ;;  %16919 = vmatpush3.bf16.msra.mxu0 %v685_v3  ;;  %1633 = vmatprep.subr.bf16.mxu1 %v20664_v50  ;;  %vm4573_vm2 = vcmask 523264   ;;  %vm20666_vm3 = vmmov 0   ;;  %vm6599_vm4 = vcmask 130048   ;;  %s22698_s16 = sld [smem:[#allocation21_spill]] }
  0xd9   : > { %1665 = vmatprep.mubr.bf16.mxu1 %v19401_v51  ;;  %v19422_v51 = vld [vmem:[#allocation7 + $0x70] ss:$8 sps:$4 sm:$0xff]   ;;  %s22699_s15 = sld [smem:[#allocation22_spill]]  ;;  %s22700_s9 = sld [smem:[#allocation23_spill]] }
  0xda   : > { %s22702_s21 = smov (!%p573_p5, %s14787_s21), 63 }
  0xdb   : > { %s14788_s30 = sshll.u32 %s22702_s21, 3 }
  0xdc   : > { %s20991_s23 = scalar_lea.vmem %s22658_s0, %s14788_s30 }
  0xdd   : > { %v585_v1 = vld [vmem:[%s20991_s23] sm:$0xff]  ;;  %v586_v2 = vld [vmem:[%s20991_s23 + $0x8] sm:$0xff]  ;;  %v587_v5 = vld [vmem:[%s20991_s23 + $0x10] sm:$0xff] }
  0xde   : > { %v617_v4 = vpack.c.bf16 %v586_v2, %v585_v1  ;;  %v588_v6 = vld [vmem:[%s20991_s23 + $0x18] sm:$0xff]  ;;  %v589_v7 = vld [vmem:[%s20991_s23 + $0x20] sm:$0xff]  ;;  %v590_v9 = vld [vmem:[%s20991_s23 + $0x28] sm:$0xff] }
  0xdf   : > { %v618_v8 = vpack.c.bf16 %v588_v6, %v587_v5  ;;  %v619_v10 = vpack.c.bf16 %v590_v9, %v589_v7  ;;  %v591_v11 = vld [vmem:[%s20991_s23 + $0x30] sm:$0xff]  ;;  %v592_v12 = vld [vmem:[%s20991_s23 + $0x38] sm:$0xff]  ;;  %v593_v13 = vld [vmem:[%s20991_s23 + $0x40] sm:$0xff]  ;;  %s22621_s19 = scalar_lea.vmem %s22700_s9, %s14788_s30 }
  0xe0   : > { %16920 = vmatprep.mubr.msk.bf16.mxu0 %vm634_vm1, %v617_v4  ;;  %v594_v14 = vld [vmem:[%s20991_s23 + $0x48] sm:$0xff]  ;;  %v620_v15 = vpack.c.bf16 %v592_v12, %v591_v11  ;;  %v595_v17 = vld [vmem:[%s20991_s23 + $0x50] sm:$0xff]  ;;  %v596_v18 = vld [vmem:[%s20991_s23 + $0x58] sm:$0xff] }
  0xe1   : > { %16921 = vmatmul.mubr.msk.bf16.vlgmr.msra.gmra.mrb[0].mxu0 %vm634_vm1, %v618_v8  ;;  %v621_v16 = vpack.c.bf16 %v594_v14, %v593_v13  ;;  %v597_v19 = vld [vmem:[%s20991_s23 + $0x60] sm:$0xff]  ;;  %v598_v20 = vld [vmem:[%s20991_s23 + $0x68] sm:$0xff]  ;;  %v622_v21 = vpack.c.bf16 %v596_v18, %v595_v17  ;;  %v599_v23 = vld [vmem:[%s20991_s23 + $0x70] sm:$0xff] }
  0xe2   : > { %16924 = vmatprep.mubr.msk.bf16.mxu0 %vm634_vm1, %v619_v10  ;;  %v623_v22 = vpack.c.bf16 %v598_v20, %v597_v19  ;;  %v600_v24 = vld [vmem:[%s20991_s23 + $0x78] sm:$0xff]  ;;  %v601_v25 = vld [vmem:[%s20991_s23 + $0x80] sm:$0xff]  ;;  %v602_v26 = vld [vmem:[%s20991_s23 + $0x88] sm:$0xff] }
  0xe3   : > { %v624_v27 = vpack.c.bf16 %v600_v24, %v599_v23  ;;  %v625_v28 = vpack.c.bf16 %v602_v26, %v601_v25  ;;  %v603_v29 = vld [vmem:[%s20991_s23 + $0x90] sm:$0xff]  ;;  %v604_v30 = vld [vmem:[%s20991_s23 + $0x98] sm:$0xff]  ;;  %v605_v31 = vld [vmem:[%s20991_s23 + $0xa0] sm:$0xff] }
  0xe4   : > { %v606_v32 = vld [vmem:[%s20991_s23 + $0xa8] sm:$0xff]  ;;  %v626_v33 = vpack.c.bf16 %v604_v30, %v603_v29  ;;  %v607_v35 = vld [vmem:[%s20991_s23 + $0xb0] sm:$0xff]  ;;  %v608_v36 = vld [vmem:[%s20991_s23 + $0xb8] sm:$0xff] }
  0xe5   : > { %v627_v34 = vpack.c.bf16 %v606_v32, %v605_v31  ;;  %v609_v37 = vld [vmem:[%s20991_s23 + $0xc0] sm:$0xff]  ;;  %v610_v38 = vld [vmem:[%s20991_s23 + $0xc8] sm:$0xff]  ;;  %v628_v39 = vpack.c.bf16 %v608_v36, %v607_v35  ;;  %v611_v41 = vld [vmem:[%s20991_s23 + $0xd0] sm:$0xff] }
  0xe6   : > { %v629_v40 = vpack.c.bf16 %v610_v38, %v609_v37  ;;  %v612_v42 = vld [vmem:[%s20991_s23 + $0xd8] sm:$0xff]  ;;  %v613_v43 = vld [vmem:[%s20991_s23 + $0xe0] sm:$0xff]  ;;  %v614_v44 = vld [vmem:[%s20991_s23 + $0xe8] sm:$0xff] }
  0xe7   : > { %v630_v45 = vpack.c.bf16 %v612_v42, %v611_v41  ;;  %v631_v46 = vpack.c.bf16 %v614_v44, %v613_v43  ;;  %v615_v47 = vld [vmem:[%s20991_s23 + $0xf0] sm:$0xff]  ;;  %v616_v48 = vld [vmem:[%s20991_s23 + $0xf8] sm:$0xff]  ;;  %v19402_v37 = vld [vmem:[#allocation7 + $0x14] ss:$8 sps:$4 sm:$0xff]  }
  0xe8   : > { %v632_v49 = vpack.c.bf16 %v616_v48, %v615_v47  ;;  %v19399_v36 = vld [vmem:[#allocation7] ss:$8 sps:$4 sm:$0xff]   ;;  %v19404_v38 = vld [vmem:[#allocation7 + $0x10] ss:$8 sps:$4 sm:$0xff]   ;;  %v19408_v41 = vld [vmem:[#allocation7 + $0x34] ss:$8 sps:$4 sm:$0xff]  }
  0xe9   : > { %16925 = vmatmul.mubr.msk.bf16.gmra.mrb[4].mxu0 %vm634_vm1, %v620_v15  ;;  %v19410_v42 = vld [vmem:[#allocation7 + $0x30] ss:$8 sps:$4 sm:$0xff]   ;;  %v19411_v43 = vld [vmem:[#allocation7 + $0x44] ss:$8 sps:$4 sm:$0xff]   ;;  %v19413_v44 = vld [vmem:[#allocation7 + $0x40] ss:$8 sps:$4 sm:$0xff]  }
  0xea   : > { %16928 = vmatprep.mubr.msk.bf16.mxu0 %vm634_vm1, %v621_v16  ;;  %v19417_v47 = vld [vmem:[#allocation7 + $0x64] ss:$8 sps:$4 sm:$0xff]   ;;  %v19419_v48 = vld [vmem:[#allocation7 + $0x60] ss:$8 sps:$4 sm:$0xff]  }
  0xf1   : > { %16929 = vmatmul.mubr.msk.bf16.gmra.mrb[8].mxu0 %vm634_vm1, %v622_v21 }
  0xf2   : > { %16932 = vmatprep.mubr.msk.bf16.mxu0 %vm634_vm1, %v623_v22 }
  0xf9   : > { %16933 = vmatmul.mubr.msk.bf16.gmra.mrb[12].mxu0 %vm634_vm1, %v624_v27 }
  0xfa   : > { %16936 = vmatprep.mubr.msk.bf16.mxu0 %vm634_vm1, %v625_v28 }
 0x101   : > { %16937 = vmatmul.mubr.msk.bf16.gmra.mrb[16].mxu0 %vm634_vm1, %v626_v33 }
 0x102   : > { %16940 = vmatprep.mubr.msk.bf16.mxu0 %vm634_vm1, %v627_v34 }
 0x109   : > { %16941 = vmatmul.mubr.msk.bf16.gmra.mrb[20].mxu0 %vm634_vm1, %v628_v39  ;;  %v19405_v39 = vld [vmem:[#allocation7 + $0x24] ss:$8 sps:$4 sm:$0xff]  }
 0x10a   : > { %16944 = vmatprep.mubr.msk.bf16.mxu0 %vm634_vm1, %v629_v40  ;;  %v19407_v40 = vld [vmem:[#allocation7 + $0x20] ss:$8 sps:$4 sm:$0xff]  }
 0x111   : > { %16945 = vmatmul.mubr.msk.bf16.gmra.mrb[24].mxu0 %vm634_vm1, %v630_v45  ;;  %v19414_v45 = vld [vmem:[#allocation7 + $0x54] ss:$8 sps:$4 sm:$0xff]  }
 0x112   : > { %16948 = vmatprep.mubr.msk.bf16.mxu0 %vm634_vm1, %v631_v46  ;;  %v19416_v46 = vld [vmem:[#allocation7 + $0x50] ss:$8 sps:$4 sm:$0xff]  }
 0x119   : > { %16949 = vmatmul.mubr.msk.bf16.gmra.mrb[28].mxu0 %vm634_vm1, %v632_v49  ;;  %v19420_v49 = vld [vmem:[#allocation7 + $0x74] ss:$8 sps:$4 sm:$0xff]  }
 0x1b4   : > { %v16922_v52 = vpop.f32.mrb[0].mxu0 }
 0x1b5   : > { %v721_v53 = vpop.f32.mrb[1].mxu0 }
 0x1b6   : > { %v16923_v54 = vpop.f32.mrb[2].mxu0 }
 0x1b7   : > { %v850_v55 = vpack.c.bf16 %v16923_v54, %v16922_v52  ;;  %v724_v56 = vpop.f32.mrb[3].mxu0  ;;  %v19423_v52 = vld [vmem:[#allocation7 + $0x84] ss:$8 sps:$4 sm:$0xff]   ;;  %v19425_v54 = vld [vmem:[#allocation7 + $0x80] ss:$8 sps:$4 sm:$0xff]  }
 0x1b8   : > { %v849_v57 = vpack.c.bf16 %v724_v56, %v721_v53  ;;  %v19472_v53 = vld [vmem:[#allocation4 + $0x48] sm:$0xff]   ;;  %v19428_v56 = vld [vmem:[#allocation7 + $0x90] ss:$8 sps:$4 sm:$0xff]  }
 0x1ba   : > { %1634 = vmatpush1.bf16.msra.mxu1 %v849_v57  ;;  %v19429_v57 = vld [vmem:[#allocation7 + $0xa4] ss:$8 sps:$4 sm:$0xff]  }
 0x1bb   : > { %1635 = vmatprep.subr.bf16.mxu1 %v20664_v50 }
 0x1bc   : > { %v16926_v58 = vpop.f32.mrb[4].mxu0 }
 0x1bd   : > { %v737_v59 = vpop.f32.mrb[5].mxu0 }
 0x1be   : > { %v16927_v60 = vpop.f32.mrb[6].mxu0  ;;  %1636 = vmatpush1.bf16.msra.mxu1 %v850_v55  ;;  %v19426_v55 = vld [vmem:[#allocation7 + $0x94] ss:$8 sps:$4 sm:$0xff]  }
 0x1bf   : > { %v852_v61 = vpack.c.bf16 %v16927_v60, %v16926_v58  ;;  %v740_v62 = vpop.f32.mrb[7].mxu0  ;;  %1637 = vmatprep.subr.bf16.mxu1 %v20664_v50  ;;  %v19431_v58 = vld [vmem:[#allocation7 + $0xa0] ss:$8 sps:$4 sm:$0xff]   ;;  %v19434_v60 = vld [vmem:[#allocation7 + $0xb0] ss:$8 sps:$4 sm:$0xff]  }
 0x1c0   : > { %v851_v63 = vpack.c.bf16 %v740_v62, %v737_v59  ;;  %v19432_v59 = vld [vmem:[#allocation7 + $0xb4] ss:$8 sps:$4 sm:$0xff]   ;;  %v19476_v62 = vld [vmem:[#allocation4 + $0x50] sm:$0xff]  }
 0x1c2   : > { %1638 = vmatpush1.bf16.msra.mxu1 %v851_v63  ;;  %v19437_v63 = vld [vmem:[#allocation7 + $0xc0] ss:$8 sps:$4 sm:$0xff]  }
 0x1c3   : > { %1639 = vmatprep.subr.bf16.mxu1 %v20664_v50 }
 0x1c4   : > { %v16930_v0 = vpop.f32.mrb[8].mxu0 }
 0x1c5   : > { %v753_v1 = vpop.f32.mrb[9].mxu0 }
 0x1c6   : > { %v16931_v2 = vpop.f32.mrb[10].mxu0  ;;  %1640 = vmatpush1.bf16.msra.mxu1 %v852_v61  ;;  %v19435_v61 = vld [vmem:[#allocation7 + $0xc4] ss:$8 sps:$4 sm:$0xff]  }
 0x1c7   : > { %v854_v3 = vpack.c.bf16 %v16931_v2, %v16930_v0  ;;  %v756_v4 = vpop.f32.mrb[11].mxu0  ;;  %1641 = vmatprep.subr.bf16.mxu1 %v20664_v50  ;;  %v19438_v0 = vld [vmem:[#allocation7 + $0xd4] ss:$8 sps:$4 sm:$0xff]   ;;  %v19440_v2 = vld [vmem:[#allocation7 + $0xd0] ss:$8 sps:$4 sm:$0xff]  }
 0x1c8   : > { %v853_v5 = vpack.c.bf16 %v756_v4, %v753_v1  ;;  %v19480_v1 = vld [vmem:[#allocation4 + $0x58] sm:$0xff]   ;;  %v19484_v4 = vld [vmem:[#allocation4 + $0x60] sm:$0xff]  }
 0x1ca   : > { %1642 = vmatpush1.bf16.msra.mxu1 %v853_v5  ;;  %v19443_v5 = vld [vmem:[#allocation7 + $0xe0] ss:$8 sps:$4 sm:$0xff]  }
 0x1cb   : > { %1643 = vmatprep.subr.bf16.mxu1 %v20664_v50 }
 0x1cc   : > { %v16934_v6 = vpop.f32.mrb[12].mxu0 }
 0x1cd   : > { %v769_v7 = vpop.f32.mrb[13].mxu0 }
 0x1ce   : > { %v16935_v8 = vpop.f32.mrb[14].mxu0  ;;  %1644 = vmatpush1.bf16.msra.mxu1 %v854_v3  ;;  %v19441_v3 = vld [vmem:[#allocation7 + $0xe4] ss:$8 sps:$4 sm:$0xff]  }
 0x1cf   : > { %v856_v9 = vpack.c.bf16 %v16935_v8, %v16934_v6  ;;  %v772_v10 = vpop.f32.mrb[15].mxu0  ;;  %1645 = vmatprep.subr.bf16.mxu1 %v20664_v50  ;;  %v19444_v6 = vld [vmem:[#allocation7 + $0xf4] ss:$8 sps:$4 sm:$0xff]   ;;  %v19446_v8 = vld [vmem:[#allocation7 + $0xf0] ss:$8 sps:$4 sm:$0xff]  }
 0x1d0   : > { %v855_v11 = vpack.c.bf16 %v772_v10, %v769_v7  ;;  %v19488_v7 = vld [vmem:[#allocation4 + $0x68] sm:$0xff]   ;;  %v19492_v10 = vld [vmem:[#allocation4 + $0x70] sm:$0xff]  }
 0x1d2   : > { %1646 = vmatpush1.bf16.msra.mxu1 %v855_v11  ;;  %v19495_v11 = vld [vmem:[#allocation4 + $0x78] sm:$0xff]  }
 0x1d3   : > { %1647 = vmatprep.subr.bf16.mxu1 %v20664_v50 }
 0x1d4   : > { %v16938_v12 = vpop.f32.mrb[16].mxu0 }
 0x1d5   : > { %v785_v13 = vpop.f32.mrb[17].mxu0 }
 0x1d6   : > { %v16939_v14 = vpop.f32.mrb[18].mxu0  ;;  %1648 = vmatpush1.bf16.msra.mxu1 %v856_v9  ;;  %v19447_v9 = vld [vmem:[#allocation7 + $0x104] ss:$8 sps:$4 sm:$0xff]  }
 0x1d7   : > { %v858_v15 = vpack.c.bf16 %v16939_v14, %v16938_v12  ;;  %v788_v16 = vpop.f32.mrb[19].mxu0  ;;  %1649 = vmatprep.subr.bf16.mxu1 %v20664_v50  ;;  %v19449_v12 = vld [vmem:[#allocation7 + $0x100] ss:$8 sps:$4 sm:$0xff]   ;;  %v21057_v14 = vld [vmem:[#allocation4] sm:$0xff]  }
 0x1d8   : > { %v857_v17 = vpack.c.bf16 %v788_v16, %v785_v13  ;;  %v19450_v13 = vld [vmem:[#allocation7 + $0x114] ss:$8 sps:$4 sm:$0xff]   ;;  %v19453_v16 = vld [vmem:[#allocation7 + $0x124] ss:$8 sps:$4 sm:$0xff]  }
 0x1da   : > { %1650 = vmatpush1.bf16.msra.mxu1 %v857_v17  ;;  %v19455_v17 = vld [vmem:[#allocation7 + $0x120] ss:$8 sps:$4 sm:$0xff]  }
 0x1db   : > { %1651 = vmatprep.subr.bf16.mxu1 %v20664_v50 }
 0x1dc   : > { %v16942_v18 = vpop.f32.mrb[20].mxu0 }
 0x1dd   : > { %v801_v19 = vpop.f32.mrb[21].mxu0 }
 0x1de   : > { %v16943_v20 = vpop.f32.mrb[22].mxu0  ;;  %1652 = vmatpush1.bf16.msra.mxu1 %v858_v15  ;;  %v19452_v15 = vld [vmem:[#allocation7 + $0x110] ss:$8 sps:$4 sm:$0xff]  }
 0x1df   : > { %v860_v21 = vpack.c.bf16 %v16943_v20, %v16942_v18  ;;  %v804_v22 = vpop.f32.mrb[23].mxu0  ;;  %1653 = vmatprep.subr.bf16.mxu1 %v20664_v50  ;;  %v19456_v18 = vld [vmem:[#allocation7 + $0x134] ss:$8 sps:$4 sm:$0xff]   ;;  %v19459_v20 = vld [vmem:[#allocation7 + $0x144] ss:$8 sps:$4 sm:$0xff]  }
 0x1e0   : > { %v859_v23 = vpack.c.bf16 %v804_v22, %v801_v19  ;;  %v19458_v19 = vld [vmem:[#allocation7 + $0x130] ss:$8 sps:$4 sm:$0xff]   ;;  %v19462_v22 = vld [vmem:[#allocation7 + $0x154] ss:$8 sps:$4 sm:$0xff]  }
 0x1e2   : > { %1654 = vmatpush1.bf16.msra.mxu1 %v859_v23  ;;  %v19464_v23 = vld [vmem:[#allocation7 + $0x150] ss:$8 sps:$4 sm:$0xff]  }
 0x1e3   : > { %1655 = vmatprep.subr.bf16.mxu1 %v20664_v50 }
 0x1e4   : > { %v16946_v24 = vpop.f32.mrb[24].mxu0 }
 0x1e5   : > { %v817_v25 = vpop.f32.mrb[25].mxu0 }
 0x1e6   : > { %v16947_v26 = vpop.f32.mrb[26].mxu0  ;;  %1656 = vmatpush1.bf16.msra.mxu1 %v860_v21  ;;  %v19461_v21 = vld [vmem:[#allocation7 + $0x140] ss:$8 sps:$4 sm:$0xff]  }
 0x1e7   : > { %v862_v27 = vpack.c.bf16 %v16947_v26, %v16946_v24  ;;  %v820_v28 = vpop.f32.mrb[27].mxu0  ;;  %1657 = vmatprep.subr.bf16.mxu1 %v20664_v50  ;;  %v19465_v24 = vld [vmem:[#allocation7 + $0x164] ss:$8 sps:$4 sm:$0xff]   ;;  %v19469_v26 = vld [vmem:[#allocation7 + $0x174] ss:$8 sps:$4 sm:$0xff]  }
 0x1e8   : > { %v861_v29 = vpack.c.bf16 %v820_v28, %v817_v25  ;;  %v19467_v25 = vld [vmem:[#allocation7 + $0x160] ss:$8 sps:$4 sm:$0xff]   ;;  %v19473_v28 = vld [vmem:[#allocation7 + $0x184] ss:$8 sps:$4 sm:$0xff]  }
 0x1ea   : > { %1658 = vmatpush1.bf16.msra.mxu1 %v861_v29  ;;  %v19475_v29 = vld [vmem:[#allocation7 + $0x180] ss:$8 sps:$4 sm:$0xff]  }
 0x1eb   : > { %1659 = vmatprep.subr.bf16.mxu1 %v20664_v50 }
 0x1ec   : > { %v16950_v30 = vpop.f32.mrb[28].mxu0 }
 0x1ed   : > { %v833_v31 = vpop.f32.mrb[29].mxu0 }
 0x1ee   : > { %v16951_v32 = vpop.f32.mrb[30].mxu0  ;;  %1660 = vmatpush1.bf16.msra.mxu1 %v862_v27  ;;  %v19471_v27 = vld [vmem:[#allocation7 + $0x170] ss:$8 sps:$4 sm:$0xff]  }
 0x1ef   : > { %v864_v33 = vpack.c.bf16 %v16951_v32, %v16950_v30  ;;  %v836_v34 = vpop.f32.mrb[31].mxu0  ;;  %1661 = vmatprep.subr.bf16.mxu1 %v20664_v50  ;;  %v19477_v30 = vld [vmem:[#allocation7 + $0x194] ss:$8 sps:$4 sm:$0xff]   ;;  %v19481_v32 = vld [vmem:[#allocation7 + $0x1a4] ss:$8 sps:$4 sm:$0xff]  }
 0x1f0   : > { %v863_v35 = vpack.c.bf16 %v836_v34, %v833_v31  ;;  %v19479_v31 = vld [vmem:[#allocation7 + $0x190] ss:$8 sps:$4 sm:$0xff]   ;;  %v19485_v34 = vld [vmem:[#allocation7 + $0x1b4] ss:$8 sps:$4 sm:$0xff]  }
 0x1f2   : > { %1662 = vmatpush1.bf16.msra.mxu1 %v863_v35  ;;  %v19487_v35 = vld [vmem:[#allocation7 + $0x1b0] ss:$8 sps:$4 sm:$0xff]  }
 0x1f3   : > { %1663 = vmatprep.subr.bf16.mxu1 %v20664_v50  ;;  %v19468_v50 = vld [vmem:[#allocation4 + $0x40] sm:$0xff]  }
 0x1f4   : > { %16952 = vmatprep.subr.bf16.mxu0 %v19468_v50 }
 0x1f5   : > { %16953 = vmatpush3.bf16.msra.mxu0 %v19468_v50 }
 0x1f6   : > { %1664 = vmatpush1.bf16.msra.mxu1 %v864_v33  ;;  %16954 = vmatprep.subr.bf16.mxu0 %v19472_v53  ;;  %v19483_v33 = vld [vmem:[#allocation7 + $0x1a0] ss:$8 sps:$4 sm:$0xff]  }
 0x1f9   : > { %1666 = vmatmul.mubr.bf16.vlgmr.msra.gmra.mrb[0].mxu1 %v19399_v36  ;;  %16955 = vmatpush3.bf16.msra.mxu0 %v19472_v53 }
 0x1fa   : > { %1673 = vmatprep.mubr.bf16.mxu1 %v19402_v37  ;;  %16956 = vmatprep.subr.bf16.mxu0 %v19476_v62  ;;  %v19489_v37 = vld [vmem:[#allocation7 + $0x1c4] ss:$8 sps:$4 sm:$0xff]  }
 0x1fd   : > { %16957 = vmatpush3.bf16.msra.mxu0 %v19476_v62 }
 0x1fe   : > { %16958 = vmatprep.subr.bf16.mxu0 %v19480_v1 }
 0x201   : > { %1674 = vmatmul.mubr.bf16.gmra.mrb[4].mxu1 %v19404_v38  ;;  %16959 = vmatpush3.bf16.msra.mxu0 %v19480_v1  ;;  %v19508_v1 = vld [vmem:[#allocation7 + $0x204] ss:$8 sps:$4 sm:$0xff]  }
 0x202   : > { %1681 = vmatprep.mubr.bf16.mxu1 %v19405_v39  ;;  %16960 = vmatprep.subr.bf16.mxu0 %v19484_v4 }
 0x205   : > { %16961 = vmatpush3.bf16.msra.mxu0 %v19484_v4 }
 0x206   : > { %16962 = vmatprep.subr.bf16.mxu0 %v19488_v7 }
 0x209   : > { %1682 = vmatmul.mubr.bf16.gmra.mrb[8].mxu1 %v19407_v40  ;;  %16963 = vmatpush3.bf16.msra.mxu0 %v19488_v7 }
 0x20a   : > { %1689 = vmatprep.mubr.bf16.mxu1 %v19408_v41  ;;  %16964 = vmatprep.subr.bf16.mxu0 %v19492_v10 }
 0x20d   : > { %16965 = vmatpush3.bf16.msra.mxu0 %v19492_v10 }
 0x20e   : > { %16966 = vmatprep.subr.bf16.mxu0 %v19495_v11 }
 0x211   : > { %1690 = vmatmul.mubr.bf16.gmra.mrb[12].mxu1 %v19410_v42  ;;  %16967 = vmatpush3.bf16.msra.mxu0 %v19495_v11  ;;  %v19491_v42 = vld [vmem:[#allocation7 + $0x1c0] ss:$8 sps:$4 sm:$0xff]  }
 0x212   : > { %1697 = vmatprep.mubr.bf16.mxu1 %v19411_v43  ;;  %16976 = vmatprep.subr.bf16.mxu0 %v21057_v14 }
 0x219   : > { %1698 = vmatmul.mubr.bf16.gmra.mrb[16].mxu1 %v19413_v44  ;;  %v19493_v44 = vld [vmem:[#allocation7 + $0x1d4] ss:$8 sps:$4 sm:$0xff]  }
 0x21a   : > { %1705 = vmatprep.mubr.bf16.mxu1 %v19414_v45 }
 0x221   : > { %1706 = vmatmul.mubr.bf16.gmra.mrb[20].mxu1 %v19416_v46 }
 0x222   : > { %1713 = vmatprep.mubr.bf16.mxu1 %v19417_v47 }
 0x229   : > { %1714 = vmatmul.mubr.bf16.gmra.mrb[24].mxu1 %v19419_v48 }
 0x22a   : > { %1721 = vmatprep.mubr.bf16.mxu1 %v19420_v49  ;;  %v19496_v49 = vld [vmem:[#allocation7 + $0x1d0] ss:$8 sps:$4 sm:$0xff]  }
 0x231   : > { %1722 = vmatmul.mubr.bf16.gmra.mrb[28].mxu1 %v19422_v51  ;;  %v19498_v51 = vld [vmem:[#allocation7 + $0x1e4] ss:$8 sps:$4 sm:$0xff]  }
 0x232   : > { %1729 = vmatprep.mubr.bf16.mxu1 %v19423_v52 }
 0x239   : > { %1730 = vmatmul.mubr.bf16.gmra.mrb[32].mxu1 %v19425_v54 }
 0x23a   : > { %1737 = vmatprep.mubr.bf16.mxu1 %v19426_v55 }
 0x241   : > { %1738 = vmatmul.mubr.bf16.gmra.mrb[36].mxu1 %v19428_v56  ;;  %v19501_v56 = vld [vmem:[#allocation7 + $0x1e0] ss:$8 sps:$4 sm:$0xff]  }
 0x242   : > { %1745 = vmatprep.mubr.bf16.mxu1 %v19429_v57 }
 0x249   : > { %1746 = vmatmul.mubr.bf16.gmra.mrb[40].mxu1 %v19431_v58  ;;  %v19503_v58 = vld [vmem:[#allocation7 + $0x1f4] ss:$8 sps:$4 sm:$0xff]  }
 0x24a   : > { %1753 = vmatprep.mubr.bf16.mxu1 %v19432_v59 }
 0x251   : > { %1754 = vmatmul.mubr.bf16.gmra.mrb[44].mxu1 %v19434_v60 }
 0x252   : > { %1761 = vmatprep.mubr.bf16.mxu1 %v19435_v61 }
 0x259   : > { %1762 = vmatmul.mubr.bf16.gmra.mrb[48].mxu1 %v19437_v63  ;;  %v19506_v63 = vld [vmem:[#allocation7 + $0x1f0] ss:$8 sps:$4 sm:$0xff]  }
 0x25a   : > { %1769 = vmatprep.mubr.bf16.mxu1 %v19438_v0 }
 0x261   : > { %1770 = vmatmul.mubr.bf16.gmra.mrb[52].mxu1 %v19440_v2 }
 0x262   : > { %1777 = vmatprep.mubr.bf16.mxu1 %v19441_v3 }
 0x269   : > { %1778 = vmatmul.mubr.bf16.gmra.mrb[56].mxu1 %v19443_v5 }
 0x26a   : > { %1785 = vmatprep.mubr.bf16.mxu1 %v19444_v6  ;;  %v19511_v6 = vld [vmem:[#allocation7 + $0x200] ss:$8 sps:$4 sm:$0xff]  }
 0x271   : > { %1786 = vmatmul.mubr.bf16.gmra.mrb[60].mxu1 %v19446_v8  ;;  %v19513_v8 = vld [vmem:[#allocation7 + $0x214] ss:$8 sps:$4 sm:$0xff]  }
 0x272   : > { %1793 = vmatprep.mubr.bf16.mxu1 %v19447_v9 }
 0x279   : > { %1794 = vmatmul.mubr.bf16.gmra.mrb[64].mxu1 %v19449_v12 }
 0x27a   : > { %1801 = vmatprep.mubr.bf16.mxu1 %v19450_v13  ;;  %v19500_v13 = vld [vmem:[#allocation4 + $0x8] sm:$0xff]  }
 0x281   : > { %1802 = vmatmul.mubr.bf16.gmra.mrb[68].mxu1 %v19452_v15  ;;  %v19502_v15 = vld [vmem:[#allocation4 + $0x10] sm:$0xff]  }
 0x282   : > { %1809 = vmatprep.mubr.bf16.mxu1 %v19453_v16  ;;  %v19516_v16 = vld [vmem:[#allocation7 + $0x210] ss:$8 sps:$4 sm:$0xff]  }
 0x289   : > { %1810 = vmatmul.mubr.bf16.gmra.mrb[72].mxu1 %v19455_v17 }
 0x28a   : > { %1817 = vmatprep.mubr.bf16.mxu1 %v19456_v18  ;;  %v19518_v18 = vld [vmem:[#allocation7 + $0x224] ss:$8 sps:$4 sm:$0xff]  }
 0x291   : > { %1818 = vmatmul.mubr.bf16.gmra.mrb[76].mxu1 %v19458_v19 }
 0x292   : > { %1825 = vmatprep.mubr.bf16.mxu1 %v19459_v20 }
 0x299   : > { %1826 = vmatmul.mubr.bf16.gmra.mrb[80].mxu1 %v19461_v21 }
 0x29a   : > { %1833 = vmatprep.mubr.bf16.mxu1 %v19462_v22 }
 0x2a1   : > { %1834 = vmatmul.mubr.bf16.gmra.mrb[84].mxu1 %v19464_v23  ;;  %v19505_v23 = vld [vmem:[#allocation4 + $0x18] sm:$0xff]  }
 0x2a2   : > { %1841 = vmatprep.mubr.bf16.mxu1 %v19465_v24  ;;  %v19507_v24 = vld [vmem:[#allocation4 + $0x20] sm:$0xff]  }
 0x2a9   : > { %1842 = vmatmul.mubr.bf16.gmra.mrb[88].mxu1 %v19467_v25 }
 0x2aa   : > { %1849 = vmatprep.mubr.bf16.mxu1 %v19469_v26 }
 0x2b1   : > { %1850 = vmatmul.mubr.bf16.gmra.mrb[92].mxu1 %v19471_v27  ;;  %v19523_v27 = vld [vmem:[#allocation7 + $0x234] ss:$8 sps:$4 sm:$0xff]  }
 0x2b2   : > { %1857 = vmatprep.mubr.bf16.mxu1 %v19473_v28 }
 0x2b9   : > { %1858 = vmatmul.mubr.bf16.gmra.mrb[96].mxu1 %v19475_v29 }
 0x2ba   : > { %1865 = vmatprep.mubr.bf16.mxu1 %v19477_v30 }
 0x2c1   : > { %1866 = vmatmul.mubr.bf16.gmra.mrb[100].mxu1 %v19479_v31  ;;  %v19510_v31 = vld [vmem:[#allocation4 + $0x28] sm:$0xff]  }
 0x2c2   : > { %1873 = vmatprep.mubr.bf16.mxu1 %v19481_v32  ;;  %v19512_v32 = vld [vmem:[#allocation4 + $0x30] sm:$0xff]  }
 0x2c9   : > { %1874 = vmatmul.mubr.bf16.gmra.mrb[104].mxu1 %v19483_v33  ;;  %v19526_v33 = vld [vmem:[#allocation7 + $0x230] ss:$8 sps:$4 sm:$0xff]  }
 0x2ca   : > { %1881 = vmatprep.mubr.bf16.mxu1 %v19485_v34 }
 0x2cc   : > { %v21060_v36 = vpop.f32.mrb[0].mxu1 }
 0x2cd   : > { %v1669_v38 = vpop.f32.mrb[1].mxu1 }
 0x2ce   : > { %v21062_v39 = vpop.f32.mrb[2].mxu1 }
 0x2cf   : > { %v2178_v40 = vpack.c.bf16 %v21062_v39, %v21060_v36  ;;  %v1672_v41 = vpop.f32.mrb[3].mxu1  ;;  %v19531_v36 = vld [vmem:[#allocation7 + $0x240] ss:$8 sps:$4 sm:$0xff]  }
 0x2d0   : > { %v19515_v41 = vld [vmem:[#allocation4 + $0x38] sm:$0xff]  }
 0x2d1   : > { %1882 = vmatmul.mubr.bf16.gmra.mrb[108].mxu1 %v19487_v35  ;;  %v19528_v35 = vld [vmem:[#allocation7 + $0x244] ss:$8 sps:$4 sm:$0xff]  }
 0x2d2   : > { %1889 = vmatprep.mubr.bf16.mxu1 %v19489_v37 }
 0x2d4   : > { %v21066_v43 = vpop.f32.mrb[4].mxu1 }
 0x2d5   : > { %v1677_v45 = vpop.f32.mrb[5].mxu1 }
 0x2d6   : > { %v21068_v46 = vpop.f32.mrb[6].mxu1  ;;  %v19517_v45 = vld [vmem:[#allocation4 + $0x80] sm:$0xff]  }
 0x2d7   : > { %v2179_v47 = vpack.c.bf16 %v21068_v46, %v21066_v43  ;;  %v1680_v48 = vpop.f32.mrb[7].mxu1  ;;  %v19527_v46 = vld [vmem:[#allocation4 + $0xa0] sm:$0xff]  }
 0x2d8   : > { %v19533_v48 = vld [vmem:[#allocation7 + $0x254] ss:$8 sps:$4 sm:$0xff]  }
 0x2d9   : > { %1890 = vmatmul.mubr.bf16.gmra.mrb[112].mxu1 %v19491_v42 }
 0x2da   : > { %1897 = vmatprep.mubr.bf16.mxu1 %v19493_v44 }
 0x2dc   : > { %v21072_v50 = vpop.f32.mrb[8].mxu1 }
 0x2dd   : > { %v1685_v52 = vpop.f32.mrb[9].mxu1 }
 0x2de   : > { %v21074_v53 = vpop.f32.mrb[10].mxu1 }
 0x2df   : > { %v2180_v54 = vpack.c.bf16 %v21074_v53, %v21072_v50  ;;  %v1688_v55 = vpop.f32.mrb[11].mxu1  ;;  %v19543_v53 = vld [vmem:[#allocation7 + $0x274] ss:$8 sps:$4 sm:$0xff]  }
 0x2e1   : > { %1898 = vmatmul.mubr.bf16.gmra.mrb[116].mxu1 %v19496_v49 }
 0x2e2   : > { %1905 = vmatprep.mubr.bf16.mxu1 %v19498_v51  ;;  %v19520_v51 = vld [vmem:[#allocation4 + $0x88] sm:$0xff]  }
 0x2e4   : > { %v21078_v57 = vpop.f32.mrb[12].mxu1 }
 0x2e5   : > { %v1693_v59 = vpop.f32.mrb[13].mxu1 }
 0x2e6   : > { %v21080_v60 = vpop.f32.mrb[14].mxu1 }
 0x2e7   : > { %v2181_v61 = vpack.c.bf16 %v21080_v60, %v21078_v57  ;;  %v1696_v62 = vpop.f32.mrb[15].mxu1  ;;  %v19532_v57 = vld [vmem:[#allocation4 + $0xb0] sm:$0xff]   ;;  %v19546_v60 = vld [vmem:[#allocation7 + $0x270] ss:$8 sps:$4 sm:$0xff]  }
 0x2e9   : > { %1906 = vmatmul.mubr.bf16.gmra.mrb[120].mxu1 %v19501_v56  ;;  %v19522_v56 = vld [vmem:[#allocation4 + $0x90] sm:$0xff]  }
 0x2ea   : > { %1913 = vmatprep.mubr.bf16.mxu1 %v19503_v58  ;;  %v19536_v58 = vld [vmem:[#allocation7 + $0x250] ss:$8 sps:$4 sm:$0xff]  }
 0x2ec   : > { %v1699_v0 = vpop.f32.mrb[16].mxu1 }
 0x2ed   : > { %v1701_v2 = vpop.f32.mrb[17].mxu1 }
 0x2ee   : > { %v1702_v3 = vpop.f32.mrb[18].mxu1 }
 0x2ef   : > { %v2182_v4 = vpack.c.bf16 %v1702_v3, %v1699_v0  ;;  %v1704_v5 = vpop.f32.mrb[19].mxu1 }
 0x2f1   : > { %16968 = vmatprep.mubr.bf16.mxu0 %v2182_v4  ;;  %1914 = vmatmul.mubr.bf16.gmra.mrb[124].mxu1 %v19506_v63  ;;  %v19538_v63 = vld [vmem:[#allocation7 + $0x264] ss:$8 sps:$4 sm:$0xff]  }
 0x2f2   : > { %1921 = vmatprep.mubr.bf16.mxu1 %v19508_v1  ;;  %v19525_v1 = vld [vmem:[#allocation4 + $0x98] sm:$0xff]   ;;  %v19530_v4 = vld [vmem:[#allocation4 + $0xa8] sm:$0xff]  }
 0x2f4   : > { %v1707_v7 = vpop.f32.mrb[20].mxu1 }
 0x2f5   : > { %v1709_v9 = vpop.f32.mrb[21].mxu1 }
 0x2f6   : > { %v1710_v10 = vpop.f32.mrb[22].mxu1 }
 0x2f7   : > { %v2183_v11 = vpack.c.bf16 %v1710_v10, %v1707_v7  ;;  %v1712_v12 = vpop.f32.mrb[23].mxu1  ;;  %v19548_v7 = vld [vmem:[#allocation7 + $0x284] ss:$8 sps:$4 sm:$0xff]   ;;  %v19535_v10 = vld [vmem:[#allocation4 + $0xb8] sm:$0xff]  }
 0x2f9   : > { %16969 = vmatmul.mubr.bf16.vlgmr.msra.gmra.mrb[32].mxu0 %v2183_v11  ;;  %1922 = vmatmul.mubr.bf16.gmra.mrb[128].mxu1 %v19511_v6 }
 0x2fa   : > { %16977 = vmatpush3.bf16.msra.mxu0 %v21057_v14  ;;  %1929 = vmatprep.mubr.bf16.mxu1 %v19513_v8  ;;  %v19521_v14 = vld [vmem:[#allocation7 + $0x220] ss:$8 sps:$4 sm:$0xff]  }
 0x2fb   : > { %16978 = vmatprep.subr.bf16.mxu0 %v19500_v13 }
 0x2fc   : > { %v1715_v17 = vpop.f32.mrb[24].mxu1 }
 0x2fd   : > { %v1717_v19 = vpop.f32.mrb[25].mxu1 }
 0x2fe   : > { %16979 = vmatpush3.bf16.msra.mxu0 %v19500_v13  ;;  %v1718_v20 = vpop.f32.mrb[26].mxu1  ;;  %v19537_v13 = vld [vmem:[#allocation4 + $0xc0] sm:$0xff]  }
 0x2ff   : > { %16980 = vmatprep.subr.bf16.mxu0 %v19502_v15  ;;  %v2184_v21 = vpack.c.bf16 %v1718_v20, %v1715_v17  ;;  %v1720_v22 = vpop.f32.mrb[27].mxu1  ;;  %v19540_v20 = vld [vmem:[#allocation4 + $0xc8] sm:$0xff]  }
 0x301   : > { %16972 = vmatprep.mubr.bf16.mxu0 %v2184_v21  ;;  %1930 = vmatmul.mubr.bf16.gmra.mrb[132].mxu1 %v19516_v16 }
 0x302   : > { %16981 = vmatpush3.bf16.msra.mxu0 %v19502_v15  ;;  %1937 = vmatprep.mubr.bf16.mxu1 %v19518_v18  ;;  %v19551_v15 = vld [vmem:[#allocation7 + $0x280] ss:$8 sps:$4 sm:$0xff]   ;;  %v19553_v18 = vld [vmem:[#allocation7 + $0x294] ss:$8 sps:$4 sm:$0xff]  }
 0x303   : > { %16982 = vmatprep.subr.bf16.mxu0 %v19505_v23 }
 0x304   : > { %v1723_v25 = vpop.f32.mrb[28].mxu1 }
 0x305   : > { %v1725_v26 = vpop.f32.mrb[29].mxu1 }
 0x306   : > { %16983 = vmatpush3.bf16.msra.mxu0 %v19505_v23  ;;  %v1726_v28 = vpop.f32.mrb[30].mxu1  ;;  %v19542_v23 = vld [vmem:[#allocation4 + $0xd0] sm:$0xff]  }
 0x307   : > { %v2185_v29 = vpack.c.bf16 %v1726_v28, %v1723_v25  ;;  %16984 = vmatprep.subr.bf16.mxu0 %v19507_v24  ;;  %v1728_v30 = vpop.f32.mrb[31].mxu1  ;;  %v19558_v26 = vld [vmem:[#allocation7 + $0x2a4] ss:$8 sps:$4 sm:$0xff]   ;;  %v19545_v28 = vld [vmem:[#allocation4 + $0xd8] sm:$0xff]  }
 0x309   : > { %16973 = vmatmul.mubr.bf16.gmra.mrb[36].mxu0 %v2185_v29  ;;  %1938 = vmatmul.mubr.bf16.gmra.mrb[136].mxu1 %v19521_v14 }
 0x30a   : > { %16985 = vmatpush3.bf16.msra.mxu0 %v19507_v24  ;;  %16992 = vmatprep.mubr.bf16.mxu0 %v2178_v40  ;;  %v19556_v24 = vld [vmem:[#allocation7 + $0x290] ss:$8 sps:$4 sm:$0xff]  }
 0x30b   : > { %16986 = vmatprep.subr.bf16.mxu0 %v19510_v31  ;;  %1945 = vmatprep.mubr.bf16.mxu1 %v19523_v27 }
 0x30c   : > { %v1731_v34 = vpop.f32.mrb[32].mxu1 }
 0x30d   : > { %v1733_v37 = vpop.f32.mrb[33].mxu1 }
 0x30e   : > { %16987 = vmatpush3.bf16.msra.mxu0 %v19510_v31  ;;  %v1734_v38 = vpop.f32.mrb[34].mxu1  ;;  %v19547_v31 = vld [vmem:[#allocation4 + $0xe0] sm:$0xff]  }
 0x30f   : > { %16988 = vmatprep.subr.bf16.mxu0 %v19512_v32  ;;  %v2186_v42 = vpack.c.bf16 %v1734_v38, %v1731_v34  ;;  %v1736_v44 = vpop.f32.mrb[35].mxu1  ;;  %v19563_v34 = vld [vmem:[#allocation7 + $0x2b4] ss:$8 sps:$4 sm:$0xff]   ;;  %v19550_v38 = vld [vmem:[#allocation4 + $0xe8] sm:$0xff]  }
 0x310   : > { %v19552_v44 = vld [vmem:[#allocation4 + $0xf0] sm:$0xff]  }
 0x311   : > { %1946 = vmatmul.mubr.bf16.gmra.mrb[140].mxu1 %v19526_v33 }
 0x312   : > { %16989 = vmatpush3.bf16.msra.mxu0 %v19512_v32  ;;  %1953 = vmatprep.mubr.bf16.mxu1 %v19528_v35  ;;  %v19561_v32 = vld [vmem:[#allocation7 + $0x2a0] ss:$8 sps:$4 sm:$0xff]  }
 0x313   : > { %16990 = vmatprep.subr.bf16.mxu0 %v19515_v41 }
 0x314   : > { %v21088_v39 = vpop.f32.mrb[36].mxu1 }
 0x315   : > { %v1741_v40 = vpop.f32.mrb[37].mxu1 }
 0x316   : > { %16991 = vmatpush3.bf16.msra.mxu0 %v19515_v41  ;;  %v21090_v49 = vpop.f32.mrb[38].mxu1 }
 0x317   : > { %17000 = vmatprep.subr.bf16.mxu0 %v19517_v45  ;;  %v2187_v52 = vpack.c.bf16 %v21090_v49, %v21088_v39  ;;  %v1744_v55 = vpop.f32.mrb[39].mxu1  ;;  %v19568_v39 = vld [vmem:[#allocation7 + $0x2c4] ss:$8 sps:$4 sm:$0xff]   ;;  %v19555_v49 = vld [vmem:[#allocation4 + $0xf8] sm:$0xff]  }
 0x318   : > { %v19557_v55 = vld [vmem:[#allocation4 + $0x100] sm:$0xff]  }
 0x319   : > { %16993 = vmatmul.mubr.bf16.vlgmr.msra.gmra.mrb[32].mxu0 %v2179_v47  ;;  %1954 = vmatmul.mubr.bf16.gmra.mrb[144].mxu1 %v19531_v36  ;;  %v19541_v47 = vld [vmem:[#allocation7 + $0x260] ss:$8 sps:$4 sm:$0xff]  }
 0x31a   : > { %16996 = vmatprep.mubr.bf16.mxu0 %v2180_v54  ;;  %17001 = vmatpush3.bf16.msra.mxu0 %v19517_v45  ;;  %v19566_v45 = vld [vmem:[#allocation7 + $0x2b0] ss:$8 sps:$4 sm:$0xff]  }
 0x31b   : > { %17002 = vmatprep.subr.bf16.mxu0 %v19520_v51  ;;  %1961 = vmatprep.mubr.bf16.mxu1 %v19533_v48 }
 0x31c   : > { %v1747_v59 = vpop.f32.mrb[40].mxu1 }
 0x31d   : > { %v1749_v62 = vpop.f32.mrb[41].mxu1 }
 0x31e   : > { %17003 = vmatpush3.bf16.msra.mxu0 %v19520_v51  ;;  %v1750_v0 = vpop.f32.mrb[42].mxu1  ;;  %v19573_v62 = vld [vmem:[#allocation7 + $0x2d4] ss:$8 sps:$4 sm:$0xff]  }
 0x31f   : > { %17004 = vmatprep.subr.bf16.mxu0 %v19522_v56  ;;  %v2188_v2 = vpack.c.bf16 %v1750_v0, %v1747_v59  ;;  %v1752_v43 = vpop.f32.mrb[43].mxu1  ;;  %v19560_v0 = vld [vmem:[#allocation4 + $0x108] sm:$0xff]  }
 0x320   : > { %v19562_v43 = vld [vmem:[#allocation4 + $0x110] sm:$0xff]  }
 0x321   : > { %16997 = vmatmul.mubr.bf16.gmra.mrb[36].mxu0 %v2181_v61  ;;  %1962 = vmatmul.mubr.bf16.gmra.mrb[148].mxu1 %v19536_v58 }
 0x322   : > { %17005 = vmatpush3.bf16.msra.mxu0 %v19522_v56  ;;  %17016 = vmatprep.mubr.bf16.mxu0 %v2186_v42  ;;  %v19571_v56 = vld [vmem:[#allocation7 + $0x2c0] ss:$8 sps:$4 sm:$0xff]  }
 0x323   : > { %17006 = vmatprep.subr.bf16.mxu0 %v19525_v1  ;;  %1969 = vmatprep.mubr.bf16.mxu1 %v19538_v63 }
 0x324   : > { %v1755_v50 = vpop.f32.mrb[44].mxu1 }
 0x325   : > { %v1757_v54 = vpop.f32.mrb[45].mxu1 }
 0x326   : > { %17007 = vmatpush3.bf16.msra.mxu0 %v19525_v1  ;;  %v1758_v3 = vpop.f32.mrb[46].mxu1 }
 0x327   : > { %17008 = vmatprep.subr.bf16.mxu0 %v19527_v46  ;;  %v2189_v5 = vpack.c.bf16 %v1758_v3, %v1755_v50  ;;  %v1760_v6 = vpop.f32.mrb[47].mxu1  ;;  %v19565_v3 = vld [vmem:[#allocation4 + $0x118] sm:$0xff]  }
 0x328   : > { %v19567_v6 = vld [vmem:[#allocation4 + $0x120] sm:$0xff]  }
 0x329   : > { %1970 = vmatmul.mubr.bf16.gmra.mrb[152].mxu1 %v19541_v47 }
 0x32a   : > { %17009 = vmatpush3.bf16.msra.mxu0 %v19527_v46  ;;  %1977 = vmatprep.mubr.bf16.mxu1 %v19543_v53  ;;  %v19576_v46 = vld [vmem:[#allocation7 + $0x2d0] ss:$8 sps:$4 sm:$0xff]   ;;  %v19578_v53 = vld [vmem:[#allocation7 + $0x2e4] ss:$8 sps:$4 sm:$0xff]  }
 0x32b   : > { %17010 = vmatprep.subr.bf16.mxu0 %v19530_v4 }
 0x32c   : > { %v1763_v61 = vpop.f32.mrb[48].mxu1 }
 0x32d   : > { %v1765_v8 = vpop.f32.mrb[49].mxu1 }
 0x32e   : > { %17011 = vmatpush3.bf16.msra.mxu0 %v19530_v4  ;;  %v1766_v9 = vpop.f32.mrb[50].mxu1 }
 0x32f   : > { %17012 = vmatprep.subr.bf16.mxu0 %v19532_v57  ;;  %v2190_v11 = vpack.c.bf16 %v1766_v9, %v1763_v61  ;;  %v1768_v12 = vpop.f32.mrb[51].mxu1  ;;  %v19583_v61 = vld [vmem:[#allocation7 + $0x2f4] ss:$8 sps:$4 sm:$0xff]   ;;  %v19570_v9 = vld [vmem:[#allocation4 + $0x128] sm:$0xff]  }
 0x330   : > { %v19572_v12 = vld [vmem:[#allocation4 + $0x130] sm:$0xff]  }
 0x331   : > { %1978 = vmatmul.mubr.bf16.gmra.mrb[156].mxu1 %v19546_v60 }
 0x332   : > { %17013 = vmatpush3.bf16.msra.mxu0 %v19532_v57  ;;  %1985 = vmatprep.mubr.bf16.mxu1 %v19548_v7  ;;  %v19581_v57 = vld [vmem:[#allocation7 + $0x2e0] ss:$8 sps:$4 sm:$0xff]  }
 0x333   : > { %17014 = vmatprep.subr.bf16.mxu0 %v19535_v10 }
 0x334   : > { %v21103_v16 = vpop.f32.mrb[52].mxu1 }
 0x335   : > { %v1773_v17 = vpop.f32.mrb[53].mxu1 }
 0x336   : > { %17015 = vmatpush3.bf16.msra.mxu0 %v19535_v10  ;;  %v21105_v19 = vpop.f32.mrb[54].mxu1 }
 0x337   : > { %17024 = vmatprep.subr.bf16.mxu0 %v19537_v13  ;;  %v2191_v21 = vpack.c.bf16 %v21105_v19, %v21103_v16  ;;  %v1776_v22 = vpop.f32.mrb[55].mxu1  ;;  %v19586_v16 = vld [vmem:[#allocation7 + $0x2f0] ss:$8 sps:$4 sm:$0xff]  }
 0x338   : > { %v19575_v19 = vld [vmem:[#allocation4 + $0x138] sm:$0xff]   ;;  %v19577_v22 = vld [vmem:[#allocation4 + $0x140] sm:$0xff]  }
 0x339   : > { %17017 = vmatmul.mubr.bf16.vlgmr.msra.gmra.mrb[32].mxu0 %v2187_v52  ;;  %1986 = vmatmul.mubr.bf16.gmra.mrb[160].mxu1 %v19551_v15 }
 0x33a   : > { %17020 = vmatprep.mubr.bf16.mxu0 %v2188_v2  ;;  %17025 = vmatpush3.bf16.msra.mxu0 %v19537_v13 }
 0x33b   : > { %17026 = vmatprep.subr.bf16.mxu0 %v19540_v20  ;;  %1993 = vmatprep.mubr.bf16.mxu1 %v19553_v18  ;;  %v19588_v18 = vld [vmem:[#allocation7 + $0x304] ss:$8 sps:$4 sm:$0xff]  }
 0x33c   : > { %v1779_v14 = vpop.f32.mrb[56].mxu1 }
 0x33d   : > { %v1781_v25 = vpop.f32.mrb[57].mxu1 }
 0x33e   : > { %17027 = vmatpush3.bf16.msra.mxu0 %v19540_v20  ;;  %v1782_v27 = vpop.f32.mrb[58].mxu1 }
 0x33f   : > { %17028 = vmatprep.subr.bf16.mxu0 %v19542_v23  ;;  %v2192_v29 = vpack.c.bf16 %v1782_v27, %v1779_v14  ;;  %v1784_v30 = vpop.f32.mrb[59].mxu1  ;;  %v19591_v14 = vld [vmem:[#allocation7 + $0x300] ss:$8 sps:$4 sm:$0xff]  }
 0x340   : > { %v19582_v30 = vld [vmem:[#allocation4 + $0x150] sm:$0xff]  }
 0x341   : > { %17021 = vmatmul.mubr.bf16.gmra.mrb[36].mxu0 %v2189_v5  ;;  %1994 = vmatmul.mubr.bf16.gmra.mrb[164].mxu1 %v19556_v24 }
 0x342   : > { %17029 = vmatpush3.bf16.msra.mxu0 %v19542_v23  ;;  %17040 = vmatprep.mubr.bf16.mxu0 %v2190_v11 }
 0x343   : > { %17030 = vmatprep.subr.bf16.mxu0 %v19545_v28  ;;  %2001 = vmatprep.mubr.bf16.mxu1 %v19558_v26  ;;  %v19580_v26 = vld [vmem:[#allocation4 + $0x148] sm:$0xff]  }
 0x344   : > { %v1787_v33 = vpop.f32.mrb[60].mxu1 }
 0x345   : > { %v1789_v35 = vpop.f32.mrb[61].mxu1 }
 0x346   : > { %17031 = vmatpush3.bf16.msra.mxu0 %v19545_v28  ;;  %v1790_v37 = vpop.f32.mrb[62].mxu1  ;;  %v19585_v35 = vld [vmem:[#allocation4 + $0x158] sm:$0xff]  }
 0x347   : > { %17032 = vmatprep.subr.bf16.mxu0 %v19547_v31  ;;  %v2193_v41 = vpack.c.bf16 %v1790_v37, %v1787_v33  ;;  %v1792_v42 = vpop.f32.mrb[63].mxu1  ;;  %v19596_v33 = vld [vmem:[#allocation7 + $0x310] ss:$8 sps:$4 sm:$0xff]  }
 0x348   : > { %v19587_v42 = vld [vmem:[#allocation4 + $0x160] sm:$0xff]  }
 0x349   : > { %2002 = vmatmul.mubr.bf16.gmra.mrb[168].mxu1 %v19561_v32 }
 0x34a   : > { %17033 = vmatpush3.bf16.msra.mxu0 %v19547_v31  ;;  %2009 = vmatprep.mubr.bf16.mxu1 %v19563_v34 }
 0x34b   : > { %17034 = vmatprep.subr.bf16.mxu0 %v19550_v38 }
 0x34c   : > { %v1795_v36 = vpop.f32.mrb[64].mxu1 }
 0x34d   : > { %v1797_v40 = vpop.f32.mrb[65].mxu1 }
 0x34e   : > { %17035 = vmatpush3.bf16.msra.mxu0 %v19550_v38  ;;  %v1798_v48 = vpop.f32.mrb[66].mxu1  ;;  %v19603_v40 = vld [vmem:[#allocation7 + $0x334] ss:$8 sps:$4 sm:$0xff]  }
 0x34f   : > { %17036 = vmatprep.subr.bf16.mxu0 %v19552_v44  ;;  %v2194_v51 = vpack.c.bf16 %v1798_v48, %v1795_v36  ;;  %v1800_v52 = vpop.f32.mrb[67].mxu1  ;;  %v19601_v36 = vld [vmem:[#allocation7 + $0x320] ss:$8 sps:$4 sm:$0xff]  }
 0x350   : > { %v19590_v48 = vld [vmem:[#allocation4 + $0x168] sm:$0xff]   ;;  %v19592_v52 = vld [vmem:[#allocation4 + $0x170] sm:$0xff]  }
 0x351   : > { %2010 = vmatmul.mubr.bf16.gmra.mrb[172].mxu1 %v19566_v45 }
 0x352   : > { %17037 = vmatpush3.bf16.msra.mxu0 %v19552_v44  ;;  %2017 = vmatprep.mubr.bf16.mxu1 %v19568_v39 }
 0x353   : > { %17038 = vmatprep.subr.bf16.mxu0 %v19555_v49 }
 0x354   : > { %v21112_v58 = vpop.f32.mrb[68].mxu1 }
 0x355   : > { %v1805_v59 = vpop.f32.mrb[69].mxu1 }
 0x356   : > { %17039 = vmatpush3.bf16.msra.mxu0 %v19555_v49  ;;  %v21114_v63 = vpop.f32.mrb[70].mxu1 }
 0x357   : > { %17048 = vmatprep.subr.bf16.mxu0 %v19557_v55  ;;  %v2195_v1 = vpack.c.bf16 %v21114_v63, %v21112_v58  ;;  %v1808_v2 = vpop.f32.mrb[71].mxu1  ;;  %v19606_v58 = vld [vmem:[#allocation7 + $0x330] ss:$8 sps:$4 sm:$0xff]  }
 0x358   : > { %v19595_v63 = vld [vmem:[#allocation4 + $0x178] sm:$0xff]   ;;  %v19597_v2 = vld [vmem:[#allocation4 + $0x180] sm:$0xff]  }
 0x359   : > { %17041 = vmatmul.mubr.bf16.vlgmr.msra.gmra.mrb[32].mxu0 %v2191_v21  ;;  %2018 = vmatmul.mubr.bf16.gmra.mrb[176].mxu1 %v19571_v56 }
 0x35a   : > { %17044 = vmatprep.mubr.bf16.mxu0 %v2192_v29  ;;  %17049 = vmatpush3.bf16.msra.mxu0 %v19557_v55  ;;  %v19593_v29 = vld [vmem:[#allocation7 + $0x314] ss:$8 sps:$4 sm:$0xff]  }
 0x35b   : > { %17050 = vmatprep.subr.bf16.mxu0 %v19560_v0  ;;  %2025 = vmatprep.mubr.bf16.mxu1 %v19573_v62  ;;  %v19608_v62 = vld [vmem:[#allocation7 + $0x344] ss:$8 sps:$4 sm:$0xff]  }
 0x35c   : > { %v1811_v47 = vpop.f32.mrb[72].mxu1 }
 0x35d   : > { %v1813_v50 = vpop.f32.mrb[73].mxu1 }
 0x35e   : > { %17051 = vmatpush3.bf16.msra.mxu0 %v19560_v0  ;;  %v1814_v54 = vpop.f32.mrb[74].mxu1 }
 0x35f   : > { %17052 = vmatprep.subr.bf16.mxu0 %v19562_v43  ;;  %v2196_v4 = vpack.c.bf16 %v1814_v54, %v1811_v47  ;;  %v1816_v5 = vpop.f32.mrb[75].mxu1  ;;  %v19611_v47 = vld [vmem:[#allocation7 + $0x340] ss:$8 sps:$4 sm:$0xff]  }
 0x360   : > { %v19602_v5 = vld [vmem:[#allocation4 + $0x190] sm:$0xff]  }
 0x361   : > { %17045 = vmatmul.mubr.bf16.gmra.mrb[36].mxu0 %v2193_v41  ;;  %2026 = vmatmul.mubr.bf16.gmra.mrb[180].mxu1 %v19576_v46  ;;  %v19598_v41 = vld [vmem:[#allocation7 + $0x324] ss:$8 sps:$4 sm:$0xff]  }
 0x362   : > { %17053 = vmatpush3.bf16.msra.mxu0 %v19562_v43  ;;  %17064 = vmatprep.mubr.bf16.mxu0 %v2194_v51 }
 0x363   : > { %17054 = vmatprep.subr.bf16.mxu0 %v19565_v3  ;;  %2033 = vmatprep.mubr.bf16.mxu1 %v19578_v53  ;;  %v19600_v53 = vld [vmem:[#allocation4 + $0x188] sm:$0xff]  }
 0x364   : > { %v1819_v60 = vpop.f32.mrb[76].mxu1 }
 0x365   : > { %v1821_v7 = vpop.f32.mrb[77].mxu1 }
 0x366   : > { %17055 = vmatpush3.bf16.msra.mxu0 %v19565_v3  ;;  %v1822_v8 = vpop.f32.mrb[78].mxu1  ;;  %v19605_v7 = vld [vmem:[#allocation4 + $0x198] sm:$0xff]  }
 0x367   : > { %17056 = vmatprep.subr.bf16.mxu0 %v19567_v6  ;;  %v2197_v10 = vpack.c.bf16 %v1822_v8, %v1819_v60  ;;  %v1824_v11 = vpop.f32.mrb[79].mxu1  ;;  %v19616_v60 = vld [vmem:[#allocation7 + $0x350] ss:$8 sps:$4 sm:$0xff]  }
 0x368   : > { %v19607_v11 = vld [vmem:[#allocation4 + $0x1a0] sm:$0xff]  }
 0x369   : > { %2034 = vmatmul.mubr.bf16.gmra.mrb[184].mxu1 %v19581_v57 }
 0x36a   : > { %17057 = vmatpush3.bf16.msra.mxu0 %v19567_v6  ;;  %2041 = vmatprep.mubr.bf16.mxu1 %v19583_v61 }
 0x36b   : > { %17058 = vmatprep.subr.bf16.mxu0 %v19570_v9 }
 0x36c   : > { %v1827_v13 = vpop.f32.mrb[80].mxu1 }
 0x36d   : > { %v1829_v15 = vpop.f32.mrb[81].mxu1 }
 0x36e   : > { %17059 = vmatpush3.bf16.msra.mxu0 %v19570_v9  ;;  %v1830_v17 = vpop.f32.mrb[82].mxu1  ;;  %v19621_v15 = vld [vmem:[#allocation7 + $0x360] ss:$8 sps:$4 sm:$0xff]  }
 0x36f   : > { %17060 = vmatprep.subr.bf16.mxu0 %v19572_v12  ;;  %v2198_v20 = vpack.c.bf16 %v1830_v17, %v1827_v13  ;;  %v1832_v21 = vpop.f32.mrb[83].mxu1  ;;  %v19623_v17 = vld [vmem:[#allocation7 + $0x374] ss:$8 sps:$4 sm:$0xff]  }
 0x370   : > { %v19612_v21 = vld [vmem:[#allocation4 + $0x1b0] sm:$0xff]  }
 0x371   : > { %2042 = vmatmul.mubr.bf16.gmra.mrb[188].mxu1 %v19586_v16 }
 0x372   : > { %17061 = vmatpush3.bf16.msra.mxu0 %v19572_v12  ;;  %2049 = vmatprep.mubr.bf16.mxu1 %v19588_v18  ;;  %v19610_v18 = vld [vmem:[#allocation4 + $0x1a8] sm:$0xff]  }
 0x373   : > { %17062 = vmatprep.subr.bf16.mxu0 %v19575_v19 }
 0x374   : > { %v21121_v23 = vpop.f32.mrb[84].mxu1 }
 0x375   : > { %v1837_v24 = vpop.f32.mrb[85].mxu1 }
 0x376   : > { %17063 = vmatpush3.bf16.msra.mxu0 %v19575_v19  ;;  %v21123_v25 = vpop.f32.mrb[86].mxu1  ;;  %v19626_v24 = vld [vmem:[#allocation7 + $0x370] ss:$8 sps:$4 sm:$0xff]  }
 0x377   : > { %17072 = vmatprep.subr.bf16.mxu0 %v19577_v22  ;;  %v2199_v27 = vpack.c.bf16 %v21123_v25, %v21121_v23  ;;  %v1840_v28 = vpop.f32.mrb[87].mxu1  ;;  %v19628_v25 = vld [vmem:[#allocation7 + $0x384] ss:$8 sps:$4 sm:$0xff]  }
 0x379   : > { %17065 = vmatmul.mubr.bf16.vlgmr.msra.gmra.mrb[32].mxu0 %v2195_v1  ;;  %2050 = vmatmul.mubr.bf16.gmra.mrb[192].mxu1 %v19591_v14 }
 0x37a   : > { %17068 = vmatprep.mubr.bf16.mxu0 %v2196_v4  ;;  %17073 = vmatpush3.bf16.msra.mxu0 %v19577_v22  ;;  %v19613_v4 = vld [vmem:[#allocation7 + $0x354] ss:$8 sps:$4 sm:$0xff]  }
 0x37b   : > { %17074 = vmatprep.subr.bf16.mxu0 %v19580_v26  ;;  %2057 = vmatprep.mubr.bf16.mxu1 %v19593_v29  ;;  %v19617_v29 = vld [vmem:[#allocation4 + $0x1c0] sm:$0xff]  }
 0x37c   : > { %v1843_v31 = vpop.f32.mrb[88].mxu1 }
 0x37d   : > { %v1845_v32 = vpop.f32.mrb[89].mxu1 }
 0x37e   : > { %17075 = vmatpush3.bf16.msra.mxu0 %v19580_v26  ;;  %v1846_v34 = vpop.f32.mrb[90].mxu1  ;;  %v19615_v26 = vld [vmem:[#allocation4 + $0x1b8] sm:$0xff]   ;;  %v19631_v32 = vld [vmem:[#allocation7 + $0x380] ss:$8 sps:$4 sm:$0xff]  }
 0x37f   : > { %17076 = vmatprep.subr.bf16.mxu0 %v19582_v30  ;;  %v2200_v37 = vpack.c.bf16 %v1846_v34, %v1843_v31  ;;  %v1848_v38 = vpop.f32.mrb[91].mxu1  ;;  %v19620_v34 = vld [vmem:[#allocation4 + $0x1c8] sm:$0xff]  }
 0x380   : > { %v19633_v38 = vld [vmem:[#allocation7 + $0x394] ss:$8 sps:$4 sm:$0xff]  }
 0x381   : > { %17069 = vmatmul.mubr.bf16.gmra.mrb[36].mxu0 %v2197_v10  ;;  %2058 = vmatmul.mubr.bf16.gmra.mrb[196].mxu1 %v19596_v33  ;;  %v19618_v10 = vld [vmem:[#allocation7 + $0x364] ss:$8 sps:$4 sm:$0xff]  }
 0x382   : > { %17077 = vmatpush3.bf16.msra.mxu0 %v19582_v30  ;;  %17088 = vmatprep.mubr.bf16.mxu0 %v2198_v20 }
 0x383   : > { %17078 = vmatprep.subr.bf16.mxu0 %v19585_v35  ;;  %2065 = vmatprep.mubr.bf16.mxu1 %v19598_v41  ;;  %v19622_v41 = vld [vmem:[#allocation4 + $0x1d0] sm:$0xff]  }
 0x384   : > { %v1851_v44 = vpop.f32.mrb[92].mxu1 }
 0x385   : > { %v1853_v45 = vpop.f32.mrb[93].mxu1 }
 0x386   : > { %17079 = vmatpush3.bf16.msra.mxu0 %v19585_v35  ;;  %v1854_v39 = vpop.f32.mrb[94].mxu1  ;;  %v19636_v45 = vld [vmem:[#allocation7 + $0x390] ss:$8 sps:$4 sm:$0xff]  }
 0x387   : > { %17080 = vmatprep.subr.bf16.mxu0 %v19587_v42  ;;  %v2201_v49 = vpack.c.bf16 %v1854_v39, %v1851_v44  ;;  %v1856_v51 = vpop.f32.mrb[95].mxu1  ;;  %v19625_v39 = vld [vmem:[#allocation4 + $0x1d8] sm:$0xff]  }
 0x388   : > { %v19627_v51 = vld [vmem:[#allocation4 + $0x1e0] sm:$0xff]  }
 0x389   : > { %2066 = vmatmul.mubr.bf16.gmra.mrb[200].mxu1 %v19601_v36 }
 0x38a   : > { %17081 = vmatpush3.bf16.msra.mxu0 %v19587_v42  ;;  %2073 = vmatprep.mubr.bf16.mxu1 %v19603_v40 }
 0x38b   : > { %17082 = vmatprep.subr.bf16.mxu0 %v19590_v48 }
 0x38c   : > { %v1859_v55 = vpop.f32.mrb[96].mxu1 }
 0x38d   : > { %v1861_v56 = vpop.f32.mrb[97].mxu1 }
 0x38e   : > { %17083 = vmatpush3.bf16.msra.mxu0 %v19590_v48  ;;  %v1862_v59 = vpop.f32.mrb[98].mxu1  ;;  %v19641_v56 = vld [vmem:[#allocation7 + $0x3a0] ss:$8 sps:$4 sm:$0xff]  }
 0x38f   : > { %17084 = vmatprep.subr.bf16.mxu0 %v19592_v52  ;;  %v2202_v0 = vpack.c.bf16 %v1862_v59, %v1859_v55  ;;  %v1864_v1 = vpop.f32.mrb[99].mxu1  ;;  %v19643_v59 = vld [vmem:[#allocation7 + $0x3b4] ss:$8 sps:$4 sm:$0xff]  }
 0x390   : > { %v19632_v1 = vld [vmem:[#allocation4 + $0x1f0] sm:$0xff]  }
 0x391   : > { %2074 = vmatmul.mubr.bf16.gmra.mrb[204].mxu1 %v19606_v58 }
 0x392   : > { %17085 = vmatpush3.bf16.msra.mxu0 %v19592_v52  ;;  %2081 = vmatprep.mubr.bf16.mxu1 %v19608_v62  ;;  %v19630_v62 = vld [vmem:[#allocation4 + $0x1e8] sm:$0xff]  }
 0x393   : > { %17086 = vmatprep.subr.bf16.mxu0 %v19595_v63 }
 0x394   : > { %v21130_v43 = vpop.f32.mrb[100].mxu1 }
 0x395   : > { %v1869_v46 = vpop.f32.mrb[101].mxu1 }
 0x396   : > { %17087 = vmatpush3.bf16.msra.mxu0 %v19595_v63  ;;  %v21132_v50 = vpop.f32.mrb[102].mxu1  ;;  %v19646_v46 = vld [vmem:[#allocation7 + $0x3b0] ss:$8 sps:$4 sm:$0xff]  }
 0x397   : > { %17096 = vmatprep.subr.bf16.mxu0 %v19597_v2  ;;  %v2203_v54 = vpack.c.bf16 %v21132_v50, %v21130_v43  ;;  %v1872_v3 = vpop.f32.mrb[103].mxu1  ;;  %v19648_v50 = vld [vmem:[#allocation7 + $0x3c4] ss:$8 sps:$4 sm:$0xff]  }
 0x399   : > { %17089 = vmatmul.mubr.bf16.vlgmr.msra.gmra.mrb[32].mxu0 %v2199_v27  ;;  %2082 = vmatmul.mubr.bf16.gmra.mrb[208].mxu1 %v19611_v47 }
 0x39a   : > { %17092 = vmatprep.mubr.bf16.mxu0 %v2200_v37  ;;  %17097 = vmatpush3.bf16.msra.mxu0 %v19597_v2 }
 0x39b   : > { %17098 = vmatprep.subr.bf16.mxu0 %v19600_v53  ;;  %2089 = vmatprep.mubr.bf16.mxu1 %v19613_v4  ;;  %v19637_v4 = vld [vmem:[#allocation4 + $0x200] sm:$0xff]  }
 0x39c   : > { %v1875_v6 = vpop.f32.mrb[104].mxu1 }
 0x39d   : > { %v1877_v57 = vpop.f32.mrb[105].mxu1 }
 0x39e   : > { %17099 = vmatpush3.bf16.msra.mxu0 %v19600_v53  ;;  %v1878_v61 = vpop.f32.mrb[106].mxu1  ;;  %v19635_v53 = vld [vmem:[#allocation4 + $0x1f8] sm:$0xff]   ;;  %v19651_v57 = vld [vmem:[#allocation7 + $0x3c0] ss:$8 sps:$4 sm:$0xff]  }
 0x39f   : > { %17100 = vmatprep.subr.bf16.mxu0 %v19602_v5  ;;  %v2204_v8 = vpack.c.bf16 %v1878_v61, %v1875_v6  ;;  %v1880_v9 = vpop.f32.mrb[107].mxu1  ;;  %v19640_v61 = vld [vmem:[#allocation4 + $0x208] sm:$0xff]  }
 0x3a0   : > { %v19653_v9 = vld [vmem:[#allocation7 + $0x3d4] ss:$8 sps:$4 sm:$0xff]  }
 0x3a1   : > { %17093 = vmatmul.mubr.bf16.gmra.mrb[36].mxu0 %v2201_v49  ;;  %2090 = vmatmul.mubr.bf16.gmra.mrb[212].mxu1 %v19616_v60  ;;  %v19638_v49 = vld [vmem:[#allocation7 + $0x3a4] ss:$8 sps:$4 sm:$0xff]  }
 0x3a2   : > { %17101 = vmatpush3.bf16.msra.mxu0 %v19602_v5  ;;  %17112 = vmatprep.mubr.bf16.mxu0 %v2202_v0 }
 0x3a3   : > { %17102 = vmatprep.subr.bf16.mxu0 %v19605_v7  ;;  %2097 = vmatprep.mubr.bf16.mxu1 %v19618_v10  ;;  %v19642_v10 = vld [vmem:[#allocation4 + $0x210] sm:$0xff]  }
 0x3a4   : > { %v1883_v12 = vpop.f32.mrb[108].mxu1 }
 0x3a5   : > { %v1885_v13 = vpop.f32.mrb[109].mxu1 }
 0x3a6   : > { %17103 = vmatpush3.bf16.msra.mxu0 %v19605_v7  ;;  %v1886_v16 = vpop.f32.mrb[110].mxu1  ;;  %v19656_v13 = vld [vmem:[#allocation7 + $0x3d0] ss:$8 sps:$4 sm:$0xff]  }
 0x3a7   : > { %17104 = vmatprep.subr.bf16.mxu0 %v19607_v11  ;;  %v2205_v19 = vpack.c.bf16 %v1886_v16, %v1883_v12  ;;  %v1888_v20 = vpop.f32.mrb[111].mxu1  ;;  %v19645_v16 = vld [vmem:[#allocation4 + $0x218] sm:$0xff]  }
 0x3a8   : > { %v19647_v20 = vld [vmem:[#allocation4 + $0x220] sm:$0xff]  }
 0x3a9   : > { %2098 = vmatmul.mubr.bf16.gmra.mrb[216].mxu1 %v19621_v15 }
 0x3aa   : > { %17105 = vmatpush3.bf16.msra.mxu0 %v19607_v11  ;;  %2105 = vmatprep.mubr.bf16.mxu1 %v19623_v17 }
 0x3ab   : > { %17106 = vmatprep.subr.bf16.mxu0 %v19610_v18 }
 0x3ac   : > { %v1891_v22 = vpop.f32.mrb[112].mxu1 }
 0x3ad   : > { %v1893_v23 = vpop.f32.mrb[113].mxu1 }
 0x3ae   : > { %17107 = vmatpush3.bf16.msra.mxu0 %v19610_v18  ;;  %v1894_v14 = vpop.f32.mrb[114].mxu1  ;;  %v19661_v23 = vld [vmem:[#allocation7 + $0x3e0] ss:$8 sps:$4 sm:$0xff]  }
 0x3af   : > { %17108 = vmatprep.subr.bf16.mxu0 %v19612_v21  ;;  %v2206_v27 = vpack.c.bf16 %v1894_v14, %v1891_v22  ;;  %v1896_v28 = vpop.f32.mrb[115].mxu1  ;;  %v19663_v14 = vld [vmem:[#allocation7 + $0x3f4] ss:$8 sps:$4 sm:$0xff]  }
 0x3b0   : > { %v19652_v28 = vld [vmem:[#allocation4 + $0x230] sm:$0xff]  }
 0x3b1   : > { %2106 = vmatmul.mubr.bf16.gmra.mrb[220].mxu1 %v19626_v24 }
 0x3b2   : > { %17109 = vmatpush3.bf16.msra.mxu0 %v19612_v21  ;;  %2113 = vmatprep.mubr.bf16.mxu1 %v19628_v25  ;;  %v19650_v25 = vld [vmem:[#allocation4 + $0x228] sm:$0xff]  }
 0x3b3   : > { %17110 = vmatprep.subr.bf16.mxu0 %v19615_v26 }
 0x3b4   : > { %v21139_v30 = vpop.f32.mrb[116].mxu1 }
 0x3b5   : > { %v1901_v31 = vpop.f32.mrb[117].mxu1 }
 0x3b6   : > { %17111 = vmatpush3.bf16.msra.mxu0 %v19615_v26  ;;  %v21141_v33 = vpop.f32.mrb[118].mxu1  ;;  %v19666_v31 = vld [vmem:[#allocation7 + $0x3f0] ss:$8 sps:$4 sm:$0xff]  }
 0x3b7   : > { %17120 = vmatprep.subr.bf16.mxu0 %v19617_v29  ;;  %v2207_v35 = vpack.c.bf16 %v21141_v33, %v21139_v30  ;;  %v1904_v37 = vpop.f32.mrb[119].mxu1  ;;  %v19655_v33 = vld [vmem:[#allocation4 + $0x238] sm:$0xff]  }
 0x3b8   : > { %v19657_v37 = vld [vmem:[#allocation4 + $0x240] sm:$0xff]  }
 0x3b9   : > { %17113 = vmatmul.mubr.bf16.vlgmr.msra.gmra.mrb[32].mxu0 %v2203_v54  ;;  %2114 = vmatmul.mubr.bf16.gmra.mrb[224].mxu1 %v19631_v32 }
 0x3ba   : > { %17116 = vmatprep.mubr.bf16.mxu0 %v2204_v8  ;;  %17121 = vmatpush3.bf16.msra.mxu0 %v19617_v29 }
 0x3bb   : > { %17122 = vmatprep.subr.bf16.mxu0 %v19620_v34  ;;  %2121 = vmatprep.mubr.bf16.mxu1 %v19633_v38 }
 0x3bc   : > { %v1907_v42 = vpop.f32.mrb[120].mxu1 }
 0x3bd   : > { %v1909_v44 = vpop.f32.mrb[121].mxu1 }
 0x3be   : > { %17123 = vmatpush3.bf16.msra.mxu0 %v19620_v34  ;;  %v1910_v36 = vpop.f32.mrb[122].mxu1  ;;  %v19660_v44 = vld [vmem:[#allocation4 + $0x248] sm:$0xff]  }
 0x3bf   : > { %17124 = vmatprep.subr.bf16.mxu0 %v19622_v41  ;;  %v2208_v40 = vpack.c.bf16 %v1910_v36, %v1907_v42  ;;  %v1912_v48 = vpop.f32.mrb[123].mxu1 }
 0x3c1   : > { %17117 = vmatmul.mubr.bf16.gmra.mrb[36].mxu0 %v2205_v19  ;;  %2122 = vmatmul.mubr.bf16.gmra.mrb[228].mxu1 %v19636_v45  ;;  %v19658_v19 = vld [vmem:[#allocation7 + $0x3e4] ss:$8 sps:$4 sm:$0xff]  }
 0x3c2   : > { %17125 = vmatpush3.bf16.msra.mxu0 %v19622_v41  ;;  %17136 = vmatprep.mubr.bf16.mxu0 %v2206_v27 }
 0x3c3   : > { %17126 = vmatprep.subr.bf16.mxu0 %v19625_v39  ;;  %2129 = vmatprep.mubr.bf16.mxu1 %v19638_v49 }
 0x3c4   : > { %v1915_v52 = vpop.f32.mrb[124].mxu1 }
 0x3c5   : > { %v1917_v55 = vpop.f32.mrb[125].mxu1 }
 0x3c6   : > { %17127 = vmatpush3.bf16.msra.mxu0 %v19625_v39  ;;  %v1918_v58 = vpop.f32.mrb[126].mxu1  ;;  %v19662_v39 = vld [vmem:[#allocation4 + $0x250] sm:$0xff]  }
 0x3c7   : > { %17128 = vmatprep.subr.bf16.mxu0 %v19627_v51  ;;  %v2209_v63 = vpack.c.bf16 %v1918_v58, %v1915_v52  ;;  %v1920_v0 = vpop.f32.mrb[127].mxu1 }
 0x3c9   : > { %2130 = vmatmul.mubr.bf16.gmra.mrb[232].mxu1 %v19641_v56  ;;  %v19667_v56 = vld [vmem:[#allocation4 + $0x260] sm:$0xff]  }
 0x3ca   : > { %17129 = vmatpush3.bf16.msra.mxu0 %v19627_v51  ;;  %2137 = vmatprep.mubr.bf16.mxu1 %v19643_v59  ;;  %v19665_v51 = vld [vmem:[#allocation4 + $0x258] sm:$0xff]  }
 0x3cb   : > { %17130 = vmatprep.subr.bf16.mxu0 %v19630_v62 }
 0x3cc   : > { %v1923_v2 = vpop.f32.mrb[128].mxu1 }
 0x3cd   : > { %v1925_v43 = vpop.f32.mrb[129].mxu1 }
 0x3ce   : > { %17131 = vmatpush3.bf16.msra.mxu0 %v19630_v62  ;;  %v1926_v47 = vpop.f32.mrb[130].mxu1 }
 0x3cf   : > { %17132 = vmatprep.subr.bf16.mxu0 %v19632_v1  ;;  %v2210_v54 = vpack.c.bf16 %v1926_v47, %v1923_v2  ;;  %v1928_v3 = vpop.f32.mrb[131].mxu1  ;;  %v19669_v2 = vld [vmem:[#allocation4 + $0x270] sm:$0xff]  }
 0x3d0   : > { %v19671_v3 = vld [vmem:[#allocation4 + $0x280] sm:$0xff]  }
 0x3d1   : > { %2138 = vmatmul.mubr.bf16.gmra.mrb[236].mxu1 %v19646_v46 }
 0x3d2   : > { %17133 = vmatpush3.bf16.msra.mxu0 %v19632_v1  ;;  %2145 = vmatprep.mubr.bf16.mxu1 %v19648_v50  ;;  %v19670_v50 = vld [vmem:[#allocation4 + $0x278] sm:$0xff]  }
 0x3d3   : > { %17134 = vmatprep.subr.bf16.mxu0 %v19635_v53 }
 0x3d4   : > { %v21148_v5 = vpop.f32.mrb[132].mxu1 }
 0x3d5   : > { %v1933_v6 = vpop.f32.mrb[133].mxu1 }
 0x3d6   : > { %17135 = vmatpush3.bf16.msra.mxu0 %v19635_v53  ;;  %v21150_v60 = vpop.f32.mrb[134].mxu1 }
 0x3d7   : > { %17144 = vmatprep.subr.bf16.mxu0 %v19637_v4  ;;  %v2211_v7 = vpack.c.bf16 %v21150_v60, %v21148_v5  ;;  %v1936_v8 = vpop.f32.mrb[135].mxu1 }
 0x3d9   : > { %17137 = vmatmul.mubr.bf16.vlgmr.msra.gmra.mrb[32].mxu0 %v2207_v35  ;;  %2146 = vmatmul.mubr.bf16.gmra.mrb[240].mxu1 %v19651_v57  ;;  %v19672_v57 = vld [vmem:[#allocation4 + $0x288] sm:$0xff]  }
 0x3da   : > { %17140 = vmatprep.mubr.bf16.mxu0 %v2208_v40  ;;  %17145 = vmatpush3.bf16.msra.mxu0 %v19637_v4 }
 0x3db   : > { %17146 = vmatprep.subr.bf16.mxu0 %v19640_v61  ;;  %2153 = vmatprep.mubr.bf16.mxu1 %v19653_v9 }
 0x3dc   : > { %v1939_v11 = vpop.f32.mrb[136].mxu1 }
 0x3dd   : > { %v1941_v12 = vpop.f32.mrb[137].mxu1 }
 0x3de   : > { %17147 = vmatpush3.bf16.msra.mxu0 %v19640_v61  ;;  %v1942_v15 = vpop.f32.mrb[138].mxu1 }
 0x3df   : > { %17148 = vmatprep.subr.bf16.mxu0 %v19642_v10  ;;  %v1944_v17 = vpop.f32.mrb[139].mxu1  ;;  %v2212_v18 = vpack.c.bf16 %v1942_v15, %v1939_v11  ;;  %v19674_v11 = vld [vmem:[#allocation4 + $0x298] sm:$0xff]   ;;  %v19706_v15 = vld [vmem:[#allocation4 + $0x440] sm:$0xff]  }
 0x3e0   : > { %v20665_v17 = vmov 0.0  }
 0x3e1   : > { %17141 = vmatmul.mubr.bf16.gmra.mrb[36].mxu0 %v2209_v63  ;;  %2154 = vmatmul.mubr.bf16.gmra.mrb[244].mxu1 %v19656_v13  ;;  %v19668_v63 = vld [vmem:[#allocation4 + $0x268] sm:$0xff]  }
 0x3e2   : > { %17149 = vmatpush3.bf16.msra.mxu0 %v19642_v10  ;;  %17160 = vmatprep.mubr.bf16.mxu0 %v2210_v54 }
 0x3e3   : > { %17150 = vmatprep.subr.bf16.mxu0 %v19645_v16  ;;  %2161 = vmatprep.mubr.bf16.mxu1 %v19658_v19 }
 0x3e4   : > { %v1947_v21 = vpop.f32.mrb[140].mxu1  ;;  %17376 = vmatprep.subr.bf16.mxu1 %v20665_v17 }
 0x3e5   : > { %v1949_v22 = vpop.f32.mrb[141].mxu1  ;;  %17377 = vmatpush3.bf16.msra.mxu1 %v19706_v15  ;;  %v19692_v15 = vld [vmem:[#allocation4 + $0x328] sm:$0xff]  }
 0x3e6   : > { %17151 = vmatpush3.bf16.msra.mxu0 %v19645_v16  ;;  %v1950_v24 = vpop.f32.mrb[142].mxu1  ;;  %v19675_v16 = vld [vmem:[#allocation4 + $0x2a0] sm:$0xff]   ;;  %17378 = vmatprep.subr.bf16.mxu1 %v20665_v17 }
 0x3e7   : > { %17152 = vmatprep.subr.bf16.mxu0 %v19647_v20  ;;  %v1952_v26 = vpop.f32.mrb[143].mxu1  ;;  %v2213_v27 = vpack.c.bf16 %v1950_v24, %v1947_v21  ;;  %v19676_v21 = vld [vmem:[#allocation4 + $0x2a8] sm:$0xff]   ;;  %v19677_v24 = vld [vmem:[#allocation4 + $0x2b0] sm:$0xff]  }
 0x3e9   : > { %2162 = vmatmul.mubr.bf16.gmra.mrb[248].mxu1 %v19661_v23 }
 0x3ea   : > { %17153 = vmatpush3.bf16.msra.mxu0 %v19647_v20  ;;  %2169 = vmatprep.mubr.bf16.mxu1 %v19663_v14 }
 0x3eb   : > { %17154 = vmatprep.subr.bf16.mxu0 %v19650_v25 }
 0x3ec   : > { %v1955_v29 = vpop.f32.mrb[144].mxu1 }
 0x3ed   : > { %v1957_v30 = vpop.f32.mrb[145].mxu1 }
 0x3ee   : > { %17155 = vmatpush3.bf16.msra.mxu0 %v19650_v25  ;;  %v1958_v32 = vpop.f32.mrb[146].mxu1  ;;  %v19679_v30 = vld [vmem:[#allocation4 + $0x2c0] sm:$0xff]  }
 0x3ef   : > { %17156 = vmatprep.subr.bf16.mxu0 %v19652_v28  ;;  %v1960_v34 = vpop.f32.mrb[147].mxu1  ;;  %v2214_v35 = vpack.c.bf16 %v1958_v32, %v1955_v29 }
 0x3f0   : > { %v19680_v34 = vld [vmem:[#allocation4 + $0x2c8] sm:$0xff]  }
 0x3f1   : > { %2170 = vmatmul.mubr.bf16.gmra.mrb[252].mxu1 %v19666_v31 }
 0x3f2   : > { %17157 = vmatpush3.bf16.msra.mxu0 %v19652_v28  ;;  %17392 = vmatprep.mubr.msk.bf16.mxu1 %vm20666_vm3, %v20665_v17 }
 0x3f3   : > { %17158 = vmatprep.subr.bf16.mxu0 %v19655_v33 }
 0x3f4   : > { %v1963_v38 = vpop.f32.mrb[148].mxu1 }
 0x3f5   : > { %v1965_v41 = vpop.f32.mrb[149].mxu1 }
 0x3f6   : > { %17159 = vmatpush3.bf16.msra.mxu0 %v19655_v33  ;;  %v1966_v42 = vpop.f32.mrb[150].mxu1 }
 0x3f7   : > { %17168 = vmatprep.subr.bf16.mxu0 %v19657_v37  ;;  %v2215_v45 = vpack.c.bf16 %v1966_v42, %v1963_v38  ;;  %v1968_v36 = vpop.f32.mrb[151].mxu1  ;;  %v19681_v38 = vld [vmem:[#allocation4 + $0x2d0] sm:$0xff]  }
 0x3f9   : > { %17161 = vmatmul.mubr.bf16.vlgmr.msra.gmra.mrb[32].mxu0 %v2211_v7  ;;  %v19673_v7 = vld [vmem:[#allocation4 + $0x290] sm:$0xff]  }
 0x3fa   : > { %17164 = vmatprep.mubr.bf16.mxu0 %v2212_v18  ;;  %17169 = vmatpush3.bf16.msra.mxu0 %v19657_v37 }
 0x3fb   : > { %17170 = vmatprep.subr.bf16.mxu0 %v19660_v44 }
 0x3fc   : > { %v1971_v40 = vpop.f32.mrb[152].mxu1 }
 0x3fd   : > { %v1973_v48 = vpop.f32.mrb[153].mxu1 }
 0x3fe   : > { %17171 = vmatpush3.bf16.msra.mxu0 %v19660_v44  ;;  %v1974_v49 = vpop.f32.mrb[154].mxu1 }
 0x3ff   : > { %17172 = vmatprep.subr.bf16.mxu0 %v19662_v39  ;;  %v2216_v52 = vpack.c.bf16 %v1974_v49, %v1971_v40  ;;  %v1976_v55 = vpop.f32.mrb[155].mxu1  ;;  %v19683_v40 = vld [vmem:[#allocation4 + $0x2e0] sm:$0xff]  }
 0x401   : > { %17165 = vmatmul.mubr.bf16.gmra.mrb[36].mxu0 %v2213_v27  ;;  %v19678_v27 = vld [vmem:[#allocation4 + $0x2b8] sm:$0xff]  }
 0x402   : > { %17173 = vmatpush3.bf16.msra.mxu0 %v19662_v39  ;;  %17184 = vmatprep.mubr.bf16.mxu0 %v2214_v35 }
 0x403   : > { %17174 = vmatprep.subr.bf16.mxu0 %v19665_v51 }
 0x404   : > { %v1979_v58 = vpop.f32.mrb[156].mxu1 }
 0x405   : > { %v1981_v59 = vpop.f32.mrb[157].mxu1 }
 0x406   : > { %17175 = vmatpush3.bf16.msra.mxu0 %v19665_v51  ;;  %v1982_v62 = vpop.f32.mrb[158].mxu1 }
 0x407   : > { %17176 = vmatprep.subr.bf16.mxu0 %v19667_v56  ;;  %v2217_v0 = vpack.c.bf16 %v1982_v62, %v1979_v58  ;;  %v1984_v1 = vpop.f32.mrb[159].mxu1  ;;  %v19685_v58 = vld [vmem:[#allocation4 + $0x2f0] sm:$0xff]  }
 0x40a   : > { %17177 = vmatpush3.bf16.msra.mxu0 %v19667_v56 }
 0x40b   : > { %17178 = vmatprep.subr.bf16.mxu0 %v19668_v63 }
 0x40c   : > { %v1987_v43 = vpop.f32.mrb[160].mxu1 }
 0x40d   : > { %v1989_v46 = vpop.f32.mrb[161].mxu1 }
 0x40e   : > { %17179 = vmatpush3.bf16.msra.mxu0 %v19668_v63  ;;  %v1990_v47 = vpop.f32.mrb[162].mxu1 }
 0x40f   : > { %17180 = vmatprep.subr.bf16.mxu0 %v19669_v2  ;;  %v2218_v53 = vpack.c.bf16 %v1990_v47, %v1987_v43  ;;  %v1992_v54 = vpop.f32.mrb[163].mxu1  ;;  %v19687_v43 = vld [vmem:[#allocation4 + $0x300] sm:$0xff]  }
 0x412   : > { %17181 = vmatpush3.bf16.msra.mxu0 %v19669_v2 }
 0x413   : > { %17182 = vmatprep.subr.bf16.mxu0 %v19670_v50 }
 0x414   : > { %v1995_v4 = vpop.f32.mrb[164].mxu1 }
 0x415   : > { %v1997_v5 = vpop.f32.mrb[165].mxu1 }
 0x416   : > { %17183 = vmatpush3.bf16.msra.mxu0 %v19670_v50  ;;  %v1998_v6 = vpop.f32.mrb[166].mxu1 }
 0x417   : > { %17192 = vmatprep.subr.bf16.mxu0 %v19671_v3  ;;  %v2219_v60 = vpack.c.bf16 %v1998_v6, %v1995_v4  ;;  %v2000_v61 = vpop.f32.mrb[167].mxu1  ;;  %v19689_v4 = vld [vmem:[#allocation4 + $0x310] sm:$0xff]  }
 0x419   : > { %17185 = vmatmul.mubr.bf16.vlgmr.msra.gmra.mrb[32].mxu0 %v2215_v45  ;;  %v19682_v45 = vld [vmem:[#allocation4 + $0x2d8] sm:$0xff]  }
 0x41a   : > { %17188 = vmatprep.mubr.bf16.mxu0 %v2216_v52  ;;  %17193 = vmatpush3.bf16.msra.mxu0 %v19671_v3  ;;  %v19684_v52 = vld [vmem:[#allocation4 + $0x2e8] sm:$0xff]  }
 0x41b   : > { %17194 = vmatprep.subr.bf16.mxu0 %v19672_v57 }
 0x41c   : > { %v2003_v8 = vpop.f32.mrb[168].mxu1 }
 0x41d   : > { %v2005_v9 = vpop.f32.mrb[169].mxu1 }
 0x41e   : > { %17195 = vmatpush3.bf16.msra.mxu0 %v19672_v57  ;;  %v2006_v10 = vpop.f32.mrb[170].mxu1  ;;  %v19691_v9 = vld [vmem:[#allocation4 + $0x320] sm:$0xff]  }
 0x41f   : > { %17196 = vmatprep.subr.bf16.mxu0 %v19673_v7  ;;  %v2220_v12 = vpack.c.bf16 %v2006_v10, %v2003_v8  ;;  %v2008_v13 = vpop.f32.mrb[171].mxu1  ;;  %v19720_v8 = vld [vmem:[#allocation4 + $0x448] sm:$0xff]   ;;  %v19721_v10 = vld [vmem:[#allocation4 + $0x450] sm:$0xff]  }
 0x420   : > { %17379 = vmatpush3.bf16.msra.mxu1 %v19720_v8 }
 0x421   : > { %17189 = vmatmul.mubr.bf16.gmra.mrb[36].mxu0 %v2217_v0  ;;  %v19686_v0 = vld [vmem:[#allocation4 + $0x2f8] sm:$0xff]   ;;  %17380 = vmatprep.subr.bf16.mxu1 %v20665_v17 }
 0x422   : > { %17197 = vmatpush3.bf16.msra.mxu0 %v19673_v7  ;;  %17208 = vmatprep.mubr.bf16.mxu0 %v2218_v53  ;;  %v19688_v53 = vld [vmem:[#allocation4 + $0x308] sm:$0xff]  }
 0x423   : > { %17198 = vmatprep.subr.bf16.mxu0 %v19674_v11 }
 0x424   : > { %v2011_v18 = vpop.f32.mrb[172].mxu1  ;;  %17381 = vmatpush3.bf16.msra.mxu1 %v19721_v10 }
 0x425   : > { %v2013_v19 = vpop.f32.mrb[173].mxu1  ;;  %17382 = vmatprep.subr.bf16.mxu1 %v20665_v17 }
 0x426   : > { %17199 = vmatpush3.bf16.msra.mxu0 %v19674_v11  ;;  %v2014_v20 = vpop.f32.mrb[174].mxu1  ;;  %v19722_v19 = vld [vmem:[#allocation4 + $0x458] sm:$0xff]  }
 0x427   : > { %17200 = vmatprep.subr.bf16.mxu0 %v19675_v16  ;;  %v2221_v22 = vpack.c.bf16 %v2014_v20, %v2011_v18  ;;  %v2016_v23 = vpop.f32.mrb[175].mxu1  ;;  %v19693_v20 = vld [vmem:[#allocation4 + $0x330] sm:$0xff]  }
 0x428   : > { %17383 = vmatpush3.bf16.msra.mxu1 %v19722_v19 }
 0x429   : > { %17384 = vmatprep.subr.bf16.mxu1 %v20665_v17 }
 0x42a   : > { %17201 = vmatpush3.bf16.msra.mxu0 %v19675_v16 }
 0x42b   : > { %17202 = vmatprep.subr.bf16.mxu0 %v19676_v21 }
 0x42c   : > { %v2019_v14 = vpop.f32.mrb[176].mxu1 }
 0x42d   : > { %v2021_v25 = vpop.f32.mrb[177].mxu1 }
 0x42e   : > { %17203 = vmatpush3.bf16.msra.mxu0 %v19676_v21  ;;  %v2022_v26 = vpop.f32.mrb[178].mxu1  ;;  %v19723_v21 = vld [vmem:[#allocation4 + $0x460] sm:$0xff]  }
 0x42f   : > { %17204 = vmatprep.subr.bf16.mxu0 %v19677_v24  ;;  %v2222_v28 = vpack.c.bf16 %v2022_v26, %v2019_v14  ;;  %v2024_v29 = vpop.f32.mrb[179].mxu1  ;;  %v19694_v14 = vld [vmem:[#allocation4 + $0x338] sm:$0xff]   ;;  %17385 = vmatpush3.bf16.msra.mxu1 %v19723_v21  ;;  %v19712_v21 = vld [vmem:[#allocation4 + $0x3c0] sm:$0xff]  }
 0x430   : > { %17386 = vmatprep.subr.bf16.mxu1 %v20665_v17 }
 0x432   : > { %17205 = vmatpush3.bf16.msra.mxu0 %v19677_v24 }
 0x433   : > { %17206 = vmatprep.subr.bf16.mxu0 %v19678_v27 }
 0x434   : > { %v2027_v31 = vpop.f32.mrb[180].mxu1 }
 0x435   : > { %v2029_v32 = vpop.f32.mrb[181].mxu1 }
 0x436   : > { %17207 = vmatpush3.bf16.msra.mxu0 %v19678_v27  ;;  %v2030_v33 = vpop.f32.mrb[182].mxu1  ;;  %v19695_v27 = vld [vmem:[#allocation4 + $0x340] sm:$0xff]  }
 0x437   : > { %17216 = vmatprep.subr.bf16.mxu0 %v19679_v30  ;;  %v2223_v35 = vpack.c.bf16 %v2030_v33, %v2027_v31  ;;  %v2032_v37 = vpop.f32.mrb[183].mxu1  ;;  %v19696_v31 = vld [vmem:[#allocation4 + $0x348] sm:$0xff]  }
 0x439   : > { %17209 = vmatmul.mubr.bf16.vlgmr.msra.gmra.mrb[32].mxu0 %v2219_v60  ;;  %v19690_v60 = vld [vmem:[#allocation4 + $0x318] sm:$0xff]  }
 0x43a   : > { %17212 = vmatprep.mubr.bf16.mxu0 %v2220_v12  ;;  %17217 = vmatpush3.bf16.msra.mxu0 %v19679_v30 }
 0x43b   : > { %17218 = vmatprep.subr.bf16.mxu0 %v19680_v34 }
 0x43c   : > { %v2035_v41 = vpop.f32.mrb[184].mxu1 }
 0x43d   : > { %v2037_v42 = vpop.f32.mrb[185].mxu1 }
 0x43e   : > { %17219 = vmatpush3.bf16.msra.mxu0 %v19680_v34  ;;  %v2038_v44 = vpop.f32.mrb[186].mxu1  ;;  %v19697_v34 = vld [vmem:[#allocation4 + $0x350] sm:$0xff]  }
 0x43f   : > { %17220 = vmatprep.subr.bf16.mxu0 %v19681_v38  ;;  %v2224_v36 = vpack.c.bf16 %v2038_v44, %v2035_v41  ;;  %v2040_v39 = vpop.f32.mrb[187].mxu1  ;;  %v19698_v41 = vld [vmem:[#allocation4 + $0x358] sm:$0xff]  }
 0x441   : > { %17213 = vmatmul.mubr.bf16.gmra.mrb[36].mxu0 %v2221_v22 }
 0x442   : > { %17221 = vmatpush3.bf16.msra.mxu0 %v19681_v38  ;;  %17232 = vmatprep.mubr.bf16.mxu0 %v2222_v28 }
 0x443   : > { %17222 = vmatprep.subr.bf16.mxu0 %v19682_v45 }
 0x444   : > { %v2043_v48 = vpop.f32.mrb[188].mxu1 }
 0x445   : > { %v2045_v49 = vpop.f32.mrb[189].mxu1 }
 0x446   : > { %17223 = vmatpush3.bf16.msra.mxu0 %v19682_v45  ;;  %v2046_v51 = vpop.f32.mrb[190].mxu1  ;;  %v19699_v45 = vld [vmem:[#allocation4 + $0x360] sm:$0xff]  }
 0x447   : > { %17224 = vmatprep.subr.bf16.mxu0 %v19683_v40  ;;  %v2225_v55 = vpack.c.bf16 %v2046_v51, %v2043_v48  ;;  %v2048_v56 = vpop.f32.mrb[191].mxu1  ;;  %v19700_v48 = vld [vmem:[#allocation4 + $0x368] sm:$0xff]  }
 0x44a   : > { %17225 = vmatpush3.bf16.msra.mxu0 %v19683_v40 }
 0x44b   : > { %17226 = vmatprep.subr.bf16.mxu0 %v19684_v52 }
 0x44c   : > { %v2051_v59 = vpop.f32.mrb[192].mxu1 }
 0x44d   : > { %v2053_v62 = vpop.f32.mrb[193].mxu1 }
 0x44e   : > { %17227 = vmatpush3.bf16.msra.mxu0 %v19684_v52  ;;  %v2054_v63 = vpop.f32.mrb[194].mxu1  ;;  %v19701_v52 = vld [vmem:[#allocation4 + $0x370] sm:$0xff]  }
 0x44f   : > { %17228 = vmatprep.subr.bf16.mxu0 %v19685_v58  ;;  %v2226_v1 = vpack.c.bf16 %v2054_v63, %v2051_v59  ;;  %v2056_v2 = vpop.f32.mrb[195].mxu1  ;;  %v19702_v59 = vld [vmem:[#allocation4 + $0x378] sm:$0xff]  }
 0x452   : > { %17229 = vmatpush3.bf16.msra.mxu0 %v19685_v58 }
 0x453   : > { %17230 = vmatprep.subr.bf16.mxu0 %v19686_v0 }
 0x454   : > { %v21159_v46 = vpop.f32.mrb[196].mxu1 }
 0x455   : > { %v2061_v47 = vpop.f32.mrb[197].mxu1 }
 0x456   : > { %17231 = vmatpush3.bf16.msra.mxu0 %v19686_v0  ;;  %v21161_v50 = vpop.f32.mrb[198].mxu1  ;;  %v19703_v0 = vld [vmem:[#allocation4 + $0x380] sm:$0xff]  }
 0x457   : > { %17240 = vmatprep.subr.bf16.mxu0 %v19687_v43  ;;  %v2227_v54 = vpack.c.bf16 %v21161_v50, %v21159_v46  ;;  %v2064_v3 = vpop.f32.mrb[199].mxu1  ;;  %v19704_v46 = vld [vmem:[#allocation4 + $0x388] sm:$0xff]  }
 0x459   : > { %17233 = vmatmul.mubr.bf16.vlgmr.msra.gmra.mrb[32].mxu0 %v2223_v35 }
 0x45a   : > { %17236 = vmatprep.mubr.bf16.mxu0 %v2224_v36  ;;  %17241 = vmatpush3.bf16.msra.mxu0 %v19687_v43 }
 0x45b   : > { %17242 = vmatprep.subr.bf16.mxu0 %v19688_v53 }
 0x45c   : > { %v2067_v5 = vpop.f32.mrb[200].mxu1 }
 0x45d   : > { %v2069_v6 = vpop.f32.mrb[201].mxu1 }
 0x45e   : > { %17243 = vmatpush3.bf16.msra.mxu0 %v19688_v53  ;;  %v2070_v57 = vpop.f32.mrb[202].mxu1  ;;  %v19705_v53 = vld [vmem:[#allocation4 + $0x390] sm:$0xff]  }
 0x45f   : > { %17244 = vmatprep.subr.bf16.mxu0 %v19689_v4  ;;  %v2228_v61 = vpack.c.bf16 %v2070_v57, %v2067_v5  ;;  %v2072_v7 = vpop.f32.mrb[203].mxu1  ;;  %v19707_v5 = vld [vmem:[#allocation4 + $0x398] sm:$0xff]  }
 0x461   : > { %17237 = vmatmul.mubr.bf16.gmra.mrb[36].mxu0 %v2225_v55 }
 0x462   : > { %17245 = vmatpush3.bf16.msra.mxu0 %v19689_v4  ;;  %17256 = vmatprep.mubr.bf16.mxu0 %v2226_v1 }
 0x463   : > { %17246 = vmatprep.subr.bf16.mxu0 %v19690_v60 }
 0x464   : > { %v2075_v11 = vpop.f32.mrb[204].mxu1 }
 0x465   : > { %v2077_v12 = vpop.f32.mrb[205].mxu1 }
 0x466   : > { %17247 = vmatpush3.bf16.msra.mxu0 %v19690_v60  ;;  %v2078_v13 = vpop.f32.mrb[206].mxu1  ;;  %v19708_v60 = vld [vmem:[#allocation4 + $0x3a0] sm:$0xff]   ;;  %v19710_v12 = vld [vmem:[#allocation4 + $0x3b0] sm:$0xff]  }
 0x467   : > { %17248 = vmatprep.subr.bf16.mxu0 %v19691_v9  ;;  %v2229_v16 = vpack.c.bf16 %v2078_v13, %v2075_v11  ;;  %v2080_v18 = vpop.f32.mrb[207].mxu1 }
 0x468   : > { %v19711_v18 = vld [vmem:[#allocation4 + $0x3b8] sm:$0xff]  }
 0x46a   : > { %17249 = vmatpush3.bf16.msra.mxu0 %v19691_v9  ;;  %v19709_v9 = vld [vmem:[#allocation4 + $0x3a8] sm:$0xff]  }
 0x46b   : > { %17250 = vmatprep.subr.bf16.mxu0 %v19692_v15 }
 0x46c   : > { %v2083_v22 = vpop.f32.mrb[208].mxu1 }
 0x46d   : > { %v2085_v23 = vpop.f32.mrb[209].mxu1 }
 0x46e   : > { %17251 = vmatpush3.bf16.msra.mxu0 %v19692_v15  ;;  %v2086_v24 = vpop.f32.mrb[210].mxu1 }
 0x46f   : > { %17252 = vmatprep.subr.bf16.mxu0 %v19693_v20  ;;  %v2230_v25 = vpack.c.bf16 %v2086_v24, %v2083_v22  ;;  %v2088_v26 = vpop.f32.mrb[211].mxu1 }
 0x472   : > { %17253 = vmatpush3.bf16.msra.mxu0 %v19693_v20 }
 0x473   : > { %17254 = vmatprep.subr.bf16.mxu0 %v19694_v14 }
 0x474   : > { %v2091_v28 = vpop.f32.mrb[212].mxu1 }
 0x475   : > { %v2093_v29 = vpop.f32.mrb[213].mxu1 }
 0x476   : > { %17255 = vmatpush3.bf16.msra.mxu0 %v19694_v14  ;;  %v2094_v30 = vpop.f32.mrb[214].mxu1  ;;  %v19713_v14 = vld [vmem:[#allocation4 + $0x3c8] sm:$0xff]  }
 0x477   : > { %17264 = vmatprep.subr.bf16.mxu0 %v19695_v27  ;;  %v2231_v32 = vpack.c.bf16 %v2094_v30, %v2091_v28  ;;  %v2096_v33 = vpop.f32.mrb[215].mxu1 }
 0x479   : > { %17257 = vmatmul.mubr.bf16.vlgmr.msra.gmra.mrb[32].mxu0 %v2227_v54 }
 0x47a   : > { %17260 = vmatprep.mubr.bf16.mxu0 %v2228_v61  ;;  %17265 = vmatpush3.bf16.msra.mxu0 %v19695_v27  ;;  %v19714_v27 = vld [vmem:[#allocation4 + $0x3d0] sm:$0xff]  }
 0x47b   : > { %17266 = vmatprep.subr.bf16.mxu0 %v19696_v31 }
 0x47c   : > { %v2099_v35 = vpop.f32.mrb[216].mxu1 }
 0x47d   : > { %v2101_v37 = vpop.f32.mrb[217].mxu1 }
 0x47e   : > { %17267 = vmatpush3.bf16.msra.mxu0 %v19696_v31  ;;  %v2102_v38 = vpop.f32.mrb[218].mxu1  ;;  %v19715_v31 = vld [vmem:[#allocation4 + $0x3d8] sm:$0xff]  }
 0x47f   : > { %17268 = vmatprep.subr.bf16.mxu0 %v19697_v34  ;;  %v2232_v42 = vpack.c.bf16 %v2102_v38, %v2099_v35  ;;  %v2104_v44 = vpop.f32.mrb[219].mxu1 }
 0x481   : > { %17261 = vmatmul.mubr.bf16.gmra.mrb[36].mxu0 %v2229_v16 }
 0x482   : > { %17269 = vmatpush3.bf16.msra.mxu0 %v19697_v34  ;;  %17280 = vmatprep.mubr.bf16.mxu0 %v2230_v25  ;;  %v19716_v34 = vld [vmem:[#allocation4 + $0x3e0] sm:$0xff]  }
 0x483   : > { %17270 = vmatprep.subr.bf16.mxu0 %v19698_v41 }
 0x484   : > { %v2107_v36 = vpop.f32.mrb[220].mxu1 }
 0x485   : > { %v2109_v39 = vpop.f32.mrb[221].mxu1 }
 0x486   : > { %17271 = vmatpush3.bf16.msra.mxu0 %v19698_v41  ;;  %v2110_v40 = vpop.f32.mrb[222].mxu1  ;;  %v19717_v41 = vld [vmem:[#allocation4 + $0x3e8] sm:$0xff]   ;;  %v19724_v39 = vld [vmem:[%s22663_s5] sm:$0xff]  }
 0x487   : > { %17272 = vmatprep.subr.bf16.mxu0 %v19699_v45  ;;  %v2233_v49 = vpack.c.bf16 %v2110_v40, %v2107_v36  ;;  %v2112_v51 = vpop.f32.mrb[223].mxu1  ;;  %v19719_v36 = vld [vmem:[#allocation4 + $0x3f8] sm:$0xff]   ;;  %v19726_v40 = vld [vmem:[#allocation4 + $0x468] sm:$0xff]  }
 0x488   : > { %17387 = vmatpush3.bf16.msra.mxu1 %v19726_v40  ;;  %v15063_v51 = vld [vmem:[#allocation6] ss:$0 sm:$0xff] }
 0x489   : > { %17388 = vmatprep.subr.bf16.mxu1 %v20665_v17 }
 0x48a   : > { %17273 = vmatpush3.bf16.msra.mxu0 %v19699_v45  ;;  %v19718_v45 = vld [vmem:[#allocation4 + $0x3f0] sm:$0xff]  }
 0x48b   : > { %17274 = vmatprep.subr.bf16.mxu0 %v19700_v48 }
 0x48c   : > { %v2115_v55 = vpop.f32.mrb[224].mxu1 }
 0x48d   : > { %v2117_v56 = vpop.f32.mrb[225].mxu1 }
 0x48e   : > { %17275 = vmatpush3.bf16.msra.mxu0 %v19700_v48  ;;  %v2118_v58 = vpop.f32.mrb[226].mxu1  ;;  %v19731_v48 = vld [vmem:[#allocation4 + $0x470] sm:$0xff]  }
 0x48f   : > { %17276 = vmatprep.subr.bf16.mxu0 %v19701_v52  ;;  %v2234_v62 = vpack.c.bf16 %v2118_v58, %v2115_v55  ;;  %v2120_v63 = vpop.f32.mrb[227].mxu1  ;;  %17389 = vmatpush3.bf16.msra.mxu1 %v19731_v48 }
 0x490   : > { %17390 = vmatprep.subr.bf16.mxu1 %v20665_v17 }
 0x492   : > { %17277 = vmatpush3.bf16.msra.mxu0 %v19701_v52 }
 0x493   : > { %17278 = vmatprep.subr.bf16.mxu0 %v19702_v59 }
 0x494   : > { %v2123_v1 = vpop.f32.mrb[228].mxu1 }
 0x495   : > { %v2125_v2 = vpop.f32.mrb[229].mxu1 }
 0x496   : > { %17279 = vmatpush3.bf16.msra.mxu0 %v19702_v59  ;;  %v2126_v43 = vpop.f32.mrb[230].mxu1 }
 0x497   : > { %17288 = vmatprep.subr.bf16.mxu0 %v19703_v0  ;;  %v2235_v47 = vpack.c.bf16 %v2126_v43, %v2123_v1  ;;  %v2128_v50 = vpop.f32.mrb[231].mxu1 }
 0x499   : > { %17281 = vmatmul.mubr.bf16.vlgmr.msra.gmra.mrb[32].mxu0 %v2231_v32 }
 0x49a   : > { %17284 = vmatprep.mubr.bf16.mxu0 %v2232_v42  ;;  %17289 = vmatpush3.bf16.msra.mxu0 %v19703_v0 }
 0x49b   : > { %17290 = vmatprep.subr.bf16.mxu0 %v19704_v46 }
 0x49c   : > { %v2131_v54 = vpop.f32.mrb[232].mxu1 }
 0x49d   : > { %v2133_v3 = vpop.f32.mrb[233].mxu1 }
 0x49e   : > { %17291 = vmatpush3.bf16.msra.mxu0 %v19704_v46  ;;  %v2134_v4 = vpop.f32.mrb[234].mxu1 }
 0x49f   : > { %17292 = vmatprep.subr.bf16.mxu0 %v19705_v53  ;;  %v2236_v6 = vpack.c.bf16 %v2134_v4, %v2131_v54  ;;  %v2136_v57 = vpop.f32.mrb[235].mxu1 }
 0x4a1   : > { %17285 = vmatmul.mubr.bf16.gmra.mrb[36].mxu0 %v2233_v49  ;;  %v19736_v49 = vld [vmem:[#allocation4 + $0x478] sm:$0xff]  }
 0x4a2   : > { %17293 = vmatpush3.bf16.msra.mxu0 %v19705_v53  ;;  %17304 = vmatprep.mubr.bf16.mxu0 %v2234_v62 }
 0x4a3   : > { %17294 = vmatprep.subr.bf16.mxu0 %v19707_v5  ;;  %17391 = vmatpush3.bf16.msra.mxu1 %v19736_v49  ;;  %v19747_v49 = vld [vmem:[#allocation4 + $0x410] sm:$0xff]  }
 0x4a4   : > { %v2139_v61 = vpop.f32.mrb[236].mxu1  ;;  %17396 = vmatprep.subr.bf16.mxu1 %v20665_v17 }
 0x4a5   : > { %v2141_v7 = vpop.f32.mrb[237].mxu1 }
 0x4a6   : > { %17295 = vmatpush3.bf16.msra.mxu0 %v19707_v5  ;;  %v2142_v8 = vpop.f32.mrb[238].mxu1 }
 0x4a7   : > { %17296 = vmatprep.subr.bf16.mxu0 %v19708_v60  ;;  %v2237_v10 = vpack.c.bf16 %v2142_v8, %v2139_v61  ;;  %v2144_v11 = vpop.f32.mrb[239].mxu1 }
 0x4aa   : > { %17297 = vmatpush3.bf16.msra.mxu0 %v19708_v60 }
 0x4ab   : > { %17298 = vmatprep.subr.bf16.mxu0 %v19709_v9 }
 0x4ac   : > { %v2147_v13 = vpop.f32.mrb[240].mxu1 }
 0x4ad   : > { %v2149_v15 = vpop.f32.mrb[241].mxu1 }
 0x4ae   : > { %17299 = vmatpush3.bf16.msra.mxu0 %v19709_v9  ;;  %v2150_v16 = vpop.f32.mrb[242].mxu1  ;;  %v19728_v15 = vld [vmem:[%s22663_s5 + $0x18] sm:$0xff]  }
 0x4af   : > { %17300 = vmatprep.subr.bf16.mxu0 %v19710_v12  ;;  %v2238_v19 = vpack.c.bf16 %v2150_v16, %v2147_v13  ;;  %v2152_v20 = vpop.f32.mrb[243].mxu1  ;;  %v19727_v13 = vld [vmem:[%s22663_s5 + $0x10] sm:$0xff]   ;;  %v19729_v16 = vld [vmem:[%s22663_s5 + $0x20] sm:$0xff]  }
 0x4b0   : > { %v19733_v20 = vld [vmem:[%s22663_s5 + $0x38] sm:$0xff]  }
 0x4b2   : > { %17301 = vmatpush3.bf16.msra.mxu0 %v19710_v12  ;;  %v19725_v12 = vld [vmem:[%s22663_s5 + $0x8] sm:$0xff]  }
 0x4b3   : > { %17302 = vmatprep.subr.bf16.mxu0 %v19711_v18 }
 0x4b4   : > { %v2155_v22 = vpop.f32.mrb[244].mxu1 }
 0x4b5   : > { %v2157_v23 = vpop.f32.mrb[245].mxu1 }
 0x4b6   : > { %17303 = vmatpush3.bf16.msra.mxu0 %v19711_v18  ;;  %v2158_v24 = vpop.f32.mrb[246].mxu1  ;;  %v19730_v18 = vld [vmem:[%s22663_s5 + $0x28] sm:$0xff]   ;;  %v19737_v23 = vld [vmem:[%s22663_s5 + $0x50] sm:$0xff]  }
 0x4b7   : > { %17312 = vmatprep.subr.bf16.mxu0 %v19712_v21  ;;  %v2239_v25 = vpack.c.bf16 %v2158_v24, %v2155_v22  ;;  %v2160_v26 = vpop.f32.mrb[247].mxu1  ;;  %v19735_v22 = vld [vmem:[%s22663_s5 + $0x48] sm:$0xff]   ;;  %v19738_v24 = vld [vmem:[%s22663_s5 + $0x58] sm:$0xff]  }
 0x4b8   : > { %v19742_v26 = vld [vmem:[#allocation4 + $0x480] sm:$0xff]  }
 0x4b9   : > { %17305 = vmatmul.mubr.bf16.vlgmr.msra.gmra.mrb[32].mxu0 %v2235_v47 }
 0x4ba   : > { %17308 = vmatprep.mubr.bf16.mxu0 %v2236_v6  ;;  %17313 = vmatpush3.bf16.msra.mxu0 %v19712_v21  ;;  %v19734_v21 = vld [vmem:[%s22663_s5 + $0x40] sm:$0xff]  }
 0x4bb   : > { %17314 = vmatprep.subr.bf16.mxu0 %v19713_v14 }
 0x4bc   : > { %v2163_v28 = vpop.f32.mrb[248].mxu1 }
 0x4bd   : > { %v2165_v29 = vpop.f32.mrb[249].mxu1 }
 0x4be   : > { %17315 = vmatpush3.bf16.msra.mxu0 %v19713_v14  ;;  %v2166_v30 = vpop.f32.mrb[250].mxu1  ;;  %v19739_v14 = vld [vmem:[%s22663_s5 + $0x60] sm:$0xff]   ;;  %v19746_v29 = vld [vmem:[%s22663_s5 + $0x78] sm:$0xff]  }
 0x4bf   : > { %17316 = vmatprep.subr.bf16.mxu0 %v19714_v27  ;;  %v2240_v32 = vpack.c.bf16 %v2166_v30, %v2163_v28  ;;  %v2168_v33 = vpop.f32.mrb[251].mxu1  ;;  %v19745_v28 = vld [vmem:[%s22663_s5 + $0x70] sm:$0xff]  }
 0x4c0   : > { %v19748_v30 = vld [vmem:[#allocation4 + $0x490] sm:$0xff]   ;;  %v19754_v33 = vld [vmem:[#allocation4 + $0x4a8] sm:$0xff]  }
 0x4c1   : > { %17309 = vmatmul.mubr.bf16.gmra.mrb[36].mxu0 %v2237_v10 }
 0x4c2   : > { %17317 = vmatpush3.bf16.msra.mxu0 %v19714_v27  ;;  %17328 = vmatprep.mubr.bf16.mxu0 %v2238_v19  ;;  %v19732_v19 = vld [vmem:[%s22663_s5 + $0x30] sm:$0xff]  }
 0x4c3   : > { %17318 = vmatprep.subr.bf16.mxu0 %v19715_v31  ;;  %v19744_v27 = vld [vmem:[#allocation4 + $0x488] sm:$0xff]  }
 0x4c4   : > { %v2171_v35 = vpop.f32.mrb[252].mxu1 }
 0x4c5   : > { %v2173_v37 = vpop.f32.mrb[253].mxu1 }
 0x4c6   : > { %17319 = vmatpush3.bf16.msra.mxu0 %v19715_v31  ;;  %v2174_v38 = vpop.f32.mrb[254].mxu1  ;;  %v19750_v31 = vld [vmem:[#allocation4 + $0x498] sm:$0xff]  }
 0x4c7   : > { %17320 = vmatprep.subr.bf16.mxu0 %v19716_v34  ;;  %v2241_v42 = vpack.c.bf16 %v2174_v38, %v2171_v35  ;;  %v2176_v44 = vpop.f32.mrb[255].mxu1  ;;  %v19758_v35 = vld [vmem:[#allocation4 + $0x4b8] sm:$0xff]  }
 0x4ca   : > { %17321 = vmatpush3.bf16.msra.mxu0 %v19716_v34  ;;  %v19756_v34 = vld [vmem:[#allocation4 + $0x4b0] sm:$0xff]  }
 0x4cb   : > { %17322 = vmatprep.subr.bf16.mxu0 %v19717_v41 }
 0x4ce   : > { %17323 = vmatpush3.bf16.msra.mxu0 %v19717_v41 }
 0x4cf   : > { %17324 = vmatprep.subr.bf16.mxu0 %v19718_v45 }
 0x4d2   : > { %17325 = vmatpush3.bf16.msra.mxu0 %v19718_v45 }
 0x4d3   : > { %17326 = vmatprep.subr.bf16.mxu0 %v19719_v36 }
 0x4d6   : > { %17327 = vmatpush3.bf16.msra.mxu0 %v19719_v36 }
 0x4d9   : > { %17329 = vmatmul.mubr.bf16.vlgmr.msra.gmra.mrb[32].mxu0 %v2239_v25  ;;  %v19740_v25 = vld [vmem:[%s22663_s5 + $0x68] sm:$0xff]  }
 0x4da   : > { %17332 = vmatprep.mubr.bf16.mxu0 %v2240_v32  ;;  %v19752_v32 = vld [vmem:[#allocation4 + $0x4a0] sm:$0xff]  }
 0x4e1   : > { %17333 = vmatmul.mubr.bf16.gmra.mrb[36].mxu0 %v2241_v42  ;;  %v19741_v42 = vld [vmem:[#allocation4 + $0x400] sm:$0xff]  }
 0x4e2   : > { %17344 = vmatprep.mubr.msk.bf16.mxu0 %vm4573_vm2, %v19724_v39  ;;  %v19743_v39 = vld [vmem:[#allocation4 + $0x408] sm:$0xff]  }
 0x5ac   : > { %v17330_v52 = vpop.f32.mrb[32].mxu0 }
 0x5ad   : > { %v4441_v55 = vadd.f32 %v17330_v52, %v15063_v51  ;;  %v4394_v56 = vpop.f32.mrb[33].mxu0 }
 0x5ae   : > { %v4439_v58 = vadd.f32 %v15063_v51, %v4394_v56  ;;  %v17331_v59 = vpop.f32.mrb[34].mxu0  ;;  %v19760_v56 = vld [vmem:[#allocation4 + $0x500] sm:$0xff]  }
 0x5af   : > { %v4442_v62 = vadd.f32 %v17331_v59, %v15063_v51  ;;  %v4397_v63 = vpop.f32.mrb[35].mxu0  ;;  %v4449_v1 = vmax.f32 %v4441_v55, 0.0  ;;  %v19749_v59 = vld [vmem:[#allocation4 + $0x418] sm:$0xff]  }
 0x5b0   : > { %v4440_v0 = vadd.f32 %v15063_v51, %v4397_v63  ;;  %v4447_v43 = vmax.f32 %v4439_v58, 0.0 }
 0x5b1   : > { %v4450_v2 = vmax.f32 %v4442_v62, 0.0  ;;  %v19762_v62 = vld [vmem:[#allocation4 + $0x508] sm:$0xff]  }
 0x5b2   : > { %v4448_v46 = vmax.f32 %v4440_v0, 0.0 }
 0x5b3   : > { %v4458_v47 = vpack.c.bf16 %v4450_v2, %v4449_v1  ;;  %v19751_v1 = vld [vmem:[#allocation4 + $0x420] sm:$0xff]  }
 0x5b4   : > { %v17334_v50 = vpop.f32.mrb[36].mxu0  ;;  %v4457_v53 = vpack.c.bf16 %v4448_v46, %v4447_v43  ;;  %v19764_v43 = vld [vmem:[#allocation4 + $0x510] sm:$0xff]  }
 0x5b5   : > { %v4445_v54 = vadd.f32 %v17334_v50, %v15063_v51  ;;  %v4410_v3 = vpop.f32.mrb[37].mxu0 }
 0x5b6   : > { %v4443_v4 = vadd.f32 %v15063_v51, %v4410_v3  ;;  %v17335_v5 = vpop.f32.mrb[38].mxu0  ;;  %17336 = vmatprep.subr.bf16.mxu0 %v4457_v53 }
 0x5b7   : > { %v4446_v6 = vadd.f32 %v17335_v5, %v15063_v51  ;;  %v4413_v57 = vpop.f32.mrb[39].mxu0  ;;  %17337 = vmatpush3.bf16.msra.mxu0 %v4457_v53  ;;  %v4453_v61 = vmax.f32 %v4445_v54, 0.0  ;;  %v19753_v53 = vld [vmem:[#allocation4 + $0x428] sm:$0xff]   ;;  %v19766_v54 = vld [vmem:[#allocation4 + $0x518] sm:$0xff]   ;;  %v19755_v5 = vld [vmem:[#allocation4 + $0x430] sm:$0xff]  }
 0x5b8   : > { %v4444_v60 = vadd.f32 %v15063_v51, %v4413_v57  ;;  %17338 = vmatprep.subr.bf16.mxu0 %v4458_v47  ;;  %v4451_v8 = vmax.f32 %v4443_v4, 0.0  ;;  %v19768_v57 = vld [vmem:[#allocation4 + $0x520] sm:$0xff]  }
 0x5b9   : > { %v4454_v7 = vmax.f32 %v4446_v6, 0.0 }
 0x5ba   : > { %v4452_v9 = vmax.f32 %v4444_v60, 0.0 }
 0x5bb   : > { %17339 = vmatpush3.bf16.msra.mxu0 %v4458_v47  ;;  %v4460_v10 = vpack.c.bf16 %v4454_v7, %v4453_v61 }
 0x5bc   : > { %v4459_v11 = vpack.c.bf16 %v4452_v9, %v4451_v8  ;;  %v19757_v8 = vld [vmem:[#allocation4 + $0x438] sm:$0xff]   ;;  %v19770_v9 = vld [vmem:[#allocation4 + $0x528] sm:$0xff]  }
 0x5be   : > { %17340 = vmatprep.subr.bf16.mxu0 %v4459_v11 }
 0x5bf   : > { %17341 = vmatpush3.bf16.msra.mxu0 %v4459_v11 }
 0x5c0   : > { %17342 = vmatprep.subr.bf16.mxu0 %v4460_v10 }
 0x5c3   : > { %17343 = vmatpush3.bf16.msra.mxu0 %v4460_v10 }
 0x5c4   : > { %17416 = vmatprep.subr.bf16.mxu0 %v20665_v17 }
 0x5c6   : > { %17345 = vmatmul.mubr.msk.bf16.vlgmr.msra.gmra.mrb[40].mxu0 %vm4573_vm2, %v19725_v12  ;;  %v19759_v12 = vld [vmem:[#allocation4 + $0x4c0] sm:$0xff]  }
 0x5c7   : > { %17348 = vmatprep.mubr.msk.bf16.mxu0 %vm4573_vm2, %v19727_v13  ;;  %17417 = vmatpush3.bf16.msra.mxu0 %v19742_v26 }
 0x5c8   : > { %17418 = vmatprep.subr.bf16.mxu0 %v20665_v17 }
 0x5cb   : > { %17419 = vmatpush3.bf16.msra.mxu0 %v19744_v27 }
 0x5cc   : > { %17420 = vmatprep.subr.bf16.mxu0 %v20665_v17 }
 0x5ce   : > { %17349 = vmatmul.mubr.msk.bf16.gmra.mrb[44].mxu0 %vm4573_vm2, %v19728_v15  ;;  %v19772_v15 = vld [vmem:[#allocation4 + $0x530] sm:$0xff]  }
 0x5cf   : > { %17352 = vmatprep.mubr.msk.bf16.mxu0 %vm4573_vm2, %v19729_v16  ;;  %17421 = vmatpush3.bf16.msra.mxu0 %v19748_v30  ;;  %v19778_v30 = vld [vmem:[#allocation4 + $0x588] sm:$0xff]  }
 0x5d0   : > { %17422 = vmatprep.subr.bf16.mxu0 %v20665_v17 }
 0x5d3   : > { %17423 = vmatpush3.bf16.msra.mxu0 %v19750_v31  ;;  %v19767_v31 = vld [vmem:[#allocation4 + $0x4e0] sm:$0xff]  }
 0x5d4   : > { %17424 = vmatprep.subr.bf16.mxu0 %v20665_v17 }
 0x5d6   : > { %17353 = vmatmul.mubr.msk.bf16.gmra.mrb[48].mxu0 %vm4573_vm2, %v19730_v18 }
 0x5d7   : > { %17356 = vmatprep.mubr.msk.bf16.mxu0 %vm4573_vm2, %v19732_v19  ;;  %17425 = vmatpush3.bf16.msra.mxu0 %v19752_v32  ;;  %v19780_v32 = vld [vmem:[#allocation4 + $0x590] sm:$0xff]  }
 0x5d8   : > { %17426 = vmatprep.subr.bf16.mxu0 %v20665_v17 }
 0x5db   : > { %17427 = vmatpush3.bf16.msra.mxu0 %v19754_v33  ;;  %v19769_v33 = vld [vmem:[#allocation4 + $0x4e8] sm:$0xff]  }
 0x5dc   : > { %17428 = vmatprep.subr.bf16.mxu0 %v20665_v17 }
 0x5de   : > { %17357 = vmatmul.mubr.msk.bf16.gmra.mrb[52].mxu0 %vm4573_vm2, %v19733_v20  ;;  %v19761_v20 = vld [vmem:[#allocation4 + $0x4c8] sm:$0xff]  }
 0x5df   : > { %17360 = vmatprep.mubr.msk.bf16.mxu0 %vm4573_vm2, %v19734_v21  ;;  %17429 = vmatpush3.bf16.msra.mxu0 %v19756_v34  ;;  %v19774_v21 = vld [vmem:[#allocation4 + $0x538] sm:$0xff]  }
 0x5e0   : > { %17430 = vmatprep.subr.bf16.mxu0 %v20665_v17  ;;  %v19782_v34 = vld [vmem:[#allocation4 + $0x598] sm:$0xff]  }
 0x5e3   : > { %17431 = vmatpush3.bf16.msra.mxu0 %v19758_v35  ;;  %v19771_v35 = vld [vmem:[#allocation4 + $0x4f0] sm:$0xff]  }
 0x5e4   : > { %17456 = vmatprep.subr.bf16.mxu0 %v20665_v17 }
 0x5e6   : > { %17361 = vmatmul.mubr.msk.bf16.gmra.mrb[56].mxu0 %vm4573_vm2, %v19735_v22 }
 0x5e7   : > { %17364 = vmatprep.mubr.msk.bf16.mxu0 %vm4573_vm2, %v19737_v23 }
 0x5ee   : > { %17365 = vmatmul.mubr.msk.bf16.gmra.mrb[60].mxu0 %vm4573_vm2, %v19738_v24  ;;  %v19763_v24 = vld [vmem:[#allocation4 + $0x4d0] sm:$0xff]  }
 0x5ef   : > { %17368 = vmatprep.mubr.msk.bf16.mxu0 %vm4573_vm2, %v19739_v14 }
 0x5f6   : > { %17369 = vmatmul.mubr.msk.bf16.gmra.mrb[64].mxu0 %vm4573_vm2, %v19740_v25  ;;  %v19776_v25 = vld [vmem:[#allocation4 + $0x580] sm:$0xff]  }
 0x5f7   : > { %17372 = vmatprep.mubr.msk.bf16.mxu0 %vm4573_vm2, %v19745_v28 }
 0x5fe   : > { %17373 = vmatmul.mubr.msk.bf16.gmra.mrb[68].mxu0 %vm4573_vm2, %v19746_v29  ;;  %v19765_v29 = vld [vmem:[#allocation4 + $0x4d8] sm:$0xff]  }
 0x5ff   : > { %17432 = vmatprep.mubr.msk.bf16.mxu0 %vm20666_vm3, %v20665_v17 }
 0x699   : > { %v17346_v37 = vpop.f32.mrb[40].mxu0 }
 0x69a   : > { %v21249_v38 = vpop.f32.mrb[41].mxu0 }
 0x69b   : > { %v17347_v41 = vpop.f32.mrb[42].mxu0 }
 0x69c   : > { %v4784_v44 = vpack.c.bf16 %v17347_v41, %v17346_v37  ;;  %v21251_v45 = vpop.f32.mrb[43].mxu0  ;;  %v19784_v37 = vld [vmem:[#allocation4 + $0x5a0] sm:$0xff]  }
 0x69d   : > { %v4783_v36 = vpack.c.bf16 %v21251_v45, %v21249_v38  ;;  %v19773_v38 = vld [vmem:[#allocation4 + $0x4f8] sm:$0xff]   ;;  %v19775_v45 = vld [vmem:[#allocation4 + $0x540] sm:$0xff]  }
 0x69e   : > { %17393 = vmatmul.mubr.bf16.vlgmr.msra.gmra.mrb[0].mxu1 %v4784_v44 }
 0x69f   : > { %17397 = vmatpush3.bf16.msra.mxu1 %v19741_v42  ;;  %17412 = vmatprep.mubr.msk.bf16.mxu1 %vm20666_vm3, %v20665_v17  ;;  %v19786_v42 = vld [vmem:[#allocation4 + $0x5a8] sm:$0xff]  }
 0x6a0   : > { %17398 = vmatprep.subr.bf16.mxu1 %v20665_v17 }
 0x6a1   : > { %v21258_v40 = vpop.f32.mrb[44].mxu0 }
 0x6a2   : > { %v4672_v48 = vpop.f32.mrb[45].mxu0 }
 0x6a3   : > { %17399 = vmatpush3.bf16.msra.mxu1 %v19743_v39  ;;  %v21260_v51 = vpop.f32.mrb[46].mxu0  ;;  %v19788_v39 = vld [vmem:[#allocation4 + $0x5b0] sm:$0xff]  }
 0x6a4   : > { %17400 = vmatprep.subr.bf16.mxu1 %v20665_v17  ;;  %v4786_v52 = vpack.c.bf16 %v21260_v51, %v21258_v40  ;;  %v4675_v55 = vpop.f32.mrb[47].mxu0  ;;  %v19781_v40 = vld [vmem:[#allocation4 + $0x558] sm:$0xff]   ;;  %v19794_v51 = vld [vmem:[#allocation4 + $0x608] sm:$0xff]  }
 0x6a5   : > { %v4785_v58 = vpack.c.bf16 %v4675_v55, %v4672_v48 }
 0x6a7   : > { %17401 = vmatpush3.bf16.msra.mxu1 %v19747_v49  ;;  %17433 = vmatmul.mubr.bf16.vlgmr.msra.gmra.mrb[72].mxu0 %v4785_v58  ;;  %v19790_v58 = vld [vmem:[#allocation4 + $0x5b8] sm:$0xff]  }
 0x6a8   : > { %17402 = vmatprep.subr.bf16.mxu1 %v20665_v17  ;;  %17457 = vmatpush3.bf16.msra.mxu0 %v19760_v56  ;;  %v19777_v56 = vld [vmem:[#allocation4 + $0x548] sm:$0xff]  }
 0x6a9   : > { %17458 = vmatprep.subr.bf16.mxu0 %v20665_v17  ;;  %v21267_v63 = vpop.f32.mrb[48].mxu0  ;;  %17472 = vmatprep.mubr.msk.bf16.mxu0 %vm20666_vm3, %v20665_v17 }
 0x6aa   : > { %v21271_v0 = vpop.f32.mrb[49].mxu0 }
 0x6ab   : > { %17403 = vmatpush3.bf16.msra.mxu1 %v19749_v59  ;;  %v21273_v2 = vpop.f32.mrb[50].mxu0  ;;  %v19779_v59 = vld [vmem:[#allocation4 + $0x550] sm:$0xff]  }
 0x6ac   : > { %17404 = vmatprep.subr.bf16.mxu1 %v20665_v17  ;;  %17459 = vmatpush3.bf16.msra.mxu0 %v19762_v62  ;;  %v4788_v46 = vpack.c.bf16 %v21273_v2, %v21267_v63  ;;  %v4691_v47 = vpop.f32.mrb[51].mxu0  ;;  %v19792_v62 = vld [vmem:[#allocation4 + $0x600] sm:$0xff]   ;;  %v19797_v63 = vld [vmem:[#allocation4 + $0x5d8] sm:$0xff]   ;;  %v19810_v2 = vld [vmem:[#allocation4 + $0x688] sm:$0xff]  }
 0x6ad   : > { %17460 = vmatprep.subr.bf16.mxu0 %v20665_v17  ;;  %v4787_v50 = vpack.c.bf16 %v4691_v47, %v21271_v0  ;;  %v19796_v0 = vld [vmem:[#allocation4 + $0x610] sm:$0xff]  }
 0x6ae   : > { %v19787_v47 = vld [vmem:[#allocation4 + $0x570] sm:$0xff]  }
 0x6af   : > { %17405 = vmatpush3.bf16.msra.mxu1 %v19751_v1  ;;  %v19785_v1 = vld [vmem:[#allocation4 + $0x568] sm:$0xff]  }
 0x6b0   : > { %17406 = vmatprep.subr.bf16.mxu1 %v20665_v17  ;;  %17461 = vmatpush3.bf16.msra.mxu0 %v19764_v43  ;;  %v19798_v43 = vld [vmem:[#allocation4 + $0x618] sm:$0xff]  }
 0x6b1   : > { %17462 = vmatprep.subr.bf16.mxu0 %v20665_v17  ;;  %v21282_v3 = vpop.f32.mrb[52].mxu0 }
 0x6b2   : > { %v21284_v4 = vpop.f32.mrb[53].mxu0 }
 0x6b3   : > { %17407 = vmatpush3.bf16.msra.mxu1 %v19753_v53  ;;  %v21286_v6 = vpop.f32.mrb[54].mxu0  ;;  %v19789_v53 = vld [vmem:[#allocation4 + $0x578] sm:$0xff]  }
 0x6b4   : > { %17408 = vmatprep.subr.bf16.mxu1 %v20665_v17  ;;  %17463 = vmatpush3.bf16.msra.mxu0 %v19766_v54  ;;  %v4790_v60 = vpack.c.bf16 %v21286_v6, %v21282_v3  ;;  %v21291_v61 = vpop.f32.mrb[55].mxu0  ;;  %v19802_v54 = vld [vmem:[#allocation4 + $0x628] sm:$0xff]   ;;  %v19813_v3 = vld [vmem:[#allocation4 + $0x658] sm:$0xff]  }
 0x6b5   : > { %17464 = vmatprep.subr.bf16.mxu0 %v20665_v17  ;;  %v4789_v7 = vpack.c.bf16 %v21291_v61, %v21284_v4  ;;  %v19826_v6 = vld [vmem:[#allocation4 + $0x708] sm:$0xff]  }
 0x6b7   : > { %17409 = vmatpush3.bf16.msra.mxu1 %v19755_v5 }
 0x6b8   : > { %17410 = vmatprep.subr.bf16.mxu1 %v20665_v17  ;;  %17465 = vmatpush3.bf16.msra.mxu0 %v19768_v57  ;;  %v19791_v57 = vld [vmem:[#allocation4 + $0x5c0] sm:$0xff]  }
 0x6b9   : > { %17466 = vmatprep.subr.bf16.mxu0 %v20665_v17  ;;  %v21298_v10 = vpop.f32.mrb[56].mxu0 }
 0x6ba   : > { %v21300_v11 = vpop.f32.mrb[57].mxu0 }
 0x6bb   : > { %17411 = vmatpush3.bf16.msra.mxu1 %v19757_v8  ;;  %v21302_v13 = vpop.f32.mrb[58].mxu0 }
 0x6bc   : > { %17436 = vmatprep.subr.bf16.mxu1 %v20665_v17  ;;  %17467 = vmatpush3.bf16.msra.mxu0 %v19770_v9  ;;  %v4792_v16 = vpack.c.bf16 %v21302_v13, %v21298_v10  ;;  %v21307_v18 = vpop.f32.mrb[59].mxu0  ;;  %v19829_v10 = vld [vmem:[#allocation4 + $0x6d8] sm:$0xff]   ;;  %v19842_v13 = vld [vmem:[#allocation4 + $0x788] sm:$0xff]  }
 0x6bd   : > { %17468 = vmatprep.subr.bf16.mxu0 %v20665_v17  ;;  %v4791_v19 = vpack.c.bf16 %v21307_v18, %v21300_v11  ;;  %v19801_v11 = vld [vmem:[#allocation4 + $0x5e8] sm:$0xff]   ;;  %v19814_v18 = vld [vmem:[#allocation4 + $0x698] sm:$0xff]  }
 0x6be   : > { %17413 = vmatmul.mubr.bf16.vlgmr.msra.gmra.mrb[4].mxu1 %v4783_v36 }
 0x6bf   : > { %17437 = vmatpush3.bf16.msra.mxu1 %v19759_v12  ;;  %17452 = vmatprep.mubr.msk.bf16.mxu1 %vm20666_vm3, %v20665_v17 }
 0x6c0   : > { %17438 = vmatprep.subr.bf16.mxu1 %v20665_v17  ;;  %17469 = vmatpush3.bf16.msra.mxu0 %v19772_v15  ;;  %v19793_v15 = vld [vmem:[#allocation4 + $0x5c8] sm:$0xff]  }
 0x6c1   : > { %17470 = vmatprep.subr.bf16.mxu0 %v20665_v17  ;;  %v21319_v22 = vpop.f32.mrb[60].mxu0 }
 0x6c2   : > { %v21321_v23 = vpop.f32.mrb[61].mxu0 }
 0x6c3   : > { %17439 = vmatpush3.bf16.msra.mxu1 %v19761_v20  ;;  %v21323_v14 = vpop.f32.mrb[62].mxu0  ;;  %v19806_v20 = vld [vmem:[#allocation4 + $0x638] sm:$0xff]  }
 0x6c4   : > { %17440 = vmatprep.subr.bf16.mxu1 %v20665_v17  ;;  %17471 = vmatpush3.bf16.msra.mxu0 %v19774_v21  ;;  %v4794_v26 = vpack.c.bf16 %v21323_v14, %v21319_v22  ;;  %v21328_v27 = vpop.f32.mrb[63].mxu0  ;;  %v19795_v21 = vld [vmem:[#allocation4 + $0x5d0] sm:$0xff]   ;;  %v19845_v22 = vld [vmem:[#allocation4 + $0x758] sm:$0xff]   ;;  %v19847_v14 = vld [vmem:[#allocation4 + $0x760] sm:$0xff]  }
 0x6c5   : > { %17496 = vmatprep.subr.bf16.mxu0 %v20665_v17  ;;  %v4793_v28 = vpack.c.bf16 %v21328_v27, %v21321_v23  ;;  %v19817_v23 = vld [vmem:[#allocation4 + $0x668] sm:$0xff]   ;;  %v19830_v27 = vld [vmem:[#allocation4 + $0x718] sm:$0xff]  }
 0x6c7   : > { %17441 = vmatpush3.bf16.msra.mxu1 %v19763_v24  ;;  %17473 = vmatmul.mubr.bf16.vlgmr.msra.gmra.mrb[76].mxu0 %v4787_v50  ;;  %v19800_v50 = vld [vmem:[#allocation4 + $0x620] sm:$0xff]  }
 0x6c8   : > { %17442 = vmatprep.subr.bf16.mxu1 %v20665_v17  ;;  %17497 = vmatpush3.bf16.msra.mxu0 %v19776_v25  ;;  %v19808_v24 = vld [vmem:[#allocation4 + $0x680] sm:$0xff]   ;;  %v19812_v25 = vld [vmem:[#allocation4 + $0x690] sm:$0xff]  }
 0x6c9   : > { %17498 = vmatprep.subr.bf16.mxu0 %v20665_v17  ;;  %17512 = vmatprep.mubr.msk.bf16.mxu0 %vm20666_vm3, %v20665_v17  ;;  %v21343_v41 = vpop.f32.mrb[64].mxu0 }
 0x6ca   : > { %v21346_v44 = vpop.f32.mrb[65].mxu0 }
 0x6cb   : > { %17443 = vmatpush3.bf16.msra.mxu1 %v19765_v29  ;;  %v21349_v36 = vpop.f32.mrb[66].mxu0  ;;  %v19816_v29 = vld [vmem:[#allocation4 + $0x6a0] sm:$0xff]  }
 0x6cc   : > { %17444 = vmatprep.subr.bf16.mxu1 %v20665_v17  ;;  %17499 = vmatpush3.bf16.msra.mxu0 %v19778_v30  ;;  %v4796_v48 = vpack.c.bf16 %v21349_v36, %v21343_v41  ;;  %v21354_v49 = vpop.f32.mrb[67].mxu0  ;;  %v19805_v30 = vld [vmem:[#allocation4 + $0x5f8] sm:$0xff]   ;;  %v19860_v41 = vld [vmem:[#allocation4 + $0x7e8] sm:$0xff]  }
 0x6cd   : > { %17500 = vmatprep.subr.bf16.mxu0 %v20665_v17  ;;  %v4795_v55 = vpack.c.bf16 %v21354_v49, %v21346_v44  ;;  %v19833_v44 = vld [vmem:[#allocation4 + $0x6e8] sm:$0xff]   ;;  %v19846_v49 = vld [vmem:[#allocation4 + $0x798] sm:$0xff]  }
 0x6cf   : > { %17445 = vmatpush3.bf16.msra.mxu1 %v19767_v31  ;;  %v19818_v31 = vld [vmem:[#allocation4 + $0x6a8] sm:$0xff]  }
 0x6d0   : > { %17446 = vmatprep.subr.bf16.mxu1 %v20665_v17  ;;  %17501 = vmatpush3.bf16.msra.mxu0 %v19780_v32  ;;  %v19807_v32 = vld [vmem:[#allocation4 + $0x640] sm:$0xff]  }
 0x6d1   : > { %17502 = vmatprep.subr.bf16.mxu0 %v20665_v17  ;;  %v21383_v4 = vpop.f32.mrb[68].mxu0 }
 0x6d2   : > { %v21385_v5 = vpop.f32.mrb[69].mxu0 }
 0x6d3   : > { %17447 = vmatpush3.bf16.msra.mxu1 %v19769_v33  ;;  %v21387_v61 = vpop.f32.mrb[70].mxu0  ;;  %v19820_v33 = vld [vmem:[#allocation4 + $0x6b0] sm:$0xff]  }
 0x6d4   : > { %17448 = vmatprep.subr.bf16.mxu1 %v20665_v17  ;;  %17503 = vmatpush3.bf16.msra.mxu0 %v19782_v34  ;;  %v4798_v8 = vpack.c.bf16 %v21387_v61, %v21383_v4  ;;  %v21392_v9 = vpop.f32.mrb[71].mxu0  ;;  %v19809_v34 = vld [vmem:[#allocation4 + $0x648] sm:$0xff]  }
 0x6d5   : > { %17504 = vmatprep.subr.bf16.mxu0 %v20665_v17  ;;  %v4797_v12 = vpack.c.bf16 %v21392_v9, %v21385_v5  ;;  %v19853_v9 = vld [vmem:[#allocation4 + $0x778] sm:$0xff]  }
 0x6d7   : > { %17449 = vmatpush3.bf16.msra.mxu1 %v19771_v35  ;;  %v19822_v35 = vld [vmem:[#allocation4 + $0x6b8] sm:$0xff]  }
 0x6d8   : > { %17450 = vmatprep.subr.bf16.mxu1 %v20665_v17  ;;  %17505 = vmatpush3.bf16.msra.mxu0 %v19784_v37  ;;  %v19811_v37 = vld [vmem:[#allocation4 + $0x650] sm:$0xff]  }
 0x6d9   : > { %17506 = vmatprep.subr.bf16.mxu0 %v20665_v17 }
 0x6db   : > { %17451 = vmatpush3.bf16.msra.mxu1 %v19773_v38  ;;  %v19824_v38 = vld [vmem:[#allocation4 + $0x700] sm:$0xff]  }
 0x6dc   : > { %17476 = vmatprep.subr.bf16.mxu1 %v20665_v17  ;;  %17507 = vmatpush3.bf16.msra.mxu0 %v19786_v42  ;;  %v19828_v42 = vld [vmem:[#allocation4 + $0x710] sm:$0xff]  }
 0x6dd   : > { %17508 = vmatprep.subr.bf16.mxu0 %v20665_v17 }
 0x6de   : > { %17453 = vmatmul.mubr.bf16.vlgmr.msra.gmra.mrb[8].mxu1 %v4786_v52  ;;  %v19783_v52 = vld [vmem:[#allocation4 + $0x560] sm:$0xff]  }
 0x6df   : > { %17477 = vmatpush3.bf16.msra.mxu1 %v19775_v45  ;;  %17492 = vmatprep.mubr.msk.bf16.mxu1 %vm20666_vm3, %v20665_v17  ;;  %v19832_v45 = vld [vmem:[#allocation4 + $0x720] sm:$0xff]  }
 0x6e0   : > { %17478 = vmatprep.subr.bf16.mxu1 %v20665_v17  ;;  %17509 = vmatpush3.bf16.msra.mxu0 %v19788_v39  ;;  %v19821_v39 = vld [vmem:[#allocation4 + $0x678] sm:$0xff]  }
 0x6e1   : > { %17510 = vmatprep.subr.bf16.mxu0 %v20665_v17 }
 0x6e3   : > { %17479 = vmatpush3.bf16.msra.mxu1 %v19777_v56  ;;  %v19834_v56 = vld [vmem:[#allocation4 + $0x728] sm:$0xff]  }
 0x6e4   : > { %17480 = vmatprep.subr.bf16.mxu1 %v20665_v17  ;;  %17511 = vmatpush3.bf16.msra.mxu0 %v19790_v58  ;;  %v19823_v58 = vld [vmem:[#allocation4 + $0x6c0] sm:$0xff]  }
 0x6e5   : > { %17536 = vmatprep.subr.bf16.mxu0 %v20665_v17 }
 0x6e7   : > { %17481 = vmatpush3.bf16.msra.mxu1 %v19779_v59  ;;  %17513 = vmatmul.mubr.bf16.vlgmr.msra.gmra.mrb[80].mxu0 %v4789_v7  ;;  %v19804_v7 = vld [vmem:[#allocation4 + $0x630] sm:$0xff]  }
 0x6e8   : > { %17482 = vmatprep.subr.bf16.mxu1 %v20665_v17  ;;  %17537 = vmatpush3.bf16.msra.mxu0 %v19792_v62  ;;  %v19836_v59 = vld [vmem:[#allocation4 + $0x730] sm:$0xff]   ;;  %v19825_v62 = vld [vmem:[#allocation4 + $0x6c8] sm:$0xff]  }
 0x6e9   : > { %17538 = vmatprep.subr.bf16.mxu0 %v20665_v17  ;;  %17552 = vmatprep.mubr.msk.bf16.mxu0 %vm20666_vm3, %v20665_v17 }
 0x6eb   : > { %17483 = vmatpush3.bf16.msra.mxu1 %v19781_v40  ;;  %v19838_v40 = vld [vmem:[#allocation4 + $0x738] sm:$0xff]  }
 0x6ec   : > { %17484 = vmatprep.subr.bf16.mxu1 %v20665_v17  ;;  %17539 = vmatpush3.bf16.msra.mxu0 %v19794_v51  ;;  %v19827_v51 = vld [vmem:[#allocation4 + $0x6d0] sm:$0xff]  }
 0x6ed   : > { %17540 = vmatprep.subr.bf16.mxu0 %v20665_v17 }
 0x6ef   : > { %17485 = vmatpush3.bf16.msra.mxu1 %v19783_v52  ;;  %v19840_v52 = vld [vmem:[#allocation4 + $0x780] sm:$0xff]  }
 0x6f0   : > { %17486 = vmatprep.subr.bf16.mxu1 %v20665_v17  ;;  %17541 = vmatpush3.bf16.msra.mxu0 %v19796_v0  ;;  %v19844_v0 = vld [vmem:[#allocation4 + $0x790] sm:$0xff]  }
 0x6f1   : > { %17542 = vmatprep.subr.bf16.mxu0 %v20665_v17 }
 0x6f3   : > { %17487 = vmatpush3.bf16.msra.mxu1 %v19785_v1  ;;  %v19848_v1 = vld [vmem:[#allocation4 + $0x7a0] sm:$0xff]  }
 0x6f4   : > { %17488 = vmatprep.subr.bf16.mxu1 %v20665_v17  ;;  %17543 = vmatpush3.bf16.msra.mxu0 %v19798_v43  ;;  %v19837_v43 = vld [vmem:[#allocation4 + $0x6f8] sm:$0xff]  }
 0x6f5   : > { %17544 = vmatprep.subr.bf16.mxu0 %v20665_v17 }
 0x6f7   : > { %17489 = vmatpush3.bf16.msra.mxu1 %v19787_v47  ;;  %v19850_v47 = vld [vmem:[#allocation4 + $0x7a8] sm:$0xff]  }
 0x6f8   : > { %17490 = vmatprep.subr.bf16.mxu1 %v20665_v17  ;;  %17545 = vmatpush3.bf16.msra.mxu0 %v19800_v50  ;;  %v19839_v50 = vld [vmem:[#allocation4 + $0x740] sm:$0xff]  }
 0x6f9   : > { %17546 = vmatprep.subr.bf16.mxu0 %v20665_v17 }
 0x6fb   : > { %17491 = vmatpush3.bf16.msra.mxu1 %v19789_v53  ;;  %v19852_v53 = vld [vmem:[#allocation4 + $0x7b0] sm:$0xff]  }
 0x6fc   : > { %17516 = vmatprep.subr.bf16.mxu1 %v20665_v17  ;;  %17547 = vmatpush3.bf16.msra.mxu0 %v19802_v54  ;;  %v19841_v54 = vld [vmem:[#allocation4 + $0x748] sm:$0xff]  }
 0x6fd   : > { %17548 = vmatprep.subr.bf16.mxu0 %v20665_v17 }
 0x6fe   : > { %17493 = vmatmul.mubr.bf16.vlgmr.msra.gmra.mrb[12].mxu1 %v4788_v46  ;;  %v19799_v46 = vld [vmem:[#allocation4 + $0x5e0] sm:$0xff]  }
 0x6ff   : > { %17517 = vmatpush3.bf16.msra.mxu1 %v19791_v57  ;;  %17532 = vmatprep.mubr.msk.bf16.mxu1 %vm20666_vm3, %v20665_v17  ;;  %v19854_v57 = vld [vmem:[#allocation4 + $0x7b8] sm:$0xff]  }
 0x700   : > { %17518 = vmatprep.subr.bf16.mxu1 %v20665_v17  ;;  %17549 = vmatpush3.bf16.msra.mxu0 %v19804_v7  ;;  %v19843_v7 = vld [vmem:[#allocation4 + $0x750] sm:$0xff]  }
 0x701   : > { %17550 = vmatprep.subr.bf16.mxu0 %v20665_v17 }
 0x703   : > { %17519 = vmatpush3.bf16.msra.mxu1 %v19793_v15 }
 0x704   : > { %17520 = vmatprep.subr.bf16.mxu1 %v20665_v17  ;;  %17551 = vmatpush3.bf16.msra.mxu0 %v19806_v20 }
 0x705   : > { %17576 = vmatprep.subr.bf16.mxu0 %v20665_v17 }
 0x707   : > { %17521 = vmatpush3.bf16.msra.mxu1 %v19795_v21  ;;  %17553 = vmatmul.mubr.bf16.vlgmr.msra.gmra.mrb[84].mxu0 %v4791_v19  ;;  %v19803_v19 = vld [vmem:[#allocation4 + $0x5f0] sm:$0xff]  }
 0x708   : > { %17522 = vmatprep.subr.bf16.mxu1 %v20665_v17  ;;  %17577 = vmatpush3.bf16.msra.mxu0 %v19808_v24  ;;  %v19851_v24 = vld [vmem:[#allocation4 + $0x770] sm:$0xff]  }
 0x709   : > { %17578 = vmatprep.subr.bf16.mxu0 %v20665_v17  ;;  %17592 = vmatprep.mubr.msk.bf16.mxu0 %vm20666_vm3, %v20665_v17 }
 0x70b   : > { %17523 = vmatpush3.bf16.msra.mxu1 %v19797_v63  ;;  %v19855_v63 = vld [vmem:[#allocation4 + $0x7c0] sm:$0xff]  }
 0x70c   : > { %17524 = vmatprep.subr.bf16.mxu1 %v20665_v17  ;;  %17579 = vmatpush3.bf16.msra.mxu0 %v19810_v2 }
 0x70d   : > { %17580 = vmatprep.subr.bf16.mxu0 %v20665_v17 }
 0x70f   : > { %17525 = vmatpush3.bf16.msra.mxu1 %v19799_v46 }
 0x710   : > { %17526 = vmatprep.subr.bf16.mxu1 %v20665_v17  ;;  %17581 = vmatpush3.bf16.msra.mxu0 %v19812_v25 }
 0x711   : > { %17582 = vmatprep.subr.bf16.mxu0 %v20665_v17 }
 0x713   : > { %17527 = vmatpush3.bf16.msra.mxu1 %v19801_v11  ;;  %v19856_v11 = vld [vmem:[#allocation4 + $0x7c8] sm:$0xff]  }
 0x714   : > { %17528 = vmatprep.subr.bf16.mxu1 %v20665_v17  ;;  %17583 = vmatpush3.bf16.msra.mxu0 %v19814_v18  ;;  %v19857_v18 = vld [vmem:[#allocation4 + $0x7d0] sm:$0xff]  }
 0x715   : > { %17584 = vmatprep.subr.bf16.mxu0 %v20665_v17 }
 0x717   : > { %17529 = vmatpush3.bf16.msra.mxu1 %v19803_v19  ;;  %v19858_v19 = vld [vmem:[#allocation4 + $0x7d8] sm:$0xff]  }
 0x718   : > { %17530 = vmatprep.subr.bf16.mxu1 %v20665_v17  ;;  %17585 = vmatpush3.bf16.msra.mxu0 %v19816_v29  ;;  %v19859_v29 = vld [vmem:[#allocation4 + $0x7e0] sm:$0xff]  }
 0x719   : > { %17586 = vmatprep.subr.bf16.mxu0 %v20665_v17 }
 0x71b   : > { %17531 = vmatpush3.bf16.msra.mxu1 %v19805_v30 }
 0x71c   : > { %17556 = vmatprep.subr.bf16.mxu1 %v20665_v17  ;;  %17587 = vmatpush3.bf16.msra.mxu0 %v19818_v31 }
 0x71d   : > { %17588 = vmatprep.subr.bf16.mxu0 %v20665_v17 }
 0x71e   : > { %17533 = vmatmul.mubr.bf16.vlgmr.msra.gmra.mrb[16].mxu1 %v4790_v60  ;;  %v19815_v60 = vld [vmem:[#allocation4 + $0x660] sm:$0xff]  }
 0x71f   : > { %17557 = vmatpush3.bf16.msra.mxu1 %v19807_v32  ;;  %17572 = vmatprep.mubr.msk.bf16.mxu1 %vm20666_vm3, %v20665_v17  ;;  %v19861_v32 = vld [vmem:[#allocation4 + $0x7f0] sm:$0xff]  }
 0x720   : > { %17558 = vmatprep.subr.bf16.mxu1 %v20665_v17  ;;  %17589 = vmatpush3.bf16.msra.mxu0 %v19820_v33 }
 0x721   : > { %17590 = vmatprep.subr.bf16.mxu0 %v20665_v17 }
 0x723   : > { %17559 = vmatpush3.bf16.msra.mxu1 %v19809_v34 }
 0x724   : > { %17560 = vmatprep.subr.bf16.mxu1 %v20665_v17  ;;  %17591 = vmatpush3.bf16.msra.mxu0 %v19822_v35 }
 0x725   : > { %17616 = vmatprep.subr.bf16.mxu0 %v20665_v17 }
 0x727   : > { %17561 = vmatpush3.bf16.msra.mxu1 %v19811_v37  ;;  %17593 = vmatmul.mubr.bf16.vlgmr.msra.gmra.mrb[88].mxu0 %v4793_v28  ;;  %v19819_v28 = vld [vmem:[#allocation4 + $0x670] sm:$0xff]  }
 0x728   : > { %17562 = vmatprep.subr.bf16.mxu1 %v20665_v17  ;;  %17617 = vmatpush3.bf16.msra.mxu0 %v19824_v38  ;;  %v19862_v38 = vld [vmem:[#allocation4 + $0x7f8] sm:$0xff]  }
 0x729   : > { %17618 = vmatprep.subr.bf16.mxu0 %v20665_v17  ;;  %17632 = vmatprep.mubr.msk.bf16.mxu0 %vm20666_vm3, %v20665_v17 }
 0x72b   : > { %17563 = vmatpush3.bf16.msra.mxu1 %v19813_v3 }
 0x72c   : > { %17564 = vmatprep.subr.bf16.mxu1 %v20665_v17  ;;  %17619 = vmatpush3.bf16.msra.mxu0 %v19826_v6 }
 0x72d   : > { %17620 = vmatprep.subr.bf16.mxu0 %v20665_v17 }
 0x72f   : > { %17565 = vmatpush3.bf16.msra.mxu1 %v19815_v60 }
 0x730   : > { %17566 = vmatprep.subr.bf16.mxu1 %v20665_v17  ;;  %17621 = vmatpush3.bf16.msra.mxu0 %v19828_v42 }
 0x731   : > { %17622 = vmatprep.subr.bf16.mxu0 %v20665_v17 }
 0x733   : > { %17567 = vmatpush3.bf16.msra.mxu1 %v19817_v23 }
 0x734   : > { %17568 = vmatprep.subr.bf16.mxu1 %v20665_v17  ;;  %17623 = vmatpush3.bf16.msra.mxu0 %v19830_v27 }
 0x735   : > { %17624 = vmatprep.subr.bf16.mxu0 %v20665_v17 }
 0x737   : > { %17569 = vmatpush3.bf16.msra.mxu1 %v19819_v28 }
 0x738   : > { %17570 = vmatprep.subr.bf16.mxu1 %v20665_v17  ;;  %17625 = vmatpush3.bf16.msra.mxu0 %v19832_v45 }
 0x739   : > { %17626 = vmatprep.subr.bf16.mxu0 %v20665_v17 }
 0x73b   : > { %17571 = vmatpush3.bf16.msra.mxu1 %v19821_v39 }
 0x73c   : > { %17596 = vmatprep.subr.bf16.mxu1 %v20665_v17  ;;  %17627 = vmatpush3.bf16.msra.mxu0 %v19834_v56 }
 0x73d   : > { %17628 = vmatprep.subr.bf16.mxu0 %v20665_v17 }
 0x73e   : > { %17573 = vmatmul.mubr.bf16.vlgmr.msra.gmra.mrb[20].mxu1 %v4792_v16  ;;  %v19831_v16 = vld [vmem:[#allocation4 + $0x6e0] sm:$0xff]  }
 0x73f   : > { %17597 = vmatpush3.bf16.msra.mxu1 %v19823_v58  ;;  %17612 = vmatprep.mubr.msk.bf16.mxu1 %vm20666_vm3, %v20665_v17 }
 0x740   : > { %17598 = vmatprep.subr.bf16.mxu1 %v20665_v17  ;;  %17629 = vmatpush3.bf16.msra.mxu0 %v19836_v59 }
 0x741   : > { %17630 = vmatprep.subr.bf16.mxu0 %v20665_v17 }
 0x743   : > { %17599 = vmatpush3.bf16.msra.mxu1 %v19825_v62 }
 0x744   : > { %17600 = vmatprep.subr.bf16.mxu1 %v20665_v17  ;;  %17631 = vmatpush3.bf16.msra.mxu0 %v19838_v40 }
 0x745   : > { %17656 = vmatprep.subr.bf16.mxu0 %v20665_v17 }
 0x747   : > { %17601 = vmatpush3.bf16.msra.mxu1 %v19827_v51  ;;  %17633 = vmatmul.mubr.bf16.vlgmr.msra.gmra.mrb[92].mxu0 %v4795_v55  ;;  %v19835_v55 = vld [vmem:[#allocation4 + $0x6f0] sm:$0xff]  }
 0x748   : > { %17602 = vmatprep.subr.bf16.mxu1 %v20665_v17  ;;  %17657 = vmatpush3.bf16.msra.mxu0 %v19840_v52 }
 0x749   : > { %17658 = vmatprep.subr.bf16.mxu0 %v20665_v17  ;;  %17672 = vmatprep.mubr.msk.bf16.mxu0 %vm20666_vm3, %v20665_v17 }
 0x74b   : > { %17603 = vmatpush3.bf16.msra.mxu1 %v19829_v10 }
 0x74c   : > { %17604 = vmatprep.subr.bf16.mxu1 %v20665_v17  ;;  %17659 = vmatpush3.bf16.msra.mxu0 %v19842_v13 }
 0x74d   : > { %17660 = vmatprep.subr.bf16.mxu0 %v20665_v17 }
 0x74f   : > { %17605 = vmatpush3.bf16.msra.mxu1 %v19831_v16 }
 0x750   : > { %17606 = vmatprep.subr.bf16.mxu1 %v20665_v17  ;;  %17661 = vmatpush3.bf16.msra.mxu0 %v19844_v0 }
 0x751   : > { %17662 = vmatprep.subr.bf16.mxu0 %v20665_v17 }
 0x753   : > { %17607 = vmatpush3.bf16.msra.mxu1 %v19833_v44 }
 0x754   : > { %17608 = vmatprep.subr.bf16.mxu1 %v20665_v17  ;;  %17663 = vmatpush3.bf16.msra.mxu0 %v19846_v49 }
 0x755   : > { %17664 = vmatprep.subr.bf16.mxu0 %v20665_v17 }
 0x757   : > { %17609 = vmatpush3.bf16.msra.mxu1 %v19835_v55 }
 0x758   : > { %17610 = vmatprep.subr.bf16.mxu1 %v20665_v17  ;;  %17665 = vmatpush3.bf16.msra.mxu0 %v19848_v1 }
 0x759   : > { %17666 = vmatprep.subr.bf16.mxu0 %v20665_v17 }
 0x75b   : > { %17611 = vmatpush3.bf16.msra.mxu1 %v19837_v43 }
 0x75c   : > { %17636 = vmatprep.subr.bf16.mxu1 %v20665_v17  ;;  %17667 = vmatpush3.bf16.msra.mxu0 %v19850_v47 }
 0x75d   : > { %17668 = vmatprep.subr.bf16.mxu0 %v20665_v17 }
 0x75e   : > { %17613 = vmatmul.mubr.bf16.vlgmr.msra.gmra.mrb[24].mxu1 %v4794_v26  ;;  %v19849_v26 = vld [vmem:[#allocation4 + $0x768] sm:$0xff]  }
 0x75f   : > { %17637 = vmatpush3.bf16.msra.mxu1 %v19839_v50  ;;  %17652 = vmatprep.mubr.msk.bf16.mxu1 %vm20666_vm3, %v20665_v17 }
 0x760   : > { %17638 = vmatprep.subr.bf16.mxu1 %v20665_v17  ;;  %17669 = vmatpush3.bf16.msra.mxu0 %v19852_v53 }
 0x761   : > { %17670 = vmatprep.subr.bf16.mxu0 %v20665_v17 }
 0x763   : > { %17639 = vmatpush3.bf16.msra.mxu1 %v19841_v54 }
 0x764   : > { %17640 = vmatprep.subr.bf16.mxu1 %v20665_v17  ;;  %17671 = vmatpush3.bf16.msra.mxu0 %v19854_v57 }
 0x765   : > { %17696 = vmatprep.subr.bf16.mxu0 %v20665_v17 }
 0x767   : > { %17641 = vmatpush3.bf16.msra.mxu1 %v19843_v7  ;;  %17673 = vmatmul.mubr.bf16.vlgmr.msra.gmra.mrb[96].mxu0 %v4797_v12 }
 0x768   : > { %17642 = vmatprep.subr.bf16.mxu1 %v20665_v17  ;;  %17698 = vmatprep.mubr.msk.bf16.mxu0 %vm20666_vm3, %v20665_v17 }
 0x76b   : > { %17643 = vmatpush3.bf16.msra.mxu1 %v19845_v22 }
 0x76c   : > { %17644 = vmatprep.subr.bf16.mxu1 %v20665_v17 }
 0x76f   : > { %17645 = vmatpush3.bf16.msra.mxu1 %v19847_v14 }
 0x770   : > { %17646 = vmatprep.subr.bf16.mxu1 %v20665_v17 }
 0x771   : > { %v4915_v15 = vpop.f32.mrb[0].mxu1 }
 0x772   : > { %v17394_v20 = vpop.f32.mrb[1].mxu1 }
 0x773   : > { %17647 = vmatpush3.bf16.msra.mxu1 %v19849_v26  ;;  %v4918_v21 = vpop.f32.mrb[2].mxu1 }
 0x774   : > { %v17395_v5 = vpop.f32.mrb[3].mxu1  ;;  %17648 = vmatprep.subr.bf16.mxu1 %v20665_v17 }
 0x777   : > { %17649 = vmatpush3.bf16.msra.mxu1 %v19851_v24 }
 0x778   : > { %17650 = vmatprep.subr.bf16.mxu1 %v20665_v17 }
 0x77a   : > { %v5110_v12 = vpop.f32.mrb[72].mxu0 }
 0x77b   : > { %17651 = vmatpush3.bf16.msra.mxu1 %v19853_v9  ;;  %v17434_v2 = vpop.f32.mrb[73].mxu0 }
 0x77c   : > { %17676 = vmatprep.subr.bf16.mxu1 %v20665_v17  ;;  %v5113_v46 = vpop.f32.mrb[74].mxu0 }
 0x77d   : > { %v17435_v25 = vpop.f32.mrb[75].mxu0 }
 0x77e   : > { %17653 = vmatmul.mubr.bf16.vlgmr.msra.gmra.mrb[28].mxu1 %v4796_v48 }
 0x77f   : > { %17677 = vmatpush3.bf16.msra.mxu1 %v19855_v63  ;;  %17692 = vmatprep.mubr.msk.bf16.mxu1 %vm20666_vm3, %v20665_v17 }
 0x780   : > { %17678 = vmatprep.subr.bf16.mxu1 %v20665_v17 }
 0x783   : > { %17679 = vmatpush3.bf16.msra.mxu1 %v19856_v11 }
 0x784   : > { %17680 = vmatprep.subr.bf16.mxu1 %v20665_v17 }
 0x787   : > { %17681 = vmatpush3.bf16.msra.mxu1 %v19857_v18 }
 0x788   : > { %17682 = vmatprep.subr.bf16.mxu1 %v20665_v17 }
 0x78b   : > { %17683 = vmatpush3.bf16.msra.mxu1 %v19858_v19 }
 0x78c   : > { %17684 = vmatprep.subr.bf16.mxu1 %v20665_v17 }
 0x78f   : > { %17685 = vmatpush3.bf16.msra.mxu1 %v19859_v29 }
 0x790   : > { %17686 = vmatprep.subr.bf16.mxu1 %v20665_v17 }
 0x791   : > { %v5004_v36 = vpop.f32.mrb[4].mxu1 }
 0x792   : > { %v5005_v48 = vadd.f32 %v5004_v36, %v4915_v15  ;;  %v17414_v30 = vpop.f32.mrb[5].mxu1 }
 0x793   : > { %v5007_v31 = vpop.f32.mrb[6].mxu1  ;;  %17687 = vmatpush3.bf16.msra.mxu1 %v19860_v41 }
 0x794   : > { %v5008_v33 = vadd.f32 %v5007_v31, %v4918_v21  ;;  %v17415_v34 = vpop.f32.mrb[7].mxu1  ;;  %17688 = vmatprep.subr.bf16.mxu1 %v20665_v17  ;;  %v5117_v35 = vadd.f32 %v5110_v12, %v5005_v48 }
 0x796   : > { %v5118_v37 = vadd.f32 %v5113_v46, %v5008_v33 }
 0x797   : > { %17689 = vmatpush3.bf16.msra.mxu1 %v19861_v32 }
 0x798   : > { %17690 = vmatprep.subr.bf16.mxu1 %v20665_v17 }
 0x79a   : > { %v5326_v3 = vpop.f32.mrb[76].mxu0 }
 0x79b   : > { %17691 = vmatpush3.bf16.msra.mxu1 %v19862_v38  ;;  %v17474_v6 = vpop.f32.mrb[77].mxu0 }
 0x79c   : > { %v5329_v60 = vpop.f32.mrb[78].mxu0  ;;  %17734 = vmatprep.subr.bf16.mxu1 %v20665_v17  ;;  %v19873_v6 = vld [vmem:[#allocation4 + $0x840] sm:$0xff]  }
 0x79d   : > { %v17475_v42 = vpop.f32.mrb[79].mxu0 }
 0x79e   : > { %17693 = vmatmul.mubr.bf16.vlgmr.msra.gmra.mrb[32].mxu1 %v4798_v8  ;;  %v19875_v42 = vld [vmem:[#allocation4 + $0x850] sm:$0xff]  }
 0x79f   : > { %17750 = vmatprep.mubr.msk.bf16.mxu1 %vm20666_vm3, %v20665_v17  ;;  %17735 = vmatpush3.bf16.msra.mxu1 %v19873_v6 }
 0x7a0   : > { %17736 = vmatprep.subr.bf16.mxu1 %v20665_v17 }
 0x7b1   : > { %v5218_v23 = vpop.f32.mrb[8].mxu1 }
 0x7b2   : > { %v5225_v27 = vadd.f32 %v5218_v23, %v5117_v35  ;;  %v17454_v28 = vpop.f32.mrb[9].mxu1  ;;  %v19877_v23 = vld [vmem:[#allocation4 + $0x858] sm:$0xff]  }
 0x7b3   : > { %v5221_v45 = vpop.f32.mrb[10].mxu1 }
 0x7b4   : > { %v5226_v39 = vadd.f32 %v5221_v45, %v5118_v37  ;;  %v17455_v56 = vpop.f32.mrb[11].mxu1  ;;  %v5333_v58 = vadd.f32 %v5326_v3, %v5225_v27  ;;  %v19878_v27 = vld [vmem:[#allocation4 + $0x860] sm:$0xff]  }
 0x7b6   : > { %v5334_v59 = vadd.f32 %v5329_v60, %v5226_v39  ;;  %v19874_v60 = vld [vmem:[#allocation4 + $0x848] sm:$0xff]  }
 0x7b7   : > { %17737 = vmatpush3.bf16.msra.mxu1 %v19874_v60  ;;  %v19888_v60 = vld [vmem:[#allocation4 + $0x818] sm:$0xff]  }
 0x7b8   : > { %17738 = vmatprep.subr.bf16.mxu1 %v20665_v17 }
 0x7ba   : > { %v5542_v62 = vpop.f32.mrb[80].mxu0 }
 0x7bb   : > { %v17514_v40 = vpop.f32.mrb[81].mxu0  ;;  %17739 = vmatpush3.bf16.msra.mxu1 %v19875_v42  ;;  %v19898_v42 = vld [vmem:[#allocation4 + $0x908] sm:$0xff]  }
 0x7bc   : > { %v5545_v51 = vpop.f32.mrb[82].mxu0  ;;  %17740 = vmatprep.subr.bf16.mxu1 %v20665_v17 }
 0x7bd   : > { %v17515_v52 = vpop.f32.mrb[83].mxu0 }
 0x7bf   : > { %17741 = vmatpush3.bf16.msra.mxu1 %v19877_v23 }
 0x7c0   : > { %17742 = vmatprep.subr.bf16.mxu1 %v20665_v17 }
 0x7c3   : > { %17743 = vmatpush3.bf16.msra.mxu1 %v19878_v27 }
 0x7c4   : > { %17744 = vmatprep.subr.bf16.mxu1 %v20665_v17 }
 0x7d1   : > { %v5434_v10 = vpop.f32.mrb[12].mxu1 }
 0x7d2   : > { %v5441_v13 = vadd.f32 %v5434_v10, %v5333_v58  ;;  %v17494_v16 = vpop.f32.mrb[13].mxu1 }
 0x7d3   : > { %v5437_v4 = vpop.f32.mrb[14].mxu1 }
 0x7d4   : > { %v5442_v61 = vadd.f32 %v5437_v4, %v5334_v59  ;;  %v17495_v8 = vpop.f32.mrb[15].mxu1  ;;  %v5549_v0 = vadd.f32 %v5542_v62, %v5441_v13 }
 0x7d6   : > { %v5550_v44 = vadd.f32 %v5545_v51, %v5442_v61  ;;  %v15224_v51 = vld [vmem:[#allocation6 + $0x1] ss:$0 sm:$0xff] }
 0x7da   : > { %v5758_v49 = vpop.f32.mrb[84].mxu0 }
 0x7db   : > { %v17554_v55 = vpop.f32.mrb[85].mxu0 }
 0x7dc   : > { %v5761_v1 = vpop.f32.mrb[86].mxu0 }
 0x7dd   : > { %v17555_v43 = vpop.f32.mrb[87].mxu0 }
 0x7de   : > { %v19872_v43 = vld [vmem:[#allocation4 + $0x880] sm:$0xff]  }
 0x7f1   : > { %v5650_v47 = vpop.f32.mrb[16].mxu1 }
 0x7f2   : > { %v5657_v50 = vadd.f32 %v5650_v47, %v5549_v0  ;;  %v17534_v53 = vpop.f32.mrb[17].mxu1  ;;  %v19876_v47 = vld [vmem:[#allocation4 + $0x888] sm:$0xff]  }
 0x7f3   : > { %v5653_v54 = vpop.f32.mrb[18].mxu1  ;;  %v19879_v53 = vld [vmem:[#allocation4 + $0x890] sm:$0xff]  }
 0x7f4   : > { %v5658_v57 = vadd.f32 %v5653_v54, %v5550_v44  ;;  %v17535_v7 = vpop.f32.mrb[19].mxu1  ;;  %v5765_v22 = vadd.f32 %v5758_v49, %v5657_v50  ;;  %v19864_v50 = vld [vmem:[%s22664_s6 + $0x8] sm:$0xff]   ;;  %v19865_v54 = vld [vmem:[%s22664_s6 + $0x10] sm:$0xff]  }
 0x7f5   : > { %v19867_v7 = vld [vmem:[%s22664_s6 + $0x20] sm:$0xff]  }
 0x7f6   : > { %v5766_v14 = vadd.f32 %v5761_v1, %v5658_v57  ;;  %v19863_v1 = vld [vmem:[%s22664_s6] sm:$0xff]   ;;  %v19866_v57 = vld [vmem:[%s22664_s6 + $0x18] sm:$0xff]  }
 0x7fa   : > { %v5974_v26 = vpop.f32.mrb[88].mxu0 }
 0x7fb   : > { %v17594_v15 = vpop.f32.mrb[89].mxu0 }
 0x7fc   : > { %v5977_v20 = vpop.f32.mrb[90].mxu0  ;;  %v19871_v15 = vld [vmem:[%s22664_s6 + $0x40] sm:$0xff]  }
 0x7fd   : > { %v17595_v21 = vpop.f32.mrb[91].mxu0 }
 0x7fe   : > { %v19881_v21 = vld [vmem:[#allocation4 + $0x870] sm:$0xff]  }
 0x811   : > { %v5866_v24 = vpop.f32.mrb[20].mxu1 }
 0x812   : > { %v5873_v5 = vadd.f32 %v5866_v24, %v5765_v22  ;;  %v17574_v9 = vpop.f32.mrb[21].mxu1  ;;  %v19868_v22 = vld [vmem:[%s22664_s6 + $0x28] sm:$0xff]   ;;  %v19882_v24 = vld [vmem:[#allocation4 + $0x898] sm:$0xff]  }
 0x813   : > { %v5869_v12 = vpop.f32.mrb[22].mxu1  ;;  %v19885_v9 = vld [vmem:[#allocation4 + $0x8a0] sm:$0xff]  }
 0x814   : > { %v5874_v63 = vadd.f32 %v5869_v12, %v5766_v14  ;;  %v17575_v2 = vpop.f32.mrb[23].mxu1  ;;  %v5981_v46 = vadd.f32 %v5974_v26, %v5873_v5  ;;  %v19869_v14 = vld [vmem:[%s22664_s6 + $0x30] sm:$0xff]   ;;  %v19870_v26 = vld [vmem:[%s22664_s6 + $0x38] sm:$0xff]  }
 0x815   : > { %v19883_v5 = vld [vmem:[#allocation4 + $0x878] sm:$0xff]   ;;  %v19889_v12 = vld [vmem:[#allocation4 + $0x8a8] sm:$0xff]  }
 0x816   : > { %v5982_v25 = vadd.f32 %v5977_v20, %v5874_v63  ;;  %v19880_v20 = vld [vmem:[#allocation4 + $0x868] sm:$0xff]   ;;  %v19892_v63 = vld [vmem:[#allocation4 + $0x8b0] sm:$0xff]   ;;  %v19894_v2 = vld [vmem:[#allocation4 + $0x8b8] sm:$0xff]  }
 0x817   : > { %17745 = vmatpush3.bf16.msra.mxu1 %v19880_v20  ;;  %v19903_v20 = vld [vmem:[#allocation4 + $0x8d8] sm:$0xff]  }
 0x818   : > { %17746 = vmatprep.subr.bf16.mxu1 %v20665_v17 }
 0x81a   : > { %v6190_v11 = vpop.f32.mrb[92].mxu0 }
 0x81b   : > { %v17634_v18 = vpop.f32.mrb[93].mxu0  ;;  %17747 = vmatpush3.bf16.msra.mxu1 %v19881_v21  ;;  %v19914_v21 = vld [vmem:[#allocation4 + $0x988] sm:$0xff]  }
 0x81c   : > { %v6193_v19 = vpop.f32.mrb[94].mxu0  ;;  %17748 = vmatprep.subr.bf16.mxu1 %v20665_v17 }
 0x81d   : > { %v17635_v29 = vpop.f32.mrb[95].mxu0 }
 0x81f   : > { %17749 = vmatpush3.bf16.msra.mxu1 %v19883_v5 }
 0x820   : > { %17754 = vmatprep.subr.bf16.mxu1 %v20665_v17 }
 0x831   : > { %v6082_v41 = vpop.f32.mrb[24].mxu1 }
 0x832   : > { %v6089_v36 = vadd.f32 %v6082_v41, %v5981_v46  ;;  %v17614_v48 = vpop.f32.mrb[25].mxu1 }
 0x833   : > { %v6085_v30 = vpop.f32.mrb[26].mxu1  ;;  %v19884_v48 = vld [vmem:[#allocation4 + $0x800] sm:$0xff]  }
 0x834   : > { %v6090_v31 = vadd.f32 %v6085_v30, %v5982_v25  ;;  %v6197_v32 = vadd.f32 %v6190_v11, %v6089_v36  ;;  %v17615_v33 = vpop.f32.mrb[27].mxu1 }
 0x836   : > { %v6198_v34 = vadd.f32 %v6193_v19, %v6090_v31 }
 0x83a   : > { %v6406_v35 = vpop.f32.mrb[96].mxu0 }
 0x83b   : > { %v17674_v37 = vpop.f32.mrb[97].mxu0 }
 0x83c   : > { %v6409_v38 = vpop.f32.mrb[98].mxu0 }
 0x83d   : > { %v17675_v3 = vpop.f32.mrb[99].mxu0 }
 0x851   : > { %v6298_v28 = vpop.f32.mrb[28].mxu1 }
 0x852   : > { %v6305_v45 = vadd.f32 %v6298_v28, %v6197_v32  ;;  %v17654_v39 = vpop.f32.mrb[29].mxu1  ;;  %v19886_v32 = vld [vmem:[#allocation4 + $0x808] sm:$0xff]   ;;  %v19890_v28 = vld [vmem:[#allocation4 + $0x820] sm:$0xff]  }
 0x853   : > { %v6301_v56 = vpop.f32.mrb[30].mxu1 }
 0x854   : > { %v6306_v58 = vadd.f32 %v6301_v56, %v6198_v34  ;;  %v6413_v59 = vadd.f32 %v6406_v35, %v6305_v45  ;;  %v17655_v62 = vpop.f32.mrb[31].mxu1  ;;  %v19887_v35 = vld [vmem:[#allocation4 + $0x810] sm:$0xff]  }
 0x855   : > { %v19900_v45 = vld [vmem:[#allocation4 + $0x910] sm:$0xff]   ;;  %v19902_v62 = vld [vmem:[#allocation4 + $0x918] sm:$0xff]  }
 0x856   : > { %v6414_v40 = vadd.f32 %v6409_v38, %v6306_v58  ;;  %v19896_v38 = vld [vmem:[#allocation4 + $0x900] sm:$0xff]  }
 0x871   : > { %v6514_v52 = vpop.f32.mrb[32].mxu1 }
 0x872   : > { %v6521_v10 = vadd.f32 %v6514_v52, %v6413_v59  ;;  %v17694_v13 = vpop.f32.mrb[33].mxu1  ;;  %v19891_v59 = vld [vmem:[#allocation4 + $0x828] sm:$0xff]   ;;  %v19893_v52 = vld [vmem:[#allocation4 + $0x830] sm:$0xff]  }
 0x873   : > { %v6517_v16 = vpop.f32.mrb[34].mxu1 }
 0x874   : > { %v6529_v4 = vadd.f32 %v15224_v51, %v6521_v10  ;;  %v6522_v61 = vadd.f32 %v6517_v16, %v6414_v40  ;;  %v17695_v8 = vpop.f32.mrb[35].mxu1  ;;  %v19904_v10 = vld [vmem:[#allocation4 + $0x920] sm:$0xff]  }
 0x875   : > { %v19906_v8 = vld [vmem:[#allocation4 + $0x928] sm:$0xff]  }
 0x876   : > { %v6530_v0 = vadd.f32 %v15224_v51, %v6522_v61  ;;  %v6531_v44 = vmax.f32 %v6529_v4, 0.0  ;;  %v19895_v61 = vld [vmem:[#allocation4 + $0x838] sm:$0xff]  }
 0x878   : > { %v6532_v49 = vmax.f32 %v6530_v0, 0.0 }
 0x87a   : > { %v6535_v55 = vpack.c.bf16 %v6532_v49, %v6531_v44  ;;  %v19897_v49 = vld [vmem:[#allocation4 + $0x8c0] sm:$0xff]  }
 0x87c   : > { %17697 = vmatpush3.bf16.msra.mxu0 %v6535_v55  ;;  %v19908_v55 = vld [vmem:[#allocation4 + $0x930] sm:$0xff]  }
 0x87d   : > { %17774 = vmatprep.subr.bf16.mxu0 %v20665_v17 }
 0x87f   : > { %17699 = vmatmul.mubr.msk.bf16.vlgmr.msra.gmra.mrb[100].mxu0 %vm6599_vm4, %v19863_v1 }
 0x880   : > { %17702 = vmatprep.mubr.msk.bf16.mxu0 %vm20666_vm3, %v20665_v17  ;;  %17775 = vmatpush3.bf16.msra.mxu0 %v19872_v43 }
 0x881   : > { %17776 = vmatprep.subr.bf16.mxu0 %v20665_v17 }
 0x884   : > { %17777 = vmatpush3.bf16.msra.mxu0 %v19876_v47 }
 0x885   : > { %17778 = vmatprep.subr.bf16.mxu0 %v20665_v17 }
 0x887   : > { %17703 = vmatmul.mubr.msk.bf16.gmra.mrb[104].mxu0 %vm6599_vm4, %v19864_v50  ;;  %v19899_v50 = vld [vmem:[#allocation4 + $0x8c8] sm:$0xff]  }
 0x888   : > { %17706 = vmatprep.mubr.msk.bf16.mxu0 %vm20666_vm3, %v20665_v17  ;;  %17779 = vmatpush3.bf16.msra.mxu0 %v19879_v53  ;;  %v19910_v53 = vld [vmem:[#allocation4 + $0x938] sm:$0xff]  }
 0x889   : > { %17780 = vmatprep.subr.bf16.mxu0 %v20665_v17 }
 0x88c   : > { %17781 = vmatpush3.bf16.msra.mxu0 %v19882_v24 }
 0x88d   : > { %17782 = vmatprep.subr.bf16.mxu0 %v20665_v17 }
 0x88f   : > { %17707 = vmatmul.mubr.msk.bf16.gmra.mrb[108].mxu0 %vm6599_vm4, %v19865_v54 }
 0x890   : > { %17710 = vmatprep.mubr.msk.bf16.mxu0 %vm20666_vm3, %v20665_v17  ;;  %17783 = vmatpush3.bf16.msra.mxu0 %v19885_v9  ;;  %v19905_v9 = vld [vmem:[#allocation4 + $0x8e0] sm:$0xff]  }
 0x891   : > { %17784 = vmatprep.subr.bf16.mxu0 %v20665_v17 }
 0x894   : > { %17785 = vmatpush3.bf16.msra.mxu0 %v19889_v12  ;;  %v19916_v12 = vld [vmem:[#allocation4 + $0x990] sm:$0xff]  }
 0x895   : > { %17786 = vmatprep.subr.bf16.mxu0 %v20665_v17 }
 0x897   : > { %17711 = vmatmul.mubr.msk.bf16.gmra.mrb[112].mxu0 %vm6599_vm4, %v19866_v57 }
 0x898   : > { %17714 = vmatprep.mubr.msk.bf16.mxu0 %vm20666_vm3, %v20665_v17  ;;  %17787 = vmatpush3.bf16.msra.mxu0 %v19892_v63 }
 0x899   : > { %17788 = vmatprep.subr.bf16.mxu0 %v20665_v17 }
 0x89c   : > { %17789 = vmatpush3.bf16.msra.mxu0 %v19894_v2 }
 0x89d   : > { %17814 = vmatprep.subr.bf16.mxu0 %v20665_v17 }
 0x89f   : > { %17715 = vmatmul.mubr.msk.bf16.gmra.mrb[116].mxu0 %vm6599_vm4, %v19867_v7  ;;  %v19901_v7 = vld [vmem:[#allocation4 + $0x8d0] sm:$0xff]  }
 0x8a0   : > { %17718 = vmatprep.mubr.msk.bf16.mxu0 %vm20666_vm3, %v20665_v17 }
 0x8a7   : > { %17719 = vmatmul.mubr.msk.bf16.gmra.mrb[120].mxu0 %vm6599_vm4, %v19868_v22  ;;  %v19912_v22 = vld [vmem:[#allocation4 + $0x980] sm:$0xff]  }
 0x8a8   : > { %17722 = vmatprep.mubr.msk.bf16.mxu0 %vm20666_vm3, %v20665_v17 }
 0x8af   : > { %17723 = vmatmul.mubr.msk.bf16.gmra.mrb[124].mxu0 %vm6599_vm4, %v19869_v14 }
 0x8b0   : > { %17726 = vmatprep.mubr.msk.bf16.mxu0 %vm20666_vm3, %v20665_v17 }
 0x8b7   : > { %17727 = vmatmul.mubr.msk.bf16.gmra.mrb[128].mxu0 %vm6599_vm4, %v19870_v26 }
 0x8b8   : > { %17730 = vmatprep.mubr.msk.bf16.mxu0 %vm20666_vm3, %v20665_v17 }
 0x8bf   : > { %17731 = vmatmul.mubr.msk.bf16.gmra.mrb[132].mxu0 %vm6599_vm4, %v19871_v15 }
 0x8c0   : > { %17790 = vmatprep.mubr.msk.bf16.mxu0 %vm20666_vm3, %v20665_v17 }
 0x952   : > { %v21584_v46 = vpop.f32.mrb[100].mxu0 }
 0x953   : > { %v17700_v25 = vpop.f32.mrb[101].mxu0 }
 0x954   : > { %v21586_v11 = vpop.f32.mrb[102].mxu0  ;;  %v19907_v25 = vld [vmem:[#allocation4 + $0x8e8] sm:$0xff]  }
 0x955   : > { %v6732_v18 = vpack.c.bf16 %v21586_v11, %v21584_v46  ;;  %v17701_v19 = vpop.f32.mrb[103].mxu0  ;;  %v19918_v11 = vld [vmem:[#allocation4 + $0x998] sm:$0xff]  }
 0x95a   : > { %v6669_v29 = vpop.f32.mrb[104].mxu0 }
 0x95b   : > { %v17704_v41 = vpop.f32.mrb[105].mxu0 }
 0x95c   : > { %v6672_v36 = vpop.f32.mrb[106].mxu0  ;;  %v19920_v41 = vld [vmem:[#allocation4 + $0x9a0] sm:$0xff]  }
 0x95d   : > { %v6733_v30 = vpack.c.bf16 %v6672_v36, %v6669_v29  ;;  %v17705_v31 = vpop.f32.mrb[107].mxu0  ;;  %v19909_v29 = vld [vmem:[#allocation4 + $0x8f0] sm:$0xff]  }
 0x95e   : > { %v19911_v31 = vld [vmem:[#allocation4 + $0x8f8] sm:$0xff]  }
 0x95f   : > { %17751 = vmatmul.mubr.bf16.vlgmr.msra.gmra.mrb[36].mxu1 %v6733_v30 }
 0x960   : > { %17755 = vmatpush3.bf16.msra.mxu1 %v19884_v48  ;;  %17770 = vmatprep.mubr.msk.bf16.mxu1 %vm20666_vm3, %v20665_v17 }
 0x961   : > { %17756 = vmatprep.subr.bf16.mxu1 %v20665_v17 }
 0x962   : > { %v6677_v33 = vpop.f32.mrb[108].mxu0 }
 0x963   : > { %v17708_v34 = vpop.f32.mrb[109].mxu0 }
 0x964   : > { %17757 = vmatpush3.bf16.msra.mxu1 %v19886_v32  ;;  %v6680_v37 = vpop.f32.mrb[110].mxu0  ;;  %v19922_v32 = vld [vmem:[#allocation4 + $0x9a8] sm:$0xff]   ;;  %v19924_v34 = vld [vmem:[#allocation4 + $0x9b0] sm:$0xff]  }
 0x965   : > { %17758 = vmatprep.subr.bf16.mxu1 %v20665_v17  ;;  %v6734_v3 = vpack.c.bf16 %v6680_v37, %v6677_v33  ;;  %v17709_v6 = vpop.f32.mrb[111].mxu0  ;;  %v19913_v33 = vld [vmem:[#allocation4 + $0x940] sm:$0xff]   ;;  %v19926_v37 = vld [vmem:[#allocation4 + $0x9b8] sm:$0xff]  }
 0x966   : > { %v19919_v6 = vld [vmem:[#allocation4 + $0x958] sm:$0xff]  }
 0x967   : > { %17791 = vmatmul.mubr.bf16.vlgmr.msra.gmra.mrb[136].mxu0 %v6734_v3  ;;  %v19928_v3 = vld [vmem:[#allocation4 + $0xa00] sm:$0xff]  }
 0x968   : > { %17759 = vmatpush3.bf16.msra.mxu1 %v19887_v35  ;;  %17815 = vmatpush3.bf16.msra.mxu0 %v19896_v38  ;;  %v19915_v35 = vld [vmem:[#allocation4 + $0x948] sm:$0xff]   ;;  %v19917_v38 = vld [vmem:[#allocation4 + $0x950] sm:$0xff]  }
 0x969   : > { %17760 = vmatprep.subr.bf16.mxu1 %v20665_v17  ;;  %17816 = vmatprep.subr.bf16.mxu0 %v20665_v17 }
 0x96a   : > { %v21596_v23 = vpop.f32.mrb[112].mxu0  ;;  %17830 = vmatprep.mubr.msk.bf16.mxu0 %vm20666_vm3, %v20665_v17 }
 0x96b   : > { %v17712_v27 = vpop.f32.mrb[113].mxu0 }
 0x96c   : > { %17761 = vmatpush3.bf16.msra.mxu1 %v19888_v60  ;;  %17817 = vmatpush3.bf16.msra.mxu0 %v19898_v42  ;;  %v21600_v39 = vpop.f32.mrb[114].mxu0  ;;  %v19930_v60 = vld [vmem:[#allocation4 + $0xa08] sm:$0xff]   ;;  %v19921_v42 = vld [vmem:[#allocation4 + $0x960] sm:$0xff]  }
 0x96d   : > { %17762 = vmatprep.subr.bf16.mxu1 %v20665_v17  ;;  %17818 = vmatprep.subr.bf16.mxu0 %v20665_v17  ;;  %v6735_v56 = vpack.c.bf16 %v21600_v39, %v21596_v23  ;;  %v17713_v58 = vpop.f32.mrb[115].mxu0  ;;  %v19932_v23 = vld [vmem:[#allocation4 + $0xa10] sm:$0xff]   ;;  %v19923_v27 = vld [vmem:[#allocation4 + $0x968] sm:$0xff]   ;;  %v19936_v39 = vld [vmem:[#allocation4 + $0xa20] sm:$0xff]  }
 0x96e   : > { %v19938_v58 = vld [vmem:[#allocation4 + $0xa28] sm:$0xff]  }
 0x970   : > { %17763 = vmatpush3.bf16.msra.mxu1 %v19890_v28  ;;  %17819 = vmatpush3.bf16.msra.mxu0 %v19900_v45  ;;  %v19934_v28 = vld [vmem:[#allocation4 + $0xa18] sm:$0xff]   ;;  %v19925_v45 = vld [vmem:[#allocation4 + $0x970] sm:$0xff]  }
 0x971   : > { %17764 = vmatprep.subr.bf16.mxu1 %v20665_v17  ;;  %17820 = vmatprep.subr.bf16.mxu0 %v20665_v17 }
 0x972   : > { %v6693_v40 = vpop.f32.mrb[116].mxu0 }
 0x973   : > { %v17716_v51 = vpop.f32.mrb[117].mxu0 }
 0x974   : > { %17765 = vmatpush3.bf16.msra.mxu1 %v19891_v59  ;;  %17821 = vmatpush3.bf16.msra.mxu0 %v19902_v62  ;;  %v6696_v13 = vpop.f32.mrb[118].mxu0  ;;  %v19929_v59 = vld [vmem:[#allocation4 + $0x9c0] sm:$0xff]   ;;  %v19940_v62 = vld [vmem:[#allocation4 + $0xa30] sm:$0xff]   ;;  %v19942_v51 = vld [vmem:[#allocation4 + $0xa38] sm:$0xff]  }
 0x975   : > { %17766 = vmatprep.subr.bf16.mxu1 %v20665_v17  ;;  %17822 = vmatprep.subr.bf16.mxu0 %v20665_v17  ;;  %v6736_v16 = vpack.c.bf16 %v6696_v13, %v6693_v40  ;;  %v17717_v4 = vpop.f32.mrb[119].mxu0  ;;  %v19931_v40 = vld [vmem:[#allocation4 + $0x9c8] sm:$0xff]   ;;  %v19937_v13 = vld [vmem:[#allocation4 + $0x9e0] sm:$0xff]  }
 0x976   : > { %v19941_v4 = vld [vmem:[#allocation4 + $0x9f0] sm:$0xff]  }
 0x978   : > { %17767 = vmatpush3.bf16.msra.mxu1 %v19893_v52  ;;  %17823 = vmatpush3.bf16.msra.mxu0 %v19904_v10  ;;  %v19933_v52 = vld [vmem:[#allocation4 + $0x9d0] sm:$0xff]   ;;  %v19935_v10 = vld [vmem:[#allocation4 + $0x9d8] sm:$0xff]  }
 0x979   : > { %17768 = vmatprep.subr.bf16.mxu1 %v20665_v17  ;;  %17824 = vmatprep.subr.bf16.mxu0 %v20665_v17 }
 0x97a   : > { %v21612_v0 = vpop.f32.mrb[120].mxu0 }
 0x97b   : > { %v17720_v44 = vpop.f32.mrb[121].mxu0 }
 0x97c   : > { %17769 = vmatpush3.bf16.msra.mxu1 %v19895_v61  ;;  %17825 = vmatpush3.bf16.msra.mxu0 %v19906_v8  ;;  %v21614_v1 = vpop.f32.mrb[122].mxu0  ;;  %v19943_v61 = vld [vmem:[#allocation4 + $0x9f8] sm:$0xff]   ;;  %v19944_v8 = vld [vmem:[#allocation4 + $0xa40] sm:$0xff]   ;;  %v19946_v44 = vld [vmem:[#allocation4 + $0xa50] sm:$0xff]  }
 0x97d   : > { %17794 = vmatprep.subr.bf16.mxu1 %v20665_v17  ;;  %17826 = vmatprep.subr.bf16.mxu0 %v20665_v17  ;;  %v6737_v43 = vpack.c.bf16 %v21614_v1, %v21612_v0  ;;  %v17721_v47 = vpop.f32.mrb[123].mxu0  ;;  %v19945_v0 = vld [vmem:[#allocation4 + $0xa48] sm:$0xff]  }
 0x97e   : > { %v19949_v1 = vld [vmem:[#allocation4 + $0xa68] sm:$0xff]  }
 0x97f   : > { %17771 = vmatmul.mubr.bf16.vlgmr.msra.gmra.mrb[40].mxu1 %v6732_v18 }
 0x980   : > { %17795 = vmatpush3.bf16.msra.mxu1 %v19897_v49  ;;  %17827 = vmatpush3.bf16.msra.mxu0 %v19908_v55  ;;  %v19947_v49 = vld [vmem:[#allocation4 + $0xa58] sm:$0xff]   ;;  %v19948_v55 = vld [vmem:[#allocation4 + $0xa60] sm:$0xff]  }
 0x981   : > { %17796 = vmatprep.subr.bf16.mxu1 %v20665_v17  ;;  %17828 = vmatprep.subr.bf16.mxu0 %v20665_v17 }
 0x982   : > { %17810 = vmatprep.mubr.msk.bf16.mxu1 %vm20666_vm3, %v20665_v17  ;;  %v21627_v54 = vpop.f32.mrb[124].mxu0 }
 0x983   : > { %v17724_v57 = vpop.f32.mrb[125].mxu0 }
 0x984   : > { %17797 = vmatpush3.bf16.msra.mxu1 %v19899_v50  ;;  %17829 = vmatpush3.bf16.msra.mxu0 %v19910_v53  ;;  %v21629_v14 = vpop.f32.mrb[126].mxu0  ;;  %v19950_v53 = vld [vmem:[#allocation4 + $0xa70] sm:$0xff]   ;;  %v19951_v57 = vld [vmem:[#allocation4 + $0xa78] sm:$0xff]  }
 0x985   : > { %17798 = vmatprep.subr.bf16.mxu1 %v20665_v17  ;;  %17854 = vmatprep.subr.bf16.mxu0 %v20665_v17  ;;  %v6738_v26 = vpack.c.bf16 %v21629_v14, %v21627_v54  ;;  %v17725_v15 = vpop.f32.mrb[127].mxu0 }
 0x986   : > { %v19952_v15 = vld [vmem:[#allocation10] sm:$0xff]  }
 0x987   : > { %17831 = vmatmul.mubr.bf16.vlgmr.msra.gmra.mrb[140].mxu0 %v6736_v16  ;;  %v19939_v16 = vld [vmem:[#allocation4 + $0x9e8] sm:$0xff]  }
 0x988   : > { %17799 = vmatpush3.bf16.msra.mxu1 %v19901_v7  ;;  %17855 = vmatpush3.bf16.msra.mxu0 %v19912_v22 }
 0x989   : > { %17800 = vmatprep.subr.bf16.mxu1 %v20665_v17  ;;  %17856 = vmatprep.subr.bf16.mxu0 %v20665_v17 }
 0x98a   : > { %17870 = vmatprep.mubr.msk.bf16.mxu0 %vm20666_vm3, %v20665_v17  ;;  %v21639_v24 = vpop.f32.mrb[128].mxu0 }
 0x98b   : > { %v17728_v5 = vpop.f32.mrb[129].mxu0 }
 0x98c   : > { %17801 = vmatpush3.bf16.msra.mxu1 %v19903_v20  ;;  %17857 = vmatpush3.bf16.msra.mxu0 %v19914_v21  ;;  %v21641_v63 = vpop.f32.mrb[130].mxu0  ;;  %v19953_v20 = vld [vmem:[#allocation10 + $0x8] sm:$0xff]   ;;  %v19954_v21 = vld [vmem:[#allocation10 + $0x10] sm:$0xff]   ;;  %v19956_v5 = vld [vmem:[#allocation10 + $0x20] sm:$0xff]  }
 0x98d   : > { %17802 = vmatprep.subr.bf16.mxu1 %v20665_v17  ;;  %17858 = vmatprep.subr.bf16.mxu0 %v20665_v17  ;;  %v6739_v2 = vpack.c.bf16 %v21641_v63, %v21639_v24  ;;  %v17729_v46 = vpop.f32.mrb[131].mxu0  ;;  %v19955_v24 = vld [vmem:[#allocation10 + $0x18] sm:$0xff]  }
 0x990   : > { %17803 = vmatpush3.bf16.msra.mxu1 %v19905_v9  ;;  %17859 = vmatpush3.bf16.msra.mxu0 %v19916_v12  ;;  %v19957_v9 = vld [vmem:[#allocation10 + $0x28] sm:$0xff]  }
 0x991   : > { %17804 = vmatprep.subr.bf16.mxu1 %v20665_v17  ;;  %17860 = vmatprep.subr.bf16.mxu0 %v20665_v17 }
 0x992   : > { %v21649_v18 = vpop.f32.mrb[132].mxu0 }
 0x993   : > { %v17732_v19 = vpop.f32.mrb[133].mxu0 }
 0x994   : > { %17805 = vmatpush3.bf16.msra.mxu1 %v19907_v25  ;;  %17861 = vmatpush3.bf16.msra.mxu0 %v19918_v11  ;;  %v21651_v36 = vpop.f32.mrb[134].mxu0 }
 0x995   : > { %17806 = vmatprep.subr.bf16.mxu1 %v20665_v17  ;;  %17862 = vmatprep.subr.bf16.mxu0 %v20665_v17  ;;  %v6740_v48 = vpack.c.bf16 %v21651_v36, %v21649_v18  ;;  %v17733_v30 = vpop.f32.mrb[135].mxu0 }
 0x998   : > { %17807 = vmatpush3.bf16.msra.mxu1 %v19909_v29  ;;  %17863 = vmatpush3.bf16.msra.mxu0 %v19920_v41 }
 0x999   : > { %17808 = vmatprep.subr.bf16.mxu1 %v20665_v17  ;;  %17864 = vmatprep.subr.bf16.mxu0 %v20665_v17 }
 0x99c   : > { %17809 = vmatpush3.bf16.msra.mxu1 %v19911_v31  ;;  %17865 = vmatpush3.bf16.msra.mxu0 %v19922_v32 }
 0x99d   : > { %17834 = vmatprep.subr.bf16.mxu1 %v20665_v17  ;;  %17866 = vmatprep.subr.bf16.mxu0 %v20665_v17 }
 0x99f   : > { %17811 = vmatmul.mubr.bf16.vlgmr.msra.gmra.mrb[44].mxu1 %v6735_v56  ;;  %v19927_v56 = vld [vmem:[#allocation4 + $0x978] sm:$0xff]  }
 0x9a0   : > { %17835 = vmatpush3.bf16.msra.mxu1 %v19913_v33  ;;  %17867 = vmatpush3.bf16.msra.mxu0 %v19924_v34 }
 0x9a1   : > { %17836 = vmatprep.subr.bf16.mxu1 %v20665_v17  ;;  %17868 = vmatprep.subr.bf16.mxu0 %v20665_v17 }
 0x9a2   : > { %17850 = vmatprep.mubr.msk.bf16.mxu1 %vm20666_vm3, %v20665_v17 }
 0x9a4   : > { %17837 = vmatpush3.bf16.msra.mxu1 %v19915_v35  ;;  %17869 = vmatpush3.bf16.msra.mxu0 %v19926_v37 }
 0x9a5   : > { %17838 = vmatprep.subr.bf16.mxu1 %v20665_v17  ;;  %17894 = vmatprep.subr.bf16.mxu0 %v20665_v17 }
 0x9a7   : > { %17871 = vmatmul.mubr.bf16.vlgmr.msra.gmra.mrb[144].mxu0 %v6738_v26 }
 0x9a8   : > { %17839 = vmatpush3.bf16.msra.mxu1 %v19917_v38  ;;  %17895 = vmatpush3.bf16.msra.mxu0 %v19928_v3 }
 0x9a9   : > { %17840 = vmatprep.subr.bf16.mxu1 %v20665_v17  ;;  %17896 = vmatprep.subr.bf16.mxu0 %v20665_v17 }
 0x9aa   : > { %17910 = vmatprep.mubr.msk.bf16.mxu0 %vm20666_vm3, %v20665_v17 }
 0x9ac   : > { %17841 = vmatpush3.bf16.msra.mxu1 %v19919_v6  ;;  %17897 = vmatpush3.bf16.msra.mxu0 %v19930_v60 }
 0x9ad   : > { %17842 = vmatprep.subr.bf16.mxu1 %v20665_v17  ;;  %17898 = vmatprep.subr.bf16.mxu0 %v20665_v17 }
 0x9b0   : > { %17843 = vmatpush3.bf16.msra.mxu1 %v19921_v42  ;;  %17899 = vmatpush3.bf16.msra.mxu0 %v19932_v23 }
 0x9b1   : > { %17844 = vmatprep.subr.bf16.mxu1 %v20665_v17  ;;  %17900 = vmatprep.subr.bf16.mxu0 %v20665_v17 }
 0x9b4   : > { %17845 = vmatpush3.bf16.msra.mxu1 %v19923_v27  ;;  %17901 = vmatpush3.bf16.msra.mxu0 %v19934_v28 }
 0x9b5   : > { %17846 = vmatprep.subr.bf16.mxu1 %v20665_v17  ;;  %17902 = vmatprep.subr.bf16.mxu0 %v20665_v17 }
 0x9b8   : > { %17847 = vmatpush3.bf16.msra.mxu1 %v19925_v45  ;;  %17903 = vmatpush3.bf16.msra.mxu0 %v19936_v39 }
 0x9b9   : > { %17848 = vmatprep.subr.bf16.mxu1 %v20665_v17  ;;  %17904 = vmatprep.subr.bf16.mxu0 %v20665_v17 }
 0x9bc   : > { %17849 = vmatpush3.bf16.msra.mxu1 %v19927_v56  ;;  %17905 = vmatpush3.bf16.msra.mxu0 %v19938_v58 }
 0x9bd   : > { %17874 = vmatprep.subr.bf16.mxu1 %v20665_v17  ;;  %17906 = vmatprep.subr.bf16.mxu0 %v20665_v17 }
 0x9bf   : > { %17851 = vmatmul.mubr.bf16.vlgmr.msra.gmra.mrb[48].mxu1 %v6737_v43 }
 0x9c0   : > { %17875 = vmatpush3.bf16.msra.mxu1 %v19929_v59  ;;  %17907 = vmatpush3.bf16.msra.mxu0 %v19940_v62 }
 0x9c1   : > { %17876 = vmatprep.subr.bf16.mxu1 %v20665_v17  ;;  %17908 = vmatprep.subr.bf16.mxu0 %v20665_v17 }
 0x9c2   : > { %17890 = vmatprep.mubr.msk.bf16.mxu1 %vm20666_vm3, %v20665_v17 }
 0x9c4   : > { %17877 = vmatpush3.bf16.msra.mxu1 %v19931_v40  ;;  %17909 = vmatpush3.bf16.msra.mxu0 %v19942_v51 }
 0x9c5   : > { %17878 = vmatprep.subr.bf16.mxu1 %v20665_v17  ;;  %17934 = vmatprep.subr.bf16.mxu0 %v20665_v17 }
 0x9c7   : > { %17911 = vmatmul.mubr.bf16.vlgmr.msra.gmra.mrb[148].mxu0 %v6740_v48 }
 0x9c8   : > { %17879 = vmatpush3.bf16.msra.mxu1 %v19933_v52  ;;  %17950 = vmatprep.mubr.msk.bf16.mxu0 %vm20666_vm3, %v20665_v17 }
 0x9c9   : > { %17880 = vmatprep.subr.bf16.mxu1 %v20665_v17  ;;  %17935 = vmatpush3.bf16.msra.mxu0 %v19952_v15 }
 0x9ca   : > { %17936 = vmatprep.subr.bf16.mxu0 %v20665_v17 }
 0x9cc   : > { %17881 = vmatpush3.bf16.msra.mxu1 %v19935_v10 }
 0x9cd   : > { %17882 = vmatprep.subr.bf16.mxu1 %v20665_v17  ;;  %17937 = vmatpush3.bf16.msra.mxu0 %v19953_v20 }
 0x9ce   : > { %17938 = vmatprep.subr.bf16.mxu0 %v20665_v17 }
 0x9d0   : > { %17883 = vmatpush3.bf16.msra.mxu1 %v19937_v13 }
 0x9d1   : > { %17884 = vmatprep.subr.bf16.mxu1 %v20665_v17  ;;  %17939 = vmatpush3.bf16.msra.mxu0 %v19954_v21  ;;  %v15333_v21 = vld [vmem:[#allocation12] ss:$0 sm:$0xff] }
 0x9d2   : > { %17940 = vmatprep.subr.bf16.mxu0 %v20665_v17 }
 0x9d4   : > { %17885 = vmatpush3.bf16.msra.mxu1 %v19939_v16 }
 0x9d5   : > { %17886 = vmatprep.subr.bf16.mxu1 %v20665_v17  ;;  %17941 = vmatpush3.bf16.msra.mxu0 %v19955_v24 }
 0x9d6   : > { %17942 = vmatprep.subr.bf16.mxu0 %v20665_v17 }
 0x9d8   : > { %17887 = vmatpush3.bf16.msra.mxu1 %v19941_v4 }
 0x9d9   : > { %17888 = vmatprep.subr.bf16.mxu1 %v20665_v17  ;;  %17943 = vmatpush3.bf16.msra.mxu0 %v19956_v5 }
 0x9da   : > { %17944 = vmatprep.subr.bf16.mxu0 %v20665_v17 }
 0x9dc   : > { %17889 = vmatpush3.bf16.msra.mxu1 %v19943_v61 }
 0x9dd   : > { %17914 = vmatprep.subr.bf16.mxu1 %v20665_v17  ;;  %17945 = vmatpush3.bf16.msra.mxu0 %v19957_v9 }
 0x9de   : > { %17946 = vmatprep.subr.bf16.mxu0 %v20665_v17 }
 0x9df   : > { %17891 = vmatmul.mubr.bf16.vlgmr.msra.gmra.mrb[52].mxu1 %v6739_v2 }
 0x9e0   : > { %17930 = vmatprep.mubr.msk.bf16.mxu1 %vm20666_vm3, %v20665_v17  ;;  %17915 = vmatpush3.bf16.msra.mxu1 %v19944_v8 }
 0x9e1   : > { %17916 = vmatprep.subr.bf16.mxu1 %v20665_v17 }
 0x9e4   : > { %17917 = vmatpush3.bf16.msra.mxu1 %v19945_v0 }
 0x9e5   : > { %17918 = vmatprep.subr.bf16.mxu1 %v20665_v17 }
 0x9e8   : > { %17919 = vmatpush3.bf16.msra.mxu1 %v19946_v44  ;;  %v15315_v44 = vld [vmem:[#allocation6 + $0x2] ss:$0 sm:$0xff] }
 0x9e9   : > { %17920 = vmatprep.subr.bf16.mxu1 %v20665_v17 }
 0x9ec   : > { %17921 = vmatpush3.bf16.msra.mxu1 %v19947_v49 }
 0x9ed   : > { %17922 = vmatprep.subr.bf16.mxu1 %v20665_v17 }
 0x9f0   : > { %17923 = vmatpush3.bf16.msra.mxu1 %v19948_v55 }
 0x9f1   : > { %17924 = vmatprep.subr.bf16.mxu1 %v20665_v17 }
 0x9f4   : > { %17925 = vmatpush3.bf16.msra.mxu1 %v19949_v1 }
 0x9f5   : > { %17926 = vmatprep.subr.bf16.mxu1 %v20665_v17 }
 0x9f8   : > { %17927 = vmatpush3.bf16.msra.mxu1 %v19950_v53  ;;  %v15316_v53 = vld [vmem:[#allocation6 + $0x3] ss:$0 sm:$0xff] }
 0x9f9   : > { %17928 = vmatprep.subr.bf16.mxu1 %v20665_v17 }
 0x9fc   : > { %17929 = vmatpush3.bf16.msra.mxu1 %v19951_v57 }
 0xa32   : > { %v6857_v43 = vpop.f32.mrb[36].mxu1 }
 0xa33   : > { %v17752_v47 = vpop.f32.mrb[37].mxu1 }
 0xa34   : > { %v6860_v50 = vpop.f32.mrb[38].mxu1  ;;  %v19958_v47 = vld [vmem:[#allocation10 + $0x30] sm:$0xff]  }
 0xa35   : > { %v17753_v54 = vpop.f32.mrb[39].mxu1  ;;  %17947 = vmatpush3.bf16.msra.mxu0 %v19958_v47  ;;  %v19962_v47 = vld [vmem:[#allocation4 + $0xa90] sm:$0xff]  }
 0xa36   : > { %17948 = vmatprep.subr.bf16.mxu0 %v20665_v17 }
 0xa3a   : > { %v7052_v7 = vpop.f32.mrb[136].mxu0 }
 0xa3b   : > { %v17792_v22 = vpop.f32.mrb[137].mxu0 }
 0xa3c   : > { %v7055_v14 = vpop.f32.mrb[138].mxu0 }
 0xa3d   : > { %v17793_v26 = vpop.f32.mrb[139].mxu0 }
 0xa52   : > { %v6946_v12 = vpop.f32.mrb[40].mxu1 }
 0xa53   : > { %v6947_v63 = vadd.f32 %v6946_v12, %v6857_v43  ;;  %v17772_v2 = vpop.f32.mrb[41].mxu1 }
 0xa54   : > { %v6949_v46 = vpop.f32.mrb[42].mxu1 }
 0xa55   : > { %v6950_v25 = vadd.f32 %v6949_v46, %v6860_v50  ;;  %v17773_v11 = vpop.f32.mrb[43].mxu1  ;;  %v7059_v18 = vadd.f32 %v7052_v7, %v6947_v63  ;;  %v19959_v50 = vld [vmem:[#allocation10 + $0x38] sm:$0xff]  }
 0xa56   : > { %17949 = vmatpush3.bf16.msra.mxu0 %v19959_v50  ;;  %v19963_v50 = vld [vmem:[#allocation4 + $0xa98] sm:$0xff]  }
 0xa57   : > { %v7060_v19 = vadd.f32 %v7055_v14, %v6950_v25  ;;  %17989 = vmatprep.subr.bf16.mxu0 %v20665_v17  ;;  %v7953_v25 = vlaneseq }
 0xa59   : > { %v21729_v11 = vand.u32 127, %v7953_v25 }
 0xa5a   : > { %v7268_v29 = vpop.f32.mrb[140].mxu0 }
 0xa5b   : > { %v17832_v41 = vpop.f32.mrb[141].mxu0 }
 0xa5c   : > { %v7271_v36 = vpop.f32.mrb[142].mxu0 }
 0xa5d   : > { %v17833_v48 = vpop.f32.mrb[143].mxu0 }
 0xa72   : > { %v7160_v30 = vpop.f32.mrb[44].mxu1 }
 0xa73   : > { %v7167_v31 = vadd.f32 %v7160_v30, %v7059_v18  ;;  %v17812_v32 = vpop.f32.mrb[45].mxu1 }
 0xa74   : > { %v7163_v33 = vpop.f32.mrb[46].mxu1  ;;  %v7993_v32 = vld [vmem:[#allocation13] sm:$0xff] }
 0xa75   : > { %v7168_v34 = vadd.f32 %v7163_v33, %v7060_v19  ;;  %v17813_v35 = vpop.f32.mrb[47].mxu1  ;;  %v7275_v37 = vadd.f32 %v7268_v29, %v7167_v31  ;;  %v7994_v33 = vld [vmem:[#allocation13 + $0x8] sm:$0xff] }
 0xa76   : > { %v19049_v35 = vpack.c.bf16 %v7994_v33, %v7993_v32  ;;  %v19972_v32 = vld [vmem:[%s22665_s7 + $0x20] sm:$0xff]  }
 0xa77   : > { %v7276_v38 = vadd.f32 %v7271_v36, %v7168_v34  ;;  %v7995_v34 = vld [vmem:[#allocation13 + $0x10] sm:$0xff] }
 0xa78   : > { %19050 = vmatprep.subr.bf16.mxu1 %v19049_v35  ;;  %v19977_v33 = vld [vmem:[#allocation4 + $0xb00] sm:$0xff]  }
 0xa7a   : > { %v7484_v3 = vpop.f32.mrb[144].mxu0 }
 0xa7b   : > { %v17872_v6 = vpop.f32.mrb[145].mxu0 }
 0xa7c   : > { %v7487_v60 = vpop.f32.mrb[146].mxu0  ;;  %v7998_v6 = vld [vmem:[#allocation13 + $0x28] sm:$0xff] }
 0xa7d   : > { %v17873_v42 = vpop.f32.mrb[147].mxu0 }
 0xa7e   : > { %v7999_v42 = vld [vmem:[#allocation13 + $0x30] sm:$0xff] }
 0xa92   : > { %v7376_v23 = vpop.f32.mrb[48].mxu1 }
 0xa93   : > { %v7383_v27 = vadd.f32 %v7376_v23, %v7275_v37  ;;  %v17852_v28 = vpop.f32.mrb[49].mxu1  ;;  %v7996_v37 = vld [vmem:[#allocation13 + $0x18] sm:$0xff] }
 0xa94   : > { %v7379_v45 = vpop.f32.mrb[50].mxu1  ;;  %v8000_v23 = vld [vmem:[#allocation13 + $0x38] sm:$0xff]  ;;  %v8001_v28 = vld [vmem:[#allocation13 + $0x40] sm:$0xff] }
 0xa95   : > { %v7384_v39 = vadd.f32 %v7379_v45, %v7276_v38  ;;  %v17853_v56 = vpop.f32.mrb[51].mxu1  ;;  %v7491_v58 = vadd.f32 %v7484_v3, %v7383_v27  ;;  %v19053_v38 = vpack.c.bf16 %v7996_v37, %v7995_v34  ;;  %v7997_v3 = vld [vmem:[#allocation13 + $0x20] sm:$0xff]  ;;  %v19061_v27 = vpack.c.bf16 %v8000_v23, %v7999_v42  ;;  %v8002_v45 = vld [vmem:[#allocation13 + $0x48] sm:$0xff]  ;;  %v19981_v42 = vld [vmem:[#allocation4 + $0xb20] sm:$0xff]  }
 0xa96   : > { %v8003_v56 = vld [vmem:[#allocation13 + $0x50] sm:$0xff]  ;;  %v19978_v34 = vld [vmem:[#allocation4 + $0xb08] sm:$0xff]  }
 0xa97   : > { %v7492_v59 = vadd.f32 %v7487_v60, %v7384_v39  ;;  %v19057_v60 = vpack.c.bf16 %v7998_v6, %v7997_v3  ;;  %v19065_v39 = vpack.c.bf16 %v8002_v45, %v8001_v28  ;;  %v19973_v37 = vld [vmem:[%s22665_s7 + $0x28] sm:$0xff]   ;;  %v19980_v3 = vld [vmem:[#allocation4 + $0xb18] sm:$0xff]   ;;  %v19970_v6 = vld [vmem:[%s22665_s7 + $0x10] sm:$0xff]  }
 0xa98   : > { %v19971_v23 = vld [vmem:[%s22665_s7 + $0x18] sm:$0xff]   ;;  %v19976_v28 = vld [vmem:[%s22665_s7 + $0x40] sm:$0xff]   ;;  %v19982_v45 = vld [vmem:[#allocation4 + $0xb28] sm:$0xff]  }
 0xa9a   : > { %v7700_v62 = vpop.f32.mrb[148].mxu0 }
 0xa9b   : > { %v17912_v40 = vpop.f32.mrb[149].mxu0 }
 0xa9c   : > { %v7703_v51 = vpop.f32.mrb[150].mxu0 }
 0xa9d   : > { %v17913_v52 = vpop.f32.mrb[151].mxu0 }
 0xab2   : > { %v7592_v10 = vpop.f32.mrb[52].mxu1 }
 0xab3   : > { %v7599_v13 = vadd.f32 %v7592_v10, %v7491_v58  ;;  %v17892_v16 = vpop.f32.mrb[53].mxu1  ;;  %v8004_v58 = vld [vmem:[#allocation13 + $0x58] sm:$0xff] }
 0xab4   : > { %v7595_v4 = vpop.f32.mrb[54].mxu1 }
 0xab5   : > { %v7707_v61 = vadd.f32 %v7700_v62, %v7599_v13  ;;  %v7600_v8 = vadd.f32 %v7595_v4, %v7492_v59  ;;  %v17893_v0 = vpop.f32.mrb[55].mxu1  ;;  %v19069_v59 = vpack.c.bf16 %v8004_v58, %v8003_v56  ;;  %v19984_v56 = vld [vmem:[#allocation4 + $0xb38] sm:$0xff]   ;;  %v19985_v58 = vld [vmem:[#allocation4 + $0xb40] sm:$0xff]  }
 0xab7   : > { %v7708_v49 = vadd.f32 %v7703_v51, %v7600_v8  ;;  %v7715_v55 = vadd.f32 %v15315_v44, %v7707_v61  ;;  %v8005_v61 = vld [vmem:[#allocation13 + $0x60] sm:$0xff]  ;;  %v8006_v8 = vld [vmem:[#allocation13 + $0x68] sm:$0xff] }
 0xab8   : > { %v19073_v0 = vpack.c.bf16 %v8006_v8, %v8005_v61 }
 0xab9   : > { %v7716_v1 = vadd.f32 %v15315_v44, %v7708_v49  ;;  %v8007_v44 = vld [vmem:[#allocation13 + $0x70] sm:$0xff]  ;;  %v8008_v49 = vld [vmem:[#allocation13 + $0x78] sm:$0xff] }
 0xabb   : > { %v7719_v43 = vpack.c.bf16 %v7716_v1, %v7715_v55  ;;  %v19077_v55 = vpack.c.bf16 %v8008_v49, %v8007_v44  ;;  %v19960_v1 = vld [vmem:[#allocation4 + $0xa80] sm:$0xff]  }
 0xabd   : > { %17931 = vmatmul.mubr.bf16.vlgmr.msra.gmra.mrb[56].mxu1 %v7719_v43  ;;  %v19961_v43 = vld [vmem:[#allocation4 + $0xa88] sm:$0xff]  }
 0xabe   : > { %19052 = vmatpush3.bf16.msra.mxu1 %v19049_v35  ;;  %v19969_v35 = vld [vmem:[%s22665_s7 + $0x8] sm:$0xff]  }
 0xabf   : > { %19054 = vmatprep.subr.bf16.mxu1 %v19053_v38 }
 0xac2   : > { %19056 = vmatpush3.bf16.msra.mxu1 %v19053_v38  ;;  %v19979_v38 = vld [vmem:[#allocation4 + $0xb10] sm:$0xff]  }
 0xac3   : > { %19058 = vmatprep.subr.bf16.mxu1 %v19057_v60 }
 0xac6   : > { %19060 = vmatpush3.bf16.msra.mxu1 %v19057_v60  ;;  %v19974_v60 = vld [vmem:[%s22665_s7 + $0x30] sm:$0xff]  }
 0xac7   : > { %19062 = vmatprep.subr.bf16.mxu1 %v19061_v27 }
 0xaca   : > { %19064 = vmatpush3.bf16.msra.mxu1 %v19061_v27  ;;  %v19975_v27 = vld [vmem:[%s22665_s7 + $0x38] sm:$0xff]  }
 0xacb   : > { %19066 = vmatprep.subr.bf16.mxu1 %v19065_v39 }
 0xace   : > { %19068 = vmatpush3.bf16.msra.mxu1 %v19065_v39  ;;  %v19983_v39 = vld [vmem:[#allocation4 + $0xb30] sm:$0xff]  }
 0xacf   : > { %19070 = vmatprep.subr.bf16.mxu1 %v19069_v59 }
 0xad2   : > { %19072 = vmatpush3.bf16.msra.mxu1 %v19069_v59  ;;  %v19987_v59 = vld [vmem:[#allocation4 + $0xb48] sm:$0xff]  }
 0xad3   : > { %19074 = vmatprep.subr.bf16.mxu1 %v19073_v0 }
 0xad6   : > { %19076 = vmatpush3.bf16.msra.mxu1 %v19073_v0 }
 0xad7   : > { %19078 = vmatprep.subr.bf16.mxu1 %v19077_v55 }
 0xada   : > { %19080 = vmatpush3.bf16.msra.mxu1 %v19077_v55 }
 0xadb   : > { %19081 = vmatprep.subr.bf16.mxu1 %v20665_v17 }
 0xb90   : > { %v7825_v54 = vpop.f32.mrb[56].mxu1 }
 0xb91   : > { %v17932_v57 = vpop.f32.mrb[57].mxu1  ;;  %v7826_v22 = vadd.f32 %v15316_v53, %v7825_v54  ;;  %v19965_v54 = vld [vmem:[#allocation4 + $0xaa8] sm:$0xff]  }
 0xb92   : > { %v7828_v7 = vpop.f32.mrb[58].mxu1  ;;  %v19966_v57 = vld [vmem:[#allocation4 + $0xab0] sm:$0xff]  }
 0xb93   : > { %v7829_v14 = vadd.f32 %v15316_v53, %v7828_v7  ;;  %v17933_v26 = vpop.f32.mrb[59].mxu1  ;;  %v19964_v53 = vld [vmem:[#allocation4 + $0xaa0] sm:$0xff]  }
 0xb95   : > { %v7832_v15 = vpack.c.bf16 %v7829_v14, %v7826_v22 }
 0xb97   : > { %17951 = vmatmul.mubr.bf16.vlgmr.msra.gmra.mrb[152].mxu0 %v7832_v15 }
 0xb98   : > { %18005 = vmatprep.mubr.msk.bf16.mxu0 %vm20666_vm3, %v20665_v17  ;;  %17990 = vmatpush3.bf16.msra.mxu0 %v19960_v1 }
 0xb99   : > { %17991 = vmatprep.subr.bf16.mxu0 %v20665_v17 }
 0xb9c   : > { %17992 = vmatpush3.bf16.msra.mxu0 %v19961_v43 }
 0xb9d   : > { %17993 = vmatprep.subr.bf16.mxu0 %v20665_v17 }
 0xba0   : > { %17994 = vmatpush3.bf16.msra.mxu0 %v19962_v47 }
 0xba1   : > { %17995 = vmatprep.subr.bf16.mxu0 %v20665_v17 }
 0xba4   : > { %17996 = vmatpush3.bf16.msra.mxu0 %v19963_v50 }
 0xba5   : > { %17997 = vmatprep.subr.bf16.mxu0 %v20665_v17 }
 0xba8   : > { %17998 = vmatpush3.bf16.msra.mxu0 %v19964_v53 }
 0xba9   : > { %17999 = vmatprep.subr.bf16.mxu0 %v20665_v17 }
 0xbac   : > { %18000 = vmatpush3.bf16.msra.mxu0 %v19965_v54 }
 0xbad   : > { %18001 = vmatprep.subr.bf16.mxu0 %v20665_v17 }
 0xbb0   : > { %18002 = vmatpush3.bf16.msra.mxu0 %v19966_v57 }
 0xbb1   : > { %18003 = vmatprep.subr.bf16.mxu0 %v20665_v17 }
 0xc6a   : > { %v7931_v20 = vpop.f32.mrb[152].mxu0 }
 0xc6b   : > { %v7938_v24 = vmul.f32 -2.0, %v7931_v20  ;;  %v17952_v5 = vpop.f32.mrb[153].mxu0 }
 0xc6c   : > { %v7934_v9 = vpop.f32.mrb[154].mxu0 }
 0xc6d   : > { %v7939_v12 = vmul.f32 -2.0, %v7934_v9  ;;  %v17953_v63 = vpop.f32.mrb[155].mxu0  ;;  %v7947_v2 = vadd.f32 %v15333_v21, %v7938_v24  ;;  %v20667_v9 = vmov 1.0  }
 0xc6e   : > { %v19967_v63 = vld [vmem:[#allocation4 + $0xab8] sm:$0xff]  }
 0xc6f   : > { %7949 = vmin.xlane.f32.xlu0 %v7947_v2  ;;  %v7948_v46 = vadd.f32 %v15333_v21, %v7939_v12  ;;  %18004 = vmatpush3.bf16.msra.mxu0 %v19967_v63  ;;  %v19990_v63 = vld [vmem:[#allocation4 + $0xad0] sm:$0xff]  }
 0xc70   : > { %18009 = vmatprep.subr.bf16.mxu0 %v20665_v17 }
 0xc73   : > { %7951 = vmin.xlane.f32.xlu0 %v7948_v46 }
 0xcfc   : > { %v7950_v18 = vpop.xlane.xlu0 %7949 }
 0xcfd   : > { %vm7955_vm5 = vcmp.le.f32.partialorder %v7947_v2, %v7950_v18  ;;  %v15338_v18 = vld [vmem:[#allocation6 + $0x4] ss:$0 sm:$0xff] }
 0xcfe   : > { %v7957_v19 = vsel %vm7955_vm5, %v21729_v11, 128 }
 0xcff   : > { %v7960_v29 = vshra.s32 %v7957_v19, 16  ;;  %v7959_v62 = vand.u32 65535, %v7957_v19 }
 0xd00   : > { %v7952_v41 = vpop.xlane.xlu0 %7951 }
 0xd01   : > { %vm7956_vm6 = vcmp.le.f32.partialorder %v7948_v46, %v7952_v41  ;;  %v7962_v36 = vcvt.s32.f32 %v7960_v29  ;;  %v7961_v52 = vcvt.s32.f32 %v7959_v62  ;;  %v19989_v62 = vld [vmem:[#allocation4 + $0xb50] sm:$0xff]  }
 0xd02   : > { %v7958_v48 = vsel %vm7956_vm6, %v21729_v11, 128 }
 0xd03   : > { %7963 = vmin.xlane.f32.xlu1 %v7962_v36  ;;  %v7974_v30 = vshra.s32 %v7958_v48, 16  ;;  %v7973_v40 = vand.u32 65535, %v7958_v48 }
 0xd05   : > { %v7976_v31 = vcvt.s32.f32 %v7974_v30  ;;  %v7975_v16 = vcvt.s32.f32 %v7973_v40  ;;  %v19991_v40 = vld [vmem:[#allocation4 + $0xb58] sm:$0xff]  }
 0xd07   : > { %7977 = vmin.xlane.f32.xlu1 %v7976_v31 }
 0xd90   : > { %v7964_v51 = vpop.xlane.xlu1 %7963 }
 0xd91   : > { %vm7965_vm7 = vcmp.eq.f32.partialorder %v7962_v36, %v7964_v51  ;;  %v7970_v7 = vcvt.f32.s32 %v7964_v51  ;;  %v19993_v51 = vld [vmem:[#allocation4 + $0xb60] sm:$0xff]  }
 0xd92   : > { %v7966_v10 = vsel %vm7965_vm7, %v7961_v52, inf  ;;  %v19995_v52 = vld [vmem:[#allocation4 + $0xb68] sm:$0xff]  }
 0xd93   : > { %7967 = vmin.xlane.f32.xlu0 %v7966_v10  ;;  %v7971_v14 = vshll.u32 %v7970_v7, 16  ;;  %v19997_v10 = vld [vmem:[#allocation4 + $0xb70] sm:$0xff]   ;;  %v19986_v7 = vld [vmem:[#allocation4 + $0xac0] sm:$0xff]  }
 0xd94   : > { %v7978_v13 = vpop.xlane.xlu1 %7977 }
 0xd95   : > { %vm7979_vm8 = vcmp.eq.f32.partialorder %v7976_v31, %v7978_v13  ;;  %v7984_v26 = vcvt.f32.s32 %v7978_v13  ;;  %v19968_v31 = vld [vmem:[%s22665_s7] sm:$0xff]  }
 0xd96   : > { %v7980_v4 = vsel %vm7979_vm8, %v7975_v16, inf  ;;  %v19999_v13 = vld [vmem:[#allocation4 + $0xb78] sm:$0xff]  }
 0xd97   : > { %7981 = vmin.xlane.f32.xlu1 %v7980_v4  ;;  %v7985_v24 = vshll.u32 %v7984_v26, 16 }
 0xe20   : > { %v7968_v22 = vpop.xlane.xlu0 %7967 }
 0xe21   : > { %v7969_v15 = vcvt.f32.s32 %v7968_v22 }
 0xe23   : > { %v7972_v20 = vadd.s32 %v7971_v14, %v7969_v15 }
 0xe24   : > { %v7982_v21 = vpop.xlane.xlu1 %7981 }
 0xe25   : > { %v7983_v5 = vcvt.f32.s32 %v7982_v21  ;;  %vm7987_vm9 = vcmp.eq.s32.totalorder %v21729_v11, %v7972_v20  ;;  %v19988_v21 = vld [vmem:[#allocation4 + $0xac8] sm:$0xff]  }
 0xe26   : > { %17986 = vmatprep.mubr.msk.f32.mxu1 %vm7987_vm9, %v20667_v9 }
 0xe27   : > { %v7986_v12 = vadd.s32 %v7985_v24, %v7983_v5 }
 0xe29   : > { %vm7988_vm10 = vcmp.eq.s32.totalorder %v21729_v11, %v7986_v12 }
 0xe2a   : > { %17987 = vmatmul.mubr.msk.f32.vlgmr.msra.gmra.mrb[60].mxu1 %vm7988_vm10, %v20667_v9 }
 0xe2b   : > { %18027 = vmatprep.mubr.msk.bf16.mxu1 %vm20666_vm3, %v20665_v17 }
 0xefd   : > { %v17988_v2 = vpop.f32.mrb[60].mxu1 }
 0xefe   : > { %v8075_v46 = vpop.f32.mrb[61].mxu1 }
 0xeff   : > { %v8086_v25 = vpack.c.bf16 %v17988_v2, %v8075_v46  ;;  %v20001_v46 = vld [vmem:[#allocation4 + $0xbc0] sm:$0xff]  }
 0xf01   : > { %18006 = vmatmul.mubr.bf16.vlgmr.msra.gmra.mrb[156].mxu0 %v8086_v25 }
 0xf02   : > { %18011 = vmatprep.mubr.msk.bf16.mxu0 %vm20666_vm3, %v20665_v17 }
 0xfd4   : > { %v8192_v19 = vpop.f32.mrb[156].mxu0 }
 0xfd5   : > { %v18007_v29 = vpop.f32.mrb[157].mxu0  ;;  %v8193_v11 = vadd.f32 %v15338_v18, %v8192_v19 }
 0xfd6   : > { %v8195_v41 = vpop.f32.mrb[158].mxu0 }
 0xfd7   : > { %v8196_v36 = vadd.f32 %v15338_v18, %v8195_v41  ;;  %v18008_v48 = vpop.f32.mrb[159].mxu0 }
 0xfd9   : > { %v8201_v30 = vpack.c.bf16 %v8196_v36, %v8193_v11  ;;  %v19992_v11 = vld [vmem:[#allocation4 + $0xad8] sm:$0xff]   ;;  %v20003_v36 = vld [vmem:[#allocation4 + $0xbc8] sm:$0xff]  }
 0xfdb   : > { %18010 = vmatpush3.bf16.msra.mxu0 %v8201_v30  ;;  %19082 = vmatpush3.bf16.msra.mxu1 %v8201_v30 }
 0xfdc   : > { %18047 = vmatprep.subr.bf16.mxu0 %v20665_v17  ;;  %18087 = vmatprep.subr.bf16.mxu1 %v20665_v17 }
 0xfde   : > { %18012 = vmatmul.mubr.msk.bf16.vlgmr.msra.gmra.mrb[160].mxu0 %vm6599_vm4, %v19968_v31  ;;  %18028 = vmatmul.mubr.msk.bf16.vlgmr.msra.gmra.mrb[64].mxu1 %vm6599_vm4, %v19972_v32 }
 0xfdf   : > { %18015 = vmatprep.mubr.msk.bf16.mxu0 %vm20666_vm3, %v20665_v17  ;;  %18031 = vmatprep.mubr.msk.bf16.mxu1 %vm20666_vm3, %v20665_v17 }
 0xfe0   : > { %18048 = vmatpush3.bf16.msra.mxu0 %v19977_v33  ;;  %18088 = vmatpush3.bf16.msra.mxu1 %v19985_v58  ;;  %v19994_v33 = vld [vmem:[#allocation4 + $0xae0] sm:$0xff]  }
 0xfe1   : > { %18049 = vmatprep.subr.bf16.mxu0 %v20665_v17  ;;  %18089 = vmatprep.subr.bf16.mxu1 %v20665_v17 }
 0xfe4   : > { %18050 = vmatpush3.bf16.msra.mxu0 %v19978_v34  ;;  %18090 = vmatpush3.bf16.msra.mxu1 %v19987_v59  ;;  %v20005_v34 = vld [vmem:[#allocation4 + $0xbd0] sm:$0xff]  }
 0xfe5   : > { %18051 = vmatprep.subr.bf16.mxu0 %v20665_v17  ;;  %18091 = vmatprep.subr.bf16.mxu1 %v20665_v17 }
 0xfe6   : > { %18016 = vmatmul.mubr.msk.bf16.gmra.mrb[164].mxu0 %vm6599_vm4, %v19969_v35  ;;  %18032 = vmatmul.mubr.msk.bf16.gmra.mrb[68].mxu1 %vm6599_vm4, %v19973_v37 }
 0xfe7   : > { %18019 = vmatprep.mubr.msk.bf16.mxu0 %vm20666_vm3, %v20665_v17  ;;  %18035 = vmatprep.mubr.msk.bf16.mxu1 %vm20666_vm3, %v20665_v17 }
 0xfe8   : > { %18052 = vmatpush3.bf16.msra.mxu0 %v19979_v38  ;;  %18092 = vmatpush3.bf16.msra.mxu1 %v19989_v62  ;;  %v20000_v62 = vld [vmem:[#allocation4 + $0xaf8] sm:$0xff]  }
 0xfe9   : > { %18053 = vmatprep.subr.bf16.mxu0 %v20665_v17  ;;  %18093 = vmatprep.subr.bf16.mxu1 %v20665_v17 }
 0xfec   : > { %18054 = vmatpush3.bf16.msra.mxu0 %v19980_v3  ;;  %18094 = vmatpush3.bf16.msra.mxu1 %v19991_v40  ;;  %v20011_v40 = vld [vmem:[#allocation4 + $0xbe8] sm:$0xff]  }
 0xfed   : > { %18055 = vmatprep.subr.bf16.mxu0 %v20665_v17  ;;  %18095 = vmatprep.subr.bf16.mxu1 %v20665_v17 }
 0xfee   : > { %18020 = vmatmul.mubr.msk.bf16.gmra.mrb[168].mxu0 %vm6599_vm4, %v19970_v6  ;;  %18036 = vmatmul.mubr.msk.bf16.gmra.mrb[72].mxu1 %vm6599_vm4, %v19974_v60 }
 0xfef   : > { %18023 = vmatprep.mubr.msk.bf16.mxu0 %vm20666_vm3, %v20665_v17  ;;  %18039 = vmatprep.mubr.msk.bf16.mxu1 %vm20666_vm3, %v20665_v17 }
 0xff0   : > { %18056 = vmatpush3.bf16.msra.mxu0 %v19981_v42  ;;  %18096 = vmatpush3.bf16.msra.mxu1 %v19993_v51  ;;  %v19996_v42 = vld [vmem:[#allocation4 + $0xae8] sm:$0xff]   ;;  %v20002_v51 = vld [vmem:[#allocation4 + $0xb80] sm:$0xff]  }
 0xff1   : > { %18057 = vmatprep.subr.bf16.mxu0 %v20665_v17  ;;  %18097 = vmatprep.subr.bf16.mxu1 %v20665_v17 }
 0xff4   : > { %18058 = vmatpush3.bf16.msra.mxu0 %v19982_v45  ;;  %18098 = vmatpush3.bf16.msra.mxu1 %v19995_v52  ;;  %v19998_v45 = vld [vmem:[#allocation4 + $0xaf0] sm:$0xff]  }
 0xff5   : > { %18059 = vmatprep.subr.bf16.mxu0 %v20665_v17  ;;  %18099 = vmatprep.subr.bf16.mxu1 %v20665_v17  ;;  %v20013_v52 = vld [vmem:[#allocation4 + $0xbf0] sm:$0xff]  }
 0xff6   : > { %18024 = vmatmul.mubr.msk.bf16.gmra.mrb[172].mxu0 %vm6599_vm4, %v19971_v23  ;;  %18040 = vmatmul.mubr.msk.bf16.gmra.mrb[76].mxu1 %vm6599_vm4, %v19975_v27  ;;  %v20007_v23 = vld [vmem:[#allocation4 + $0xbd8] sm:$0xff]  }
 0xff7   : > { %18043 = vmatprep.mubr.msk.bf16.mxu1 %vm20666_vm3, %v20665_v17  ;;  %18063 = vmatprep.mubr.msk.bf16.mxu0 %vm20666_vm3, %v20665_v17 }
 0xff8   : > { %18060 = vmatpush3.bf16.msra.mxu0 %v19983_v39  ;;  %18100 = vmatpush3.bf16.msra.mxu1 %v19997_v10  ;;  %v20009_v39 = vld [vmem:[#allocation4 + $0xbe0] sm:$0xff]   ;;  %v20004_v10 = vld [vmem:[#allocation4 + $0xb88] sm:$0xff]  }
 0xff9   : > { %18061 = vmatprep.subr.bf16.mxu0 %v20665_v17  ;;  %18101 = vmatprep.subr.bf16.mxu1 %v20665_v17 }
 0xffc   : > { %18062 = vmatpush3.bf16.msra.mxu0 %v19984_v56  ;;  %18102 = vmatpush3.bf16.msra.mxu1 %v19999_v13  ;;  %v20015_v13 = vld [vmem:[#allocation4 + $0xbf8] sm:$0xff]  }
 0xffd   : > { %18067 = vmatprep.subr.bf16.mxu0 %v20665_v17  ;;  %18127 = vmatprep.subr.bf16.mxu1 %v20665_v17 }
 0xffe   : > { %18044 = vmatmul.mubr.msk.bf16.gmra.mrb[80].mxu1 %vm6599_vm4, %v19976_v28 }
 0xfff   : > { %18103 = vmatprep.mubr.msk.bf16.mxu1 %vm20666_vm3, %v20665_v17 }
0x10b1   : > { %v21820_v16 = vpop.f32.mrb[160].mxu0  ;;  %v21822_v4 = vpop.f32.mrb[64].mxu1 }
0x10b2   : > { %v18013_v61 = vpop.f32.mrb[161].mxu0  ;;  %v18029_v8 = vpop.f32.mrb[65].mxu1 }
0x10b3   : > { %v21824_v0 = vpop.f32.mrb[162].mxu0  ;;  %v21826_v44 = vpop.f32.mrb[66].mxu1  ;;  %v20006_v61 = vld [vmem:[#allocation4 + $0xb90] sm:$0xff]   ;;  %v20017_v8 = vld [vmem:[#allocation4 + $0xc40] sm:$0xff]  }
0x10b4   : > { %v8397_v49 = vpack.c.bf16 %v21824_v0, %v21820_v16  ;;  %v18014_v55 = vpop.f32.mrb[163].mxu0  ;;  %v8401_v1 = vpack.c.bf16 %v21826_v44, %v21822_v4  ;;  %v18030_v43 = vpop.f32.mrb[67].mxu1  ;;  %v20008_v16 = vld [vmem:[#allocation4 + $0xb98] sm:$0xff]   ;;  %v20019_v0 = vld [vmem:[#allocation4 + $0xc48] sm:$0xff]  }
0x10b5   : > { %v20021_v55 = vld [vmem:[#allocation4 + $0xc50] sm:$0xff]   ;;  %v20012_v4 = vld [vmem:[#allocation4 + $0xba8] sm:$0xff]   ;;  %v20023_v44 = vld [vmem:[#allocation4 + $0xc58] sm:$0xff]  }
0x10b6   : > { %v20025_v43 = vld [vmem:[#allocation4 + $0xc60] sm:$0xff]  }
0x10b9   : > { %v8334_v47 = vpop.f32.mrb[164].mxu0  ;;  %v21832_v50 = vpop.f32.mrb[68].mxu1 }
0x10ba   : > { %v18017_v53 = vpop.f32.mrb[165].mxu0  ;;  %v18033_v54 = vpop.f32.mrb[69].mxu1 }
0x10bb   : > { %v8337_v57 = vpop.f32.mrb[166].mxu0  ;;  %v21834_v22 = vpop.f32.mrb[70].mxu1  ;;  %v20027_v53 = vld [vmem:[#allocation4 + $0xc68] sm:$0xff]   ;;  %v20018_v54 = vld [vmem:[#allocation4 + $0xc00] sm:$0xff]  }
0x10bc   : > { %v8398_v14 = vpack.c.bf16 %v8337_v57, %v8334_v47  ;;  %v18018_v26 = vpop.f32.mrb[167].mxu0  ;;  %v8402_v15 = vpack.c.bf16 %v21834_v22, %v21832_v50  ;;  %v18034_v20 = vpop.f32.mrb[71].mxu1  ;;  %v20016_v47 = vld [vmem:[#allocation4 + $0xbb8] sm:$0xff]   ;;  %v20029_v57 = vld [vmem:[#allocation4 + $0xc70] sm:$0xff]   ;;  %v20042_v22 = vld [vmem:[#allocation4 + $0xca0] sm:$0xff]  }
0x10bd   : > { %v20022_v26 = vld [vmem:[#allocation4 + $0xc10] sm:$0xff]   ;;  %v20033_v20 = vld [vmem:[#allocation4 + $0xcc0] sm:$0xff]   ;;  %v20040_v50 = vld [vmem:[#allocation4 + $0xc98] sm:$0xff]  }
0x10be   : > { %18064 = vmatmul.mubr.bf16.vlgmr.msra.gmra.mrb[176].mxu0 %v8398_v14  ;;  %v20031_v14 = vld [vmem:[#allocation4 + $0xc78] sm:$0xff]  }
0x10bf   : > { %18068 = vmatpush3.bf16.msra.mxu0 %v19986_v7  ;;  %18083 = vmatprep.mubr.msk.bf16.mxu0 %vm20666_vm3, %v20665_v17  ;;  %v20020_v7 = vld [vmem:[#allocation4 + $0xc08] sm:$0xff]  }
0x10c0   : > { %18069 = vmatprep.subr.bf16.mxu0 %v20665_v17 }
0x10c1   : > { %v8342_v24 = vpop.f32.mrb[168].mxu0  ;;  %v21841_v5 = vpop.f32.mrb[72].mxu1 }
0x10c2   : > { %v18021_v9 = vpop.f32.mrb[169].mxu0  ;;  %v18037_v12 = vpop.f32.mrb[73].mxu1 }
0x10c3   : > { %18070 = vmatpush3.bf16.msra.mxu0 %v19988_v21  ;;  %v8345_v2 = vpop.f32.mrb[170].mxu0  ;;  %v21843_v25 = vpop.f32.mrb[74].mxu1  ;;  %v20024_v21 = vld [vmem:[#allocation4 + $0xc18] sm:$0xff]   ;;  %v20026_v9 = vld [vmem:[#allocation4 + $0xc20] sm:$0xff]   ;;  %v20037_v12 = vld [vmem:[#allocation4 + $0xcd0] sm:$0xff]  }
0x10c4   : > { %18071 = vmatprep.subr.bf16.mxu0 %v20665_v17  ;;  %v8399_v18 = vpack.c.bf16 %v8345_v2, %v8342_v24  ;;  %v18022_v19 = vpop.f32.mrb[171].mxu0  ;;  %v8403_v29 = vpack.c.bf16 %v21843_v25, %v21841_v5  ;;  %v18038_v41 = vpop.f32.mrb[75].mxu1  ;;  %v20035_v24 = vld [vmem:[#allocation4 + $0xcc8] sm:$0xff]   ;;  %v20030_v2 = vld [vmem:[#allocation4 + $0xc30] sm:$0xff]   ;;  %v20032_v25 = vld [vmem:[#allocation4 + $0xc38] sm:$0xff]  }
0x10c5   : > { %v20028_v5 = vld [vmem:[#allocation4 + $0xc28] sm:$0xff]   ;;  %v20034_v19 = vld [vmem:[#allocation4 + $0xc80] sm:$0xff]  }
0x10c6   : > { %18104 = vmatmul.mubr.bf16.vlgmr.msra.gmra.mrb[84].mxu1 %v8399_v18  ;;  %v20043_v18 = vld [vmem:[#allocation4 + $0xce8] sm:$0xff]  }
0x10c7   : > { %18072 = vmatpush3.bf16.msra.mxu0 %v19990_v63  ;;  %18128 = vmatpush3.bf16.msra.mxu1 %v20001_v46  ;;  %v20039_v63 = vld [vmem:[#allocation4 + $0xcd8] sm:$0xff]   ;;  %v20041_v46 = vld [vmem:[#allocation4 + $0xce0] sm:$0xff]   ;;  %v20036_v41 = vld [vmem:[#allocation4 + $0xc88] sm:$0xff]  }
0x10c8   : > { %18073 = vmatprep.subr.bf16.mxu0 %v20665_v17  ;;  %18129 = vmatprep.subr.bf16.mxu1 %v20665_v17 }
0x10c9   : > { %v21850_v48 = vpop.f32.mrb[172].mxu0  ;;  %18143 = vmatprep.mubr.msk.bf16.mxu1 %vm20666_vm3, %v20665_v17  ;;  %v21854_v30 = vpop.f32.mrb[76].mxu1 }
0x10ca   : > { %v18025_v31 = vpop.f32.mrb[173].mxu0  ;;  %v18041_v32 = vpop.f32.mrb[77].mxu1 }
0x10cb   : > { %18074 = vmatpush3.bf16.msra.mxu0 %v19992_v11  ;;  %18130 = vmatpush3.bf16.msra.mxu1 %v20003_v36  ;;  %v21856_v35 = vpop.f32.mrb[174].mxu0  ;;  %v21858_v37 = vpop.f32.mrb[78].mxu1  ;;  %v20047_v11 = vld [vmem:[#allocation4 + $0xcf8] sm:$0xff]   ;;  %v20038_v36 = vld [vmem:[#allocation4 + $0xc90] sm:$0xff]  }
0x10cc   : > { %18075 = vmatprep.subr.bf16.mxu0 %v20665_v17  ;;  %18131 = vmatprep.subr.bf16.mxu1 %v20665_v17  ;;  %v8400_v38 = vpack.c.bf16 %v21856_v35, %v21850_v48  ;;  %v18026_v3 = vpop.f32.mrb[175].mxu0  ;;  %v8404_v6 = vpack.c.bf16 %v21858_v37, %v21854_v30  ;;  %v18042_v60 = vpop.f32.mrb[79].mxu1  ;;  %v20046_v48 = vld [vmem:[#allocation4 + $0xcb0] sm:$0xff]   ;;  %v20048_v31 = vld [vmem:[#allocation4 + $0xcb8] sm:$0xff]  }
0x10cf   : > { %18076 = vmatpush3.bf16.msra.mxu0 %v19994_v33  ;;  %18132 = vmatpush3.bf16.msra.mxu1 %v20005_v34 }
0x10d0   : > { %18077 = vmatprep.subr.bf16.mxu0 %v20665_v17  ;;  %18133 = vmatprep.subr.bf16.mxu1 %v20665_v17 }
0x10d1   : > { %v21868_v27 = vpop.f32.mrb[80].mxu1 }
0x10d2   : > { %v18045_v28 = vpop.f32.mrb[81].mxu1 }
0x10d3   : > { %18078 = vmatpush3.bf16.msra.mxu0 %v19996_v42  ;;  %18134 = vmatpush3.bf16.msra.mxu1 %v20007_v23  ;;  %v21870_v56 = vpop.f32.mrb[82].mxu1 }
0x10d4   : > { %18079 = vmatprep.subr.bf16.mxu0 %v20665_v17  ;;  %18135 = vmatprep.subr.bf16.mxu1 %v20665_v17  ;;  %v8405_v58 = vpack.c.bf16 %v21870_v56, %v21868_v27  ;;  %v18046_v59 = vpop.f32.mrb[83].mxu1 }
0x10d7   : > { %18080 = vmatpush3.bf16.msra.mxu0 %v19998_v45  ;;  %18136 = vmatpush3.bf16.msra.mxu1 %v20009_v39 }
0x10d8   : > { %18081 = vmatprep.subr.bf16.mxu0 %v20665_v17  ;;  %18137 = vmatprep.subr.bf16.mxu1 %v20665_v17 }
0x10db   : > { %18082 = vmatpush3.bf16.msra.mxu0 %v20000_v62  ;;  %18138 = vmatpush3.bf16.msra.mxu1 %v20011_v40 }
0x10dc   : > { %18107 = vmatprep.subr.bf16.mxu0 %v20665_v17  ;;  %18139 = vmatprep.subr.bf16.mxu1 %v20665_v17 }
0x10de   : > { %18084 = vmatmul.mubr.bf16.vlgmr.msra.gmra.mrb[180].mxu0 %v8397_v49  ;;  %v20010_v49 = vld [vmem:[#allocation4 + $0xba0] sm:$0xff]  }
0x10df   : > { %18108 = vmatpush3.bf16.msra.mxu0 %v20002_v51  ;;  %18140 = vmatpush3.bf16.msra.mxu1 %v20013_v52  ;;  %v20056_v51 = vld [vmem:[#allocation4 + $0xd40] sm:$0xff]  }
0x10e0   : > { %18109 = vmatprep.subr.bf16.mxu0 %v20665_v17  ;;  %18141 = vmatprep.subr.bf16.mxu1 %v20665_v17 }
0x10e1   : > { %18123 = vmatprep.mubr.msk.bf16.mxu0 %vm20666_vm3, %v20665_v17 }
0x10e3   : > { %18110 = vmatpush3.bf16.msra.mxu0 %v20004_v10  ;;  %18142 = vmatpush3.bf16.msra.mxu1 %v20015_v13 }
0x10e4   : > { %18111 = vmatprep.subr.bf16.mxu0 %v20665_v17  ;;  %18167 = vmatprep.subr.bf16.mxu1 %v20665_v17 }
0x10e6   : > { %18144 = vmatmul.mubr.bf16.vlgmr.msra.gmra.mrb[88].mxu1 %v8401_v1  ;;  %v20014_v1 = vld [vmem:[#allocation4 + $0xbb0] sm:$0xff]  }
0x10e7   : > { %18112 = vmatpush3.bf16.msra.mxu0 %v20006_v61  ;;  %18168 = vmatpush3.bf16.msra.mxu1 %v20017_v8  ;;  %v20057_v61 = vld [vmem:[#allocation4 + $0xd48] sm:$0xff]  }
0x10e8   : > { %18113 = vmatprep.subr.bf16.mxu0 %v20665_v17  ;;  %18169 = vmatprep.subr.bf16.mxu1 %v20665_v17 }
0x10e9   : > { %18183 = vmatprep.mubr.msk.bf16.mxu1 %vm20666_vm3, %v20665_v17 }
0x10eb   : > { %18114 = vmatpush3.bf16.msra.mxu0 %v20008_v16  ;;  %18170 = vmatpush3.bf16.msra.mxu1 %v20019_v0 }
0x10ec   : > { %18115 = vmatprep.subr.bf16.mxu0 %v20665_v17  ;;  %18171 = vmatprep.subr.bf16.mxu1 %v20665_v17 }
0x10ef   : > { %18116 = vmatpush3.bf16.msra.mxu0 %v20010_v49  ;;  %18172 = vmatpush3.bf16.msra.mxu1 %v20021_v55 }
0x10f0   : > { %18117 = vmatprep.subr.bf16.mxu0 %v20665_v17  ;;  %18173 = vmatprep.subr.bf16.mxu1 %v20665_v17 }
0x10f3   : > { %18118 = vmatpush3.bf16.msra.mxu0 %v20012_v4  ;;  %18174 = vmatpush3.bf16.msra.mxu1 %v20023_v44  ;;  %v20059_v4 = vld [vmem:[#allocation4 + $0xd50] sm:$0xff]  }
0x10f4   : > { %18119 = vmatprep.subr.bf16.mxu0 %v20665_v17  ;;  %18175 = vmatprep.subr.bf16.mxu1 %v20665_v17 }
0x10f7   : > { %18120 = vmatpush3.bf16.msra.mxu0 %v20014_v1  ;;  %18176 = vmatpush3.bf16.msra.mxu1 %v20025_v43  ;;  %v20060_v43 = vld [vmem:[#allocation4 + $0xd58] sm:$0xff]  }
0x10f8   : > { %18121 = vmatprep.subr.bf16.mxu0 %v20665_v17  ;;  %18177 = vmatprep.subr.bf16.mxu1 %v20665_v17 }
0x10fb   : > { %18122 = vmatpush3.bf16.msra.mxu0 %v20016_v47  ;;  %18178 = vmatpush3.bf16.msra.mxu1 %v20027_v53  ;;  %v20061_v53 = vld [vmem:[#allocation4 + $0xd60] sm:$0xff]  }
0x10fc   : > { %18147 = vmatprep.subr.bf16.mxu0 %v20665_v17  ;;  %18179 = vmatprep.subr.bf16.mxu1 %v20665_v17 }
0x10fe   : > { %18124 = vmatmul.mubr.bf16.vlgmr.msra.gmra.mrb[184].mxu0 %v8400_v38 }
0x10ff   : > { %18148 = vmatpush3.bf16.msra.mxu0 %v20018_v54  ;;  %18180 = vmatpush3.bf16.msra.mxu1 %v20029_v57  ;;  %v20063_v54 = vld [vmem:[#allocation4 + $0xd68] sm:$0xff]  }
0x1100   : > { %18149 = vmatprep.subr.bf16.mxu0 %v20665_v17  ;;  %18181 = vmatprep.subr.bf16.mxu1 %v20665_v17 }
0x1101   : > { %18163 = vmatprep.mubr.msk.bf16.mxu0 %vm20666_vm3, %v20665_v17 }
0x1103   : > { %18150 = vmatpush3.bf16.msra.mxu0 %v20020_v7  ;;  %18182 = vmatpush3.bf16.msra.mxu1 %v20031_v14 }
0x1104   : > { %18151 = vmatprep.subr.bf16.mxu0 %v20665_v17  ;;  %18207 = vmatprep.subr.bf16.mxu1 %v20665_v17 }
0x1106   : > { %18184 = vmatmul.mubr.bf16.vlgmr.msra.gmra.mrb[92].mxu1 %v8403_v29  ;;  %v20045_v29 = vld [vmem:[#allocation4 + $0xcf0] sm:$0xff]  }
0x1107   : > { %18152 = vmatpush3.bf16.msra.mxu0 %v20022_v26  ;;  %18208 = vmatpush3.bf16.msra.mxu1 %v20033_v20 }
0x1108   : > { %18153 = vmatprep.subr.bf16.mxu0 %v20665_v17  ;;  %18209 = vmatprep.subr.bf16.mxu1 %v20665_v17 }
0x1109   : > { %18223 = vmatprep.mubr.msk.bf16.mxu1 %vm20666_vm3, %v20665_v17 }
0x110b   : > { %18154 = vmatpush3.bf16.msra.mxu0 %v20024_v21  ;;  %18210 = vmatpush3.bf16.msra.mxu1 %v20035_v24 }
0x110c   : > { %18155 = vmatprep.subr.bf16.mxu0 %v20665_v17  ;;  %18211 = vmatprep.subr.bf16.mxu1 %v20665_v17 }
0x110f   : > { %18156 = vmatpush3.bf16.msra.mxu0 %v20026_v9  ;;  %18212 = vmatpush3.bf16.msra.mxu1 %v20037_v12 }
0x1110   : > { %18157 = vmatprep.subr.bf16.mxu0 %v20665_v17  ;;  %18213 = vmatprep.subr.bf16.mxu1 %v20665_v17 }
0x1113   : > { %18158 = vmatpush3.bf16.msra.mxu0 %v20028_v5  ;;  %18214 = vmatpush3.bf16.msra.mxu1 %v20039_v63 }
0x1114   : > { %18159 = vmatprep.subr.bf16.mxu0 %v20665_v17  ;;  %18215 = vmatprep.subr.bf16.mxu1 %v20665_v17 }
0x1117   : > { %18160 = vmatpush3.bf16.msra.mxu0 %v20030_v2  ;;  %18216 = vmatpush3.bf16.msra.mxu1 %v20041_v46 }
0x1118   : > { %18161 = vmatprep.subr.bf16.mxu0 %v20665_v17  ;;  %18217 = vmatprep.subr.bf16.mxu1 %v20665_v17 }
0x111b   : > { %18162 = vmatpush3.bf16.msra.mxu0 %v20032_v25  ;;  %18218 = vmatpush3.bf16.msra.mxu1 %v20043_v18 }
0x111c   : > { %18187 = vmatprep.subr.bf16.mxu0 %v20665_v17  ;;  %18219 = vmatprep.subr.bf16.mxu1 %v20665_v17 }
0x111e   : > { %18164 = vmatmul.mubr.bf16.vlgmr.msra.gmra.mrb[188].mxu0 %v8402_v15  ;;  %v20044_v15 = vld [vmem:[#allocation4 + $0xca8] sm:$0xff]  }
0x111f   : > { %18188 = vmatpush3.bf16.msra.mxu0 %v20034_v19  ;;  %18220 = vmatpush3.bf16.msra.mxu1 %v20045_v29  ;;  %v15437_v19 = vld [vmem:[#allocation6 + $0x5] ss:$0 sm:$0xff] }
0x1120   : > { %18189 = vmatprep.subr.bf16.mxu0 %v20665_v17  ;;  %18221 = vmatprep.subr.bf16.mxu1 %v20665_v17 }
0x1121   : > { %18203 = vmatprep.mubr.msk.bf16.mxu0 %vm20666_vm3, %v20665_v17 }
0x1123   : > { %18190 = vmatpush3.bf16.msra.mxu0 %v20036_v41  ;;  %18222 = vmatpush3.bf16.msra.mxu1 %v20047_v11 }
0x1124   : > { %18191 = vmatprep.subr.bf16.mxu0 %v20665_v17  ;;  %18265 = vmatprep.subr.bf16.mxu1 %v20665_v17 }
0x1126   : > { %18224 = vmatmul.mubr.bf16.vlgmr.msra.gmra.mrb[96].mxu1 %v8405_v58 }
0x1127   : > { %18192 = vmatpush3.bf16.msra.mxu0 %v20038_v36  ;;  %18281 = vmatprep.mubr.msk.bf16.mxu1 %vm20666_vm3, %v20665_v17 }
0x1128   : > { %18193 = vmatprep.subr.bf16.mxu0 %v20665_v17  ;;  %18266 = vmatpush3.bf16.msra.mxu1 %v20056_v51 }
0x1129   : > { %18267 = vmatprep.subr.bf16.mxu1 %v20665_v17 }
0x112b   : > { %18194 = vmatpush3.bf16.msra.mxu0 %v20040_v50 }
0x112c   : > { %18195 = vmatprep.subr.bf16.mxu0 %v20665_v17  ;;  %18268 = vmatpush3.bf16.msra.mxu1 %v20057_v61 }
0x112d   : > { %18269 = vmatprep.subr.bf16.mxu1 %v20665_v17 }
0x112f   : > { %18196 = vmatpush3.bf16.msra.mxu0 %v20042_v22 }
0x1130   : > { %18197 = vmatprep.subr.bf16.mxu0 %v20665_v17  ;;  %18270 = vmatpush3.bf16.msra.mxu1 %v20059_v4  ;;  %v20071_v4 = vld [vmem:[#allocation4 + $0xd08] sm:$0xff]  }
0x1131   : > { %18271 = vmatprep.subr.bf16.mxu1 %v20665_v17 }
0x1133   : > { %18198 = vmatpush3.bf16.msra.mxu0 %v20044_v15 }
0x1134   : > { %18199 = vmatprep.subr.bf16.mxu0 %v20665_v17  ;;  %18272 = vmatpush3.bf16.msra.mxu1 %v20060_v43  ;;  %v20074_v43 = vld [vmem:[#allocation4 + $0xd10] sm:$0xff]  }
0x1135   : > { %18273 = vmatprep.subr.bf16.mxu1 %v20665_v17 }
0x1137   : > { %18200 = vmatpush3.bf16.msra.mxu0 %v20046_v48 }
0x1138   : > { %18201 = vmatprep.subr.bf16.mxu0 %v20665_v17  ;;  %18274 = vmatpush3.bf16.msra.mxu1 %v20061_v53 }
0x1139   : > { %18275 = vmatprep.subr.bf16.mxu1 %v20665_v17 }
0x113b   : > { %18202 = vmatpush3.bf16.msra.mxu0 %v20048_v31 }
0x113c   : > { %18227 = vmatprep.subr.bf16.mxu0 %v20665_v17  ;;  %18276 = vmatpush3.bf16.msra.mxu1 %v20063_v54 }
0x113d   : > { %18277 = vmatprep.subr.bf16.mxu1 %v20665_v17 }
0x113e   : > { %18204 = vmatmul.mubr.bf16.vlgmr.msra.gmra.mrb[192].mxu0 %v8404_v6 }
0x113f   : > { %18229 = vmatprep.mubr.msk.bf16.mxu0 %vm20666_vm3, %v20665_v17 }
0x1191   : > { %v8522_v32 = vpop.f32.mrb[176].mxu0 }
0x1192   : > { %v18065_v33 = vpop.f32.mrb[177].mxu0 }
0x1193   : > { %v8525_v34 = vpop.f32.mrb[178].mxu0  ;;  %v20049_v33 = vld [vmem:[%s22698_s16] sm:$0xff]  }
0x1194   : > { %v18066_v35 = vpop.f32.mrb[179].mxu0 }
0x1195   : > { %v20064_v35 = vld [vmem:[#allocation4 + $0xd88] sm:$0xff]  }
0x1199   : > { %v8717_v38 = vpop.f32.mrb[84].mxu1 }
0x119a   : > { %v18105_v3 = vpop.f32.mrb[85].mxu1 }
0x119b   : > { %v8720_v60 = vpop.f32.mrb[86].mxu1  ;;  %v20051_v3 = vld [vmem:[%s22698_s16 + $0x10] sm:$0xff]  }
0x119c   : > { %v18106_v42 = vpop.f32.mrb[87].mxu1 }
0x119d   : > { %v20053_v42 = vld [vmem:[%s22698_s16 + $0x20] sm:$0xff]  }
0x11b1   : > { %v8611_v23 = vpop.f32.mrb[180].mxu0 }
0x11b2   : > { %v8612_v27 = vadd.f32 %v8611_v23, %v8522_v32  ;;  %v18085_v28 = vpop.f32.mrb[181].mxu0  ;;  %v20054_v23 = vld [vmem:[%s22698_s16 + $0x28] sm:$0xff]  }
0x11b3   : > { %v8614_v45 = vpop.f32.mrb[182].mxu0  ;;  %v20058_v28 = vld [vmem:[%s22698_s16 + $0x38] sm:$0xff]  }
0x11b4   : > { %v8615_v39 = vadd.f32 %v8614_v45, %v8525_v34  ;;  %v18086_v56 = vpop.f32.mrb[183].mxu0  ;;  %v8724_v58 = vadd.f32 %v8717_v38, %v8612_v27  ;;  %v20062_v34 = vld [vmem:[#allocation4 + $0xd80] sm:$0xff]   ;;  %v20055_v27 = vld [vmem:[%s22698_s16 + $0x30] sm:$0xff]  }
0x11b5   : > { %v20050_v38 = vld [vmem:[%s22698_s16 + $0x8] sm:$0xff]   ;;  %v20065_v45 = vld [vmem:[#allocation4 + $0xd70] sm:$0xff]   ;;  %v20067_v56 = vld [vmem:[#allocation4 + $0xd78] sm:$0xff]  }
0x11b6   : > { %v8725_v30 = vadd.f32 %v8720_v60, %v8615_v39  ;;  %v20052_v60 = vld [vmem:[%s22698_s16 + $0x18] sm:$0xff]   ;;  %18278 = vmatpush3.bf16.msra.mxu1 %v20065_v45 }
0x11b7   : > { %v20066_v39 = vld [vmem:[#allocation4 + $0xd90] sm:$0xff]   ;;  %18279 = vmatprep.subr.bf16.mxu1 %v20665_v17  ;;  %v20093_v45 = vld [vmem:[#allocation4 + $0xe78] sm:$0xff]  }
0x11b9   : > { %v8933_v37 = vpop.f32.mrb[88].mxu1 }
0x11ba   : > { %v18145_v6 = vpop.f32.mrb[89].mxu1  ;;  %18280 = vmatpush3.bf16.msra.mxu1 %v20067_v56  ;;  %v20095_v56 = vld [vmem:[#allocation4 + $0xe80] sm:$0xff]  }
0x11bb   : > { %v8936_v59 = vpop.f32.mrb[90].mxu1  ;;  %18285 = vmatprep.subr.bf16.mxu1 %v20665_v17  ;;  %v20073_v6 = vld [vmem:[%s22698_s16 + $0x40] sm:$0xff]  }
0x11bc   : > { %v18146_v62 = vpop.f32.mrb[91].mxu1 }
0x11bd   : > { %v20077_v62 = vld [vmem:[#allocation4 + $0xdb8] sm:$0xff]  }
0x11d1   : > { %v8825_v40 = vpop.f32.mrb[184].mxu0 }
0x11d2   : > { %v8832_v52 = vadd.f32 %v8825_v40, %v8724_v58  ;;  %v18125_v10 = vpop.f32.mrb[185].mxu0  ;;  %v20068_v58 = vld [vmem:[#allocation4 + $0xd98] sm:$0xff]  }
0x11d3   : > { %v8828_v13 = vpop.f32.mrb[186].mxu0 }
0x11d4   : > { %v8833_v8 = vadd.f32 %v8828_v13, %v8725_v30  ;;  %v18126_v16 = vpop.f32.mrb[187].mxu0  ;;  %v8940_v0 = vadd.f32 %v8933_v37, %v8832_v52  ;;  %v20070_v30 = vld [vmem:[#allocation4 + $0xda0] sm:$0xff]   ;;  %v20072_v37 = vld [vmem:[#allocation4 + $0xda8] sm:$0xff]  }
0x11d6   : > { %v8941_v49 = vadd.f32 %v8936_v59, %v8833_v8  ;;  %v20075_v59 = vld [vmem:[#allocation4 + $0xdb0] sm:$0xff]  }
0x11d9   : > { %v9149_v55 = vpop.f32.mrb[92].mxu1 }
0x11da   : > { %v18185_v44 = vpop.f32.mrb[93].mxu1 }
0x11db   : > { %v9152_v1 = vpop.f32.mrb[94].mxu1 }
0x11dc   : > { %v18186_v47 = vpop.f32.mrb[95].mxu1 }
0x11f1   : > { %v9041_v57 = vpop.f32.mrb[188].mxu0 }
0x11f2   : > { %v9048_v7 = vadd.f32 %v9041_v57, %v8940_v0  ;;  %v18165_v14 = vpop.f32.mrb[189].mxu0  ;;  %v20069_v0 = vld [vmem:[#allocation4 + $0xd00] sm:$0xff]   ;;  %v20076_v57 = vld [vmem:[#allocation4 + $0xd18] sm:$0xff]  }
0x11f3   : > { %v9044_v26 = vpop.f32.mrb[190].mxu0 }
0x11f4   : > { %v9049_v20 = vadd.f32 %v9044_v26, %v8941_v49  ;;  %v18166_v21 = vpop.f32.mrb[191].mxu0  ;;  %v9156_v24 = vadd.f32 %v9149_v55, %v9048_v7 }
0x11f5   : > { %v20079_v21 = vld [vmem:[#allocation4 + $0xe40] sm:$0xff]  }
0x11f6   : > { %v9157_v9 = vadd.f32 %v9152_v1, %v9049_v20  ;;  %v20078_v20 = vld [vmem:[#allocation4 + $0xd20] sm:$0xff]  }
0x11f9   : > { %v9365_v12 = vpop.f32.mrb[96].mxu1 }
0x11fa   : > { %v18225_v5 = vpop.f32.mrb[97].mxu1 }
0x11fb   : > { %v9368_v63 = vpop.f32.mrb[98].mxu1  ;;  %v20081_v5 = vld [vmem:[#allocation4 + $0xe48] sm:$0xff]  }
0x11fc   : > { %v18226_v2 = vpop.f32.mrb[99].mxu1 }
0x1211   : > { %v9257_v46 = vpop.f32.mrb[192].mxu0 }
0x1212   : > { %v9264_v25 = vadd.f32 %v9257_v46, %v9156_v24  ;;  %v18205_v18 = vpop.f32.mrb[193].mxu0  ;;  %v20082_v46 = vld [vmem:[#allocation4 + $0xd30] sm:$0xff]  }
0x1213   : > { %v9260_v29 = vpop.f32.mrb[194].mxu0 }
0x1214   : > { %v9372_v41 = vadd.f32 %v9365_v12, %v9264_v25  ;;  %v9265_v11 = vadd.f32 %v9260_v29, %v9157_v9  ;;  %v18206_v36 = vpop.f32.mrb[195].mxu0  ;;  %v20080_v12 = vld [vmem:[#allocation4 + $0xd28] sm:$0xff]   ;;  %v20083_v25 = vld [vmem:[#allocation4 + $0xe50] sm:$0xff]  }
0x1216   : > { %v9380_v50 = vadd.f32 %v15437_v19, %v9372_v41  ;;  %v9373_v22 = vadd.f32 %v9368_v63, %v9265_v11  ;;  %v20084_v41 = vld [vmem:[#allocation4 + $0xd38] sm:$0xff]  }
0x1217   : > { %v20085_v11 = vld [vmem:[#allocation4 + $0xe58] sm:$0xff]  }
0x1218   : > { %v9381_v15 = vadd.f32 %v15437_v19, %v9373_v22  ;;  %v9382_v48 = vmax.f32 %v9380_v50, 0.0  ;;  %v20086_v22 = vld [vmem:[#allocation4 + $0xdc0] sm:$0xff]  }
0x121a   : > { %v9383_v31 = vmax.f32 %v9381_v15, 0.0  ;;  %v20087_v15 = vld [vmem:[#allocation4 + $0xe60] sm:$0xff]  }
0x121c   : > { %v9386_v32 = vpack.c.bf16 %v9383_v31, %v9382_v48 }
0x121e   : > { %18228 = vmatpush3.bf16.msra.mxu0 %v9386_v32 }
0x121f   : > { %18305 = vmatprep.subr.bf16.mxu0 %v20665_v17 }
0x1221   : > { %18230 = vmatmul.mubr.msk.bf16.vlgmr.msra.gmra.mrb[196].mxu0 %vm6599_vm4, %v20049_v33  ;;  %v20088_v33 = vld [vmem:[#allocation4 + $0xdc8] sm:$0xff]  }
0x1222   : > { %18233 = vmatprep.mubr.msk.bf16.mxu0 %vm20666_vm3, %v20665_v17  ;;  %18306 = vmatpush3.bf16.msra.mxu0 %v20062_v34  ;;  %v20089_v34 = vld [vmem:[#allocation4 + $0xe68] sm:$0xff]  }
0x1223   : > { %18307 = vmatprep.subr.bf16.mxu0 %v20665_v17 }
0x1226   : > { %18308 = vmatpush3.bf16.msra.mxu0 %v20064_v35 }
0x1227   : > { %18309 = vmatprep.subr.bf16.mxu0 %v20665_v17 }
0x1229   : > { %18234 = vmatmul.mubr.msk.bf16.gmra.mrb[200].mxu0 %vm6599_vm4, %v20050_v38 }
0x122a   : > { %18237 = vmatprep.mubr.msk.bf16.mxu0 %vm20666_vm3, %v20665_v17  ;;  %18310 = vmatpush3.bf16.msra.mxu0 %v20066_v39  ;;  %v20094_v39 = vld [vmem:[#allocation4 + $0xde0] sm:$0xff]  }
0x122b   : > { %18311 = vmatprep.subr.bf16.mxu0 %v20665_v17 }
0x122e   : > { %18312 = vmatpush3.bf16.msra.mxu0 %v20068_v58  ;;  %v20096_v58 = vld [vmem:[#allocation4 + $0xde8] sm:$0xff]  }
0x122f   : > { %18313 = vmatprep.subr.bf16.mxu0 %v20665_v17 }
0x1231   : > { %18238 = vmatmul.mubr.msk.bf16.gmra.mrb[204].mxu0 %vm6599_vm4, %v20051_v3  ;;  %v20090_v3 = vld [vmem:[#allocation4 + $0xdd0] sm:$0xff]  }
0x1232   : > { %18241 = vmatprep.mubr.msk.bf16.mxu0 %vm20666_vm3, %v20665_v17  ;;  %18314 = vmatpush3.bf16.msra.mxu0 %v20070_v30  ;;  %v20097_v30 = vld [vmem:[#allocation4 + $0xe88] sm:$0xff]  }
0x1233   : > { %18315 = vmatprep.subr.bf16.mxu0 %v20665_v17 }
0x1236   : > { %18316 = vmatpush3.bf16.msra.mxu0 %v20072_v37  ;;  %v20098_v37 = vld [vmem:[#allocation4 + $0xdf0] sm:$0xff]  }
0x1237   : > { %18317 = vmatprep.subr.bf16.mxu0 %v20665_v17 }
0x1239   : > { %18242 = vmatmul.mubr.msk.bf16.gmra.mrb[208].mxu0 %vm6599_vm4, %v20052_v60  ;;  %v20091_v60 = vld [vmem:[#allocation4 + $0xe70] sm:$0xff]  }
0x123a   : > { %18245 = vmatprep.mubr.msk.bf16.mxu0 %vm20666_vm3, %v20665_v17  ;;  %18318 = vmatpush3.bf16.msra.mxu0 %v20075_v59  ;;  %v20100_v59 = vld [vmem:[#allocation4 + $0xdf8] sm:$0xff]  }
0x123b   : > { %18319 = vmatprep.subr.bf16.mxu0 %v20665_v17 }
0x123e   : > { %18320 = vmatpush3.bf16.msra.mxu0 %v20077_v62  ;;  %v20101_v62 = vld [vmem:[#allocation4 + $0xe98] sm:$0xff]  }
0x123f   : > { %18345 = vmatprep.subr.bf16.mxu0 %v20665_v17 }
0x1241   : > { %18246 = vmatmul.mubr.msk.bf16.gmra.mrb[212].mxu0 %vm6599_vm4, %v20053_v42 }
0x1242   : > { %18249 = vmatprep.mubr.msk.bf16.mxu0 %vm20666_vm3, %v20665_v17 }
0x1249   : > { %18250 = vmatmul.mubr.msk.bf16.gmra.mrb[216].mxu0 %vm6599_vm4, %v20054_v23 }
0x124a   : > { %18253 = vmatprep.mubr.msk.bf16.mxu0 %vm20666_vm3, %v20665_v17 }
0x1251   : > { %18254 = vmatmul.mubr.msk.bf16.gmra.mrb[220].mxu0 %vm6599_vm4, %v20055_v27 }
0x1252   : > { %18257 = vmatprep.mubr.msk.bf16.mxu0 %vm20666_vm3, %v20665_v17 }
0x1259   : > { %18258 = vmatmul.mubr.msk.bf16.gmra.mrb[224].mxu0 %vm6599_vm4, %v20058_v28  ;;  %v20092_v28 = vld [vmem:[#allocation4 + $0xdd8] sm:$0xff]  }
0x125a   : > { %18261 = vmatprep.mubr.msk.bf16.mxu0 %vm20666_vm3, %v20665_v17 }
0x1261   : > { %18262 = vmatmul.mubr.msk.bf16.gmra.mrb[228].mxu0 %vm6599_vm4, %v20073_v6  ;;  %v20099_v6 = vld [vmem:[#allocation4 + $0xe90] sm:$0xff]  }
0x1262   : > { %18321 = vmatprep.mubr.msk.bf16.mxu0 %vm20666_vm3, %v20665_v17 }
0x12f4   : > { %v22028_v40 = vpop.f32.mrb[196].mxu0 }
0x12f5   : > { %v18231_v51 = vpop.f32.mrb[197].mxu0 }
0x12f6   : > { %v22030_v52 = vpop.f32.mrb[198].mxu0 }
0x12f7   : > { %v9582_v10 = vpack.c.bf16 %v22030_v52, %v22028_v40  ;;  %v18232_v13 = vpop.f32.mrb[199].mxu0 }
0x12fc   : > { %v9519_v61 = vpop.f32.mrb[200].mxu0 }
0x12fd   : > { %v18235_v8 = vpop.f32.mrb[201].mxu0 }
0x12fe   : > { %v9522_v16 = vpop.f32.mrb[202].mxu0  ;;  %v20103_v8 = vld [vmem:[#allocation4 + $0xea0] sm:$0xff]  }
0x12ff   : > { %v22034_v49 = vpack.c.bf16 %v9522_v16, %v9519_v61  ;;  %v18236_v55 = vpop.f32.mrb[203].mxu0  ;;  %v20102_v61 = vld [vmem:[#allocation4 + $0xe00] sm:$0xff]   ;;  %v20104_v16 = vld [vmem:[#allocation4 + $0xe08] sm:$0xff]  }
0x1300   : > { %v20106_v55 = vld [vmem:[#allocation4 + $0xe10] sm:$0xff]  }
0x1301   : > { %18282 = vmatmul.mubr.bf16.vlgmr.msra.gmra.mrb[100].mxu1 %v22034_v49 }
0x1302   : > { %18286 = vmatpush3.bf16.msra.mxu1 %v20069_v0  ;;  %18301 = vmatprep.mubr.msk.bf16.mxu1 %vm20666_vm3, %v20665_v17  ;;  %v20105_v0 = vld [vmem:[#allocation4 + $0xea8] sm:$0xff]  }
0x1303   : > { %18287 = vmatprep.subr.bf16.mxu1 %v20665_v17 }
0x1304   : > { %v22040_v44 = vpop.f32.mrb[204].mxu0 }
0x1305   : > { %v18239_v1 = vpop.f32.mrb[205].mxu0 }
0x1306   : > { %18288 = vmatpush3.bf16.msra.mxu1 %v20071_v4  ;;  %v22042_v47 = vpop.f32.mrb[206].mxu0  ;;  %v20107_v4 = vld [vmem:[#allocation4 + $0xeb0] sm:$0xff]   ;;  %v20109_v1 = vld [vmem:[#allocation4 + $0xeb8] sm:$0xff]  }
0x1307   : > { %18289 = vmatprep.subr.bf16.mxu1 %v20665_v17  ;;  %v9584_v53 = vpack.c.bf16 %v22042_v47, %v22040_v44  ;;  %v18240_v54 = vpop.f32.mrb[207].mxu0  ;;  %v20108_v44 = vld [vmem:[#allocation4 + $0xe18] sm:$0xff]   ;;  %v20111_v47 = vld [vmem:[#allocation4 + $0xf40] sm:$0xff]  }
0x1308   : > { %v20113_v54 = vld [vmem:[#allocation4 + $0xf48] sm:$0xff]  }
0x130a   : > { %18290 = vmatpush3.bf16.msra.mxu1 %v20074_v43  ;;  %v20110_v43 = vld [vmem:[#allocation4 + $0xe20] sm:$0xff]  }
0x130b   : > { %18291 = vmatprep.subr.bf16.mxu1 %v20665_v17 }
0x130c   : > { %v9535_v7 = vpop.f32.mrb[208].mxu0 }
0x130d   : > { %v18243_v14 = vpop.f32.mrb[209].mxu0 }
0x130e   : > { %18292 = vmatpush3.bf16.msra.mxu1 %v20076_v57  ;;  %v9538_v26 = vpop.f32.mrb[210].mxu0  ;;  %v20114_v57 = vld [vmem:[#allocation4 + $0xe30] sm:$0xff]   ;;  %v20116_v14 = vld [vmem:[#allocation4 + $0xe38] sm:$0xff]  }
0x130f   : > { %v22048_v24 = vpack.c.bf16 %v9538_v26, %v9535_v7  ;;  %18293 = vmatprep.subr.bf16.mxu1 %v20665_v17  ;;  %v18244_v9 = vpop.f32.mrb[211].mxu0  ;;  %v20115_v7 = vld [vmem:[#allocation4 + $0xf50] sm:$0xff]   ;;  %v20117_v26 = vld [vmem:[#allocation4 + $0xf58] sm:$0xff]  }
0x1310   : > { %v20120_v9 = vld [vmem:[#allocation4 + $0xec8] sm:$0xff]  }
0x1311   : > { %18322 = vmatmul.mubr.bf16.vlgmr.msra.gmra.mrb[232].mxu0 %v22048_v24 }
0x1312   : > { %18294 = vmatpush3.bf16.msra.mxu1 %v20078_v20  ;;  %18346 = vmatpush3.bf16.msra.mxu0 %v20079_v21  ;;  %v20118_v20 = vld [vmem:[#allocation4 + $0xec0] sm:$0xff]  }
0x1313   : > { %18295 = vmatprep.subr.bf16.mxu1 %v20665_v17  ;;  %18347 = vmatprep.subr.bf16.mxu0 %v20665_v17  ;;  %v20119_v21 = vld [vmem:[#allocation4 + $0xf60] sm:$0xff]  }
0x1314   : > { %18361 = vmatprep.mubr.msk.bf16.mxu0 %vm20666_vm3, %v20665_v17  ;;  %v9543_v63 = vpop.f32.mrb[212].mxu0 }
0x1315   : > { %v18247_v2 = vpop.f32.mrb[213].mxu0 }
0x1316   : > { %18296 = vmatpush3.bf16.msra.mxu1 %v20080_v12  ;;  %18348 = vmatpush3.bf16.msra.mxu0 %v20081_v5  ;;  %v9546_v18 = vpop.f32.mrb[214].mxu0  ;;  %v20121_v12 = vld [vmem:[#allocation4 + $0xf68] sm:$0xff]   ;;  %v20122_v5 = vld [vmem:[#allocation4 + $0xed0] sm:$0xff]   ;;  %v20125_v2 = vld [vmem:[#allocation4 + $0xf78] sm:$0xff]  }
0x1317   : > { %18297 = vmatprep.subr.bf16.mxu1 %v20665_v17  ;;  %18349 = vmatprep.subr.bf16.mxu0 %v20665_v17  ;;  %v22058_v19 = vpack.c.bf16 %v9546_v18, %v9543_v63  ;;  %v18248_v29 = vpop.f32.mrb[215].mxu0  ;;  %v20123_v63 = vld [vmem:[#allocation4 + $0xf70] sm:$0xff]  }
0x131a   : > { %18298 = vmatpush3.bf16.msra.mxu1 %v20082_v46  ;;  %18350 = vmatpush3.bf16.msra.mxu0 %v20083_v25  ;;  %v20126_v46 = vld [vmem:[#allocation4 + $0xee0] sm:$0xff]  }
0x131b   : > { %18299 = vmatprep.subr.bf16.mxu1 %v20665_v17  ;;  %18351 = vmatprep.subr.bf16.mxu0 %v20665_v17  ;;  %v20127_v25 = vld [vmem:[#allocation4 + $0xf80] sm:$0xff]  }
0x131c   : > { %v9551_v36 = vpop.f32.mrb[216].mxu0 }
0x131d   : > { %v18251_v50 = vpop.f32.mrb[217].mxu0 }
0x131e   : > { %18300 = vmatpush3.bf16.msra.mxu1 %v20084_v41  ;;  %18352 = vmatpush3.bf16.msra.mxu0 %v20085_v11  ;;  %v9554_v48 = vpop.f32.mrb[218].mxu0  ;;  %v20128_v41 = vld [vmem:[#allocation4 + $0xee8] sm:$0xff]  }
0x131f   : > { %18325 = vmatprep.subr.bf16.mxu1 %v20665_v17  ;;  %18353 = vmatprep.subr.bf16.mxu0 %v20665_v17  ;;  %v22064_v31 = vpack.c.bf16 %v9554_v48, %v9551_v36  ;;  %v18252_v32 = vpop.f32.mrb[219].mxu0  ;;  %v20129_v11 = vld [vmem:[#allocation4 + $0xf88] sm:$0xff]   ;;  %v20131_v48 = vld [vmem:[#allocation4 + $0xf90] sm:$0xff]  }
0x1320   : > { %v20132_v32 = vld [vmem:[#allocation4 + $0xef8] sm:$0xff]  }
0x1321   : > { %18302 = vmatmul.mubr.bf16.vlgmr.msra.gmra.mrb[104].mxu1 %v9582_v10 }
0x1322   : > { %18326 = vmatpush3.bf16.msra.mxu1 %v20086_v22  ;;  %18354 = vmatpush3.bf16.msra.mxu0 %v20087_v15  ;;  %v20130_v15 = vld [vmem:[#allocation4 + $0xef0] sm:$0xff]  }
0x1323   : > { %18327 = vmatprep.subr.bf16.mxu1 %v20665_v17  ;;  %18355 = vmatprep.subr.bf16.mxu0 %v20665_v17 }
0x1324   : > { %18341 = vmatprep.mubr.msk.bf16.mxu1 %vm20666_vm3, %v20665_v17  ;;  %v22073_v35 = vpop.f32.mrb[220].mxu0 }
0x1325   : > { %v18255_v38 = vpop.f32.mrb[221].mxu0 }
0x1326   : > { %18328 = vmatpush3.bf16.msra.mxu1 %v20088_v33  ;;  %18356 = vmatpush3.bf16.msra.mxu0 %v20089_v34  ;;  %v22075_v42 = vpop.f32.mrb[222].mxu0  ;;  %v20133_v33 = vld [vmem:[#allocation4 + $0xf98] sm:$0xff]   ;;  %v20134_v34 = vld [vmem:[#allocation4 + $0xf00] sm:$0xff]  }
0x1327   : > { %18329 = vmatprep.subr.bf16.mxu1 %v20665_v17  ;;  %18357 = vmatprep.subr.bf16.mxu0 %v20665_v17  ;;  %v9588_v23 = vpack.c.bf16 %v22075_v42, %v22073_v35  ;;  %v18256_v27 = vpop.f32.mrb[223].mxu0  ;;  %v20135_v38 = vld [vmem:[#allocation4 + $0xfa0] sm:$0xff]   ;;  %v20148_v35 = vld [vmem:[#allocation4 + $0xf38] sm:$0xff]  }
0x1328   : > { %v20138_v27 = vld [vmem:[#allocation4 + $0xf10] sm:$0xff]   ;;  %v20149_v42 = vld [vmem:[#allocation4 + $0x1058] sm:$0xff]  }
0x132a   : > { %18330 = vmatpush3.bf16.msra.mxu1 %v20090_v3  ;;  %18358 = vmatpush3.bf16.msra.mxu0 %v20091_v60  ;;  %v20136_v3 = vld [vmem:[#allocation4 + $0xf08] sm:$0xff]  }
0x132b   : > { %18331 = vmatprep.subr.bf16.mxu1 %v20665_v17  ;;  %18359 = vmatprep.subr.bf16.mxu0 %v20665_v17  ;;  %v20137_v60 = vld [vmem:[#allocation4 + $0xfa8] sm:$0xff]  }
0x132c   : > { %v9567_v40 = vpop.f32.mrb[224].mxu0 }
0x132d   : > { %v18259_v51 = vpop.f32.mrb[225].mxu0 }
0x132e   : > { %18332 = vmatpush3.bf16.msra.mxu1 %v20092_v28  ;;  %18360 = vmatpush3.bf16.msra.mxu0 %v20093_v45  ;;  %v9570_v52 = vpop.f32.mrb[226].mxu0  ;;  %v20139_v28 = vld [vmem:[#allocation4 + $0xfb0] sm:$0xff]   ;;  %v20140_v45 = vld [vmem:[#allocation4 + $0xf18] sm:$0xff]   ;;  %v20153_v51 = vld [vmem:[#allocation4 + $0x1068] sm:$0xff]  }
0x132f   : > { %18333 = vmatprep.subr.bf16.mxu1 %v20665_v17  ;;  %18385 = vmatprep.subr.bf16.mxu0 %v20665_v17  ;;  %v22096_v10 = vpack.c.bf16 %v9570_v52, %v9567_v40  ;;  %v18260_v13 = vpop.f32.mrb[227].mxu0  ;;  %v20152_v40 = vld [vmem:[#allocation4 + $0xfc8] sm:$0xff]   ;;  %v20154_v52 = vld [vmem:[#allocation4 + $0xfd0] sm:$0xff]  }
0x1330   : > { %v20155_v13 = vld [vmem:[#allocation4 + $0x1070] sm:$0xff]  }
0x1331   : > { %18362 = vmatmul.mubr.bf16.vlgmr.msra.gmra.mrb[236].mxu0 %v9584_v53  ;;  %v20112_v53 = vld [vmem:[#allocation4 + $0xe28] sm:$0xff]  }
0x1332   : > { %18334 = vmatpush3.bf16.msra.mxu1 %v20094_v39  ;;  %18386 = vmatpush3.bf16.msra.mxu0 %v20095_v56  ;;  %v20141_v39 = vld [vmem:[#allocation4 + $0xfb8] sm:$0xff]   ;;  %v20142_v56 = vld [vmem:[#allocation4 + $0xf20] sm:$0xff]  }
0x1333   : > { %18335 = vmatprep.subr.bf16.mxu1 %v20665_v17  ;;  %18387 = vmatprep.subr.bf16.mxu0 %v20665_v17 }
0x1334   : > { %18401 = vmatprep.mubr.msk.bf16.mxu0 %vm20666_vm3, %v20665_v17  ;;  %v22133_v18 = vpop.f32.mrb[228].mxu0 }
0x1335   : > { %v18263_v29 = vpop.f32.mrb[229].mxu0 }
0x1336   : > { %18336 = vmatpush3.bf16.msra.mxu1 %v20096_v58  ;;  %18388 = vmatpush3.bf16.msra.mxu0 %v20097_v30  ;;  %v22136_v36 = vpop.f32.mrb[230].mxu0  ;;  %v20143_v58 = vld [vmem:[#allocation4 + $0x1040] sm:$0xff]   ;;  %v20144_v30 = vld [vmem:[#allocation4 + $0xf28] sm:$0xff]  }
0x1337   : > { %18337 = vmatprep.subr.bf16.mxu1 %v20665_v17  ;;  %18389 = vmatprep.subr.bf16.mxu0 %v20665_v17  ;;  %v9590_v50 = vpack.c.bf16 %v22136_v36, %v22133_v18  ;;  %v18264_v22 = vpop.f32.mrb[231].mxu0 }
0x133a   : > { %18338 = vmatpush3.bf16.msra.mxu1 %v20098_v37  ;;  %18390 = vmatpush3.bf16.msra.mxu0 %v20099_v6  ;;  %v20145_v37 = vld [vmem:[#allocation4 + $0x1048] sm:$0xff]   ;;  %v20146_v6 = vld [vmem:[#allocation4 + $0xf30] sm:$0xff]  }
0x133b   : > { %18339 = vmatprep.subr.bf16.mxu1 %v20665_v17  ;;  %18391 = vmatprep.subr.bf16.mxu0 %v20665_v17 }
0x133e   : > { %18340 = vmatpush3.bf16.msra.mxu1 %v20100_v59  ;;  %18392 = vmatpush3.bf16.msra.mxu0 %v20101_v62  ;;  %v20147_v59 = vld [vmem:[#allocation4 + $0x1050] sm:$0xff]   ;;  %v20151_v62 = vld [vmem:[#allocation4 + $0x1060] sm:$0xff]  }
0x133f   : > { %18365 = vmatprep.subr.bf16.mxu1 %v20665_v17  ;;  %18393 = vmatprep.subr.bf16.mxu0 %v20665_v17 }
0x1341   : > { %18342 = vmatmul.mubr.bf16.vlgmr.msra.gmra.mrb[108].mxu1 %v22058_v19 }
0x1342   : > { %18366 = vmatpush3.bf16.msra.mxu1 %v20102_v61  ;;  %18394 = vmatpush3.bf16.msra.mxu0 %v20103_v8  ;;  %v20157_v61 = vld [vmem:[#allocation4 + $0x1078] sm:$0xff]   ;;  %v20158_v8 = vld [vmem:[#allocation4 + $0xfe0] sm:$0xff]  }
0x1343   : > { %18367 = vmatprep.subr.bf16.mxu1 %v20665_v17  ;;  %18395 = vmatprep.subr.bf16.mxu0 %v20665_v17 }
0x1344   : > { %18381 = vmatprep.mubr.msk.bf16.mxu1 %vm20666_vm3, %v20665_v17 }
0x1346   : > { %18368 = vmatpush3.bf16.msra.mxu1 %v20104_v16  ;;  %18396 = vmatpush3.bf16.msra.mxu0 %v20105_v0  ;;  %v20159_v16 = vld [vmem:[#allocation4 + $0x1080] sm:$0xff]   ;;  %v20160_v0 = vld [vmem:[#allocation4 + $0xfe8] sm:$0xff]  }
0x1347   : > { %18369 = vmatprep.subr.bf16.mxu1 %v20665_v17  ;;  %18397 = vmatprep.subr.bf16.mxu0 %v20665_v17 }
0x134a   : > { %18370 = vmatpush3.bf16.msra.mxu1 %v20106_v55  ;;  %18398 = vmatpush3.bf16.msra.mxu0 %v20107_v4  ;;  %v20161_v55 = vld [vmem:[#allocation4 + $0x1088] sm:$0xff]   ;;  %v20162_v4 = vld [vmem:[#allocation4 + $0xff0] sm:$0xff]  }
0x134b   : > { %18371 = vmatprep.subr.bf16.mxu1 %v20665_v17  ;;  %18399 = vmatprep.subr.bf16.mxu0 %v20665_v17 }
0x134e   : > { %18372 = vmatpush3.bf16.msra.mxu1 %v20108_v44  ;;  %18400 = vmatpush3.bf16.msra.mxu0 %v20109_v1  ;;  %v20163_v44 = vld [vmem:[#allocation4 + $0x1090] sm:$0xff]   ;;  %v20165_v1 = vld [vmem:[#allocation4 + $0x1098] sm:$0xff]  }
0x134f   : > { %18373 = vmatprep.subr.bf16.mxu1 %v20665_v17  ;;  %18425 = vmatprep.subr.bf16.mxu0 %v20665_v17 }
0x1351   : > { %18402 = vmatmul.mubr.bf16.vlgmr.msra.gmra.mrb[240].mxu0 %v22058_v19 }
0x1352   : > { %18374 = vmatpush3.bf16.msra.mxu1 %v20110_v43  ;;  %18426 = vmatpush3.bf16.msra.mxu0 %v20111_v47  ;;  %v20166_v43 = vld [vmem:[#allocation4 + $0x1000] sm:$0xff]  }
0x1353   : > { %18375 = vmatprep.subr.bf16.mxu1 %v20665_v17  ;;  %18427 = vmatprep.subr.bf16.mxu0 %v20665_v17  ;;  %v20167_v47 = vld [vmem:[#allocation4 + $0x10a0] sm:$0xff]  }
0x1354   : > { %18441 = vmatprep.mubr.msk.bf16.mxu0 %vm20666_vm3, %v20665_v17 }
0x1356   : > { %18376 = vmatpush3.bf16.msra.mxu1 %v20112_v53  ;;  %18428 = vmatpush3.bf16.msra.mxu0 %v20113_v54  ;;  %v20168_v53 = vld [vmem:[#allocation4 + $0x1008] sm:$0xff]  }
0x1357   : > { %18377 = vmatprep.subr.bf16.mxu1 %v20665_v17  ;;  %18429 = vmatprep.subr.bf16.mxu0 %v20665_v17  ;;  %v20169_v54 = vld [vmem:[#allocation4 + $0x10a8] sm:$0xff]  }
0x135a   : > { %18378 = vmatpush3.bf16.msra.mxu1 %v20114_v57  ;;  %18430 = vmatpush3.bf16.msra.mxu0 %v20115_v7  ;;  %v20170_v57 = vld [vmem:[#allocation4 + $0x1010] sm:$0xff]  }
0x135b   : > { %18379 = vmatprep.subr.bf16.mxu1 %v20665_v17  ;;  %18431 = vmatprep.subr.bf16.mxu0 %v20665_v17  ;;  %v20171_v7 = vld [vmem:[#allocation4 + $0x10b0] sm:$0xff]  }
0x135e   : > { %18380 = vmatpush3.bf16.msra.mxu1 %v20116_v14  ;;  %18432 = vmatpush3.bf16.msra.mxu0 %v20117_v26  ;;  %v20172_v14 = vld [vmem:[#allocation4 + $0x1018] sm:$0xff]  }
0x135f   : > { %18405 = vmatprep.subr.bf16.mxu1 %v20665_v17  ;;  %18433 = vmatprep.subr.bf16.mxu0 %v20665_v17  ;;  %v20173_v26 = vld [vmem:[#allocation4 + $0x10b8] sm:$0xff]  }
0x1361   : > { %18382 = vmatmul.mubr.bf16.vlgmr.msra.gmra.mrb[112].mxu1 %v22034_v49  ;;  %v20124_v49 = vld [vmem:[#allocation4 + $0xed8] sm:$0xff]  }
0x1362   : > { %18406 = vmatpush3.bf16.msra.mxu1 %v20118_v20  ;;  %18434 = vmatpush3.bf16.msra.mxu0 %v20119_v21  ;;  %v20174_v20 = vld [vmem:[#allocation4 + $0x1020] sm:$0xff]   ;;  %v20175_v21 = vld [vmem:[#allocation4 + $0x1028] sm:$0xff]  }
0x1363   : > { %18407 = vmatprep.subr.bf16.mxu1 %v20665_v17  ;;  %18435 = vmatprep.subr.bf16.mxu0 %v20665_v17 }
0x1364   : > { %18421 = vmatprep.mubr.msk.bf16.mxu1 %vm20666_vm3, %v20665_v17 }
0x1366   : > { %18408 = vmatpush3.bf16.msra.mxu1 %v20120_v9  ;;  %18436 = vmatpush3.bf16.msra.mxu0 %v20121_v12 }
0x1367   : > { %18409 = vmatprep.subr.bf16.mxu1 %v20665_v17  ;;  %18437 = vmatprep.subr.bf16.mxu0 %v20665_v17 }
0x136a   : > { %18410 = vmatpush3.bf16.msra.mxu1 %v20122_v5  ;;  %18438 = vmatpush3.bf16.msra.mxu0 %v20123_v63  ;;  %v20176_v63 = vld [vmem:[#allocation4 + $0x1030] sm:$0xff]  }
0x136b   : > { %18411 = vmatprep.subr.bf16.mxu1 %v20665_v17  ;;  %18439 = vmatprep.subr.bf16.mxu0 %v20665_v17 }
0x136e   : > { %18412 = vmatpush3.bf16.msra.mxu1 %v20124_v49  ;;  %18440 = vmatpush3.bf16.msra.mxu0 %v20125_v2  ;;  %v20177_v2 = vld [vmem:[#allocation4 + $0x1038] sm:$0xff]  }
0x136f   : > { %18413 = vmatprep.subr.bf16.mxu1 %v20665_v17  ;;  %18465 = vmatprep.subr.bf16.mxu0 %v20665_v17 }
0x1371   : > { %18442 = vmatmul.mubr.bf16.vlgmr.msra.gmra.mrb[244].mxu0 %v22058_v19 }
0x1372   : > { %18414 = vmatpush3.bf16.msra.mxu1 %v20126_v46  ;;  %18466 = vmatpush3.bf16.msra.mxu0 %v20127_v25  ;;  %v20178_v46 = vld [vmem:[#allocation4 + $0x10c0] sm:$0xff]  }
0x1373   : > { %18415 = vmatprep.subr.bf16.mxu1 %v20665_v17  ;;  %18467 = vmatprep.subr.bf16.mxu0 %v20665_v17 }
0x1374   : > { %18481 = vmatprep.mubr.msk.bf16.mxu0 %vm20666_vm3, %v20665_v17 }
0x1376   : > { %18416 = vmatpush3.bf16.msra.mxu1 %v20128_v41  ;;  %18468 = vmatpush3.bf16.msra.mxu0 %v20129_v11  ;;  %v20180_v41 = vld [vmem:[#allocation4 + $0x10d0] sm:$0xff]  }
0x1377   : > { %18417 = vmatprep.subr.bf16.mxu1 %v20665_v17  ;;  %18469 = vmatprep.subr.bf16.mxu0 %v20665_v17 }
0x137a   : > { %18418 = vmatpush3.bf16.msra.mxu1 %v20130_v15  ;;  %18470 = vmatpush3.bf16.msra.mxu0 %v20131_v48  ;;  %v20181_v15 = vld [vmem:[#allocation4 + $0x10d8] sm:$0xff]   ;;  %v20183_v48 = vld [vmem:[#allocation4 + $0x10e8] sm:$0xff]  }
0x137b   : > { %18419 = vmatprep.subr.bf16.mxu1 %v20665_v17  ;;  %18471 = vmatprep.subr.bf16.mxu0 %v20665_v17 }
0x137e   : > { %18420 = vmatpush3.bf16.msra.mxu1 %v20132_v32  ;;  %18472 = vmatpush3.bf16.msra.mxu0 %v20133_v33 }
0x137f   : > { %18445 = vmatprep.subr.bf16.mxu1 %v20665_v17  ;;  %18473 = vmatprep.subr.bf16.mxu0 %v20665_v17 }
0x1381   : > { %18422 = vmatmul.mubr.bf16.vlgmr.msra.gmra.mrb[116].mxu1 %v22064_v31 }
0x1382   : > { %18446 = vmatpush3.bf16.msra.mxu1 %v20134_v34  ;;  %18474 = vmatpush3.bf16.msra.mxu0 %v20135_v38 }
0x1383   : > { %18447 = vmatprep.subr.bf16.mxu1 %v20665_v17  ;;  %18475 = vmatprep.subr.bf16.mxu0 %v20665_v17 }
0x1384   : > { %18461 = vmatprep.mubr.msk.bf16.mxu1 %vm20666_vm3, %v20665_v17 }
0x1386   : > { %18448 = vmatpush3.bf16.msra.mxu1 %v20136_v3  ;;  %18476 = vmatpush3.bf16.msra.mxu0 %v20137_v60  ;;  %v20184_v3 = vld [vmem:[#allocation4 + $0x10f0] sm:$0xff]  }
0x1387   : > { %18449 = vmatprep.subr.bf16.mxu1 %v20665_v17  ;;  %18477 = vmatprep.subr.bf16.mxu0 %v20665_v17 }
0x138a   : > { %18450 = vmatpush3.bf16.msra.mxu1 %v20138_v27  ;;  %18478 = vmatpush3.bf16.msra.mxu0 %v20139_v28 }
0x138b   : > { %18451 = vmatprep.subr.bf16.mxu1 %v20665_v17  ;;  %18479 = vmatprep.subr.bf16.mxu0 %v20665_v17 }
0x138e   : > { %18452 = vmatpush3.bf16.msra.mxu1 %v20140_v45  ;;  %18480 = vmatpush3.bf16.msra.mxu0 %v20141_v39  ;;  %v20185_v39 = vld [vmem:[#allocation4 + $0x10f8] sm:$0xff]  }
0x138f   : > { %18453 = vmatprep.subr.bf16.mxu1 %v20665_v17  ;;  %18505 = vmatprep.subr.bf16.mxu0 %v20665_v17 }
0x1391   : > { %18482 = vmatmul.mubr.bf16.vlgmr.msra.gmra.mrb[248].mxu0 %v9588_v23  ;;  %v20150_v23 = vld [vmem:[#allocation4 + $0xfc0] sm:$0xff]  }
0x1392   : > { %18454 = vmatpush3.bf16.msra.mxu1 %v20142_v56  ;;  %18506 = vmatpush3.bf16.msra.mxu0 %v20143_v58 }
0x1393   : > { %18455 = vmatprep.subr.bf16.mxu1 %v20665_v17  ;;  %18507 = vmatprep.subr.bf16.mxu0 %v20665_v17 }
0x1394   : > { %18521 = vmatprep.mubr.msk.bf16.mxu0 %vm20666_vm3, %v20665_v17 }
0x1396   : > { %18456 = vmatpush3.bf16.msra.mxu1 %v20144_v30  ;;  %18508 = vmatpush3.bf16.msra.mxu0 %v20145_v37 }
0x1397   : > { %18457 = vmatprep.subr.bf16.mxu1 %v20665_v17  ;;  %18509 = vmatprep.subr.bf16.mxu0 %v20665_v17 }
0x139a   : > { %18458 = vmatpush3.bf16.msra.mxu1 %v20146_v6  ;;  %18510 = vmatpush3.bf16.msra.mxu0 %v20147_v59  ;;  %v22224_v6 = vld [vmem:[#allocation6 + $0x6] ss:$0 sm:$0xff] }
0x139b   : > { %18459 = vmatprep.subr.bf16.mxu1 %v20665_v17  ;;  %18511 = vmatprep.subr.bf16.mxu0 %v20665_v17 }
0x139e   : > { %18460 = vmatpush3.bf16.msra.mxu1 %v20148_v35  ;;  %18512 = vmatpush3.bf16.msra.mxu0 %v20149_v42 }
0x139f   : > { %18485 = vmatprep.subr.bf16.mxu1 %v20665_v17  ;;  %18513 = vmatprep.subr.bf16.mxu0 %v20665_v17 }
0x13a1   : > { %18462 = vmatmul.mubr.bf16.vlgmr.msra.gmra.mrb[120].mxu1 %v22048_v24  ;;  %v20156_v24 = vld [vmem:[#allocation4 + $0xfd8] sm:$0xff]  }
0x13a2   : > { %18486 = vmatpush3.bf16.msra.mxu1 %v20150_v23  ;;  %18514 = vmatpush3.bf16.msra.mxu0 %v20151_v62 }
0x13a3   : > { %18487 = vmatprep.subr.bf16.mxu1 %v20665_v17  ;;  %18515 = vmatprep.subr.bf16.mxu0 %v20665_v17 }
0x13a4   : > { %18501 = vmatprep.mubr.msk.bf16.mxu1 %vm20666_vm3, %v20665_v17 }
0x13a6   : > { %18488 = vmatpush3.bf16.msra.mxu1 %v20152_v40  ;;  %18516 = vmatpush3.bf16.msra.mxu0 %v20153_v51 }
0x13a7   : > { %18489 = vmatprep.subr.bf16.mxu1 %v20665_v17  ;;  %18517 = vmatprep.subr.bf16.mxu0 %v20665_v17 }
0x13aa   : > { %18490 = vmatpush3.bf16.msra.mxu1 %v20154_v52  ;;  %18518 = vmatpush3.bf16.msra.mxu0 %v20155_v13 }
0x13ab   : > { %18491 = vmatprep.subr.bf16.mxu1 %v20665_v17  ;;  %18519 = vmatprep.subr.bf16.mxu0 %v20665_v17 }
0x13ae   : > { %18492 = vmatpush3.bf16.msra.mxu1 %v20156_v24  ;;  %18520 = vmatpush3.bf16.msra.mxu0 %v20157_v61 }
0x13af   : > { %18493 = vmatprep.subr.bf16.mxu1 %v20665_v17  ;;  %18545 = vmatprep.subr.bf16.mxu0 %v20665_v17 }
0x13b1   : > { %18522 = vmatmul.mubr.bf16.vlgmr.msra.gmra.mrb[252].mxu0 %v22064_v31  ;;  %v20164_v31 = vld [vmem:[#allocation4 + $0xff8] sm:$0xff]  }
0x13b2   : > { %18494 = vmatpush3.bf16.msra.mxu1 %v20158_v8  ;;  %18546 = vmatpush3.bf16.msra.mxu0 %v20159_v16 }
0x13b3   : > { %18495 = vmatprep.subr.bf16.mxu1 %v20665_v17  ;;  %18547 = vmatprep.subr.bf16.mxu0 %v20665_v17 }
0x13b4   : > { %18561 = vmatprep.mubr.msk.bf16.mxu0 %vm20666_vm3, %v20665_v17 }
0x13b6   : > { %18496 = vmatpush3.bf16.msra.mxu1 %v20160_v0  ;;  %18548 = vmatpush3.bf16.msra.mxu0 %v20161_v55 }
0x13b7   : > { %18497 = vmatprep.subr.bf16.mxu1 %v20665_v17  ;;  %18549 = vmatprep.subr.bf16.mxu0 %v20665_v17 }
0x13ba   : > { %18498 = vmatpush3.bf16.msra.mxu1 %v20162_v4  ;;  %18550 = vmatpush3.bf16.msra.mxu0 %v20163_v44 }
0x13bb   : > { %18499 = vmatprep.subr.bf16.mxu1 %v20665_v17  ;;  %18551 = vmatprep.subr.bf16.mxu0 %v20665_v17 }
0x13be   : > { %18500 = vmatpush3.bf16.msra.mxu1 %v20164_v31  ;;  %18552 = vmatpush3.bf16.msra.mxu0 %v20165_v1 }
0x13bf   : > { %18525 = vmatprep.subr.bf16.mxu1 %v20665_v17  ;;  %18553 = vmatprep.subr.bf16.mxu0 %v20665_v17 }
0x13c1   : > { %18502 = vmatmul.mubr.bf16.vlgmr.msra.gmra.mrb[124].mxu1 %v22096_v10 }
0x13c2   : > { %18526 = vmatpush3.bf16.msra.mxu1 %v20166_v43  ;;  %18554 = vmatpush3.bf16.msra.mxu0 %v20167_v47 }
0x13c3   : > { %18527 = vmatprep.subr.bf16.mxu1 %v20665_v17  ;;  %18555 = vmatprep.subr.bf16.mxu0 %v20665_v17 }
0x13c4   : > { %18541 = vmatprep.mubr.msk.bf16.mxu1 %vm20666_vm3, %v20665_v17 }
0x13c6   : > { %18528 = vmatpush3.bf16.msra.mxu1 %v20168_v53  ;;  %18556 = vmatpush3.bf16.msra.mxu0 %v20169_v54 }
0x13c7   : > { %18529 = vmatprep.subr.bf16.mxu1 %v20665_v17  ;;  %18557 = vmatprep.subr.bf16.mxu0 %v20665_v17 }
0x13ca   : > { %18530 = vmatpush3.bf16.msra.mxu1 %v20170_v57  ;;  %18558 = vmatpush3.bf16.msra.mxu0 %v20171_v7 }
0x13cb   : > { %18531 = vmatprep.subr.bf16.mxu1 %v20665_v17  ;;  %18559 = vmatprep.subr.bf16.mxu0 %v20665_v17 }
0x13ce   : > { %18532 = vmatpush3.bf16.msra.mxu1 %v20172_v14  ;;  %18560 = vmatpush3.bf16.msra.mxu0 %v20173_v26 }
0x13cf   : > { %18533 = vmatprep.subr.bf16.mxu1 %v20665_v17 }
0x13d1   : > { %18562 = vmatmul.mubr.bf16.vlgmr.msra.gmra.mrb[0].mxu0 %v22096_v10  ;;  %v20179_v10 = vld [vmem:[#allocation4 + $0x10c8] sm:$0xff]  }
0x13d2   : > { %18534 = vmatpush3.bf16.msra.mxu1 %v20174_v20 }
0x13d3   : > { %18535 = vmatprep.subr.bf16.mxu1 %v20665_v17 }
0x13d4   : > { %v9707_v9 = vpop.f32.mrb[100].mxu1 }
0x13d5   : > { %v18283_v12 = vpop.f32.mrb[101].mxu1 }
0x13d6   : > { %18536 = vmatpush3.bf16.msra.mxu1 %v20175_v21  ;;  %v9710_v5 = vpop.f32.mrb[102].mxu1 }
0x13d7   : > { %v18284_v49 = vpop.f32.mrb[103].mxu1  ;;  %18537 = vmatprep.subr.bf16.mxu1 %v20665_v17 }
0x13da   : > { %18538 = vmatpush3.bf16.msra.mxu1 %v20176_v63 }
0x13db   : > { %18539 = vmatprep.subr.bf16.mxu1 %v20665_v17 }
0x13de   : > { %18540 = vmatpush3.bf16.msra.mxu1 %v20177_v2  ;;  %v20186_v2 = vld [vmem:[%s22699_s15] sm:$0xff]  }
0x13df   : > { %18565 = vmatprep.subr.bf16.mxu1 %v20665_v17  ;;  %18593 = vmatprep.mubr.msk.bf16.mxu0 %vm4573_vm2, %v20186_v2  ;;  %v20192_v2 = vld [vmem:[%s22699_s15 + $0x30] sm:$0xff]  }
0x13e1   : > { %18542 = vmatmul.mubr.bf16.vlgmr.msra.gmra.mrb[128].mxu1 %v22058_v19  ;;  %v20182_v19 = vld [vmem:[#allocation4 + $0x10e0] sm:$0xff]  }
0x13e2   : > { %18566 = vmatpush3.bf16.msra.mxu1 %v20178_v46  ;;  %18581 = vmatprep.mubr.msk.bf16.mxu1 %vm20666_vm3, %v20665_v17 }
0x13e3   : > { %18567 = vmatprep.subr.bf16.mxu1 %v20665_v17 }
0x13e4   : > { %v9902_v25 = vpop.f32.mrb[232].mxu0 }
0x13e5   : > { %v18323_v29 = vpop.f32.mrb[233].mxu0 }
0x13e6   : > { %18568 = vmatpush3.bf16.msra.mxu1 %v20179_v10  ;;  %v9905_v11 = vpop.f32.mrb[234].mxu0 }
0x13e7   : > { %18569 = vmatprep.subr.bf16.mxu1 %v20665_v17  ;;  %v18324_v22 = vpop.f32.mrb[235].mxu0 }
0x13ea   : > { %18570 = vmatpush3.bf16.msra.mxu1 %v20180_v41 }
0x13eb   : > { %18571 = vmatprep.subr.bf16.mxu1 %v20665_v17 }
0x13ee   : > { %18572 = vmatpush3.bf16.msra.mxu1 %v20181_v15 }
0x13ef   : > { %18573 = vmatprep.subr.bf16.mxu1 %v20665_v17 }
0x13f2   : > { %18574 = vmatpush3.bf16.msra.mxu1 %v20182_v19 }
0x13f3   : > { %18575 = vmatprep.subr.bf16.mxu1 %v20665_v17 }
0x13f4   : > { %v9796_v32 = vpop.f32.mrb[104].mxu1 }
0x13f5   : > { %v9797_v33 = vadd.f32 %v9796_v32, %v9707_v9  ;;  %v18303_v34 = vpop.f32.mrb[105].mxu1 }
0x13f6   : > { %v9799_v38 = vpop.f32.mrb[106].mxu1  ;;  %18576 = vmatpush3.bf16.msra.mxu1 %v20183_v48 }
0x13f7   : > { %v9800_v60 = vadd.f32 %v9799_v38, %v9710_v5  ;;  %v9909_v27 = vadd.f32 %v9902_v25, %v9797_v33  ;;  %v18304_v28 = vpop.f32.mrb[107].mxu1  ;;  %18577 = vmatprep.subr.bf16.mxu1 %v20665_v17 }
0x13f9   : > { %v9910_v45 = vadd.f32 %v9905_v11, %v9800_v60 }
0x13fa   : > { %18578 = vmatpush3.bf16.msra.mxu1 %v20184_v3 }
0x13fb   : > { %18579 = vmatprep.subr.bf16.mxu1 %v20665_v17 }
0x13fe   : > { %18580 = vmatpush3.bf16.msra.mxu1 %v20185_v39 }
0x1401   : > { %18582 = vmatmul.mubr.bf16.vlgmr.msra.gmra.mrb[132].mxu1 %v9590_v50 }
0x1404   : > { %v10145_v56 = vpop.f32.mrb[236].mxu0 }
0x1405   : > { %v18363_v58 = vpop.f32.mrb[237].mxu0 }
0x1406   : > { %v10148_v30 = vpop.f32.mrb[238].mxu0 }
0x1407   : > { %v18364_v37 = vpop.f32.mrb[239].mxu0 }
0x1414   : > { %v10010_v59 = vpop.f32.mrb[108].mxu1 }
0x1415   : > { %v10017_v35 = vadd.f32 %v10010_v59, %v9909_v27  ;;  %v18343_v42 = vpop.f32.mrb[109].mxu1 }
0x1416   : > { %v10013_v23 = vpop.f32.mrb[110].mxu1 }
0x1417   : > { %v10025_v62 = vadd.f32 %v22224_v6, %v10017_v35  ;;  %v10018_v40 = vadd.f32 %v10013_v23, %v9910_v45  ;;  %v18344_v51 = vpop.f32.mrb[111].mxu1 }
0x1419   : > { %v10026_v17 = vadd.f32 %v22224_v6, %v10018_v40  ;;  %v10027_v52 = vmax.f32 %v10025_v62, 0.0 }
0x141b   : > { %v10028_v13 = vmax.f32 %v10026_v17, 0.0 }
0x141d   : > { %v11327_v18 = vpack.c.bf16 %v10028_v13, %v10027_v52 }
0x141f   : > { %18585 = vmatprep.subr.bf16.mxu0 %v11327_v18 }
0x1420   : > { %18586 = vmatpush3.bf16.msra.mxu0 %v11327_v18 }
0x1424   : > { %v10340_v36 = vpop.f32.mrb[240].mxu0 }
0x1425   : > { %v18403_v50 = vpop.f32.mrb[241].mxu0 }
0x1426   : > { %v10343_v24 = vpop.f32.mrb[242].mxu0 }
0x1427   : > { %v18404_v61 = vpop.f32.mrb[243].mxu0 }
0x1434   : > { %v10234_v8 = vpop.f32.mrb[112].mxu1 }
0x1435   : > { %v10235_v16 = vadd.f32 %v10234_v8, %v10145_v56  ;;  %v18383_v0 = vpop.f32.mrb[113].mxu1  ;;  %v20217_v8 = vld [vmem:[#allocation4 + $0x1140] sm:$0xff]  }
0x1436   : > { %v10237_v55 = vpop.f32.mrb[114].mxu1  ;;  %18665 = vmatprep.subr.bf16.mxu1 %v20217_v8  ;;  %v20221_v0 = vld [vmem:[#allocation4 + $0x1150] sm:$0xff]  }
0x1437   : > { %v10238_v4 = vadd.f32 %v10237_v55, %v10148_v30  ;;  %v18384_v44 = vpop.f32.mrb[115].mxu1  ;;  %v10347_v31 = vadd.f32 %v10340_v36, %v10235_v16  ;;  %18666 = vmatpush3.bf16.msra.mxu1 %v20217_v8  ;;  %v20219_v16 = vld [vmem:[#allocation4 + $0x1148] sm:$0xff]  }
0x1438   : > { %18667 = vmatprep.subr.bf16.mxu1 %v20219_v16 }
0x1439   : > { %v10348_v1 = vadd.f32 %v10343_v24, %v10238_v4 }
0x143b   : > { %18668 = vmatpush3.bf16.msra.mxu1 %v20219_v16 }
0x143c   : > { %18669 = vmatprep.subr.bf16.mxu1 %v20221_v0 }
0x143f   : > { %18670 = vmatpush3.bf16.msra.mxu1 %v20221_v0 }
0x1444   : > { %v10577_v43 = vpop.f32.mrb[244].mxu0 }
0x1445   : > { %v18443_v47 = vpop.f32.mrb[245].mxu0 }
0x1446   : > { %v10580_v53 = vpop.f32.mrb[246].mxu0 }
0x1447   : > { %v18444_v54 = vpop.f32.mrb[247].mxu0 }
0x1454   : > { %v10448_v57 = vpop.f32.mrb[116].mxu1 }
0x1455   : > { %v10455_v7 = vadd.f32 %v10448_v57, %v10347_v31  ;;  %v18423_v14 = vpop.f32.mrb[117].mxu1 }
0x1456   : > { %v10451_v26 = vpop.f32.mrb[118].mxu1  ;;  %v20204_v14 = vld [vmem:[#allocation4 + $0x1240] sm:$0xff]  }
0x1457   : > { %v10457_v20 = vadd.f32 %v22224_v6, %v10455_v7  ;;  %v10456_v21 = vadd.f32 %v10451_v26, %v10348_v1  ;;  %v18424_v9 = vpop.f32.mrb[119].mxu1  ;;  %v20187_v26 = vld [vmem:[%s22699_s15 + $0x8] sm:$0xff]  }
0x1458   : > { %v20189_v9 = vld [vmem:[%s22699_s15 + $0x18] sm:$0xff]  }
0x1459   : > { %v10458_v12 = vadd.f32 %v22224_v6, %v10456_v21  ;;  %v10459_v5 = vmax.f32 %v10457_v20, 0.0  ;;  %v20188_v20 = vld [vmem:[%s22699_s15 + $0x10] sm:$0xff]  }
0x145a   : > { %v20209_v21 = vld [vmem:[#allocation4 + $0x1248] sm:$0xff]  }
0x145b   : > { %v10460_v63 = vmax.f32 %v10458_v12, 0.0  ;;  %v20190_v12 = vld [vmem:[%s22699_s15 + $0x20] sm:$0xff]  }
0x145d   : > { %v11328_v49 = vpack.c.bf16 %v10460_v63, %v10459_v5  ;;  %v20213_v5 = vld [vmem:[#allocation4 + $0x1258] sm:$0xff]   ;;  %v20214_v63 = vld [vmem:[#allocation4 + $0x1260] sm:$0xff]  }
0x145f   : > { %18587 = vmatprep.subr.bf16.mxu0 %v11328_v49 }
0x1460   : > { %18588 = vmatpush3.bf16.msra.mxu0 %v11328_v49  ;;  %v20191_v49 = vld [vmem:[%s22699_s15 + $0x28] sm:$0xff]  }
0x1464   : > { %v10772_v46 = vpop.f32.mrb[248].mxu0 }
0x1465   : > { %v18483_v10 = vpop.f32.mrb[249].mxu0 }
0x1466   : > { %v10775_v25 = vpop.f32.mrb[250].mxu0  ;;  %v20193_v10 = vld [vmem:[%s22699_s15 + $0x38] sm:$0xff]  }
0x1467   : > { %v18484_v29 = vpop.f32.mrb[251].mxu0 }
0x1468   : > { %v20195_v29 = vld [vmem:[%s22699_s15 + $0x48] sm:$0xff]  }
0x1474   : > { %v10666_v41 = vpop.f32.mrb[120].mxu1 }
0x1475   : > { %v10667_v11 = vadd.f32 %v10666_v41, %v10577_v43  ;;  %v18463_v22 = vpop.f32.mrb[121].mxu1  ;;  %v20196_v41 = vld [vmem:[%s22699_s15 + $0x50] sm:$0xff]  }
0x1476   : > { %v10669_v15 = vpop.f32.mrb[122].mxu1  ;;  %v20198_v22 = vld [vmem:[%s22699_s15 + $0x60] sm:$0xff]  }
0x1477   : > { %v10670_v19 = vadd.f32 %v10669_v15, %v10580_v53  ;;  %v10779_v48 = vadd.f32 %v10772_v46, %v10667_v11  ;;  %v18464_v32 = vpop.f32.mrb[123].mxu1  ;;  %v20215_v46 = vld [vmem:[#allocation4 + $0x1268] sm:$0xff]   ;;  %v20197_v11 = vld [vmem:[%s22699_s15 + $0x58] sm:$0xff]  }
0x1478   : > { %v20199_v15 = vld [vmem:[%s22699_s15 + $0x68] sm:$0xff]   ;;  %v20202_v32 = vld [vmem:[%s22699_s15 + $0x80] sm:$0xff]  }
0x1479   : > { %v10780_v33 = vadd.f32 %v10775_v25, %v10670_v19  ;;  %v20194_v25 = vld [vmem:[%s22699_s15 + $0x40] sm:$0xff]   ;;  %v20200_v19 = vld [vmem:[%s22699_s15 + $0x70] sm:$0xff]  }
0x1484   : > { %v11009_v34 = vpop.f32.mrb[252].mxu0 }
0x1485   : > { %v18523_v38 = vpop.f32.mrb[253].mxu0 }
0x1486   : > { %v11012_v3 = vpop.f32.mrb[254].mxu0  ;;  %v20206_v38 = vld [vmem:[%s22699_s15 + $0x98] sm:$0xff]  }
0x1487   : > { %v18524_v60 = vpop.f32.mrb[255].mxu0 }
0x1488   : > { %v20208_v60 = vld [vmem:[%s22699_s15 + $0xa8] sm:$0xff]  }
0x1494   : > { %v10880_v27 = vpop.f32.mrb[124].mxu1 }
0x1495   : > { %v10887_v28 = vadd.f32 %v10880_v27, %v10779_v48  ;;  %v18503_v45 = vpop.f32.mrb[125].mxu1  ;;  %v20201_v48 = vld [vmem:[%s22699_s15 + $0x78] sm:$0xff]   ;;  %v20210_v27 = vld [vmem:[%s22699_s15 + $0xb0] sm:$0xff]  }
0x1496   : > { %v10883_v39 = vpop.f32.mrb[126].mxu1  ;;  %v20211_v45 = vld [vmem:[%s22699_s15 + $0xb8] sm:$0xff]  }
0x1497   : > { %v10889_v56 = vadd.f32 %v22224_v6, %v10887_v28  ;;  %v10888_v58 = vadd.f32 %v10883_v39, %v10780_v33  ;;  %v18504_v30 = vpop.f32.mrb[127].mxu1  ;;  %v20203_v33 = vld [vmem:[%s22699_s15 + $0x88] sm:$0xff]   ;;  %v20223_v28 = vld [vmem:[#allocation4 + $0x1158] sm:$0xff]  }
0x1498   : > { %v20216_v39 = vld [vmem:[%s22699_s15 + $0xc0] sm:$0xff]   ;;  %18671 = vmatprep.subr.bf16.mxu1 %v20223_v28  ;;  %v20228_v30 = vld [vmem:[#allocation4 + $0x1168] sm:$0xff]  }
0x1499   : > { %v10890_v37 = vadd.f32 %v22224_v6, %v10888_v58  ;;  %v10891_v59 = vmax.f32 %v10889_v56, 0.0  ;;  %18672 = vmatpush3.bf16.msra.mxu1 %v20223_v28  ;;  %v20225_v56 = vld [vmem:[#allocation4 + $0x1160] sm:$0xff]   ;;  %v20227_v58 = vld [vmem:[#allocation4 + $0x1270] sm:$0xff]  }
0x149a   : > { %18673 = vmatprep.subr.bf16.mxu1 %v20225_v56 }
0x149b   : > { %v10892_v35 = vmax.f32 %v10890_v37, 0.0  ;;  %v20218_v37 = vld [vmem:[%s22699_s15 + $0xc8] sm:$0xff]  }
0x149d   : > { %v11329_v42 = vpack.c.bf16 %v10892_v35, %v10891_v59  ;;  %18674 = vmatpush3.bf16.msra.mxu1 %v20225_v56  ;;  %v20220_v59 = vld [vmem:[%s22699_s15 + $0xd0] sm:$0xff]   ;;  %v20249_v56 = vld [vmem:[#allocation4 + $0x1218] sm:$0xff]  }
0x149e   : > { %18675 = vmatprep.subr.bf16.mxu1 %v20228_v30  ;;  %v20230_v35 = vld [vmem:[#allocation4 + $0x1170] sm:$0xff]  }
0x149f   : > { %18589 = vmatprep.subr.bf16.mxu0 %v11329_v42 }
0x14a0   : > { %18590 = vmatpush3.bf16.msra.mxu0 %v11329_v42  ;;  %v20232_v42 = vld [vmem:[#allocation4 + $0x1178] sm:$0xff]  }
0x14a1   : > { %18676 = vmatpush3.bf16.msra.mxu1 %v20228_v30  ;;  %v20250_v30 = vld [vmem:[#allocation4 + $0x1180] sm:$0xff]  }
0x14a2   : > { %18677 = vmatprep.subr.bf16.mxu1 %v20230_v35 }
0x14a4   : > { %v11204_v23 = vpop.f32.mrb[0].mxu0 }
0x14a5   : > { %v18563_v62 = vpop.f32.mrb[1].mxu0  ;;  %18678 = vmatpush3.bf16.msra.mxu1 %v20230_v35 }
0x14a6   : > { %v11207_v40 = vpop.f32.mrb[2].mxu0  ;;  %v20224_v62 = vld [vmem:[%s22699_s15 + $0xe0] sm:$0xff]   ;;  %18679 = vmatprep.subr.bf16.mxu1 %v20232_v42 }
0x14a7   : > { %v18564_v51 = vpop.f32.mrb[3].mxu0 }
0x14a8   : > { %v20226_v51 = vld [vmem:[%s22699_s15 + $0xe8] sm:$0xff]  }
0x14a9   : > { %18680 = vmatpush3.bf16.msra.mxu1 %v20232_v42 }
0x14b4   : > { %v11098_v17 = vpop.f32.mrb[128].mxu1 }
0x14b5   : > { %v11099_v52 = vadd.f32 %v11098_v17, %v11009_v34  ;;  %v18543_v13 = vpop.f32.mrb[129].mxu1  ;;  %v20205_v34 = vld [vmem:[%s22699_s15 + $0x90] sm:$0xff]   ;;  %v20236_v17 = vld [vmem:[#allocation4 + $0x1278] sm:$0xff]  }
0x14b6   : > { %v11101_v18 = vpop.f32.mrb[130].mxu1  ;;  %v20231_v13 = vld [vmem:[%s22699_s15 + $0xf8] sm:$0xff]  }
0x14b7   : > { %v11102_v36 = vadd.f32 %v11101_v18, %v11012_v3  ;;  %v18544_v50 = vpop.f32.mrb[131].mxu1  ;;  %v11211_v24 = vadd.f32 %v11204_v23, %v11099_v52  ;;  %v20207_v3 = vld [vmem:[%s22699_s15 + $0xa0] sm:$0xff]   ;;  %v20222_v23 = vld [vmem:[%s22699_s15 + $0xd8] sm:$0xff]   ;;  %v20229_v52 = vld [vmem:[%s22699_s15 + $0xf0] sm:$0xff]  }
0x14b8   : > { %v20233_v18 = vld [vmem:[%s22699_s15 + $0x100] sm:$0xff]   ;;  %v20235_v50 = vld [vmem:[%s22699_s15 + $0x108] sm:$0xff]  }
0x14b9   : > { %v11212_v61 = vadd.f32 %v11207_v40, %v11102_v36  ;;  %v20234_v40 = vld [vmem:[#allocation4 + $0x1100] sm:$0xff]  }
0x14ba   : > { %18689 = vmatprep.subr.bf16.mxu1 %v20234_v40  ;;  %v20243_v36 = vld [vmem:[#allocation4 + $0x1200] sm:$0xff]  }
0x14d4   : > { %v11312_v55 = vpop.f32.mrb[132].mxu1 }
0x14d5   : > { %v11319_v4 = vadd.f32 %v11312_v55, %v11211_v24  ;;  %v18583_v44 = vpop.f32.mrb[133].mxu1  ;;  %v20238_v24 = vld [vmem:[%s22699_s15 + $0x110] sm:$0xff]  }
0x14d6   : > { %v11315_v31 = vpop.f32.mrb[134].mxu1 }
0x14d7   : > { %v11321_v1 = vadd.f32 %v22224_v6, %v11319_v4  ;;  %v11320_v43 = vadd.f32 %v11315_v31, %v11212_v61  ;;  %v18584_v47 = vpop.f32.mrb[135].mxu1  ;;  %v20240_v61 = vld [vmem:[%s22699_s15 + $0x118] sm:$0xff]  }
0x14d9   : > { %v11322_v53 = vadd.f32 %v22224_v6, %v11320_v43  ;;  %v11323_v54 = vmax.f32 %v11321_v1, 0.0  ;;  %v20212_v6 = vld [vmem:[#allocation4 + $0x1250] sm:$0xff]  }
0x14db   : > { %v11324_v57 = vmax.f32 %v11322_v53, 0.0 }
0x14dd   : > { %v11330_v7 = vpack.c.bf16 %v11324_v57, %v11323_v54 }
0x14df   : > { %18591 = vmatprep.subr.bf16.mxu0 %v11330_v7 }
0x14e0   : > { %18592 = vmatpush3.bf16.msra.mxu0 %v11330_v7 }
0x14e1   : > { %18761 = vmatprep.subr.bf16.mxu0 %v20204_v14 }
0x14e3   : > { %18594 = vmatmul.mubr.msk.bf16.vlgmr.msra.gmra.mrb[4].mxu0 %vm4573_vm2, %v20187_v26 }
0x14e4   : > { %18597 = vmatprep.mubr.msk.bf16.mxu0 %vm4573_vm2, %v20188_v20  ;;  %18762 = vmatpush3.bf16.msra.mxu0 %v20204_v14 }
0x14e5   : > { %18763 = vmatprep.subr.bf16.mxu0 %v20209_v21 }
0x14e8   : > { %18764 = vmatpush3.bf16.msra.mxu0 %v20209_v21 }
0x14e9   : > { %18765 = vmatprep.subr.bf16.mxu0 %v20212_v6 }
0x14eb   : > { %18598 = vmatmul.mubr.msk.bf16.gmra.mrb[8].mxu0 %vm4573_vm2, %v20189_v9 }
0x14ec   : > { %18601 = vmatprep.mubr.msk.bf16.mxu0 %vm4573_vm2, %v20190_v12  ;;  %18766 = vmatpush3.bf16.msra.mxu0 %v20212_v6  ;;  %v20237_v6 = vld [vmem:[#allocation4 + $0x1108] sm:$0xff]  }
0x14ed   : > { %18767 = vmatprep.subr.bf16.mxu0 %v20213_v5 }
0x14f0   : > { %18768 = vmatpush3.bf16.msra.mxu0 %v20213_v5  ;;  %v20239_v5 = vld [vmem:[#allocation4 + $0x1110] sm:$0xff]  }
0x14f1   : > { %18769 = vmatprep.subr.bf16.mxu0 %v20214_v63 }
0x14f3   : > { %18602 = vmatmul.mubr.msk.bf16.gmra.mrb[12].mxu0 %vm4573_vm2, %v20191_v49 }
0x14f4   : > { %18605 = vmatprep.mubr.msk.bf16.mxu0 %vm4573_vm2, %v20192_v2  ;;  %18770 = vmatpush3.bf16.msra.mxu0 %v20214_v63 }
0x14f5   : > { %18771 = vmatprep.subr.bf16.mxu0 %v20215_v46 }
0x14f8   : > { %18772 = vmatpush3.bf16.msra.mxu0 %v20215_v46 }
0x14f9   : > { %18773 = vmatprep.subr.bf16.mxu0 %v20227_v58 }
0x14fb   : > { %18606 = vmatmul.mubr.msk.bf16.gmra.mrb[16].mxu0 %vm4573_vm2, %v20193_v10  ;;  %v20241_v10 = vld [vmem:[#allocation4 + $0x1118] sm:$0xff]  }
0x14fc   : > { %18609 = vmatprep.mubr.msk.bf16.mxu0 %vm4573_vm2, %v20194_v25  ;;  %18774 = vmatpush3.bf16.msra.mxu0 %v20227_v58 }
0x14fd   : > { %18775 = vmatprep.subr.bf16.mxu0 %v20236_v17 }
0x1500   : > { %18776 = vmatpush3.bf16.msra.mxu0 %v20236_v17 }
0x1501   : > { %18785 = vmatprep.subr.bf16.mxu0 %v20243_v36 }
0x1503   : > { %18610 = vmatmul.mubr.msk.bf16.gmra.mrb[20].mxu0 %vm4573_vm2, %v20195_v29 }
0x1504   : > { %18613 = vmatprep.mubr.msk.bf16.mxu0 %vm4573_vm2, %v20196_v41  ;;  %v20242_v41 = vld [vmem:[#allocation4 + $0x1120] sm:$0xff]  }
0x150b   : > { %18614 = vmatmul.mubr.msk.bf16.gmra.mrb[24].mxu0 %vm4573_vm2, %v20197_v11 }
0x150c   : > { %18617 = vmatprep.mubr.msk.bf16.mxu0 %vm4573_vm2, %v20198_v22 }
0x1513   : > { %18618 = vmatmul.mubr.msk.bf16.gmra.mrb[28].mxu0 %vm4573_vm2, %v20199_v15 }
0x1514   : > { %18621 = vmatprep.mubr.msk.bf16.mxu0 %vm4573_vm2, %v20200_v19 }
0x151b   : > { %18622 = vmatmul.mubr.msk.bf16.gmra.mrb[32].mxu0 %vm4573_vm2, %v20201_v48  ;;  %v20244_v48 = vld [vmem:[#allocation4 + $0x1128] sm:$0xff]  }
0x151c   : > { %18625 = vmatprep.mubr.msk.bf16.mxu0 %vm4573_vm2, %v20202_v32  ;;  %v20245_v32 = vld [vmem:[#allocation4 + $0x1208] sm:$0xff]  }
0x1523   : > { %18626 = vmatmul.mubr.msk.bf16.gmra.mrb[36].mxu0 %vm4573_vm2, %v20203_v33 }
0x1524   : > { %18629 = vmatprep.mubr.msk.bf16.mxu0 %vm4573_vm2, %v20205_v34 }
0x152b   : > { %18630 = vmatmul.mubr.msk.bf16.gmra.mrb[40].mxu0 %vm4573_vm2, %v20206_v38  ;;  %v20246_v38 = vld [vmem:[#allocation4 + $0x1130] sm:$0xff]  }
0x152c   : > { %18633 = vmatprep.mubr.msk.bf16.mxu0 %vm4573_vm2, %v20207_v3  ;;  %v20247_v3 = vld [vmem:[#allocation4 + $0x1210] sm:$0xff]  }
0x1533   : > { %18634 = vmatmul.mubr.msk.bf16.gmra.mrb[44].mxu0 %vm4573_vm2, %v20208_v60 }
0x1534   : > { %18637 = vmatprep.mubr.msk.bf16.mxu0 %vm4573_vm2, %v20210_v27 }
0x153b   : > { %18638 = vmatmul.mubr.msk.bf16.gmra.mrb[48].mxu0 %vm4573_vm2, %v20211_v45 }
0x153c   : > { %18641 = vmatprep.mubr.msk.bf16.mxu0 %vm4573_vm2, %v20216_v39  ;;  %v20248_v39 = vld [vmem:[#allocation4 + $0x1138] sm:$0xff]  }
0x1543   : > { %18642 = vmatmul.mubr.msk.bf16.gmra.mrb[52].mxu0 %vm4573_vm2, %v20218_v37  ;;  %v20251_v37 = vld [vmem:[#allocation4 + $0x1220] sm:$0xff]  }
0x1544   : > { %18645 = vmatprep.mubr.msk.bf16.mxu0 %vm4573_vm2, %v20220_v59 }
0x154b   : > { %18646 = vmatmul.mubr.msk.bf16.gmra.mrb[56].mxu0 %vm4573_vm2, %v20222_v23 }
0x154c   : > { %18649 = vmatprep.mubr.msk.bf16.mxu0 %vm4573_vm2, %v20224_v62 }
0x1553   : > { %18650 = vmatmul.mubr.msk.bf16.gmra.mrb[60].mxu0 %vm4573_vm2, %v20226_v51  ;;  %v20253_v51 = vld [vmem:[#allocation4 + $0x1228] sm:$0xff]  }
0x1554   : > { %18653 = vmatprep.mubr.msk.bf16.mxu0 %vm4573_vm2, %v20229_v52  ;;  %v20254_v52 = vld [vmem:[#allocation4 + $0x1190] sm:$0xff]  }
0x155b   : > { %18654 = vmatmul.mubr.msk.bf16.gmra.mrb[64].mxu0 %vm4573_vm2, %v20231_v13 }
0x155c   : > { %18657 = vmatprep.mubr.msk.bf16.mxu0 %vm4573_vm2, %v20233_v18  ;;  %v20255_v18 = vld [vmem:[#allocation4 + $0x1230] sm:$0xff]  }
0x1563   : > { %18658 = vmatmul.mubr.msk.bf16.gmra.mrb[68].mxu0 %vm4573_vm2, %v20235_v50 }
0x1564   : > { %18661 = vmatprep.mubr.msk.bf16.mxu0 %vm4573_vm2, %v20238_v24 }
0x156b   : > { %18662 = vmatmul.mubr.msk.bf16.gmra.mrb[72].mxu0 %vm4573_vm2, %v20240_v61 }
0x15b6   : > { %v22378_v8 = vpop.f32.mrb[4].mxu0 }
0x15b7   : > { %v11725_v16 = vpop.f32.mrb[5].mxu0 }
0x15b8   : > { %v22380_v0 = vpop.f32.mrb[6].mxu0 }
0x15b9   : > { %v12013_v55 = vpack.c.bf16 %v22380_v0, %v22378_v8  ;;  %v11728_v4 = vpop.f32.mrb[7].mxu0  ;;  %v20256_v8 = vld [vmem:[#allocation4 + $0x1198] sm:$0xff]  }
0x15ba   : > { %v12012_v44 = vpack.c.bf16 %v11728_v4, %v11725_v16  ;;  %v20257_v16 = vld [vmem:[#allocation4 + $0x1238] sm:$0xff]  }
0x15be   : > { %v22384_v31 = vpop.f32.mrb[8].mxu0 }
0x15bf   : > { %v22386_v1 = vpop.f32.mrb[9].mxu0 }
0x15c0   : > { %v22388_v43 = vpop.f32.mrb[10].mxu0 }
0x15c1   : > { %v12015_v47 = vpack.c.bf16 %v22388_v43, %v22384_v31  ;;  %v22392_v53 = vpop.f32.mrb[11].mxu0  ;;  %v20260_v31 = vld [vmem:[#allocation4 + $0x11a8] sm:$0xff]  }
0x15c2   : > { %v12014_v54 = vpack.c.bf16 %v22392_v53, %v22386_v1  ;;  %v20261_v43 = vld [vmem:[#allocation4 + $0x1288] sm:$0xff]  }
0x15c6   : > { %v18603_v57 = vpop.f32.mrb[12].mxu0 }
0x15c7   : > { %v11757_v7 = vpop.f32.mrb[13].mxu0 }
0x15c8   : > { %v18604_v14 = vpop.f32.mrb[14].mxu0 }
0x15c9   : > { %v22396_v26 = vpack.c.bf16 %v18604_v14, %v18603_v57  ;;  %v11760_v20 = vpop.f32.mrb[15].mxu0 }
0x15ca   : > { %v12016_v21 = vpack.c.bf16 %v11760_v20, %v11757_v7  ;;  %v20262_v7 = vld [vmem:[#allocation4 + $0x11b0] sm:$0xff]  }
0x15cb   : > { %v20263_v20 = vld [vmem:[#allocation4 + $0x1290] sm:$0xff]  }
0x15cc   : > { %18681 = vmatprep.mubr.bf16.mxu1 %v12016_v21 }
0x15cd   : > { %18682 = vmatmul.mubr.bf16.vlgmr.msra.gmra.mrb[136].mxu1 %v22396_v26 }
0x15ce   : > { %18690 = vmatpush3.bf16.msra.mxu1 %v20234_v40  ;;  %v18607_v9 = vpop.f32.mrb[16].mxu0  ;;  %v20252_v40 = vld [vmem:[#allocation4 + $0x1188] sm:$0xff]  }
0x15cf   : > { %v11773_v12 = vpop.f32.mrb[17].mxu0  ;;  %18691 = vmatprep.subr.bf16.mxu1 %v20237_v6 }
0x15d0   : > { %v18608_v63 = vpop.f32.mrb[18].mxu0 }
0x15d1   : > { %v22399_v49 = vpack.c.bf16 %v18608_v63, %v18607_v9  ;;  %v11776_v2 = vpop.f32.mrb[19].mxu0 }
0x15d2   : > { %v22401_v46 = vpack.c.bf16 %v11776_v2, %v11773_v12  ;;  %18692 = vmatpush3.bf16.msra.mxu1 %v20237_v6  ;;  %v20266_v2 = vld [vmem:[#allocation4 + $0x11c0] sm:$0xff]  }
0x15d3   : > { %18693 = vmatprep.subr.bf16.mxu1 %v20239_v5 }
0x15d4   : > { %18685 = vmatprep.mubr.bf16.mxu1 %v22401_v46 }
0x15d5   : > { %18686 = vmatmul.mubr.bf16.gmra.mrb[140].mxu1 %v22399_v49 }
0x15d6   : > { %18694 = vmatpush3.bf16.msra.mxu1 %v20239_v5  ;;  %v18611_v25 = vpop.f32.mrb[20].mxu0  ;;  %18705 = vmatprep.mubr.bf16.mxu1 %v12012_v44  ;;  %v20259_v44 = vld [vmem:[#allocation4 + $0x1280] sm:$0xff]   ;;  %v20265_v5 = vld [vmem:[#allocation4 + $0x1298] sm:$0xff]  }
0x15d7   : > { %v11789_v29 = vpop.f32.mrb[21].mxu0  ;;  %18695 = vmatprep.subr.bf16.mxu1 %v20241_v10 }
0x15d8   : > { %v18612_v11 = vpop.f32.mrb[22].mxu0 }
0x15d9   : > { %v12021_v22 = vpack.c.bf16 %v18612_v11, %v18611_v25  ;;  %v11792_v15 = vpop.f32.mrb[23].mxu0 }
0x15da   : > { %v12020_v19 = vpack.c.bf16 %v11792_v15, %v11789_v29  ;;  %18696 = vmatpush3.bf16.msra.mxu1 %v20241_v10  ;;  %v20267_v10 = vld [vmem:[#allocation4 + $0x12a0] sm:$0xff]  }
0x15db   : > { %18697 = vmatprep.subr.bf16.mxu1 %v20242_v41 }
0x15dc   : > { %18777 = vmatprep.mubr.bf16.mxu0 %v12020_v19  ;;  %v20270_v19 = vld [vmem:[#allocation4 + $0x11d0] sm:$0xff]  }
0x15dd   : > { %18778 = vmatmul.mubr.bf16.vlgmr.msra.gmra.mrb[76].mxu0 %v12021_v22  ;;  %v20269_v22 = vld [vmem:[#allocation4 + $0x12a8] sm:$0xff]  }
0x15de   : > { %18698 = vmatpush3.bf16.msra.mxu1 %v20242_v41  ;;  %18786 = vmatpush3.bf16.msra.mxu0 %v20243_v36  ;;  %v18615_v33 = vpop.f32.mrb[24].mxu0 }
0x15df   : > { %v11805_v34 = vpop.f32.mrb[25].mxu0  ;;  %18699 = vmatprep.subr.bf16.mxu1 %v20244_v48  ;;  %18787 = vmatprep.subr.bf16.mxu0 %v20245_v32 }
0x15e0   : > { %v18616_v60 = vpop.f32.mrb[26].mxu0 }
0x15e1   : > { %v12023_v27 = vpack.c.bf16 %v18616_v60, %v18615_v33  ;;  %v11808_v28 = vpop.f32.mrb[27].mxu0  ;;  %v20272_v60 = vld [vmem:[#allocation4 + $0x11d8] sm:$0xff]  }
0x15e2   : > { %v12022_v45 = vpack.c.bf16 %v11808_v28, %v11805_v34  ;;  %18700 = vmatpush3.bf16.msra.mxu1 %v20244_v48  ;;  %18788 = vmatpush3.bf16.msra.mxu0 %v20245_v32  ;;  %v20271_v32 = vld [vmem:[#allocation4 + $0x12b0] sm:$0xff]  }
0x15e3   : > { %18701 = vmatprep.subr.bf16.mxu1 %v20246_v38  ;;  %18789 = vmatprep.subr.bf16.mxu0 %v20247_v3 }
0x15e4   : > { %18781 = vmatprep.mubr.bf16.mxu0 %v12022_v45  ;;  %v20274_v45 = vld [vmem:[#allocation4 + $0x11e0] sm:$0xff]  }
0x15e5   : > { %18782 = vmatmul.mubr.bf16.gmra.mrb[80].mxu0 %v12023_v27  ;;  %v20273_v27 = vld [vmem:[#allocation4 + $0x12b8] sm:$0xff]  }
0x15e6   : > { %18702 = vmatpush3.bf16.msra.mxu1 %v20246_v38  ;;  %18790 = vmatpush3.bf16.msra.mxu0 %v20247_v3  ;;  %v18619_v58 = vpop.f32.mrb[28].mxu0 }
0x15e7   : > { %18801 = vmatprep.mubr.bf16.mxu0 %v12016_v21  ;;  %18703 = vmatprep.subr.bf16.mxu1 %v20248_v39  ;;  %v11821_v59 = vpop.f32.mrb[29].mxu0 }
0x15e8   : > { %18791 = vmatprep.subr.bf16.mxu0 %v20249_v56  ;;  %v18620_v35 = vpop.f32.mrb[30].mxu0 }
0x15e9   : > { %v22405_v42 = vpack.c.bf16 %v18620_v35, %v18619_v58  ;;  %v11824_v23 = vpop.f32.mrb[31].mxu0  ;;  %v20276_v35 = vld [vmem:[#allocation4 + $0x11e8] sm:$0xff]  }
0x15ea   : > { %18704 = vmatpush3.bf16.msra.mxu1 %v20248_v39  ;;  %18792 = vmatpush3.bf16.msra.mxu0 %v20249_v56  ;;  %v22407_v62 = vpack.c.bf16 %v11824_v23, %v11821_v59  ;;  %v20275_v56 = vld [vmem:[#allocation4 + $0x12c0] sm:$0xff]   ;;  %v20277_v23 = vld [vmem:[#allocation4 + $0x12c8] sm:$0xff]  }
0x15eb   : > { %18713 = vmatprep.subr.bf16.mxu1 %v20250_v30  ;;  %18793 = vmatprep.subr.bf16.mxu0 %v20251_v37 }
0x15ed   : > { %18706 = vmatmul.mubr.bf16.vlgmr.msra.gmra.mrb[136].mxu1 %v12013_v55  ;;  %v20258_v55 = vld [vmem:[#allocation4 + $0x11a0] sm:$0xff]  }
0x15ee   : > { %18709 = vmatprep.mubr.bf16.mxu1 %v12014_v54  ;;  %18714 = vmatpush3.bf16.msra.mxu1 %v20250_v30  ;;  %v18623_v17 = vpop.f32.mrb[32].mxu0 }
0x15ef   : > { %18794 = vmatpush3.bf16.msra.mxu0 %v20251_v37  ;;  %18715 = vmatprep.subr.bf16.mxu1 %v20252_v40  ;;  %v11837_v13 = vpop.f32.mrb[33].mxu0 }
0x15f0   : > { %18795 = vmatprep.subr.bf16.mxu0 %v20253_v51  ;;  %v18624_v36 = vpop.f32.mrb[34].mxu0 }
0x15f1   : > { %v22415_v50 = vpack.c.bf16 %v18624_v36, %v18623_v17  ;;  %v11840_v24 = vpop.f32.mrb[35].mxu0 }
0x15f2   : > { %18716 = vmatpush3.bf16.msra.mxu1 %v20252_v40  ;;  %v22417_v61 = vpack.c.bf16 %v11840_v24, %v11837_v13 }
0x15f3   : > { %18796 = vmatpush3.bf16.msra.mxu0 %v20253_v51  ;;  %18717 = vmatprep.subr.bf16.mxu1 %v20254_v52  ;;  %v20278_v51 = vld [vmem:[#allocation4 + $0x11f0] sm:$0xff]  }
0x15f4   : > { %18797 = vmatprep.subr.bf16.mxu0 %v20255_v18 }
0x15f5   : > { %18710 = vmatmul.mubr.bf16.gmra.mrb[140].mxu1 %v12015_v47 }
0x15f6   : > { %18718 = vmatpush3.bf16.msra.mxu1 %v20254_v52  ;;  %18729 = vmatprep.mubr.bf16.mxu1 %v22407_v62  ;;  %v18627_v0 = vpop.f32.mrb[36].mxu0  ;;  %v20279_v52 = vld [vmem:[#allocation4 + $0x12d0] sm:$0xff]  }
0x15f7   : > { %18798 = vmatpush3.bf16.msra.mxu0 %v20255_v18  ;;  %18719 = vmatprep.subr.bf16.mxu1 %v20256_v8  ;;  %v11853_v4 = vpop.f32.mrb[37].mxu0 }
0x15f8   : > { %18799 = vmatprep.subr.bf16.mxu0 %v20257_v16  ;;  %v18628_v1 = vpop.f32.mrb[38].mxu0 }
0x15f9   : > { %v22423_v53 = vpack.c.bf16 %v18628_v1, %v18627_v0  ;;  %v11856_v54 = vpop.f32.mrb[39].mxu0 }
0x15fa   : > { %18720 = vmatpush3.bf16.msra.mxu1 %v20256_v8  ;;  %v22425_v57 = vpack.c.bf16 %v11856_v54, %v11853_v4  ;;  %v20280_v8 = vld [vmem:[#allocation4 + $0x11f8] sm:$0xff]  }
0x15fb   : > { %18800 = vmatpush3.bf16.msra.mxu0 %v20257_v16  ;;  %18721 = vmatprep.subr.bf16.mxu1 %v20258_v55  ;;  %v20281_v16 = vld [vmem:[#allocation4 + $0x12d8] sm:$0xff]  }
0x15fc   : > { %18809 = vmatprep.subr.bf16.mxu0 %v20259_v44 }
0x15fe   : > { %18802 = vmatmul.mubr.bf16.vlgmr.msra.gmra.mrb[76].mxu0 %v22396_v26  ;;  %18722 = vmatpush3.bf16.msra.mxu1 %v20258_v55  ;;  %v18631_v47 = vpop.f32.mrb[40].mxu0  ;;  %v20264_v26 = vld [vmem:[#allocation4 + $0x11b8] sm:$0xff]   ;;  %v20283_v55 = vld [vmem:[#allocation4 + $0x1340] sm:$0xff]  }
0x15ff   : > { %18805 = vmatprep.mubr.bf16.mxu0 %v22401_v46  ;;  %18810 = vmatpush3.bf16.msra.mxu0 %v20259_v44  ;;  %v11869_v14 = vpop.f32.mrb[41].mxu0  ;;  %v20282_v44 = vld [vmem:[#allocation4 + $0x12e0] sm:$0xff]  }
0x1600   : > { %18723 = vmatprep.subr.bf16.mxu1 %v20260_v31  ;;  %18811 = vmatprep.subr.bf16.mxu0 %v20261_v43  ;;  %v18632_v21 = vpop.f32.mrb[42].mxu0 }
0x1601   : > { %v22429_v6 = vpack.c.bf16 %v18632_v21, %v18631_v47  ;;  %v11872_v9 = vpop.f32.mrb[43].mxu0  ;;  %v20285_v47 = vld [vmem:[#allocation4 + $0x1348] sm:$0xff]  }
0x1602   : > { %18724 = vmatpush3.bf16.msra.mxu1 %v20260_v31  ;;  %v22431_v12 = vpack.c.bf16 %v11872_v9, %v11869_v14  ;;  %v20286_v9 = vld [vmem:[#allocation4 + $0x12f0] sm:$0xff]  }
0x1603   : > { %18812 = vmatpush3.bf16.msra.mxu0 %v20261_v43  ;;  %18725 = vmatprep.subr.bf16.mxu1 %v20262_v7 }
0x1604   : > { %18813 = vmatprep.subr.bf16.mxu0 %v20263_v20 }
0x1606   : > { %18806 = vmatmul.mubr.bf16.gmra.mrb[80].mxu0 %v22399_v49  ;;  %18726 = vmatpush3.bf16.msra.mxu1 %v20262_v7  ;;  %v18635_v63 = vpop.f32.mrb[44].mxu0  ;;  %v20268_v49 = vld [vmem:[#allocation4 + $0x11c8] sm:$0xff]  }
0x1607   : > { %18814 = vmatpush3.bf16.msra.mxu0 %v20263_v20  ;;  %18727 = vmatprep.subr.bf16.mxu1 %v20264_v26  ;;  %v11885_v46 = vpop.f32.mrb[45].mxu0  ;;  %v20284_v7 = vld [vmem:[#allocation4 + $0x12e8] sm:$0xff]   ;;  %v20287_v20 = vld [vmem:[#allocation4 + $0x1350] sm:$0xff]  }
0x1608   : > { %18815 = vmatprep.subr.bf16.mxu0 %v20265_v5  ;;  %18825 = vmatprep.mubr.bf16.mxu0 %v22425_v57  ;;  %v18636_v25 = vpop.f32.mrb[46].mxu0 }
0x1609   : > { %v22435_v29 = vpack.c.bf16 %v18636_v25, %v18635_v63  ;;  %v11888_v41 = vpop.f32.mrb[47].mxu0 }
0x160a   : > { %18728 = vmatpush3.bf16.msra.mxu1 %v20264_v26  ;;  %v22437_v11 = vpack.c.bf16 %v11888_v41, %v11885_v46  ;;  %v20289_v46 = vld [vmem:[#allocation4 + $0x1358] sm:$0xff]   ;;  %v20290_v41 = vld [vmem:[#allocation4 + $0x1360] sm:$0xff]  }
0x160b   : > { %18816 = vmatpush3.bf16.msra.mxu0 %v20265_v5  ;;  %18737 = vmatprep.subr.bf16.mxu1 %v20266_v2 }
0x160c   : > { %18817 = vmatprep.subr.bf16.mxu0 %v20267_v10 }
0x160d   : > { %18730 = vmatmul.mubr.bf16.vlgmr.msra.gmra.mrb[136].mxu1 %v22405_v42 }
0x160e   : > { %18738 = vmatpush3.bf16.msra.mxu1 %v20266_v2  ;;  %18733 = vmatprep.mubr.bf16.mxu1 %v22417_v61  ;;  %v18639_v15 = vpop.f32.mrb[48].mxu0 }
0x160f   : > { %18818 = vmatpush3.bf16.msra.mxu0 %v20267_v10  ;;  %18739 = vmatprep.subr.bf16.mxu1 %v20268_v49  ;;  %v11901_v48 = vpop.f32.mrb[49].mxu0  ;;  %v20288_v10 = vld [vmem:[#allocation4 + $0x12f8] sm:$0xff]  }
0x1610   : > { %18819 = vmatprep.subr.bf16.mxu0 %v20269_v22  ;;  %v18640_v33 = vpop.f32.mrb[50].mxu0 }
0x1611   : > { %v22441_v34 = vpack.c.bf16 %v18640_v33, %v18639_v15  ;;  %v11904_v38 = vpop.f32.mrb[51].mxu0  ;;  %v20292_v33 = vld [vmem:[#allocation4 + $0x1368] sm:$0xff]  }
0x1612   : > { %18740 = vmatpush3.bf16.msra.mxu1 %v20268_v49  ;;  %v22443_v3 = vpack.c.bf16 %v11904_v38, %v11901_v48  ;;  %v20293_v38 = vld [vmem:[#allocation4 + $0x1448] sm:$0xff]  }
0x1613   : > { %18820 = vmatpush3.bf16.msra.mxu0 %v20269_v22  ;;  %18741 = vmatprep.subr.bf16.mxu1 %v20270_v19  ;;  %v20291_v22 = vld [vmem:[#allocation4 + $0x1440] sm:$0xff]  }
0x1614   : > { %18821 = vmatprep.subr.bf16.mxu0 %v20271_v32 }
0x1615   : > { %18734 = vmatmul.mubr.bf16.gmra.mrb[140].mxu1 %v22415_v50 }
0x1616   : > { %18742 = vmatpush3.bf16.msra.mxu1 %v20270_v19  ;;  %18753 = vmatprep.mubr.bf16.mxu1 %v22425_v57  ;;  %v22447_v28 = vpop.f32.mrb[52].mxu0 }
0x1617   : > { %18822 = vmatpush3.bf16.msra.mxu0 %v20271_v32  ;;  %18743 = vmatprep.subr.bf16.mxu1 %v20272_v60  ;;  %v22449_v39 = vpop.f32.mrb[53].mxu0 }
0x1618   : > { %18823 = vmatprep.subr.bf16.mxu0 %v20273_v27  ;;  %v22451_v58 = vpop.f32.mrb[54].mxu0 }
0x1619   : > { %v12037_v30 = vpack.c.bf16 %v22451_v58, %v22447_v28  ;;  %v22455_v37 = vpop.f32.mrb[55].mxu0  ;;  %v20338_v28 = vld [vmem:[#allocation4 + $0x13e0] sm:$0xff]  }
0x161a   : > { %18744 = vmatpush3.bf16.msra.mxu1 %v20272_v60  ;;  %v12036_v59 = vpack.c.bf16 %v22455_v37, %v22449_v39  ;;  %v20327_v39 = vld [vmem:[#allocation4 + $0x1490] sm:$0xff]   ;;  %v20328_v37 = vld [vmem:[#allocation4 + $0x13b8] sm:$0xff]   ;;  %v20339_v58 = vld [vmem:[#allocation4 + $0x14c0] sm:$0xff]  }
0x161b   : > { %18824 = vmatpush3.bf16.msra.mxu0 %v20273_v27  ;;  %18745 = vmatprep.subr.bf16.mxu1 %v20274_v45  ;;  %v20294_v27 = vld [vmem:[#allocation4 + $0x1370] sm:$0xff]  }
0x161c   : > { %18833 = vmatprep.subr.bf16.mxu0 %v20275_v56 }
0x161e   : > { %18746 = vmatpush3.bf16.msra.mxu1 %v20274_v45  ;;  %18826 = vmatmul.mubr.bf16.vlgmr.msra.gmra.mrb[76].mxu0 %v22423_v53  ;;  %v22460_v40 = vpop.f32.mrb[56].mxu0 }
0x161f   : > { %18834 = vmatpush3.bf16.msra.mxu0 %v20275_v56  ;;  %18747 = vmatprep.subr.bf16.mxu1 %v20276_v35  ;;  %v22462_v17 = vpop.f32.mrb[57].mxu0  ;;  %v20295_v56 = vld [vmem:[#allocation4 + $0x1450] sm:$0xff]  }
0x1620   : > { %18835 = vmatprep.subr.bf16.mxu0 %v20277_v23  ;;  %18829 = vmatprep.mubr.bf16.mxu0 %v22431_v12  ;;  %v22465_v13 = vpop.f32.mrb[58].mxu0 }
0x1621   : > { %v12039_v18 = vpack.c.bf16 %v22465_v13, %v22460_v40  ;;  %v22469_v36 = vpop.f32.mrb[59].mxu0  ;;  %v20342_v40 = vld [vmem:[#allocation4 + $0x13f0] sm:$0xff]  }
0x1622   : > { %18748 = vmatpush3.bf16.msra.mxu1 %v20276_v35  ;;  %v12038_v24 = vpack.c.bf16 %v22469_v36, %v22462_v17  ;;  %v20341_v17 = vld [vmem:[#allocation4 + $0x14c8] sm:$0xff]   ;;  %v20343_v13 = vld [vmem:[#allocation4 + $0x14d0] sm:$0xff]   ;;  %v20345_v36 = vld [vmem:[#allocation4 + $0x14d8] sm:$0xff]  }
0x1623   : > { %18836 = vmatpush3.bf16.msra.mxu0 %v20277_v23  ;;  %18749 = vmatprep.subr.bf16.mxu1 %v20278_v51 }
0x1624   : > { %18837 = vmatprep.subr.bf16.mxu0 %v20279_v52 }
0x1626   : > { %18750 = vmatpush3.bf16.msra.mxu1 %v20278_v51  ;;  %18830 = vmatmul.mubr.bf16.gmra.mrb[80].mxu0 %v22429_v6  ;;  %v18651_v0 = vpop.f32.mrb[60].mxu0 }
0x1627   : > { %18838 = vmatpush3.bf16.msra.mxu0 %v20279_v52  ;;  %18751 = vmatprep.subr.bf16.mxu1 %v20280_v8  ;;  %v11949_v4 = vpop.f32.mrb[61].mxu0 }
0x1628   : > { %18839 = vmatprep.subr.bf16.mxu0 %v20281_v16  ;;  %18849 = vmatprep.mubr.bf16.mxu0 %v22437_v11  ;;  %v18652_v1 = vpop.f32.mrb[62].mxu0 }
0x1629   : > { %v22475_v54 = vpack.c.bf16 %v18652_v1, %v18651_v0  ;;  %v11952_v31 = vpop.f32.mrb[63].mxu0  ;;  %v20298_v0 = vld [vmem:[#allocation4 + $0x1300] sm:$0xff]   ;;  %v20302_v1 = vld [vmem:[#allocation4 + $0x1310] sm:$0xff]  }
0x162a   : > { %18752 = vmatpush3.bf16.msra.mxu1 %v20280_v8  ;;  %v22477_v43 = vpack.c.bf16 %v11952_v31, %v11949_v4  ;;  %v20296_v8 = vld [vmem:[#allocation4 + $0x1378] sm:$0xff]   ;;  %v20300_v4 = vld [vmem:[#allocation4 + $0x1308] sm:$0xff]  }
0x162b   : > { %18840 = vmatpush3.bf16.msra.mxu0 %v20281_v16  ;;  %18857 = vmatprep.subr.bf16.mxu1 %v20283_v55  ;;  %v20297_v16 = vld [vmem:[#allocation4 + $0x1458] sm:$0xff]  }
0x162c   : > { %18841 = vmatprep.subr.bf16.mxu0 %v20282_v44  ;;  %v20304_v31 = vld [vmem:[#allocation4 + $0x1318] sm:$0xff]  }
0x162d   : > { %18754 = vmatmul.mubr.bf16.vlgmr.msra.gmra.mrb[136].mxu1 %v22423_v53 }
0x162e   : > { %18858 = vmatpush3.bf16.msra.mxu1 %v20283_v55  ;;  %18757 = vmatprep.mubr.bf16.mxu1 %v22431_v12  ;;  %v18655_v14 = vpop.f32.mrb[64].mxu0  ;;  %v20299_v55 = vld [vmem:[#allocation4 + $0x1460] sm:$0xff]  }
0x162f   : > { %18842 = vmatpush3.bf16.msra.mxu0 %v20282_v44  ;;  %18859 = vmatprep.subr.bf16.mxu1 %v20285_v47  ;;  %v11965_v21 = vpop.f32.mrb[65].mxu0  ;;  %v20301_v44 = vld [vmem:[#allocation4 + $0x1468] sm:$0xff]  }
0x1630   : > { %18843 = vmatprep.subr.bf16.mxu0 %v20284_v7  ;;  %v18656_v26 = vpop.f32.mrb[66].mxu0 }
0x1631   : > { %v22481_v5 = vpack.c.bf16 %v18656_v26, %v18655_v14  ;;  %v11968_v63 = vpop.f32.mrb[67].mxu0  ;;  %v20307_v14 = vld [vmem:[#allocation4 + $0x1400] sm:$0xff]   ;;  %v20312_v26 = vld [vmem:[#allocation4 + $0x1338] sm:$0xff]  }
0x1632   : > { %18860 = vmatpush3.bf16.msra.mxu1 %v20285_v47  ;;  %v22483_v2 = vpack.c.bf16 %v11968_v63, %v11965_v21  ;;  %v20305_v47 = vld [vmem:[#allocation4 + $0x1478] sm:$0xff]   ;;  %v20309_v21 = vld [vmem:[#allocation4 + $0x1408] sm:$0xff]  }
0x1633   : > { %18844 = vmatpush3.bf16.msra.mxu0 %v20284_v7  ;;  %18861 = vmatprep.subr.bf16.mxu1 %v20287_v20  ;;  %v20306_v7 = vld [vmem:[#allocation4 + $0x1320] sm:$0xff]   ;;  %v20313_v63 = vld [vmem:[#allocation4 + $0x1418] sm:$0xff]  }
0x1634   : > { %18845 = vmatprep.subr.bf16.mxu0 %v20286_v9 }
0x1635   : > { %18758 = vmatmul.mubr.bf16.gmra.mrb[140].mxu1 %v22429_v6 }
0x1636   : > { %18862 = vmatpush3.bf16.msra.mxu1 %v20287_v20  ;;  %18873 = vmatprep.mubr.bf16.mxu1 %v22425_v57  ;;  %v22487_v25 = vpop.f32.mrb[68].mxu0  ;;  %v20308_v20 = vld [vmem:[#allocation4 + $0x1328] sm:$0xff]  }
0x1637   : > { %18846 = vmatpush3.bf16.msra.mxu0 %v20286_v9  ;;  %18863 = vmatprep.subr.bf16.mxu1 %v20289_v46  ;;  %v22489_v49 = vpop.f32.mrb[69].mxu0  ;;  %v20310_v9 = vld [vmem:[#allocation4 + $0x1330] sm:$0xff]  }
0x1638   : > { %18847 = vmatprep.subr.bf16.mxu0 %v20288_v10  ;;  %v22491_v15 = vpop.f32.mrb[70].mxu0 }
0x1639   : > { %v12045_v19 = vpack.c.bf16 %v22491_v15, %v22487_v25  ;;  %v22495_v48 = vpop.f32.mrb[71].mxu0 }
0x163a   : > { %18864 = vmatpush3.bf16.msra.mxu1 %v20289_v46  ;;  %v12044_v32 = vpack.c.bf16 %v22495_v48, %v22489_v49  ;;  %v20316_v46 = vld [vmem:[#allocation4 + $0x1388] sm:$0xff]  }
0x163b   : > { %18848 = vmatpush3.bf16.msra.mxu0 %v20288_v10  ;;  %18865 = vmatprep.subr.bf16.mxu1 %v20290_v41  ;;  %v20317_v10 = vld [vmem:[#allocation4 + $0x1428] sm:$0xff]  }
0x163c   : > { %18953 = vmatprep.subr.bf16.mxu0 %v20291_v22 }
0x163e   : > { %18850 = vmatmul.mubr.bf16.vlgmr.msra.gmra.mrb[76].mxu0 %v22435_v29  ;;  %18866 = vmatpush3.bf16.msra.mxu1 %v20290_v41  ;;  %v22500_v60 = vpop.f32.mrb[72].mxu0  ;;  %v20320_v41 = vld [vmem:[#allocation4 + $0x1398] sm:$0xff]  }
0x163f   : > { %18954 = vmatpush3.bf16.msra.mxu0 %v20291_v22  ;;  %18867 = vmatprep.subr.bf16.mxu1 %v20292_v33  ;;  %v22502_v45 = vpop.f32.mrb[73].mxu0  ;;  %v20321_v22 = vld [vmem:[#allocation4 + $0x1438] sm:$0xff]  }
0x1640   : > { %18955 = vmatprep.subr.bf16.mxu0 %v20293_v38  ;;  %18853 = vmatprep.mubr.bf16.mxu0 %v22443_v3  ;;  %v22505_v35 = vpop.f32.mrb[74].mxu0 }
0x1641   : > { %v12047_v23 = vpack.c.bf16 %v22505_v35, %v22500_v60  ;;  %v22509_v51 = vpop.f32.mrb[75].mxu0 }
0x1642   : > { %18868 = vmatpush3.bf16.msra.mxu1 %v20292_v33  ;;  %v12046_v52 = vpack.c.bf16 %v22509_v51, %v22502_v45  ;;  %v20324_v33 = vld [vmem:[#allocation4 + $0x13a8] sm:$0xff]  }
0x1643   : > { %18956 = vmatpush3.bf16.msra.mxu0 %v20293_v38  ;;  %18869 = vmatprep.subr.bf16.mxu1 %v20294_v27  ;;  %v20325_v38 = vld [vmem:[#allocation4 + $0x1488] sm:$0xff]  }
0x1644   : > { %18957 = vmatprep.subr.bf16.mxu0 %v20295_v56 }
0x1646   : > { %18854 = vmatmul.mubr.bf16.gmra.mrb[80].mxu0 %v22441_v34  ;;  %18870 = vmatpush3.bf16.msra.mxu1 %v20294_v27  ;;  %v20331_v27 = vld [vmem:[#allocation4 + $0x14a0] sm:$0xff]  }
0x1647   : > { %18958 = vmatpush3.bf16.msra.mxu0 %v20295_v56  ;;  %18969 = vmatprep.mubr.bf16.mxu0 %v22437_v11  ;;  %v20303_v11 = vld [vmem:[#allocation4 + $0x1470] sm:$0xff]   ;;  %v20333_v56 = vld [vmem:[#allocation4 + $0x14a8] sm:$0xff]  }
0x1648   : > { %18871 = vmatprep.subr.bf16.mxu1 %v20296_v8  ;;  %18959 = vmatprep.subr.bf16.mxu0 %v20297_v16 }
0x164a   : > { %18872 = vmatpush3.bf16.msra.mxu1 %v20296_v8  ;;  %v20335_v8 = vld [vmem:[#allocation4 + $0x14b0] sm:$0xff]  }
0x164b   : > { %18960 = vmatpush3.bf16.msra.mxu0 %v20297_v16  ;;  %18881 = vmatprep.subr.bf16.mxu1 %v20298_v0  ;;  %v20336_v16 = vld [vmem:[#allocation4 + $0x13d8] sm:$0xff]  }
0x164c   : > { %18961 = vmatprep.subr.bf16.mxu0 %v20299_v55 }
0x164d   : > { %18874 = vmatmul.mubr.bf16.vlgmr.msra.gmra.mrb[144].mxu1 %v22423_v53 }
0x164e   : > { %18877 = vmatprep.mubr.bf16.mxu1 %v22431_v12  ;;  %18882 = vmatpush3.bf16.msra.mxu1 %v20298_v0  ;;  %v20337_v0 = vld [vmem:[#allocation4 + $0x14b8] sm:$0xff]  }
0x164f   : > { %18962 = vmatpush3.bf16.msra.mxu0 %v20299_v55  ;;  %18883 = vmatprep.subr.bf16.mxu1 %v20300_v4  ;;  %v20348_v55 = vld [vmem:[#allocation4 + $0x14f0] sm:$0xff]  }
0x1650   : > { %18963 = vmatprep.subr.bf16.mxu0 %v20301_v44 }
0x1652   : > { %18884 = vmatpush3.bf16.msra.mxu1 %v20300_v4  ;;  %v20349_v4 = vld [vmem:[#allocation4 + $0x14f8] sm:$0xff]  }
0x1653   : > { %18964 = vmatpush3.bf16.msra.mxu0 %v20301_v44  ;;  %18885 = vmatprep.subr.bf16.mxu1 %v20302_v1 }
0x1654   : > { %18965 = vmatprep.subr.bf16.mxu0 %v20303_v11 }
0x1655   : > { %18878 = vmatmul.mubr.bf16.gmra.mrb[148].mxu1 %v22429_v6 }
0x1656   : > { %18886 = vmatpush3.bf16.msra.mxu1 %v20302_v1  ;;  %18897 = vmatprep.mubr.bf16.mxu1 %v22407_v62  ;;  %v20311_v62 = vld [vmem:[#allocation4 + $0x1410] sm:$0xff]  }
0x1657   : > { %18966 = vmatpush3.bf16.msra.mxu0 %v20303_v11  ;;  %18887 = vmatprep.subr.bf16.mxu1 %v20304_v31 }
0x1658   : > { %18967 = vmatprep.subr.bf16.mxu0 %v20305_v47 }
0x165a   : > { %18888 = vmatpush3.bf16.msra.mxu1 %v20304_v31 }
0x165b   : > { %18968 = vmatpush3.bf16.msra.mxu0 %v20305_v47  ;;  %18889 = vmatprep.subr.bf16.mxu1 %v20306_v7 }
0x165c   : > { %18977 = vmatprep.subr.bf16.mxu0 %v20307_v14 }
0x165e   : > { %18970 = vmatmul.mubr.bf16.vlgmr.msra.gmra.mrb[84].mxu0 %v22435_v29  ;;  %18890 = vmatpush3.bf16.msra.mxu1 %v20306_v7  ;;  %v20314_v29 = vld [vmem:[#allocation4 + $0x1380] sm:$0xff]  }
0x165f   : > { %18973 = vmatprep.mubr.bf16.mxu0 %v22443_v3  ;;  %18978 = vmatpush3.bf16.msra.mxu0 %v20307_v14  ;;  %v20315_v3 = vld [vmem:[#allocation4 + $0x1420] sm:$0xff]  }
0x1660   : > { %18891 = vmatprep.subr.bf16.mxu1 %v20308_v20  ;;  %18979 = vmatprep.subr.bf16.mxu0 %v20309_v21 }
0x1662   : > { %18892 = vmatpush3.bf16.msra.mxu1 %v20308_v20 }
0x1663   : > { %18980 = vmatpush3.bf16.msra.mxu0 %v20309_v21  ;;  %18893 = vmatprep.subr.bf16.mxu1 %v20310_v9 }
0x1664   : > { %18981 = vmatprep.subr.bf16.mxu0 %v20311_v62 }
0x1666   : > { %18974 = vmatmul.mubr.bf16.gmra.mrb[88].mxu0 %v22441_v34  ;;  %18894 = vmatpush3.bf16.msra.mxu1 %v20310_v9  ;;  %v20318_v34 = vld [vmem:[#allocation4 + $0x1390] sm:$0xff]  }
0x1667   : > { %18982 = vmatpush3.bf16.msra.mxu0 %v20311_v62  ;;  %18993 = vmatprep.mubr.bf16.mxu0 %v22425_v57  ;;  %v20319_v57 = vld [vmem:[#allocation4 + $0x1430] sm:$0xff]  }
0x1668   : > { %18895 = vmatprep.subr.bf16.mxu1 %v20312_v26  ;;  %18983 = vmatprep.subr.bf16.mxu0 %v20313_v63 }
0x166a   : > { %18896 = vmatpush3.bf16.msra.mxu1 %v20312_v26 }
0x166b   : > { %18984 = vmatpush3.bf16.msra.mxu0 %v20313_v63  ;;  %18905 = vmatprep.subr.bf16.mxu1 %v20314_v29 }
0x166c   : > { %18985 = vmatprep.subr.bf16.mxu0 %v20315_v3 }
0x166d   : > { %18898 = vmatmul.mubr.bf16.vlgmr.msra.gmra.mrb[144].mxu1 %v22405_v42  ;;  %v20322_v42 = vld [vmem:[#allocation4 + $0x13a0] sm:$0xff]  }
0x166e   : > { %18901 = vmatprep.mubr.bf16.mxu1 %v22417_v61  ;;  %18906 = vmatpush3.bf16.msra.mxu1 %v20314_v29  ;;  %v20323_v61 = vld [vmem:[#allocation4 + $0x1480] sm:$0xff]  }
0x166f   : > { %18986 = vmatpush3.bf16.msra.mxu0 %v20315_v3  ;;  %18907 = vmatprep.subr.bf16.mxu1 %v20316_v46 }
0x1670   : > { %18987 = vmatprep.subr.bf16.mxu0 %v20317_v10 }
0x1672   : > { %18908 = vmatpush3.bf16.msra.mxu1 %v20316_v46 }
0x1673   : > { %18988 = vmatpush3.bf16.msra.mxu0 %v20317_v10  ;;  %18909 = vmatprep.subr.bf16.mxu1 %v20318_v34 }
0x1674   : > { %18989 = vmatprep.subr.bf16.mxu0 %v20319_v57 }
0x1675   : > { %18902 = vmatmul.mubr.bf16.gmra.mrb[148].mxu1 %v22415_v50  ;;  %v20326_v50 = vld [vmem:[#allocation4 + $0x13b0] sm:$0xff]  }
0x1676   : > { %18910 = vmatpush3.bf16.msra.mxu1 %v20318_v34  ;;  %18921 = vmatprep.mubr.bf16.mxu1 %v12036_v59  ;;  %v20329_v59 = vld [vmem:[#allocation4 + $0x1498] sm:$0xff]  }
0x1677   : > { %18990 = vmatpush3.bf16.msra.mxu0 %v20319_v57  ;;  %18911 = vmatprep.subr.bf16.mxu1 %v20320_v41 }
0x1678   : > { %18991 = vmatprep.subr.bf16.mxu0 %v20321_v22 }
0x167a   : > { %18912 = vmatpush3.bf16.msra.mxu1 %v20320_v41 }
0x167b   : > { %18992 = vmatpush3.bf16.msra.mxu0 %v20321_v22  ;;  %18913 = vmatprep.subr.bf16.mxu1 %v20322_v42 }
0x167c   : > { %19001 = vmatprep.subr.bf16.mxu0 %v20323_v61 }
0x167e   : > { %18994 = vmatmul.mubr.bf16.vlgmr.msra.gmra.mrb[84].mxu0 %v22423_v53  ;;  %18914 = vmatpush3.bf16.msra.mxu1 %v20322_v42  ;;  %v20330_v53 = vld [vmem:[#allocation4 + $0x13c0] sm:$0xff]  }
0x167f   : > { %18997 = vmatprep.mubr.bf16.mxu0 %v22431_v12  ;;  %19002 = vmatpush3.bf16.msra.mxu0 %v20323_v61  ;;  %v20332_v12 = vld [vmem:[#allocation4 + $0x13c8] sm:$0xff]  }
0x1680   : > { %18915 = vmatprep.subr.bf16.mxu1 %v20324_v33  ;;  %19003 = vmatprep.subr.bf16.mxu0 %v20325_v38 }
0x1682   : > { %18916 = vmatpush3.bf16.msra.mxu1 %v20324_v33 }
0x1683   : > { %19004 = vmatpush3.bf16.msra.mxu0 %v20325_v38  ;;  %18917 = vmatprep.subr.bf16.mxu1 %v20326_v50 }
0x1684   : > { %19005 = vmatprep.subr.bf16.mxu0 %v20327_v39 }
0x1686   : > { %18998 = vmatmul.mubr.bf16.gmra.mrb[88].mxu0 %v22429_v6  ;;  %18918 = vmatpush3.bf16.msra.mxu1 %v20326_v50  ;;  %v20334_v6 = vld [vmem:[#allocation4 + $0x13d0] sm:$0xff]  }
0x1687   : > { %19006 = vmatpush3.bf16.msra.mxu0 %v20327_v39  ;;  %18919 = vmatprep.subr.bf16.mxu1 %v20328_v37  ;;  %v20352_v39 = vld [vmem:[#allocation9 + $0x4] ss:$8 sps:$4 sm:$0xff]  }
0x1688   : > { %19007 = vmatprep.subr.bf16.mxu0 %v20329_v59  ;;  %19017 = vmatprep.mubr.bf16.mxu0 %v22477_v43 }
0x168a   : > { %18920 = vmatpush3.bf16.msra.mxu1 %v20328_v37 }
0x168b   : > { %19008 = vmatpush3.bf16.msra.mxu0 %v20329_v59  ;;  %18929 = vmatprep.subr.bf16.mxu1 %v20330_v53 }
0x168c   : > { %19009 = vmatprep.subr.bf16.mxu0 %v20331_v27 }
0x168d   : > { %18922 = vmatmul.mubr.bf16.vlgmr.msra.gmra.mrb[144].mxu1 %v12037_v30  ;;  %v20340_v30 = vld [vmem:[#allocation4 + $0x13e8] sm:$0xff]  }
0x168e   : > { %18930 = vmatpush3.bf16.msra.mxu1 %v20330_v53  ;;  %18925 = vmatprep.mubr.bf16.mxu1 %v12038_v24  ;;  %v20346_v24 = vld [vmem:[#allocation4 + $0x14e0] sm:$0xff]  }
0x168f   : > { %19010 = vmatpush3.bf16.msra.mxu0 %v20331_v27  ;;  %18931 = vmatprep.subr.bf16.mxu1 %v20332_v12 }
0x1690   : > { %19011 = vmatprep.subr.bf16.mxu0 %v20333_v56 }
0x1692   : > { %18932 = vmatpush3.bf16.msra.mxu1 %v20332_v12 }
0x1693   : > { %19012 = vmatpush3.bf16.msra.mxu0 %v20333_v56  ;;  %18933 = vmatprep.subr.bf16.mxu1 %v20334_v6 }
0x1694   : > { %19013 = vmatprep.subr.bf16.mxu0 %v20335_v8 }
0x1695   : > { %18926 = vmatmul.mubr.bf16.gmra.mrb[148].mxu1 %v12039_v18  ;;  %v20344_v18 = vld [vmem:[#allocation4 + $0x13f8] sm:$0xff]  }
0x1696   : > { %18934 = vmatpush3.bf16.msra.mxu1 %v20334_v6  ;;  %18945 = vmatprep.mubr.bf16.mxu1 %v22477_v43  ;;  %v20347_v43 = vld [vmem:[#allocation4 + $0x14e8] sm:$0xff]  }
0x1697   : > { %19014 = vmatpush3.bf16.msra.mxu0 %v20335_v8  ;;  %18935 = vmatprep.subr.bf16.mxu1 %v20336_v16 }
0x1698   : > { %19015 = vmatprep.subr.bf16.mxu0 %v20337_v0 }
0x169a   : > { %18936 = vmatpush3.bf16.msra.mxu1 %v20336_v16 }
0x169b   : > { %19016 = vmatpush3.bf16.msra.mxu0 %v20337_v0  ;;  %18937 = vmatprep.subr.bf16.mxu1 %v20338_v28 }
0x169c   : > { %19025 = vmatprep.subr.bf16.mxu0 %v20339_v58 }
0x169e   : > { %19018 = vmatmul.mubr.bf16.vlgmr.msra.gmra.mrb[84].mxu0 %v22475_v54  ;;  %18938 = vmatpush3.bf16.msra.mxu1 %v20338_v28 }
0x169f   : > { %19026 = vmatpush3.bf16.msra.mxu0 %v20339_v58  ;;  %18939 = vmatprep.subr.bf16.mxu1 %v20340_v30 }
0x16a0   : > { %19021 = vmatprep.mubr.bf16.mxu0 %v22483_v2  ;;  %19027 = vmatprep.subr.bf16.mxu0 %v20341_v17 }
0x16a2   : > { %18940 = vmatpush3.bf16.msra.mxu1 %v20340_v30 }
0x16a3   : > { %19028 = vmatpush3.bf16.msra.mxu0 %v20341_v17  ;;  %18941 = vmatprep.subr.bf16.mxu1 %v20342_v40 }
0x16a4   : > { %19029 = vmatprep.subr.bf16.mxu0 %v20343_v13 }
0x16a6   : > { %19022 = vmatmul.mubr.bf16.gmra.mrb[88].mxu0 %v22481_v5  ;;  %18942 = vmatpush3.bf16.msra.mxu1 %v20342_v40 }
0x16a7   : > { %19030 = vmatpush3.bf16.msra.mxu0 %v20343_v13  ;;  %18943 = vmatprep.subr.bf16.mxu1 %v20344_v18 }
0x16a8   : > { %19031 = vmatprep.subr.bf16.mxu0 %v20345_v36  ;;  %19041 = vmatprep.mubr.bf16.mxu0 %v12044_v32 }
0x16aa   : > { %18944 = vmatpush3.bf16.msra.mxu1 %v20344_v18 }
0x16ab   : > { %19032 = vmatpush3.bf16.msra.mxu0 %v20345_v36 }
0x16ac   : > { %19033 = vmatprep.subr.bf16.mxu0 %v20346_v24 }
0x16ad   : > { %18946 = vmatmul.mubr.bf16.vlgmr.msra.gmra.mrb[144].mxu1 %v22475_v54  ;;  %v22561_v54 = vld [vmem:[#allocation6 + $0x7] ss:$0 sm:$0xff] }
0x16ae   : > { %18949 = vmatprep.mubr.bf16.mxu1 %v22483_v2 }
0x16af   : > { %19034 = vmatpush3.bf16.msra.mxu0 %v20346_v24 }
0x16b0   : > { %19035 = vmatprep.subr.bf16.mxu0 %v20347_v43 }
0x16b3   : > { %19036 = vmatpush3.bf16.msra.mxu0 %v20347_v43 }
0x16b4   : > { %19037 = vmatprep.subr.bf16.mxu0 %v20348_v55 }
0x16b5   : > { %18950 = vmatmul.mubr.bf16.gmra.mrb[148].mxu1 %v22481_v5 }
0x16b6   : > { %14470 = vmatprep.mubr.bf16.mxu1 %v20352_v39  ;;  %v20388_v39 = vld [vmem:[#allocation9 + $0xc4] ss:$8 sps:$4 sm:$0xff]  }
0x16b7   : > { %19038 = vmatpush3.bf16.msra.mxu0 %v20348_v55 }
0x16b8   : > { %19039 = vmatprep.subr.bf16.mxu0 %v20349_v4 }
0x16bb   : > { %19040 = vmatpush3.bf16.msra.mxu0 %v20349_v4 }
0x16be   : > { %19042 = vmatmul.mubr.bf16.vlgmr.msra.gmra.mrb[84].mxu0 %v12045_v19 }
0x16bf   : > { %19045 = vmatprep.mubr.bf16.mxu0 %v12046_v52 }
0x16c6   : > { %19046 = vmatmul.mubr.bf16.gmra.mrb[88].mxu0 %v12047_v23 }
0x1700   : > { %v18755_v2 = vpop.f32.mrb[136].mxu1 }
0x1701   : > { %v12545_v49 = vpop.f32.mrb[137].mxu1  ;;  %v12592_v48 = vadd.f32 %v18755_v2, %v22561_v54 }
0x1702   : > { %v18756_v5 = vpop.f32.mrb[138].mxu1  ;;  %v12590_v25 = vadd.f32 %v22561_v54, %v12545_v49 }
0x1703   : > { %v12593_v32 = vadd.f32 %v18756_v5, %v22561_v54  ;;  %v12548_v44 = vpop.f32.mrb[139].mxu1 }
0x1704   : > { %v12591_v15 = vadd.f32 %v22561_v54, %v12548_v44 }
0x1705   : > { %v14231_v19 = vpack.c.bf16 %v12593_v32, %v12592_v48 }
0x1706   : > { %v14230_v45 = vpack.c.bf16 %v12591_v15, %v12590_v25 }
0x1708   : > { %v18759_v51 = vpop.f32.mrb[140].mxu1 }
0x1709   : > { %v12561_v52 = vpop.f32.mrb[141].mxu1  ;;  %v22568_v35 = vadd.f32 %v18759_v51, %v22561_v54 }
0x170a   : > { %v18760_v60 = vpop.f32.mrb[142].mxu1  ;;  %v12594_v11 = vadd.f32 %v22561_v54, %v12561_v52 }
0x170b   : > { %v22571_v23 = vadd.f32 %v18760_v60, %v22561_v54  ;;  %v12564_v1 = vpop.f32.mrb[143].mxu1 }
0x170c   : > { %v12595_v31 = vadd.f32 %v22561_v54, %v12564_v1 }
0x170d   : > { %v14233_v47 = vpack.c.bf16 %v22571_v23, %v22568_v35 }
0x170e   : > { %v14232_v7 = vpack.c.bf16 %v12595_v31, %v12594_v11 }
0x1711   : > { %v18851_v14 = vpop.f32.mrb[76].mxu0 }
0x1712   : > { %v13095_v20 = vpop.f32.mrb[77].mxu0  ;;  %v22578_v9 = vadd.f32 %v18851_v14, %v22561_v54  ;;  %v20353_v14 = vld [vmem:[#allocation9 + $0x10] ss:$8 sps:$4 sm:$0xff]  }
0x1713   : > { %v18852_v21 = vpop.f32.mrb[78].mxu0  ;;  %v13134_v63 = vadd.f32 %v22561_v54, %v13095_v20  ;;  %v20358_v20 = vld [vmem:[#allocation9 + $0x24] ss:$8 sps:$4 sm:$0xff]  }
0x1714   : > { %v22581_v62 = vadd.f32 %v18852_v21, %v22561_v54  ;;  %v13098_v26 = vpop.f32.mrb[79].mxu0  ;;  %v20356_v21 = vld [vmem:[#allocation9 + $0x20] ss:$8 sps:$4 sm:$0xff]  }
0x1715   : > { %v13135_v29 = vadd.f32 %v22561_v54, %v13098_v26  ;;  %v20359_v26 = vld [vmem:[#allocation9 + $0x30] ss:$8 sps:$4 sm:$0xff]  }
0x1716   : > { %v14235_v3 = vpack.c.bf16 %v22581_v62, %v22578_v9  ;;  %v20364_v9 = vld [vmem:[#allocation9 + $0x44] ss:$8 sps:$4 sm:$0xff]   ;;  %v20362_v62 = vld [vmem:[#allocation9 + $0x40] ss:$8 sps:$4 sm:$0xff]  }
0x1717   : > { %v14234_v46 = vpack.c.bf16 %v13135_v29, %v13134_v63  ;;  %v20367_v63 = vld [vmem:[#allocation9 + $0x54] ss:$8 sps:$4 sm:$0xff]   ;;  %v20365_v29 = vld [vmem:[#allocation9 + $0x50] ss:$8 sps:$4 sm:$0xff]  }
0x1719   : > { %v18855_v10 = vpop.f32.mrb[80].mxu0 }
0x171a   : > { %v13111_v34 = vpop.f32.mrb[81].mxu0  ;;  %v22588_v41 = vadd.f32 %v18855_v10, %v22561_v54  ;;  %v20373_v10 = vld [vmem:[#allocation9 + $0x74] ss:$8 sps:$4 sm:$0xff]  }
0x171b   : > { %v18856_v57 = vpop.f32.mrb[82].mxu0  ;;  %v13138_v61 = vadd.f32 %v22561_v54, %v13111_v34  ;;  %v20371_v34 = vld [vmem:[#allocation9 + $0x70] ss:$8 sps:$4 sm:$0xff]  }
0x171c   : > { %v22591_v22 = vadd.f32 %v18856_v57, %v22561_v54  ;;  %v13114_v42 = vpop.f32.mrb[83].mxu0  ;;  %v20376_v57 = vld [vmem:[#allocation9 + $0x84] ss:$8 sps:$4 sm:$0xff]  }
0x171d   : > { %v13139_v33 = vadd.f32 %v22561_v54, %v13114_v42  ;;  %v20377_v42 = vld [vmem:[#allocation9 + $0x90] ss:$8 sps:$4 sm:$0xff]  }
0x171e   : > { %v14237_v38 = vpack.c.bf16 %v22591_v22, %v22588_v41  ;;  %v20374_v41 = vld [vmem:[#allocation9 + $0x80] ss:$8 sps:$4 sm:$0xff]   ;;  %v20379_v22 = vld [vmem:[#allocation9 + $0x94] ss:$8 sps:$4 sm:$0xff]  }
0x171f   : > { %v14236_v50 = vpack.c.bf16 %v13139_v33, %v13138_v61  ;;  %v20382_v61 = vld [vmem:[#allocation9 + $0xa4] ss:$8 sps:$4 sm:$0xff]   ;;  %v20380_v33 = vld [vmem:[#allocation9 + $0xa0] ss:$8 sps:$4 sm:$0xff]  }
0x1780   : > { %v18947_v37 = vpop.f32.mrb[144].mxu1 }
0x1781   : > { %v13639_v59 = vpop.f32.mrb[145].mxu1  ;;  %v13680_v27 = vadd.f32 %v18947_v37, %v22561_v54  ;;  %v20386_v37 = vld [vmem:[#allocation9 + $0xc0] ss:$8 sps:$4 sm:$0xff]  }
0x1782   : > { %v18948_v53 = vpop.f32.mrb[146].mxu1  ;;  %v13678_v6 = vadd.f32 %v22561_v54, %v13639_v59  ;;  %v20391_v59 = vld [vmem:[#allocation9 + $0xd4] ss:$8 sps:$4 sm:$0xff]  }
0x1783   : > { %v13681_v12 = vadd.f32 %v18948_v53, %v22561_v54  ;;  %v13642_v56 = vpop.f32.mrb[147].mxu1  ;;  %v20389_v53 = vld [vmem:[#allocation9 + $0xd0] ss:$8 sps:$4 sm:$0xff]  }
0x1784   : > { %v13679_v8 = vadd.f32 %v22561_v54, %v13642_v56  ;;  %v20397_v56 = vld [vmem:[#allocation9 + $0xf4] ss:$8 sps:$4 sm:$0xff]  }
0x1785   : > { %v14239_v16 = vpack.c.bf16 %v13681_v12, %v13680_v27  ;;  %v20394_v27 = vld [vmem:[#allocation9 + $0xe4] ss:$8 sps:$4 sm:$0xff]   ;;  %v20392_v12 = vld [vmem:[#allocation9 + $0xe0] ss:$8 sps:$4 sm:$0xff]  }
0x1786   : > { %v14238_v0 = vpack.c.bf16 %v13679_v8, %v13678_v6  ;;  %v20395_v6 = vld [vmem:[#allocation9 + $0xf0] ss:$8 sps:$4 sm:$0xff]  }
0x1788   : > { %v18951_v28 = vpop.f32.mrb[148].mxu1  ;;  %16806 = vmatprep.subr.bf16.mxu1 %v14238_v0 }
0x1789   : > { %v13655_v58 = vpop.f32.mrb[149].mxu1  ;;  %16807 = vmatpush3.bf16.msra.mxu1 %v14230_v45  ;;  %v13684_v17 = vadd.f32 %v18951_v28, %v22561_v54 }
0x178a   : > { %v18952_v30 = vpop.f32.mrb[150].mxu1  ;;  %16808 = vmatprep.subr.bf16.mxu1 %v14239_v16  ;;  %v13682_v18 = vadd.f32 %v22561_v54, %v13655_v58 }
0x178b   : > { %v13685_v40 = vadd.f32 %v18952_v30, %v22561_v54  ;;  %v13658_v13 = vpop.f32.mrb[151].mxu1 }
0x178c   : > { %v13683_v36 = vadd.f32 %v22561_v54, %v13658_v13 }
0x178d   : > { %v14241_v24 = vpack.c.bf16 %v13685_v40, %v13684_v17  ;;  %16809 = vmatpush3.bf16.msra.mxu1 %v14231_v19 }
0x178e   : > { %v14240_v43 = vpack.c.bf16 %v13683_v36, %v13682_v18 }
0x1790   : > { %16810 = vmatprep.subr.bf16.mxu1 %v14240_v43 }
0x1791   : > { %v19043_v55 = vpop.f32.mrb[84].mxu0  ;;  %16811 = vmatpush3.bf16.msra.mxu1 %v14232_v7  ;;  %v20355_v7 = vld [vmem:[#allocation9 + $0x14] ss:$8 sps:$4 sm:$0xff]  }
0x1792   : > { %v14183_v4 = vpop.f32.mrb[85].mxu0  ;;  %16812 = vmatprep.subr.bf16.mxu1 %v14241_v24  ;;  %v14224_v49 = vadd.f32 %v19043_v55, %v22561_v54 }
0x1793   : > { %v19044_v2 = vpop.f32.mrb[86].mxu0  ;;  %v14222_v32 = vadd.f32 %v22561_v54, %v14183_v4 }
0x1794   : > { %v14225_v5 = vadd.f32 %v19044_v2, %v22561_v54  ;;  %v14186_v48 = vpop.f32.mrb[87].mxu0 }
0x1795   : > { %v14223_v44 = vadd.f32 %v22561_v54, %v14186_v48  ;;  %16813 = vmatpush3.bf16.msra.mxu1 %v14233_v47  ;;  %v20350_v47 = vld [vmem:[#allocation9] ss:$8 sps:$4 sm:$0xff]  }
0x1796   : > { %v14243_v25 = vpack.c.bf16 %v14225_v5, %v14224_v49 }
0x1797   : > { %v14242_v15 = vpack.c.bf16 %v14223_v44, %v14222_v32 }
0x1799   : > { %v19047_v19 = vpop.f32.mrb[88].mxu0  ;;  %16814 = vmatprep.subr.bf16.mxu1 %v14242_v15 }
0x179a   : > { %v14199_v45 = vpop.f32.mrb[89].mxu0  ;;  %16815 = vmatpush3.bf16.msra.mxu1 %v14234_v46  ;;  %v14228_v52 = vadd.f32 %v19047_v19, %v22561_v54  ;;  %v20368_v46 = vld [vmem:[#allocation9 + $0x60] ss:$8 sps:$4 sm:$0xff]  }
0x179b   : > { %v19048_v51 = vpop.f32.mrb[90].mxu0  ;;  %16816 = vmatprep.subr.bf16.mxu1 %v14243_v25  ;;  %v14226_v23 = vadd.f32 %v22561_v54, %v14199_v45 }
0x179c   : > { %v14229_v60 = vadd.f32 %v19048_v51, %v22561_v54  ;;  %v14202_v35 = vpop.f32.mrb[91].mxu0 }
0x179d   : > { %v14227_v1 = vadd.f32 %v22561_v54, %v14202_v35  ;;  %v20361_v54 = vld [vmem:[#allocation9 + $0x34] ss:$8 sps:$4 sm:$0xff]  }
0x179e   : > { %v14245_v11 = vpack.c.bf16 %v14229_v60, %v14228_v52  ;;  %16817 = vmatpush3.bf16.msra.mxu1 %v14235_v3  ;;  %v20370_v3 = vld [vmem:[#allocation9 + $0x64] ss:$8 sps:$4 sm:$0xff]  }
0x179f   : > { %v14244_v31 = vpack.c.bf16 %v14227_v1, %v14226_v23 }
0x17a1   : > { %16818 = vmatprep.subr.bf16.mxu1 %v14244_v31 }
0x17a2   : > { %16819 = vmatpush3.bf16.msra.mxu1 %v14236_v50  ;;  %v20383_v50 = vld [vmem:[#allocation9 + $0xb0] ss:$8 sps:$4 sm:$0xff]  }
0x17a3   : > { %16820 = vmatprep.subr.bf16.mxu1 %v14245_v11 }
0x17a6   : > { %16821 = vmatpush3.bf16.msra.mxu1 %v14237_v38  ;;  %v20385_v38 = vld [vmem:[#allocation9 + $0xb4] ss:$8 sps:$4 sm:$0xff]  }
0x17a9   : > { %14471 = vmatmul.mubr.bf16.vlgmr.msra.gmra.mrb[152].mxu1 %v20350_v47 }
0x17aa   : > { %14478 = vmatprep.mubr.bf16.mxu1 %v20355_v7 }
0x17b1   : > { %14479 = vmatmul.mubr.bf16.gmra.mrb[156].mxu1 %v20353_v14 }
0x17b2   : > { %14486 = vmatprep.mubr.bf16.mxu1 %v20358_v20 }
0x17b9   : > { %14487 = vmatmul.mubr.bf16.gmra.mrb[160].mxu1 %v20356_v21 }
0x17ba   : > { %14494 = vmatprep.mubr.bf16.mxu1 %v20361_v54 }
0x17c1   : > { %14495 = vmatmul.mubr.bf16.gmra.mrb[164].mxu1 %v20359_v26 }
0x17c2   : > { %14502 = vmatprep.mubr.bf16.mxu1 %v20364_v9 }
0x17c9   : > { %14503 = vmatmul.mubr.bf16.gmra.mrb[168].mxu1 %v20362_v62 }
0x17ca   : > { %14510 = vmatprep.mubr.bf16.mxu1 %v20367_v63 }
0x17d1   : > { %14511 = vmatmul.mubr.bf16.gmra.mrb[172].mxu1 %v20365_v29 }
0x17d2   : > { %14518 = vmatprep.mubr.bf16.mxu1 %v20370_v3 }
0x17d9   : > { %14519 = vmatmul.mubr.bf16.gmra.mrb[176].mxu1 %v20368_v46 }
0x17da   : > { %14526 = vmatprep.mubr.bf16.mxu1 %v20373_v10 }
0x17e1   : > { %14527 = vmatmul.mubr.bf16.gmra.mrb[180].mxu1 %v20371_v34 }
0x17e2   : > { %14534 = vmatprep.mubr.bf16.mxu1 %v20376_v57 }
0x17e9   : > { %14535 = vmatmul.mubr.bf16.gmra.mrb[184].mxu1 %v20374_v41 }
0x17ea   : > { %14542 = vmatprep.mubr.bf16.mxu1 %v20379_v22 }
0x17f1   : > { %14543 = vmatmul.mubr.bf16.gmra.mrb[188].mxu1 %v20377_v42 }
0x17f2   : > { %14550 = vmatprep.mubr.bf16.mxu1 %v20382_v61 }
0x17f9   : > { %14551 = vmatmul.mubr.bf16.gmra.mrb[192].mxu1 %v20380_v33 }
0x17fa   : > { %14558 = vmatprep.mubr.bf16.mxu1 %v20385_v38 }
0x1801   : > { %14559 = vmatmul.mubr.bf16.gmra.mrb[196].mxu1 %v20383_v50 }
0x1802   : > { %14566 = vmatprep.mubr.bf16.mxu1 %v20388_v39 }
0x1809   : > { %14567 = vmatmul.mubr.bf16.gmra.mrb[200].mxu1 %v20386_v37 }
0x180a   : > { %14574 = vmatprep.mubr.bf16.mxu1 %v20391_v59 }
0x1811   : > { %14575 = vmatmul.mubr.bf16.gmra.mrb[204].mxu1 %v20389_v53 }
0x1812   : > { %14582 = vmatprep.mubr.bf16.mxu1 %v20394_v27 }
0x1819   : > { %14583 = vmatmul.mubr.bf16.gmra.mrb[208].mxu1 %v20392_v12 }
0x181a   : > { %14590 = vmatprep.mubr.bf16.mxu1 %v20397_v56 }
0x1821   : > { %14591 = vmatmul.mubr.bf16.gmra.mrb[212].mxu1 %v20395_v6 }
0x187c   : > { %v16822_v8 = vpop.f32.mrb[152].mxu1 }
0x187d   : > { %v16823_v16 = vpop.f32.mrb[153].mxu1 }
0x187e   : > { %v16824_v0 = vadd.f32 %v16823_v16, %v16822_v8  ;;  %v16825_v28 = vpop.f32.mrb[154].mxu1 }
0x187f   : > { %v16826_v58 = vpop.f32.mrb[155].mxu1 }
0x1880   : > { %14599 = vst [vmem:[%s22621_s19] sm:$0xff] %v16824_v0  ;;  %v16827_v30 = vadd.f32 %v16826_v58, %v16825_v28 }
0x1882   : > { %14600 = vst [vmem:[%s22621_s19 + $0x8] sm:$0xff] %v16827_v30 }
0x1884   : > { %v16828_v17 = vpop.f32.mrb[156].mxu1 }
0x1885   : > { %v16829_v40 = vpop.f32.mrb[157].mxu1 }
0x1886   : > { %v16830_v13 = vadd.f32 %v16829_v40, %v16828_v17  ;;  %v16831_v18 = vpop.f32.mrb[158].mxu1 }
0x1887   : > { %v16832_v36 = vpop.f32.mrb[159].mxu1 }
0x1888   : > { %14601 = vst [vmem:[%s22621_s19 + $0x10] sm:$0xff] %v16830_v13  ;;  %v16833_v24 = vadd.f32 %v16832_v36, %v16831_v18 }
0x188a   : > { %14602 = vst [vmem:[%s22621_s19 + $0x18] sm:$0xff] %v16833_v24 }
0x188c   : > { %v16834_v43 = vpop.f32.mrb[160].mxu1 }
0x188d   : > { %v16835_v55 = vpop.f32.mrb[161].mxu1 }
0x188e   : > { %v16836_v4 = vadd.f32 %v16835_v55, %v16834_v43  ;;  %v16837_v2 = vpop.f32.mrb[162].mxu1 }
0x188f   : > { %v16838_v49 = vpop.f32.mrb[163].mxu1 }
0x1890   : > { %14603 = vst [vmem:[%s22621_s19 + $0x20] sm:$0xff] %v16836_v4  ;;  %v16839_v5 = vadd.f32 %v16838_v49, %v16837_v2 }
0x1892   : > { %14604 = vst [vmem:[%s22621_s19 + $0x28] sm:$0xff] %v16839_v5 }
0x1894   : > { %v16840_v48 = vpop.f32.mrb[164].mxu1 }
0x1895   : > { %v16841_v32 = vpop.f32.mrb[165].mxu1 }
0x1896   : > { %v16842_v44 = vadd.f32 %v16841_v32, %v16840_v48  ;;  %v16843_v25 = vpop.f32.mrb[166].mxu1 }
0x1897   : > { %v16844_v15 = vpop.f32.mrb[167].mxu1 }
0x1898   : > { %14605 = vst [vmem:[%s22621_s19 + $0x30] sm:$0xff] %v16842_v44  ;;  %v16845_v19 = vadd.f32 %v16844_v15, %v16843_v25 }
0x189a   : > { %14606 = vst [vmem:[%s22621_s19 + $0x38] sm:$0xff] %v16845_v19 }
0x189c   : > { %v16846_v45 = vpop.f32.mrb[168].mxu1 }
0x189d   : > { %v16847_v51 = vpop.f32.mrb[169].mxu1 }
0x189e   : > { %v16848_v52 = vadd.f32 %v16847_v51, %v16846_v45  ;;  %v16849_v60 = vpop.f32.mrb[170].mxu1 }
0x189f   : > { %v16850_v35 = vpop.f32.mrb[171].mxu1 }
0x18a0   : > { %14607 = vst [vmem:[%s22621_s19 + $0x40] sm:$0xff] %v16848_v52  ;;  %v16851_v23 = vadd.f32 %v16850_v35, %v16849_v60 }
0x18a2   : > { %14608 = vst [vmem:[%s22621_s19 + $0x48] sm:$0xff] %v16851_v23 }
0x18a4   : > { %v16852_v1 = vpop.f32.mrb[172].mxu1 }
0x18a5   : > { %v16853_v11 = vpop.f32.mrb[173].mxu1 }
0x18a6   : > { %v16854_v31 = vadd.f32 %v16853_v11, %v16852_v1  ;;  %v16855_v47 = vpop.f32.mrb[174].mxu1 }
0x18a7   : > { %v16856_v7 = vpop.f32.mrb[175].mxu1 }
0x18a8   : > { %14609 = vst [vmem:[%s22621_s19 + $0x50] sm:$0xff] %v16854_v31  ;;  %v16857_v14 = vadd.f32 %v16856_v7, %v16855_v47 }
0x18aa   : > { %14610 = vst [vmem:[%s22621_s19 + $0x58] sm:$0xff] %v16857_v14 }
0x18ac   : > { %v16858_v20 = vpop.f32.mrb[176].mxu1 }
0x18ad   : > { %v16859_v21 = vpop.f32.mrb[177].mxu1 }
0x18ae   : > { %v16860_v54 = vadd.f32 %v16859_v21, %v16858_v20  ;;  %v16861_v26 = vpop.f32.mrb[178].mxu1 }
0x18af   : > { %v16862_v9 = vpop.f32.mrb[179].mxu1 }
0x18b0   : > { %14611 = vst [vmem:[%s22621_s19 + $0x60] sm:$0xff] %v16860_v54  ;;  %v16863_v62 = vadd.f32 %v16862_v9, %v16861_v26 }
0x18b2   : > { %14612 = vst [vmem:[%s22621_s19 + $0x68] sm:$0xff] %v16863_v62 }
0x18b4   : > { %v16864_v63 = vpop.f32.mrb[180].mxu1 }
0x18b5   : > { %v16865_v29 = vpop.f32.mrb[181].mxu1 }
0x18b6   : > { %v16866_v3 = vadd.f32 %v16865_v29, %v16864_v63  ;;  %v16867_v46 = vpop.f32.mrb[182].mxu1 }
0x18b7   : > { %v16868_v10 = vpop.f32.mrb[183].mxu1 }
0x18b8   : > { %14613 = vst [vmem:[%s22621_s19 + $0x70] sm:$0xff] %v16866_v3  ;;  %v16869_v34 = vadd.f32 %v16868_v10, %v16867_v46 }
0x18ba   : > { %14614 = vst [vmem:[%s22621_s19 + $0x78] sm:$0xff] %v16869_v34 }
0x18bc   : > { %v16870_v57 = vpop.f32.mrb[184].mxu1 }
0x18bd   : > { %v16871_v41 = vpop.f32.mrb[185].mxu1 }
0x18be   : > { %v16872_v22 = vadd.f32 %v16871_v41, %v16870_v57  ;;  %v16873_v42 = vpop.f32.mrb[186].mxu1 }
0x18bf   : > { %v16874_v61 = vpop.f32.mrb[187].mxu1 }
0x18c0   : > { %14615 = vst [vmem:[%s22621_s19 + $0x80] sm:$0xff] %v16872_v22  ;;  %v16875_v33 = vadd.f32 %v16874_v61, %v16873_v42 }
0x18c2   : > { %14616 = vst [vmem:[%s22621_s19 + $0x88] sm:$0xff] %v16875_v33 }
0x18c4   : > { %v16876_v38 = vpop.f32.mrb[188].mxu1 }
0x18c5   : > { %v16877_v50 = vpop.f32.mrb[189].mxu1 }
0x18c6   : > { %v16878_v39 = vadd.f32 %v16877_v50, %v16876_v38  ;;  %v16879_v37 = vpop.f32.mrb[190].mxu1 }
0x18c7   : > { %v16880_v59 = vpop.f32.mrb[191].mxu1 }
0x18c8   : > { %14617 = vst [vmem:[%s22621_s19 + $0x90] sm:$0xff] %v16878_v39  ;;  %v16881_v53 = vadd.f32 %v16880_v59, %v16879_v37 }
0x18ca   : > { %14618 = vst [vmem:[%s22621_s19 + $0x98] sm:$0xff] %v16881_v53 }
0x18cc   : > { %v16882_v27 = vpop.f32.mrb[192].mxu1 }
0x18cd   : > { %v16883_v12 = vpop.f32.mrb[193].mxu1 }
0x18ce   : > { %v16884_v56 = vadd.f32 %v16883_v12, %v16882_v27  ;;  %v16885_v6 = vpop.f32.mrb[194].mxu1 }
0x18cf   : > { %v16886_v8 = vpop.f32.mrb[195].mxu1 }
0x18d0   : > { %14619 = vst [vmem:[%s22621_s19 + $0xa0] sm:$0xff] %v16884_v56  ;;  %v16887_v16 = vadd.f32 %v16886_v8, %v16885_v6 }
0x18d2   : > { %14620 = vst [vmem:[%s22621_s19 + $0xa8] sm:$0xff] %v16887_v16 }
0x18d4   : > { %v16888_v0 = vpop.f32.mrb[196].mxu1 }
0x18d5   : > { %v16889_v28 = vpop.f32.mrb[197].mxu1 }
0x18d6   : > { %v16890_v58 = vadd.f32 %v16889_v28, %v16888_v0  ;;  %v16891_v30 = vpop.f32.mrb[198].mxu1 }
0x18d7   : > { %v16892_v17 = vpop.f32.mrb[199].mxu1 }
0x18d8   : > { %14621 = vst [vmem:[%s22621_s19 + $0xb0] sm:$0xff] %v16890_v58  ;;  %v16893_v40 = vadd.f32 %v16892_v17, %v16891_v30 }
0x18da   : > { %14622 = vst [vmem:[%s22621_s19 + $0xb8] sm:$0xff] %v16893_v40 }
0x18dc   : > { %v16894_v13 = vpop.f32.mrb[200].mxu1 }
0x18dd   : > { %v16895_v18 = vpop.f32.mrb[201].mxu1 }
0x18de   : > { %v16896_v36 = vadd.f32 %v16895_v18, %v16894_v13  ;;  %v16897_v24 = vpop.f32.mrb[202].mxu1 }
0x18df   : > { %v16898_v43 = vpop.f32.mrb[203].mxu1 }
0x18e0   : > { %14623 = vst [vmem:[%s22621_s19 + $0xc0] sm:$0xff] %v16896_v36  ;;  %v16899_v55 = vadd.f32 %v16898_v43, %v16897_v24 }
0x18e2   : > { %14624 = vst [vmem:[%s22621_s19 + $0xc8] sm:$0xff] %v16899_v55 }
0x18e4   : > { %v16900_v4 = vpop.f32.mrb[204].mxu1 }
0x18e5   : > { %v16901_v2 = vpop.f32.mrb[205].mxu1 }
0x18e6   : > { %v16902_v49 = vadd.f32 %v16901_v2, %v16900_v4  ;;  %v16903_v5 = vpop.f32.mrb[206].mxu1 }
0x18e7   : > { %v16904_v48 = vpop.f32.mrb[207].mxu1 }
0x18e8   : > { %14625 = vst [vmem:[%s22621_s19 + $0xd0] sm:$0xff] %v16902_v49  ;;  %v16905_v32 = vadd.f32 %v16904_v48, %v16903_v5 }
0x18ea   : > { %14626 = vst [vmem:[%s22621_s19 + $0xd8] sm:$0xff] %v16905_v32 }
0x18ec   : > { %v16906_v44 = vpop.f32.mrb[208].mxu1 }
0x18ed   : > { %v16907_v25 = vpop.f32.mrb[209].mxu1 }
0x18ee   : > { %v16908_v15 = vadd.f32 %v16907_v25, %v16906_v44  ;;  %v16909_v19 = vpop.f32.mrb[210].mxu1 }
0x18ef   : > { %v16910_v45 = vpop.f32.mrb[211].mxu1 }
0x18f0   : > { %14627 = vst [vmem:[%s22621_s19 + $0xe0] sm:$0xff] %v16908_v15  ;;  %v16911_v51 = vadd.f32 %v16910_v45, %v16909_v19 }
0x18f2   : > { %14628 = vst [vmem:[%s22621_s19 + $0xe8] sm:$0xff] %v16911_v51 }
0x18f4   : > { %v16912_v52 = vpop.f32.mrb[212].mxu1 }
0x18f5   : > { %v16913_v60 = vpop.f32.mrb[213].mxu1 }
0x18f6   : > { %v16914_v35 = vadd.f32 %v16913_v60, %v16912_v52  ;;  %v16915_v23 = vpop.f32.mrb[214].mxu1 }
0x18f7   : > { %v16916_v1 = vpop.f32.mrb[215].mxu1 }
0x18f8   : > { %14629 = vst [vmem:[%s22621_s19 + $0xf0] sm:$0xff] %v16914_v35  ;;  %v16917_v11 = vadd.f32 %v16916_v1, %v16915_v23 }
0x18fa   : > { %14630 = vst [vmem:[%s22621_s19 + $0xf8] sm:$0xff] %v16917_v11 }
0x18fb PF: > { %s29_s29 = sadd.s32 1, %s20648_s29  }
0x18fc   : > { %p26_p3 = scmp.ge.s32.totalorder %s29_s29, 4  }
0x18fe   :  { %28 = sbr.rel (!%p26_p3) target bundleno = 10 (0xa), region = 229 }
0x1905   :  { %14653 = vsyncpa [#allocation3], 1 }
0x1906   :  { %14655 = vsyncpa [#allocation3 + $0x1], 1 }
0x1907   :  { %14656 = vsyncpa [#allocation5], 1 }
0x1908   :  { %14657 = vsyncpa [#allocation8], 1 }
0x1909   :  { %14658 = vsyncpa [#allocation11], 1 }
0x190a   :  { %14659 = vsyncpa [#allocation14], 1 }

</bundles_post_ra>
